<compile_context>
chip_gen: v7x
topology: tpu7x:2x2x1
jax: 0.10.0
libtpu: 0.0.40
codegen_flags: <defaults>
</compile_context>

<pallas_src>
import jax
import jax.numpy as jnp
from jax import lax
from jax.experimental import pallas as pl
from jax.experimental.pallas import tpu as pltpu


# ----------------------------------------------------------------------------
# Fused encoder kernel: 2 bidirectional LSTM layers over the full sequence.
# Inputs (VMEM, auto-DMA'd in prologue):
#   x_ref      : (T, E)      embedded input (f32)
#   wih0_ref   : (E, 8H)     layer-0 input->gates, cols [fwd i,f,o,g | rev i,f,o,g] (bf16)
#   whh0f_ref  : (H, 4H)     layer-0 forward hidden->gates (bf16)
#   whh0r_ref  : (H, 4H)     layer-0 reverse hidden->gates (bf16)
#   b0_ref     : (1, 8H)     layer-0 combined bias (f32)
# Inputs (pl.ANY -> raw HBM refs, prefetched manually behind layer-0 compute):
#   wih1_hbm   : (2H, 8H)    layer-1 input->gates (bf16)
#   whh1f_hbm  : (H, 4H)     layer-1 forward hidden->gates (bf16)
#   whh1r_hbm  : (H, 4H)     layer-1 reverse hidden->gates (bf16)
#   b1_hbm     : (1, 8H)     layer-1 combined bias (f32)
# Outputs:
#   out_ref    : (T, 2H)     layer-1 bidirectional outputs (f32)
#   h_ref      : (2, H)      final forward-direction hidden per layer (f32)
#   c_ref      : (2, H)      final forward-direction cell per layer (f32)
# Scratch:
#   gx_ref     : (T, 8H) f32 hoisted input projection (reused by both layers)
#   act_ref    : (T, 2H) bf16 layer-0 activations (inter-layer buffer, VMEM only)
#   wih1_ref / whh1f_ref / whh1r_ref / b1_ref : VMEM copies of layer-1 weights
#   dma_sems   : DMA semaphores for the layer-1 weight prefetch
# ----------------------------------------------------------------------------
def encoder_kernel(x_ref, wih0_ref, whh0f_ref, whh0r_ref, b0_ref,
                   wih1_hbm, whh1f_hbm, whh1r_hbm, b1_hbm,
                   out_ref, h_ref, c_ref,
                   gx_ref, act_ref,
                   wih1_ref, whh1f_ref, whh1r_ref, b1_ref, dma_sems):
    T = x_ref.shape[0]
    H = h_ref.shape[-1]
    H2, H3, H4 = 2 * H, 3 * H, 4 * H

    # Kick off the layer-1 weight DMA immediately; it overlaps the whole
    # layer-0 recurrence and is only waited on just before layer 1 starts.
    l1_copies = (
        pltpu.make_async_copy(wih1_hbm, wih1_ref, dma_sems.at[0]),
        pltpu.make_async_copy(whh1f_hbm, whh1f_ref, dma_sems.at[1]),
        pltpu.make_async_copy(whh1r_hbm, whh1r_ref, dma_sems.at[2]),
        pltpu.make_async_copy(b1_hbm, b1_ref, dma_sems.at[3]),
    )
    for cp in l1_copies:
        cp.start()

    # Bounded unroll: enough window for the scheduler to overlap the next
    # step's MXU push with the current step's EUP/VPU gate math, without
    # exploding instruction footprint at large T.
    if T % 8 == 0:
        unroll = 8
    elif T % 4 == 0:
        unroll = 4
    elif T % 2 == 0:
        unroll = 2
    else:
        unroll = 1

    def run_layer(x, wih, whh_f, whh_r, b, layer_out_ref):
        # (1) Hoisted input projection: one big MXU matmul for all timesteps
        #     and both directions; bias folded in here, not in the loop.
        gx_ref[...] = (
            jnp.dot(x.astype(jnp.bfloat16), wih,
                    preferred_element_type=jnp.float32) + b)          # (T, 8H)

        def gate_math(gates, c):
            # kernel gate order (i, f, o, g): one wide sigmoid + one tanh.
            sig = jax.nn.sigmoid(gates[:, 0:H3])
            g = jnp.tanh(gates[:, H3:H4])
            c_new = sig[:, H:H2] * c + sig[:, 0:H] * g
            h_new = sig[:, H2:H3] * jnp.tanh(c_new)
            return h_new, c_new

        def step(t, carry):
            h_f, c_f, h_r, c_r = carry
            t_rev = T - 1 - t
            # (2) Independent per-direction recurrent matmuls: no zero-padded
            #     block-diagonal weights, no per-step carry concat, and the
            #     fwd/rev dependency chains are decoupled for overlap.
            rec_f = jnp.dot(h_f.astype(jnp.bfloat16), whh_f,
                            preferred_element_type=jnp.float32)       # (1, 4H)
            rec_r = jnp.dot(h_r.astype(jnp.bfloat16), whh_r,
                            preferred_element_type=jnp.float32)       # (1, 4H)
            gates_f = gx_ref[pl.ds(t, 1), 0:H4] + rec_f
            gates_r = gx_ref[pl.ds(t_rev, 1), H4:2 * H4] + rec_r
            h_f, c_f = gate_math(gates_f, c_f)
            h_r, c_r = gate_math(gates_r, c_r)
            # Forward output at row t, reverse output at row T-1-t (lane-dense
            # (T, 2H) output, no flip/concat needed afterwards).
            layer_out_ref[pl.ds(t, 1), 0:H] = h_f.astype(layer_out_ref.dtype)
            layer_out_ref[pl.ds(t_rev, 1), H:H2] = h_r.astype(layer_out_ref.dtype)
            return (h_f, c_f, h_r, c_r)

        zero = jnp.zeros((1, H), jnp.float32)
        h_f, c_f, _, _ = lax.fori_loop(0, T, step, (zero, zero, zero, zero),
                                       unroll=unroll)
        # Final forward-direction states (the only ones Seq2SeqModel keeps).
        return h_f, c_f

    # Layer 0: input = embedded tokens, output -> act_ref (bf16 VMEM scratch).
    h0f, c0f = run_layer(x_ref[...], wih0_ref[...], whh0f_ref[...],
                         whh0r_ref[...], b0_ref[...], act_ref)

    # Layer-1 weights must have landed by now (DMA overlapped layer 0).
    for cp in l1_copies:
        cp.wait()

    # Layer 1: input = layer-0 activations, output -> out_ref (f32).
    h1f, c1f = run_layer(act_ref[...], wih1_ref[...], whh1f_ref[...],
                         whh1r_ref[...], b1_ref[...], out_ref)

    h_ref[...] = jnp.concatenate([h0f, h1f], axis=0)
    c_ref[...] = jnp.concatenate([c0f, c1f], axis=0)


def _vmem_limit_bytes():
    """Per-generation scoped-VMEM limit: physical capacity minus headroom."""
    cap = 64 * 1024 * 1024
    try:
        cap = int(pltpu.get_tpu_info().vmem_capacity_bytes)
    except Exception:
        pass
    return max(32 * 1024 * 1024, cap - 8 * 1024 * 1024)


def encoder_forward(embedded, layer_params):
    """embedded: (T, E) f32 -> (out (T,2H), h_fwd (2,H), c_fwd (2,H))."""
    T = embedded.shape[0]
    (wih0, whh0f, whh0r, b0), (wih1, whh1f, whh1r, b1) = layer_params
    H = b0.shape[-1] // 8
    H2 = 2 * H
    vmem = pl.BlockSpec(memory_space=pltpu.MemorySpace.VMEM)
    hbm = pl.BlockSpec(memory_space=pl.ANY)   # layer-1 weights: manual prefetch

    out, h_fwd, c_fwd = pl.pallas_call(
        encoder_kernel,
        in_specs=[vmem, vmem, vmem, vmem, vmem,   # x + layer-0 params (auto-DMA)
                  hbm, hbm, hbm, hbm],            # layer-1 params (prefetched)
        out_specs=(vmem, vmem, vmem),
        out_shape=(
            jax.ShapeDtypeStruct((T, H2), jnp.float32),
            jax.ShapeDtypeStruct((2, H), jnp.float32),
            jax.ShapeDtypeStruct((2, H), jnp.float32),
        ),
        scratch_shapes=[
            pltpu.VMEM((T, 8 * H), jnp.float32),       # hoisted input projection
            pltpu.VMEM((T, H2), jnp.bfloat16),         # layer-0 activations
            pltpu.VMEM(wih1.shape, jnp.bfloat16),      # layer-1 weight landing
            pltpu.VMEM(whh1f.shape, jnp.bfloat16),
            pltpu.VMEM(whh1r.shape, jnp.bfloat16),
            pltpu.VMEM(b1.shape, jnp.float32),
            pltpu.SemaphoreType.DMA((4,)),
        ],
        compiler_params=pltpu.CompilerParams(
            vmem_limit_bytes=_vmem_limit_bytes()),
    )(embedded, wih0, whh0f, whh0r, b0, wih1, whh1f, whh1r, b1)
    return out, h_fwd, c_fwd


# ----------------------------------------------------------------------------
# Parameter construction (deterministic, synthetic, PyTorch-layout) + kernel prep
# ----------------------------------------------------------------------------
def init_lstm_dir_params(key, in_dim, hidden_dim):
    """PyTorch nn.LSTM layout: W_ih (4H,in), W_hh (4H,H), b_ih (4H,), b_hh (4H,)."""
    k1, k2, k3, k4 = jax.random.split(key, 4)
    scale = 1.0 / jnp.sqrt(hidden_dim)
    w_ih = jax.random.uniform(k1, (4 * hidden_dim, in_dim), jnp.float32, -scale, scale)
    w_hh = jax.random.uniform(k2, (4 * hidden_dim, hidden_dim), jnp.float32, -scale, scale)
    b_ih = jax.random.uniform(k3, (4 * hidden_dim,), jnp.float32, -scale, scale)
    b_hh = jax.random.uniform(k4, (4 * hidden_dim,), jnp.float32, -scale, scale)
    return w_ih, w_hh, b_ih, b_hh


def _ifgo_to_ifog(a, H):
    """Reorder PyTorch gate blocks (i, f, g, o) -> kernel order (i, f, o, g) along axis 0."""
    return jnp.concatenate([a[0:2 * H], a[3 * H:4 * H], a[2 * H:3 * H]], axis=0)


def prep_bidir_layer(fwd, rev, H):
    """Pack one bidirectional layer's params into the fused-kernel layout."""
    prepped = []
    for (w_ih, w_hh, b_ih, b_hh) in (fwd, rev):
        prepped.append((
            _ifgo_to_ifog(w_ih, H).T,            # (Din, 4H)
            _ifgo_to_ifog(w_hh, H).T,            # (H, 4H)
            _ifgo_to_ifog(b_ih + b_hh, H),       # (4H,)  biases folded
        ))
    (wih_f, whh_f, b_f), (wih_r, whh_r, b_r) = prepped
    # Input->gates for both directions, one matmul's worth of columns (bf16 MXU path).
    wih_cat = jnp.concatenate([wih_f, wih_r], axis=1).astype(jnp.bfloat16)   # (Din, 8H)
    # Per-direction hidden->gates matrices (no zero-padded block-diagonal).
    whh_f = whh_f.astype(jnp.bfloat16)                                       # (H, 4H)
    whh_r = whh_r.astype(jnp.bfloat16)                                       # (H, 4H)
    b_cat = jnp.concatenate([b_f, b_r])[None, :]                             # (1, 8H) f32
    return wih_cat, whh_f, whh_r, b_cat


def init_params(key, vocab_size, embed_dim, hidden_dim, num_layers=2):
    keys = jax.random.split(key, 1 + 2 * num_layers)
    emb = 0.1 * jax.random.normal(keys[0], (vocab_size, embed_dim), jnp.float32)
    emb = emb.at[0].set(0.0)  # padding_idx=0
    layers = []
    in_dim = embed_dim
    for l in range(num_layers):
        fwd = init_lstm_dir_params(keys[1 + 2 * l], in_dim, hidden_dim)
        rev = init_lstm_dir_params(keys[2 + 2 * l], in_dim, hidden_dim)
        layers.append(prep_bidir_layer(fwd, rev, hidden_dim))
        in_dim = 2 * hidden_dim
    return {"embedding": emb, "layers": layers}


# ----------------------------------------------------------------------------
# Full Seq2SeqModel.forward (encoder path)
# ----------------------------------------------------------------------------
def seq2seq_forward(src, params):
    # src: (1, T) int32; batch must be 1 (implied by the .view in the module).
    assert src.shape[0] == 1
    T = src.shape[1]

    embedded = jnp.take(params["embedding"], src[0], axis=0)          # (T, E)
    out, h_fwd, c_fwd = encoder_forward(embedded, params["layers"])

    encoder_outputs = out[None, :, :]                                  # (1, T, 2H)
    # hidden.view(num_layers, 2, 1, H)[:, 0, :, :] == forward-direction states only.
    hidden = h_fwd[:, None, :]                                         # (L, 1, H)
    cell = c_fwd[:, None, :]                                           # (L, 1, H)
    return encoder_outputs, hidden, cell


if __name__ == "__main__":
    # Small shapes (the PyTorch defaults are E=256, H=512; scaled down here).
    VOCAB, E, H, T, L = 50, 64, 128, 8, 2

    key = jax.random.PRNGKey(0)
    k_params, k_src = jax.random.split(key)
    params = init_params(k_params, VOCAB, E, H, num_layers=L)
    src = jax.random.randint(k_src, (1, T), 0, VOCAB, dtype=jnp.int32)

    fwd = jax.jit(seq2seq_forward)
    enc_out, hidden, cell = fwd(src, params)
    jax.block_until_ready((enc_out, hidden, cell))

    assert enc_out.shape == (1, T, 2 * H)
    assert hidden.shape == (L, 1, H)
    assert cell.shape == (L, 1, H)
    assert bool(jnp.all(jnp.isfinite(enc_out)))
    assert bool(jnp.all(jnp.isfinite(hidden)))
    assert bool(jnp.all(jnp.isfinite(cell)))
    print("KERNEL_OK")
</pallas_src>

<mosaic_0001>
module attributes {stable_mosaic.version = 11 : i64} {
  func.func @encoder_kernel(%arg0: memref<8x64xf32, #tpu.memory_space<vmem>>, %arg1: memref<64x1024xbf16, #tpu.memory_space<vmem>>, %arg2: memref<128x512xbf16, #tpu.memory_space<vmem>>, %arg3: memref<128x512xbf16, #tpu.memory_space<vmem>>, %arg4: memref<1x1024xf32, #tpu.memory_space<vmem>>, %arg5: memref<256x1024xbf16, #tpu.memory_space<any>>, %arg6: memref<128x512xbf16, #tpu.memory_space<any>>, %arg7: memref<128x512xbf16, #tpu.memory_space<any>>, %arg8: memref<1x1024xf32, #tpu.memory_space<any>>, %arg9: memref<8x256xf32, #tpu.memory_space<vmem>>, %arg10: memref<2x128xf32, #tpu.memory_space<vmem>>, %arg11: memref<2x128xf32, #tpu.memory_space<vmem>>, %arg12: memref<8x1024xf32, #tpu.memory_space<vmem>>, %arg13: memref<8x256xbf16, #tpu.memory_space<vmem>>, %arg14: memref<256x1024xbf16, #tpu.memory_space<vmem>>, %arg15: memref<128x512xbf16, #tpu.memory_space<vmem>>, %arg16: memref<128x512xbf16, #tpu.memory_space<vmem>>, %arg17: memref<1x1024xf32, #tpu.memory_space<vmem>>, %arg18: memref<4x!tpu.dma_semaphore, #tpu.memory_space<semaphore_mem>>) attributes {dimension_semantics = [], scalar_prefetch = 0 : i64, scratch_operands = 7 : i64, tpu.core_type = #tpu.core_type<tc>} {
    %c0_i32 = arith.constant 0 : i32
    %0 = tpu.memref_slice %arg18[%c0_i32] : memref<4x!tpu.dma_semaphore, #tpu.memory_space<semaphore_mem>> -> memref<1x!tpu.dma_semaphore, #tpu.memory_space<semaphore_mem>>
    %1 = tpu.memref_squeeze %0 : memref<1x!tpu.dma_semaphore, #tpu.memory_space<semaphore_mem>> -> memref<!tpu.dma_semaphore, #tpu.memory_space<semaphore_mem>>
    tpu.enqueue_dma source(%arg5 : memref<256x1024xbf16, #tpu.memory_space<any>>) target(%arg14 : memref<256x1024xbf16, #tpu.memory_space<vmem>>) target_semaphore(%1 : memref<!tpu.dma_semaphore, #tpu.memory_space<semaphore_mem>>)
    %c1_i32 = arith.constant 1 : i32
    %2 = tpu.memref_slice %arg18[%c1_i32] : memref<4x!tpu.dma_semaphore, #tpu.memory_space<semaphore_mem>> -> memref<1x!tpu.dma_semaphore, #tpu.memory_space<semaphore_mem>>
    %3 = tpu.memref_squeeze %2 : memref<1x!tpu.dma_semaphore, #tpu.memory_space<semaphore_mem>> -> memref<!tpu.dma_semaphore, #tpu.memory_space<semaphore_mem>>
    tpu.enqueue_dma source(%arg6 : memref<128x512xbf16, #tpu.memory_space<any>>) target(%arg15 : memref<128x512xbf16, #tpu.memory_space<vmem>>) target_semaphore(%3 : memref<!tpu.dma_semaphore, #tpu.memory_space<semaphore_mem>>)
    %c2_i32 = arith.constant 2 : i32
    %4 = tpu.memref_slice %arg18[%c2_i32] : memref<4x!tpu.dma_semaphore, #tpu.memory_space<semaphore_mem>> -> memref<1x!tpu.dma_semaphore, #tpu.memory_space<semaphore_mem>>
    %5 = tpu.memref_squeeze %4 : memref<1x!tpu.dma_semaphore, #tpu.memory_space<semaphore_mem>> -> memref<!tpu.dma_semaphore, #tpu.memory_space<semaphore_mem>>
    tpu.enqueue_dma source(%arg7 : memref<128x512xbf16, #tpu.memory_space<any>>) target(%arg16 : memref<128x512xbf16, #tpu.memory_space<vmem>>) target_semaphore(%5 : memref<!tpu.dma_semaphore, #tpu.memory_space<semaphore_mem>>)
    %c3_i32 = arith.constant 3 : i32
    %6 = tpu.memref_slice %arg18[%c3_i32] : memref<4x!tpu.dma_semaphore, #tpu.memory_space<semaphore_mem>> -> memref<1x!tpu.dma_semaphore, #tpu.memory_space<semaphore_mem>>
    %7 = tpu.memref_squeeze %6 : memref<1x!tpu.dma_semaphore, #tpu.memory_space<semaphore_mem>> -> memref<!tpu.dma_semaphore, #tpu.memory_space<semaphore_mem>>
    tpu.enqueue_dma source(%arg8 : memref<1x1024xf32, #tpu.memory_space<any>>) target(%arg17 : memref<1x1024xf32, #tpu.memory_space<vmem>>) target_semaphore(%7 : memref<!tpu.dma_semaphore, #tpu.memory_space<semaphore_mem>>)
    %c0 = arith.constant 0 : index
    %c0_0 = arith.constant 0 : index
    %8 = vector.load %arg0[%c0, %c0_0] : memref<8x64xf32, #tpu.memory_space<vmem>>, vector<8x64xf32>
    %c0_1 = arith.constant 0 : index
    %c0_2 = arith.constant 0 : index
    %9 = vector.load %arg1[%c0_1, %c0_2] : memref<64x1024xbf16, #tpu.memory_space<vmem>>, vector<64x1024xbf16>
    %c0_3 = arith.constant 0 : index
    %c0_4 = arith.constant 0 : index
    %10 = vector.load %arg2[%c0_3, %c0_4] : memref<128x512xbf16, #tpu.memory_space<vmem>>, vector<128x512xbf16>
    %c0_5 = arith.constant 0 : index
    %c0_6 = arith.constant 0 : index
    %11 = vector.load %arg3[%c0_5, %c0_6] : memref<128x512xbf16, #tpu.memory_space<vmem>>, vector<128x512xbf16>
    %c0_7 = arith.constant 0 : index
    %c0_8 = arith.constant 0 : index
    %12 = vector.load %arg4[%c0_7, %c0_8] : memref<1x1024xf32, #tpu.memory_space<vmem>>, vector<1x1024xf32>
    %13 = arith.truncf %8 : vector<8x64xf32> to vector<8x64xbf16>
    %cst = arith.constant dense<0.000000e+00> : vector<8x1024xf32>
    %14 = tpu.matmul %13, %9, %cst {dimension_numbers = #tpu.dot_dimension_numbers<[1], [0], [0], [1], [0, 0, 1, 1], [], []>} : vector<8x64xbf16>, vector<64x1024xbf16>, vector<8x1024xf32> -> vector<8x1024xf32>
    %15 = vector.broadcast %12 : vector<1x1024xf32> to vector<8x1024xf32>
    %16 = arith.addf %14, %15 : vector<8x1024xf32>
    %c0_9 = arith.constant 0 : index
    %c0_10 = arith.constant 0 : index
    %17 = vector.load %arg12[%c0_9, %c0_10] : memref<8x1024xf32, #tpu.memory_space<vmem>>, vector<8x1024xf32>
    tpu.vector_store %arg12[%c0_9, %c0_10], %16 {strides = array<i32>} : memref<8x1024xf32, #tpu.memory_space<vmem>>, vector<8x1024xf32>,
    %cst_11 = arith.constant 0.000000e+00 : f32
    %18 = vector.broadcast %cst_11 : f32 to vector<1x128xf32>
    %c0_i32_12 = arith.constant 0 : i32
    %c7_i32 = arith.constant 7 : i32
    %19 = arith.subi %c7_i32, %c0_i32_12 : i32
    %20 = arith.truncf %18 : vector<1x128xf32> to vector<1x128xbf16>
    %cst_13 = arith.constant dense<0.000000e+00> : vector<1x512xf32>
    %21 = tpu.matmul %20, %10, %cst_13 {dimension_numbers = #tpu.dot_dimension_numbers<[1], [0], [0], [1], [0, 0, 1, 1], [], []>} : vector<1x128xbf16>, vector<128x512xbf16>, vector<1x512xf32> -> vector<1x512xf32>
    %22 = arith.truncf %18 : vector<1x128xf32> to vector<1x128xbf16>
    %cst_14 = arith.constant dense<0.000000e+00> : vector<1x512xf32>
    %23 = tpu.matmul %22, %11, %cst_14 {dimension_numbers = #tpu.dot_dimension_numbers<[1], [0], [0], [1], [0, 0, 1, 1], [], []>} : vector<1x128xbf16>, vector<128x512xbf16>, vector<1x512xf32> -> vector<1x512xf32>
    %24 = arith.index_cast %c0_i32_12 : i32 to index
    %c0_15 = arith.constant 0 : index
    %25 = vector.load %arg12[%24, %c0_15] : memref<8x1024xf32, #tpu.memory_space<vmem>>, vector<1x512xf32>
    %26 = arith.addf %25, %21 : vector<1x512xf32>
    %27 = arith.index_cast %19 : i32 to index
    %c512 = arith.constant 512 : index
    %28 = vector.load %arg12[%27, %c512] : memref<8x1024xf32, #tpu.memory_space<vmem>>, vector<1x512xf32>
    %29 = arith.addf %28, %23 : vector<1x512xf32>
    %30 = vector.extract_strided_slice %26 {offsets = [0, 0], sizes = [1, 384], strides = [1, 1]} : vector<1x512xf32> to vector<1x384xf32>
    %31 = arith.negf %30 : vector<1x384xf32>
    %32 = math.exp %31 : vector<1x384xf32>
    %cst_16 = arith.constant 1.000000e+00 : f32
    %33 = vector.broadcast %cst_16 : f32 to vector<1x384xf32>
    %34 = arith.addf %33, %32 : vector<1x384xf32>
    %35 = arith.divf %33, %34 : vector<1x384xf32>
    %36 = vector.extract_strided_slice %26 {offsets = [0, 384], sizes = [1, 128], strides = [1, 1]} : vector<1x512xf32> to vector<1x128xf32>
    %37 = math.tanh %36 : vector<1x128xf32>
    %38 = vector.extract_strided_slice %35 {offsets = [0, 128], sizes = [1, 128], strides = [1, 1]} : vector<1x384xf32> to vector<1x128xf32>
    %39 = arith.mulf %38, %18 : vector<1x128xf32>
    %40 = vector.extract_strided_slice %35 {offsets = [0, 0], sizes = [1, 128], strides = [1, 1]} : vector<1x384xf32> to vector<1x128xf32>
    %41 = arith.mulf %40, %37 : vector<1x128xf32>
    %42 = arith.addf %39, %41 : vector<1x128xf32>
    %43 = vector.extract_strided_slice %35 {offsets = [0, 256], sizes = [1, 128], strides = [1, 1]} : vector<1x384xf32> to vector<1x128xf32>
    %44 = math.tanh %42 : vector<1x128xf32>
    %45 = arith.mulf %43, %44 : vector<1x128xf32>
    %46 = vector.extract_strided_slice %29 {offsets = [0, 0], sizes = [1, 384], strides = [1, 1]} : vector<1x512xf32> to vector<1x384xf32>
    %47 = arith.negf %46 : vector<1x384xf32>
    %48 = math.exp %47 : vector<1x384xf32>
    %cst_17 = arith.constant 1.000000e+00 : f32
    %49 = vector.broadcast %cst_17 : f32 to vector<1x384xf32>
    %50 = arith.addf %49, %48 : vector<1x384xf32>
    %51 = arith.divf %49, %50 : vector<1x384xf32>
    %52 = vector.extract_strided_slice %29 {offsets = [0, 384], sizes = [1, 128], strides = [1, 1]} : vector<1x512xf32> to vector<1x128xf32>
    %53 = math.tanh %52 : vector<1x128xf32>
    %54 = vector.extract_strided_slice %51 {offsets = [0, 128], sizes = [1, 128], strides = [1, 1]} : vector<1x384xf32> to vector<1x128xf32>
    %55 = arith.mulf %54, %18 : vector<1x128xf32>
    %56 = vector.extract_strided_slice %51 {offsets = [0, 0], sizes = [1, 128], strides = [1, 1]} : vector<1x384xf32> to vector<1x128xf32>
    %57 = arith.mulf %56, %53 : vector<1x128xf32>
    %58 = arith.addf %55, %57 : vector<1x128xf32>
    %59 = vector.extract_strided_slice %51 {offsets = [0, 256], sizes = [1, 128], strides = [1, 1]} : vector<1x384xf32> to vector<1x128xf32>
    %60 = math.tanh %58 : vector<1x128xf32>
    %61 = arith.mulf %59, %60 : vector<1x128xf32>
    %62 = arith.truncf %45 : vector<1x128xf32> to vector<1x128xbf16>
    %63 = arith.index_cast %c0_i32_12 : i32 to index
    %c0_18 = arith.constant 0 : index
    %64 = vector.load %arg13[%63, %c0_18] : memref<8x256xbf16, #tpu.memory_space<vmem>>, vector<1x128xbf16>
    tpu.vector_store %arg13[%63, %c0_18], %62 {strides = array<i32>} : memref<8x256xbf16, #tpu.memory_space<vmem>>, vector<1x128xbf16>,
    %65 = arith.truncf %61 : vector<1x128xf32> to vector<1x128xbf16>
    %66 = arith.index_cast %19 : i32 to index
    %c128 = arith.constant 128 : index
    %67 = vector.load %arg13[%66, %c128] : memref<8x256xbf16, #tpu.memory_space<vmem>>, vector<1x128xbf16>
    tpu.vector_store %arg13[%66, %c128], %65 {strides = array<i32>} : memref<8x256xbf16, #tpu.memory_space<vmem>>, vector<1x128xbf16>,
    %c1_i32_19 = arith.constant 1 : i32
    %c7_i32_20 = arith.constant 7 : i32
    %68 = arith.subi %c7_i32_20, %c1_i32_19 : i32
    %69 = arith.truncf %45 : vector<1x128xf32> to vector<1x128xbf16>
    %cst_21 = arith.constant dense<0.000000e+00> : vector<1x512xf32>
    %70 = tpu.matmul %69, %10, %cst_21 {dimension_numbers = #tpu.dot_dimension_numbers<[1], [0], [0], [1], [0, 0, 1, 1], [], []>} : vector<1x128xbf16>, vector<128x512xbf16>, vector<1x512xf32> -> vector<1x512xf32>
    %71 = arith.truncf %61 : vector<1x128xf32> to vector<1x128xbf16>
    %cst_22 = arith.constant dense<0.000000e+00> : vector<1x512xf32>
    %72 = tpu.matmul %71, %11, %cst_22 {dimension_numbers = #tpu.dot_dimension_numbers<[1], [0], [0], [1], [0, 0, 1, 1], [], []>} : vector<1x128xbf16>, vector<128x512xbf16>, vector<1x512xf32> -> vector<1x512xf32>
    %73 = arith.index_cast %c1_i32_19 : i32 to index
    %c0_23 = arith.constant 0 : index
    %74 = vector.load %arg12[%73, %c0_23] : memref<8x1024xf32, #tpu.memory_space<vmem>>, vector<1x512xf32>
    %75 = arith.addf %74, %70 : vector<1x512xf32>
    %76 = arith.index_cast %68 : i32 to index
    %c512_24 = arith.constant 512 : index
    %77 = vector.load %arg12[%76, %c512_24] : memref<8x1024xf32, #tpu.memory_space<vmem>>, vector<1x512xf32>
    %78 = arith.addf %77, %72 : vector<1x512xf32>
    %79 = vector.extract_strided_slice %75 {offsets = [0, 0], sizes = [1, 384], strides = [1, 1]} : vector<1x512xf32> to vector<1x384xf32>
    %80 = arith.negf %79 : vector<1x384xf32>
    %81 = math.exp %80 : vector<1x384xf32>
    %cst_25 = arith.constant 1.000000e+00 : f32
    %82 = vector.broadcast %cst_25 : f32 to vector<1x384xf32>
    %83 = arith.addf %82, %81 : vector<1x384xf32>
    %84 = arith.divf %82, %83 : vector<1x384xf32>
    %85 = vector.extract_strided_slice %75 {offsets = [0, 384], sizes = [1, 128], strides = [1, 1]} : vector<1x512xf32> to vector<1x128xf32>
    %86 = math.tanh %85 : vector<1x128xf32>
    %87 = vector.extract_strided_slice %84 {offsets = [0, 128], sizes = [1, 128], strides = [1, 1]} : vector<1x384xf32> to vector<1x128xf32>
    %88 = arith.mulf %87, %42 : vector<1x128xf32>
    %89 = vector.extract_strided_slice %84 {offsets = [0, 0], sizes = [1, 128], strides = [1, 1]} : vector<1x384xf32> to vector<1x128xf32>
    %90 = arith.mulf %89, %86 : vector<1x128xf32>
    %91 = arith.addf %88, %90 : vector<1x128xf32>
    %92 = vector.extract_strided_slice %84 {offsets = [0, 256], sizes = [1, 128], strides = [1, 1]} : vector<1x384xf32> to vector<1x128xf32>
    %93 = math.tanh %91 : vector<1x128xf32>
    %94 = arith.mulf %92, %93 : vector<1x128xf32>
    %95 = vector.extract_strided_slice %78 {offsets = [0, 0], sizes = [1, 384], strides = [1, 1]} : vector<1x512xf32> to vector<1x384xf32>
    %96 = arith.negf %95 : vector<1x384xf32>
    %97 = math.exp %96 : vector<1x384xf32>
    %cst_26 = arith.constant 1.000000e+00 : f32
    %98 = vector.broadcast %cst_26 : f32 to vector<1x384xf32>
    %99 = arith.addf %98, %97 : vector<1x384xf32>
    %100 = arith.divf %98, %99 : vector<1x384xf32>
    %101 = vector.extract_strided_slice %78 {offsets = [0, 384], sizes = [1, 128], strides = [1, 1]} : vector<1x512xf32> to vector<1x128xf32>
    %102 = math.tanh %101 : vector<1x128xf32>
    %103 = vector.extract_strided_slice %100 {offsets = [0, 128], sizes = [1, 128], strides = [1, 1]} : vector<1x384xf32> to vector<1x128xf32>
    %104 = arith.mulf %103, %58 : vector<1x128xf32>
    %105 = vector.extract_strided_slice %100 {offsets = [0, 0], sizes = [1, 128], strides = [1, 1]} : vector<1x384xf32> to vector<1x128xf32>
    %106 = arith.mulf %105, %102 : vector<1x128xf32>
    %107 = arith.addf %104, %106 : vector<1x128xf32>
    %108 = vector.extract_strided_slice %100 {offsets = [0, 256], sizes = [1, 128], strides = [1, 1]} : vector<1x384xf32> to vector<1x128xf32>
    %109 = math.tanh %107 : vector<1x128xf32>
    %110 = arith.mulf %108, %109 : vector<1x128xf32>
    %111 = arith.truncf %94 : vector<1x128xf32> to vector<1x128xbf16>
    %112 = arith.index_cast %c1_i32_19 : i32 to index
    %c0_27 = arith.constant 0 : index
    %113 = vector.load %arg13[%112, %c0_27] : memref<8x256xbf16, #tpu.memory_space<vmem>>, vector<1x128xbf16>
    tpu.vector_store %arg13[%112, %c0_27], %111 {strides = array<i32>} : memref<8x256xbf16, #tpu.memory_space<vmem>>, vector<1x128xbf16>,
    %114 = arith.truncf %110 : vector<1x128xf32> to vector<1x128xbf16>
    %115 = arith.index_cast %68 : i32 to index
    %c128_28 = arith.constant 128 : index
    %116 = vector.load %arg13[%115, %c128_28] : memref<8x256xbf16, #tpu.memory_space<vmem>>, vector<1x128xbf16>
    tpu.vector_store %arg13[%115, %c128_28], %114 {strides = array<i32>} : memref<8x256xbf16, #tpu.memory_space<vmem>>, vector<1x128xbf16>,
    %c2_i32_29 = arith.constant 2 : i32
    %c7_i32_30 = arith.constant 7 : i32
    %117 = arith.subi %c7_i32_30, %c2_i32_29 : i32
    %118 = arith.truncf %94 : vector<1x128xf32> to vector<1x128xbf16>
    %cst_31 = arith.constant dense<0.000000e+00> : vector<1x512xf32>
    %119 = tpu.matmul %118, %10, %cst_31 {dimension_numbers = #tpu.dot_dimension_numbers<[1], [0], [0], [1], [0, 0, 1, 1], [], []>} : vector<1x128xbf16>, vector<128x512xbf16>, vector<1x512xf32> -> vector<1x512xf32>
    %120 = arith.truncf %110 : vector<1x128xf32> to vector<1x128xbf16>
    %cst_32 = arith.constant dense<0.000000e+00> : vector<1x512xf32>
    %121 = tpu.matmul %120, %11, %cst_32 {dimension_numbers = #tpu.dot_dimension_numbers<[1], [0], [0], [1], [0, 0, 1, 1], [], []>} : vector<1x128xbf16>, vector<128x512xbf16>, vector<1x512xf32> -> vector<1x512xf32>
    %122 = arith.index_cast %c2_i32_29 : i32 to index
    %c0_33 = arith.constant 0 : index
    %123 = vector.load %arg12[%122, %c0_33] : memref<8x1024xf32, #tpu.memory_space<vmem>>, vector<1x512xf32>
    %124 = arith.addf %123, %119 : vector<1x512xf32>
    %125 = arith.index_cast %117 : i32 to index
    %c512_34 = arith.constant 512 : index
    %126 = vector.load %arg12[%125, %c512_34] : memref<8x1024xf32, #tpu.memory_space<vmem>>, vector<1x512xf32>
    %127 = arith.addf %126, %121 : vector<1x512xf32>
    %128 = vector.extract_strided_slice %124 {offsets = [0, 0], sizes = [1, 384], strides = [1, 1]} : vector<1x512xf32> to vector<1x384xf32>
    %129 = arith.negf %128 : vector<1x384xf32>
    %130 = math.exp %129 : vector<1x384xf32>
    %cst_35 = arith.constant 1.000000e+00 : f32
    %131 = vector.broadcast %cst_35 : f32 to vector<1x384xf32>
    %132 = arith.addf %131, %130 : vector<1x384xf32>
    %133 = arith.divf %131, %132 : vector<1x384xf32>
    %134 = vector.extract_strided_slice %124 {offsets = [0, 384], sizes = [1, 128], strides = [1, 1]} : vector<1x512xf32> to vector<1x128xf32>
    %135 = math.tanh %134 : vector<1x128xf32>
    %136 = vector.extract_strided_slice %133 {offsets = [0, 128], sizes = [1, 128], strides = [1, 1]} : vector<1x384xf32> to vector<1x128xf32>
    %137 = arith.mulf %136, %91 : vector<1x128xf32>
    %138 = vector.extract_strided_slice %133 {offsets = [0, 0], sizes = [1, 128], strides = [1, 1]} : vector<1x384xf32> to vector<1x128xf32>
    %139 = arith.mulf %138, %135 : vector<1x128xf32>
    %140 = arith.addf %137, %139 : vector<1x128xf32>
    %141 = vector.extract_strided_slice %133 {offsets = [0, 256], sizes = [1, 128], strides = [1, 1]} : vector<1x384xf32> to vector<1x128xf32>
    %142 = math.tanh %140 : vector<1x128xf32>
    %143 = arith.mulf %141, %142 : vector<1x128xf32>
    %144 = vector.extract_strided_slice %127 {offsets = [0, 0], sizes = [1, 384], strides = [1, 1]} : vector<1x512xf32> to vector<1x384xf32>
    %145 = arith.negf %144 : vector<1x384xf32>
    %146 = math.exp %145 : vector<1x384xf32>
    %cst_36 = arith.constant 1.000000e+00 : f32
    %147 = vector.broadcast %cst_36 : f32 to vector<1x384xf32>
    %148 = arith.addf %147, %146 : vector<1x384xf32>
    %149 = arith.divf %147, %148 : vector<1x384xf32>
    %150 = vector.extract_strided_slice %127 {offsets = [0, 384], sizes = [1, 128], strides = [1, 1]} : vector<1x512xf32> to vector<1x128xf32>
    %151 = math.tanh %150 : vector<1x128xf32>
    %152 = vector.extract_strided_slice %149 {offsets = [0, 128], sizes = [1, 128], strides = [1, 1]} : vector<1x384xf32> to vector<1x128xf32>
    %153 = arith.mulf %152, %107 : vector<1x128xf32>
    %154 = vector.extract_strided_slice %149 {offsets = [0, 0], sizes = [1, 128], strides = [1, 1]} : vector<1x384xf32> to vector<1x128xf32>
    %155 = arith.mulf %154, %151 : vector<1x128xf32>
    %156 = arith.addf %153, %155 : vector<1x128xf32>
    %157 = vector.extract_strided_slice %149 {offsets = [0, 256], sizes = [1, 128], strides = [1, 1]} : vector<1x384xf32> to vector<1x128xf32>
    %158 = math.tanh %156 : vector<1x128xf32>
    %159 = arith.mulf %157, %158 : vector<1x128xf32>
    %160 = arith.truncf %143 : vector<1x128xf32> to vector<1x128xbf16>
    %161 = arith.index_cast %c2_i32_29 : i32 to index
    %c0_37 = arith.constant 0 : index
    %162 = vector.load %arg13[%161, %c0_37] : memref<8x256xbf16, #tpu.memory_space<vmem>>, vector<1x128xbf16>
    tpu.vector_store %arg13[%161, %c0_37], %160 {strides = array<i32>} : memref<8x256xbf16, #tpu.memory_space<vmem>>, vector<1x128xbf16>,
    %163 = arith.truncf %159 : vector<1x128xf32> to vector<1x128xbf16>
    %164 = arith.index_cast %117 : i32 to index
    %c128_38 = arith.constant 128 : index
    %165 = vector.load %arg13[%164, %c128_38] : memref<8x256xbf16, #tpu.memory_space<vmem>>, vector<1x128xbf16>
    tpu.vector_store %arg13[%164, %c128_38], %163 {strides = array<i32>} : memref<8x256xbf16, #tpu.memory_space<vmem>>, vector<1x128xbf16>,
    %c3_i32_39 = arith.constant 3 : i32
    %c7_i32_40 = arith.constant 7 : i32
    %166 = arith.subi %c7_i32_40, %c3_i32_39 : i32
    %167 = arith.truncf %143 : vector<1x128xf32> to vector<1x128xbf16>
    %cst_41 = arith.constant dense<0.000000e+00> : vector<1x512xf32>
    %168 = tpu.matmul %167, %10, %cst_41 {dimension_numbers = #tpu.dot_dimension_numbers<[1], [0], [0], [1], [0, 0, 1, 1], [], []>} : vector<1x128xbf16>, vector<128x512xbf16>, vector<1x512xf32> -> vector<1x512xf32>
    %169 = arith.truncf %159 : vector<1x128xf32> to vector<1x128xbf16>
    %cst_42 = arith.constant dense<0.000000e+00> : vector<1x512xf32>
    %170 = tpu.matmul %169, %11, %cst_42 {dimension_numbers = #tpu.dot_dimension_numbers<[1], [0], [0], [1], [0, 0, 1, 1], [], []>} : vector<1x128xbf16>, vector<128x512xbf16>, vector<1x512xf32> -> vector<1x512xf32>
    %171 = arith.index_cast %c3_i32_39 : i32 to index
    %c0_43 = arith.constant 0 : index
    %172 = vector.load %arg12[%171, %c0_43] : memref<8x1024xf32, #tpu.memory_space<vmem>>, vector<1x512xf32>
    %173 = arith.addf %172, %168 : vector<1x512xf32>
    %174 = arith.index_cast %166 : i32 to index
    %c512_44 = arith.constant 512 : index
    %175 = vector.load %arg12[%174, %c512_44] : memref<8x1024xf32, #tpu.memory_space<vmem>>, vector<1x512xf32>
    %176 = arith.addf %175, %170 : vector<1x512xf32>
    %177 = vector.extract_strided_slice %173 {offsets = [0, 0], sizes = [1, 384], strides = [1, 1]} : vector<1x512xf32> to vector<1x384xf32>
    %178 = arith.negf %177 : vector<1x384xf32>
    %179 = math.exp %178 : vector<1x384xf32>
    %cst_45 = arith.constant 1.000000e+00 : f32
    %180 = vector.broadcast %cst_45 : f32 to vector<1x384xf32>
    %181 = arith.addf %180, %179 : vector<1x384xf32>
    %182 = arith.divf %180, %181 : vector<1x384xf32>
    %183 = vector.extract_strided_slice %173 {offsets = [0, 384], sizes = [1, 128], strides = [1, 1]} : vector<1x512xf32> to vector<1x128xf32>
    %184 = math.tanh %183 : vector<1x128xf32>
    %185 = vector.extract_strided_slice %182 {offsets = [0, 128], sizes = [1, 128], strides = [1, 1]} : vector<1x384xf32> to vector<1x128xf32>
    %186 = arith.mulf %185, %140 : vector<1x128xf32>
    %187 = vector.extract_strided_slice %182 {offsets = [0, 0], sizes = [1, 128], strides = [1, 1]} : vector<1x384xf32> to vector<1x128xf32>
    %188 = arith.mulf %187, %184 : vector<1x128xf32>
    %189 = arith.addf %186, %188 : vector<1x128xf32>
    %190 = vector.extract_strided_slice %182 {offsets = [0, 256], sizes = [1, 128], strides = [1, 1]} : vector<1x384xf32> to vector<1x128xf32>
    %191 = math.tanh %189 : vector<1x128xf32>
    %192 = arith.mulf %190, %191 : vector<1x128xf32>
    %193 = vector.extract_strided_slice %176 {offsets = [0, 0], sizes = [1, 384], strides = [1, 1]} : vector<1x512xf32> to vector<1x384xf32>
    %194 = arith.negf %193 : vector<1x384xf32>
    %195 = math.exp %194 : vector<1x384xf32>
    %cst_46 = arith.constant 1.000000e+00 : f32
    %196 = vector.broadcast %cst_46 : f32 to vector<1x384xf32>
    %197 = arith.addf %196, %195 : vector<1x384xf32>
    %198 = arith.divf %196, %197 : vector<1x384xf32>
    %199 = vector.extract_strided_slice %176 {offsets = [0, 384], sizes = [1, 128], strides = [1, 1]} : vector<1x512xf32> to vector<1x128xf32>
    %200 = math.tanh %199 : vector<1x128xf32>
    %201 = vector.extract_strided_slice %198 {offsets = [0, 128], sizes = [1, 128], strides = [1, 1]} : vector<1x384xf32> to vector<1x128xf32>
    %202 = arith.mulf %201, %156 : vector<1x128xf32>
    %203 = vector.extract_strided_slice %198 {offsets = [0, 0], sizes = [1, 128], strides = [1, 1]} : vector<1x384xf32> to vector<1x128xf32>
    %204 = arith.mulf %203, %200 : vector<1x128xf32>
    %205 = arith.addf %202, %204 : vector<1x128xf32>
    %206 = vector.extract_strided_slice %198 {offsets = [0, 256], sizes = [1, 128], strides = [1, 1]} : vector<1x384xf32> to vector<1x128xf32>
    %207 = math.tanh %205 : vector<1x128xf32>
    %208 = arith.mulf %206, %207 : vector<1x128xf32>
    %209 = arith.truncf %192 : vector<1x128xf32> to vector<1x128xbf16>
    %210 = arith.index_cast %c3_i32_39 : i32 to index
    %c0_47 = arith.constant 0 : index
    %211 = vector.load %arg13[%210, %c0_47] : memref<8x256xbf16, #tpu.memory_space<vmem>>, vector<1x128xbf16>
    tpu.vector_store %arg13[%210, %c0_47], %209 {strides = array<i32>} : memref<8x256xbf16, #tpu.memory_space<vmem>>, vector<1x128xbf16>,
    %212 = arith.truncf %208 : vector<1x128xf32> to vector<1x128xbf16>
    %213 = arith.index_cast %166 : i32 to index
    %c128_48 = arith.constant 128 : index
    %214 = vector.load %arg13[%213, %c128_48] : memref<8x256xbf16, #tpu.memory_space<vmem>>, vector<1x128xbf16>
    tpu.vector_store %arg13[%213, %c128_48], %212 {strides = array<i32>} : memref<8x256xbf16, #tpu.memory_space<vmem>>, vector<1x128xbf16>,
    %c4_i32 = arith.constant 4 : i32
    %c7_i32_49 = arith.constant 7 : i32
    %215 = arith.subi %c7_i32_49, %c4_i32 : i32
    %216 = arith.truncf %192 : vector<1x128xf32> to vector<1x128xbf16>
    %cst_50 = arith.constant dense<0.000000e+00> : vector<1x512xf32>
    %217 = tpu.matmul %216, %10, %cst_50 {dimension_numbers = #tpu.dot_dimension_numbers<[1], [0], [0], [1], [0, 0, 1, 1], [], []>} : vector<1x128xbf16>, vector<128x512xbf16>, vector<1x512xf32> -> vector<1x512xf32>
    %218 = arith.truncf %208 : vector<1x128xf32> to vector<1x128xbf16>
    %cst_51 = arith.constant dense<0.000000e+00> : vector<1x512xf32>
    %219 = tpu.matmul %218, %11, %cst_51 {dimension_numbers = #tpu.dot_dimension_numbers<[1], [0], [0], [1], [0, 0, 1, 1], [], []>} : vector<1x128xbf16>, vector<128x512xbf16>, vector<1x512xf32> -> vector<1x512xf32>
    %220 = arith.index_cast %c4_i32 : i32 to index
    %c0_52 = arith.constant 0 : index
    %221 = vector.load %arg12[%220, %c0_52] : memref<8x1024xf32, #tpu.memory_space<vmem>>, vector<1x512xf32>
    %222 = arith.addf %221, %217 : vector<1x512xf32>
    %223 = arith.index_cast %215 : i32 to index
    %c512_53 = arith.constant 512 : index
    %224 = vector.load %arg12[%223, %c512_53] : memref<8x1024xf32, #tpu.memory_space<vmem>>, vector<1x512xf32>
    %225 = arith.addf %224, %219 : vector<1x512xf32>
    %226 = vector.extract_strided_slice %222 {offsets = [0, 0], sizes = [1, 384], strides = [1, 1]} : vector<1x512xf32> to vector<1x384xf32>
    %227 = arith.negf %226 : vector<1x384xf32>
    %228 = math.exp %227 : vector<1x384xf32>
    %cst_54 = arith.constant 1.000000e+00 : f32
    %229 = vector.broadcast %cst_54 : f32 to vector<1x384xf32>
    %230 = arith.addf %229, %228 : vector<1x384xf32>
    %231 = arith.divf %229, %230 : vector<1x384xf32>
    %232 = vector.extract_strided_slice %222 {offsets = [0, 384], sizes = [1, 128], strides = [1, 1]} : vector<1x512xf32> to vector<1x128xf32>
    %233 = math.tanh %232 : vector<1x128xf32>
    %234 = vector.extract_strided_slice %231 {offsets = [0, 128], sizes = [1, 128], strides = [1, 1]} : vector<1x384xf32> to vector<1x128xf32>
    %235 = arith.mulf %234, %189 : vector<1x128xf32>
    %236 = vector.extract_strided_slice %231 {offsets = [0, 0], sizes = [1, 128], strides = [1, 1]} : vector<1x384xf32> to vector<1x128xf32>
    %237 = arith.mulf %236, %233 : vector<1x128xf32>
    %238 = arith.addf %235, %237 : vector<1x128xf32>
    %239 = vector.extract_strided_slice %231 {offsets = [0, 256], sizes = [1, 128], strides = [1, 1]} : vector<1x384xf32> to vector<1x128xf32>
    %240 = math.tanh %238 : vector<1x128xf32>
    %241 = arith.mulf %239, %240 : vector<1x128xf32>
    %242 = vector.extract_strided_slice %225 {offsets = [0, 0], sizes = [1, 384], strides = [1, 1]} : vector<1x512xf32> to vector<1x384xf32>
    %243 = arith.negf %242 : vector<1x384xf32>
    %244 = math.exp %243 : vector<1x384xf32>
    %cst_55 = arith.constant 1.000000e+00 : f32
    %245 = vector.broadcast %cst_55 : f32 to vector<1x384xf32>
    %246 = arith.addf %245, %244 : vector<1x384xf32>
    %247 = arith.divf %245, %246 : vector<1x384xf32>
    %248 = vector.extract_strided_slice %225 {offsets = [0, 384], sizes = [1, 128], strides = [1, 1]} : vector<1x512xf32> to vector<1x128xf32>
    %249 = math.tanh %248 : vector<1x128xf32>
    %250 = vector.extract_strided_slice %247 {offsets = [0, 128], sizes = [1, 128], strides = [1, 1]} : vector<1x384xf32> to vector<1x128xf32>
    %251 = arith.mulf %250, %205 : vector<1x128xf32>
    %252 = vector.extract_strided_slice %247 {offsets = [0, 0], sizes = [1, 128], strides = [1, 1]} : vector<1x384xf32> to vector<1x128xf32>
    %253 = arith.mulf %252, %249 : vector<1x128xf32>
    %254 = arith.addf %251, %253 : vector<1x128xf32>
    %255 = vector.extract_strided_slice %247 {offsets = [0, 256], sizes = [1, 128], strides = [1, 1]} : vector<1x384xf32> to vector<1x128xf32>
    %256 = math.tanh %254 : vector<1x128xf32>
    %257 = arith.mulf %255, %256 : vector<1x128xf32>
    %258 = arith.truncf %241 : vector<1x128xf32> to vector<1x128xbf16>
    %259 = arith.index_cast %c4_i32 : i32 to index
    %c0_56 = arith.constant 0 : index
    %260 = vector.load %arg13[%259, %c0_56] : memref<8x256xbf16, #tpu.memory_space<vmem>>, vector<1x128xbf16>
    tpu.vector_store %arg13[%259, %c0_56], %258 {strides = array<i32>} : memref<8x256xbf16, #tpu.memory_space<vmem>>, vector<1x128xbf16>,
    %261 = arith.truncf %257 : vector<1x128xf32> to vector<1x128xbf16>
    %262 = arith.index_cast %215 : i32 to index
    %c128_57 = arith.constant 128 : index
    %263 = vector.load %arg13[%262, %c128_57] : memref<8x256xbf16, #tpu.memory_space<vmem>>, vector<1x128xbf16>
    tpu.vector_store %arg13[%262, %c128_57], %261 {strides = array<i32>} : memref<8x256xbf16, #tpu.memory_space<vmem>>, vector<1x128xbf16>,
    %c5_i32 = arith.constant 5 : i32
    %c7_i32_58 = arith.constant 7 : i32
    %264 = arith.subi %c7_i32_58, %c5_i32 : i32
    %265 = arith.truncf %241 : vector<1x128xf32> to vector<1x128xbf16>
    %cst_59 = arith.constant dense<0.000000e+00> : vector<1x512xf32>
    %266 = tpu.matmul %265, %10, %cst_59 {dimension_numbers = #tpu.dot_dimension_numbers<[1], [0], [0], [1], [0, 0, 1, 1], [], []>} : vector<1x128xbf16>, vector<128x512xbf16>, vector<1x512xf32> -> vector<1x512xf32>
    %267 = arith.truncf %257 : vector<1x128xf32> to vector<1x128xbf16>
    %cst_60 = arith.constant dense<0.000000e+00> : vector<1x512xf32>
    %268 = tpu.matmul %267, %11, %cst_60 {dimension_numbers = #tpu.dot_dimension_numbers<[1], [0], [0], [1], [0, 0, 1, 1], [], []>} : vector<1x128xbf16>, vector<128x512xbf16>, vector<1x512xf32> -> vector<1x512xf32>
    %269 = arith.index_cast %c5_i32 : i32 to index
    %c0_61 = arith.constant 0 : index
    %270 = vector.load %arg12[%269, %c0_61] : memref<8x1024xf32, #tpu.memory_space<vmem>>, vector<1x512xf32>
    %271 = arith.addf %270, %266 : vector<1x512xf32>
    %272 = arith.index_cast %264 : i32 to index
    %c512_62 = arith.constant 512 : index
    %273 = vector.load %arg12[%272, %c512_62] : memref<8x1024xf32, #tpu.memory_space<vmem>>, vector<1x512xf32>
    %274 = arith.addf %273, %268 : vector<1x512xf32>
    %275 = vector.extract_strided_slice %271 {offsets = [0, 0], sizes = [1, 384], strides = [1, 1]} : vector<1x512xf32> to vector<1x384xf32>
    %276 = arith.negf %275 : vector<1x384xf32>
    %277 = math.exp %276 : vector<1x384xf32>
    %cst_63 = arith.constant 1.000000e+00 : f32
    %278 = vector.broadcast %cst_63 : f32 to vector<1x384xf32>
    %279 = arith.addf %278, %277 : vector<1x384xf32>
    %280 = arith.divf %278, %279 : vector<1x384xf32>
    %281 = vector.extract_strided_slice %271 {offsets = [0, 384], sizes = [1, 128], strides = [1, 1]} : vector<1x512xf32> to vector<1x128xf32>
    %282 = math.tanh %281 : vector<1x128xf32>
    %283 = vector.extract_strided_slice %280 {offsets = [0, 128], sizes = [1, 128], strides = [1, 1]} : vector<1x384xf32> to vector<1x128xf32>
    %284 = arith.mulf %283, %238 : vector<1x128xf32>
    %285 = vector.extract_strided_slice %280 {offsets = [0, 0], sizes = [1, 128], strides = [1, 1]} : vector<1x384xf32> to vector<1x128xf32>
    %286 = arith.mulf %285, %282 : vector<1x128xf32>
    %287 = arith.addf %284, %286 : vector<1x128xf32>
    %288 = vector.extract_strided_slice %280 {offsets = [0, 256], sizes = [1, 128], strides = [1, 1]} : vector<1x384xf32> to vector<1x128xf32>
    %289 = math.tanh %287 : vector<1x128xf32>
    %290 = arith.mulf %288, %289 : vector<1x128xf32>
    %291 = vector.extract_strided_slice %274 {offsets = [0, 0], sizes = [1, 384], strides = [1, 1]} : vector<1x512xf32> to vector<1x384xf32>
    %292 = arith.negf %291 : vector<1x384xf32>
    %293 = math.exp %292 : vector<1x384xf32>
    %cst_64 = arith.constant 1.000000e+00 : f32
    %294 = vector.broadcast %cst_64 : f32 to vector<1x384xf32>
    %295 = arith.addf %294, %293 : vector<1x384xf32>
    %296 = arith.divf %294, %295 : vector<1x384xf32>
    %297 = vector.extract_strided_slice %274 {offsets = [0, 384], sizes = [1, 128], strides = [1, 1]} : vector<1x512xf32> to vector<1x128xf32>
    %298 = math.tanh %297 : vector<1x128xf32>
    %299 = vector.extract_strided_slice %296 {offsets = [0, 128], sizes = [1, 128], strides = [1, 1]} : vector<1x384xf32> to vector<1x128xf32>
    %300 = arith.mulf %299, %254 : vector<1x128xf32>
    %301 = vector.extract_strided_slice %296 {offsets = [0, 0], sizes = [1, 128], strides = [1, 1]} : vector<1x384xf32> to vector<1x128xf32>
    %302 = arith.mulf %301, %298 : vector<1x128xf32>
    %303 = arith.addf %300, %302 : vector<1x128xf32>
    %304 = vector.extract_strided_slice %296 {offsets = [0, 256], sizes = [1, 128], strides = [1, 1]} : vector<1x384xf32> to vector<1x128xf32>
    %305 = math.tanh %303 : vector<1x128xf32>
    %306 = arith.mulf %304, %305 : vector<1x128xf32>
    %307 = arith.truncf %290 : vector<1x128xf32> to vector<1x128xbf16>
    %308 = arith.index_cast %c5_i32 : i32 to index
    %c0_65 = arith.constant 0 : index
    %309 = vector.load %arg13[%308, %c0_65] : memref<8x256xbf16, #tpu.memory_space<vmem>>, vector<1x128xbf16>
    tpu.vector_store %arg13[%308, %c0_65], %307 {strides = array<i32>} : memref<8x256xbf16, #tpu.memory_space<vmem>>, vector<1x128xbf16>,
    %310 = arith.truncf %306 : vector<1x128xf32> to vector<1x128xbf16>
    %311 = arith.index_cast %264 : i32 to index
    %c128_66 = arith.constant 128 : index
    %312 = vector.load %arg13[%311, %c128_66] : memref<8x256xbf16, #tpu.memory_space<vmem>>, vector<1x128xbf16>
    tpu.vector_store %arg13[%311, %c128_66], %310 {strides = array<i32>} : memref<8x256xbf16, #tpu.memory_space<vmem>>, vector<1x128xbf16>,
    %c6_i32 = arith.constant 6 : i32
    %c7_i32_67 = arith.constant 7 : i32
    %313 = arith.subi %c7_i32_67, %c6_i32 : i32
    %314 = arith.truncf %290 : vector<1x128xf32> to vector<1x128xbf16>
    %cst_68 = arith.constant dense<0.000000e+00> : vector<1x512xf32>
    %315 = tpu.matmul %314, %10, %cst_68 {dimension_numbers = #tpu.dot_dimension_numbers<[1], [0], [0], [1], [0, 0, 1, 1], [], []>} : vector<1x128xbf16>, vector<128x512xbf16>, vector<1x512xf32> -> vector<1x512xf32>
    %316 = arith.truncf %306 : vector<1x128xf32> to vector<1x128xbf16>
    %cst_69 = arith.constant dense<0.000000e+00> : vector<1x512xf32>
    %317 = tpu.matmul %316, %11, %cst_69 {dimension_numbers = #tpu.dot_dimension_numbers<[1], [0], [0], [1], [0, 0, 1, 1], [], []>} : vector<1x128xbf16>, vector<128x512xbf16>, vector<1x512xf32> -> vector<1x512xf32>
    %318 = arith.index_cast %c6_i32 : i32 to index
    %c0_70 = arith.constant 0 : index
    %319 = vector.load %arg12[%318, %c0_70] : memref<8x1024xf32, #tpu.memory_space<vmem>>, vector<1x512xf32>
    %320 = arith.addf %319, %315 : vector<1x512xf32>
    %321 = arith.index_cast %313 : i32 to index
    %c512_71 = arith.constant 512 : index
    %322 = vector.load %arg12[%321, %c512_71] : memref<8x1024xf32, #tpu.memory_space<vmem>>, vector<1x512xf32>
    %323 = arith.addf %322, %317 : vector<1x512xf32>
    %324 = vector.extract_strided_slice %320 {offsets = [0, 0], sizes = [1, 384], strides = [1, 1]} : vector<1x512xf32> to vector<1x384xf32>
    %325 = arith.negf %324 : vector<1x384xf32>
    %326 = math.exp %325 : vector<1x384xf32>
    %cst_72 = arith.constant 1.000000e+00 : f32
    %327 = vector.broadcast %cst_72 : f32 to vector<1x384xf32>
    %328 = arith.addf %327, %326 : vector<1x384xf32>
    %329 = arith.divf %327, %328 : vector<1x384xf32>
    %330 = vector.extract_strided_slice %320 {offsets = [0, 384], sizes = [1, 128], strides = [1, 1]} : vector<1x512xf32> to vector<1x128xf32>
    %331 = math.tanh %330 : vector<1x128xf32>
    %332 = vector.extract_strided_slice %329 {offsets = [0, 128], sizes = [1, 128], strides = [1, 1]} : vector<1x384xf32> to vector<1x128xf32>
    %333 = arith.mulf %332, %287 : vector<1x128xf32>
    %334 = vector.extract_strided_slice %329 {offsets = [0, 0], sizes = [1, 128], strides = [1, 1]} : vector<1x384xf32> to vector<1x128xf32>
    %335 = arith.mulf %334, %331 : vector<1x128xf32>
    %336 = arith.addf %333, %335 : vector<1x128xf32>
    %337 = vector.extract_strided_slice %329 {offsets = [0, 256], sizes = [1, 128], strides = [1, 1]} : vector<1x384xf32> to vector<1x128xf32>
    %338 = math.tanh %336 : vector<1x128xf32>
    %339 = arith.mulf %337, %338 : vector<1x128xf32>
    %340 = vector.extract_strided_slice %323 {offsets = [0, 0], sizes = [1, 384], strides = [1, 1]} : vector<1x512xf32> to vector<1x384xf32>
    %341 = arith.negf %340 : vector<1x384xf32>
    %342 = math.exp %341 : vector<1x384xf32>
    %cst_73 = arith.constant 1.000000e+00 : f32
    %343 = vector.broadcast %cst_73 : f32 to vector<1x384xf32>
    %344 = arith.addf %343, %342 : vector<1x384xf32>
    %345 = arith.divf %343, %344 : vector<1x384xf32>
    %346 = vector.extract_strided_slice %323 {offsets = [0, 384], sizes = [1, 128], strides = [1, 1]} : vector<1x512xf32> to vector<1x128xf32>
    %347 = math.tanh %346 : vector<1x128xf32>
    %348 = vector.extract_strided_slice %345 {offsets = [0, 128], sizes = [1, 128], strides = [1, 1]} : vector<1x384xf32> to vector<1x128xf32>
    %349 = arith.mulf %348, %303 : vector<1x128xf32>
    %350 = vector.extract_strided_slice %345 {offsets = [0, 0], sizes = [1, 128], strides = [1, 1]} : vector<1x384xf32> to vector<1x128xf32>
    %351 = arith.mulf %350, %347 : vector<1x128xf32>
    %352 = arith.addf %349, %351 : vector<1x128xf32>
    %353 = vector.extract_strided_slice %345 {offsets = [0, 256], sizes = [1, 128], strides = [1, 1]} : vector<1x384xf32> to vector<1x128xf32>
    %354 = math.tanh %352 : vector<1x128xf32>
    %355 = arith.mulf %353, %354 : vector<1x128xf32>
    %356 = arith.truncf %339 : vector<1x128xf32> to vector<1x128xbf16>
    %357 = arith.index_cast %c6_i32 : i32 to index
    %c0_74 = arith.constant 0 : index
    %358 = vector.load %arg13[%357, %c0_74] : memref<8x256xbf16, #tpu.memory_space<vmem>>, vector<1x128xbf16>
    tpu.vector_store %arg13[%357, %c0_74], %356 {strides = array<i32>} : memref<8x256xbf16, #tpu.memory_space<vmem>>, vector<1x128xbf16>,
    %359 = arith.truncf %355 : vector<1x128xf32> to vector<1x128xbf16>
    %360 = arith.index_cast %313 : i32 to index
    %c128_75 = arith.constant 128 : index
    %361 = vector.load %arg13[%360, %c128_75] : memref<8x256xbf16, #tpu.memory_space<vmem>>, vector<1x128xbf16>
    tpu.vector_store %arg13[%360, %c128_75], %359 {strides = array<i32>} : memref<8x256xbf16, #tpu.memory_space<vmem>>, vector<1x128xbf16>,
    %c7_i32_76 = arith.constant 7 : i32
    %c7_i32_77 = arith.constant 7 : i32
    %362 = arith.subi %c7_i32_77, %c7_i32_76 : i32
    %363 = arith.truncf %339 : vector<1x128xf32> to vector<1x128xbf16>
    %cst_78 = arith.constant dense<0.000000e+00> : vector<1x512xf32>
    %364 = tpu.matmul %363, %10, %cst_78 {dimension_numbers = #tpu.dot_dimension_numbers<[1], [0], [0], [1], [0, 0, 1, 1], [], []>} : vector<1x128xbf16>, vector<128x512xbf16>, vector<1x512xf32> -> vector<1x512xf32>
    %365 = arith.truncf %355 : vector<1x128xf32> to vector<1x128xbf16>
    %cst_79 = arith.constant dense<0.000000e+00> : vector<1x512xf32>
    %366 = tpu.matmul %365, %11, %cst_79 {dimension_numbers = #tpu.dot_dimension_numbers<[1], [0], [0], [1], [0, 0, 1, 1], [], []>} : vector<1x128xbf16>, vector<128x512xbf16>, vector<1x512xf32> -> vector<1x512xf32>
    %367 = arith.index_cast %c7_i32_76 : i32 to index
    %c0_80 = arith.constant 0 : index
    %368 = vector.load %arg12[%367, %c0_80] : memref<8x1024xf32, #tpu.memory_space<vmem>>, vector<1x512xf32>
    %369 = arith.addf %368, %364 : vector<1x512xf32>
    %370 = arith.index_cast %362 : i32 to index
    %c512_81 = arith.constant 512 : index
    %371 = vector.load %arg12[%370, %c512_81] : memref<8x1024xf32, #tpu.memory_space<vmem>>, vector<1x512xf32>
    %372 = arith.addf %371, %366 : vector<1x512xf32>
    %373 = vector.extract_strided_slice %369 {offsets = [0, 0], sizes = [1, 384], strides = [1, 1]} : vector<1x512xf32> to vector<1x384xf32>
    %374 = arith.negf %373 : vector<1x384xf32>
    %375 = math.exp %374 : vector<1x384xf32>
    %cst_82 = arith.constant 1.000000e+00 : f32
    %376 = vector.broadcast %cst_82 : f32 to vector<1x384xf32>
    %377 = arith.addf %376, %375 : vector<1x384xf32>
    %378 = arith.divf %376, %377 : vector<1x384xf32>
    %379 = vector.extract_strided_slice %369 {offsets = [0, 384], sizes = [1, 128], strides = [1, 1]} : vector<1x512xf32> to vector<1x128xf32>
    %380 = math.tanh %379 : vector<1x128xf32>
    %381 = vector.extract_strided_slice %378 {offsets = [0, 128], sizes = [1, 128], strides = [1, 1]} : vector<1x384xf32> to vector<1x128xf32>
    %382 = arith.mulf %381, %336 : vector<1x128xf32>
    %383 = vector.extract_strided_slice %378 {offsets = [0, 0], sizes = [1, 128], strides = [1, 1]} : vector<1x384xf32> to vector<1x128xf32>
    %384 = arith.mulf %383, %380 : vector<1x128xf32>
    %385 = arith.addf %382, %384 : vector<1x128xf32>
    %386 = vector.extract_strided_slice %378 {offsets = [0, 256], sizes = [1, 128], strides = [1, 1]} : vector<1x384xf32> to vector<1x128xf32>
    %387 = math.tanh %385 : vector<1x128xf32>
    %388 = arith.mulf %386, %387 : vector<1x128xf32>
    %389 = vector.extract_strided_slice %372 {offsets = [0, 0], sizes = [1, 384], strides = [1, 1]} : vector<1x512xf32> to vector<1x384xf32>
    %390 = arith.negf %389 : vector<1x384xf32>
    %391 = math.exp %390 : vector<1x384xf32>
    %cst_83 = arith.constant 1.000000e+00 : f32
    %392 = vector.broadcast %cst_83 : f32 to vector<1x384xf32>
    %393 = arith.addf %392, %391 : vector<1x384xf32>
    %394 = arith.divf %392, %393 : vector<1x384xf32>
    %395 = vector.extract_strided_slice %372 {offsets = [0, 384], sizes = [1, 128], strides = [1, 1]} : vector<1x512xf32> to vector<1x128xf32>
    %396 = math.tanh %395 : vector<1x128xf32>
    %397 = vector.extract_strided_slice %394 {offsets = [0, 128], sizes = [1, 128], strides = [1, 1]} : vector<1x384xf32> to vector<1x128xf32>
    %398 = arith.mulf %397, %352 : vector<1x128xf32>
    %399 = vector.extract_strided_slice %394 {offsets = [0, 0], sizes = [1, 128], strides = [1, 1]} : vector<1x384xf32> to vector<1x128xf32>
    %400 = arith.mulf %399, %396 : vector<1x128xf32>
    %401 = arith.addf %398, %400 : vector<1x128xf32>
    %402 = vector.extract_strided_slice %394 {offsets = [0, 256], sizes = [1, 128], strides = [1, 1]} : vector<1x384xf32> to vector<1x128xf32>
    %403 = math.tanh %401 : vector<1x128xf32>
    %404 = arith.mulf %402, %403 : vector<1x128xf32>
    %405 = arith.truncf %388 : vector<1x128xf32> to vector<1x128xbf16>
    %406 = arith.index_cast %c7_i32_76 : i32 to index
    %c0_84 = arith.constant 0 : index
    %407 = vector.load %arg13[%406, %c0_84] : memref<8x256xbf16, #tpu.memory_space<vmem>>, vector<1x128xbf16>
    tpu.vector_store %arg13[%406, %c0_84], %405 {strides = array<i32>} : memref<8x256xbf16, #tpu.memory_space<vmem>>, vector<1x128xbf16>,
    %408 = arith.truncf %404 : vector<1x128xf32> to vector<1x128xbf16>
    %409 = arith.index_cast %362 : i32 to index
    %c128_85 = arith.constant 128 : index
    %410 = vector.load %arg13[%409, %c128_85] : memref<8x256xbf16, #tpu.memory_space<vmem>>, vector<1x128xbf16>
    tpu.vector_store %arg13[%409, %c128_85], %408 {strides = array<i32>} : memref<8x256xbf16, #tpu.memory_space<vmem>>, vector<1x128xbf16>,
    %c8_i32 = arith.constant 8 : i32
    %c0_i32_86 = arith.constant 0 : i32
    %411 = tpu.memref_slice %arg18[%c0_i32_86] : memref<4x!tpu.dma_semaphore, #tpu.memory_space<semaphore_mem>> -> memref<1x!tpu.dma_semaphore, #tpu.memory_space<semaphore_mem>>
    %412 = tpu.memref_squeeze %411 : memref<1x!tpu.dma_semaphore, #tpu.memory_space<semaphore_mem>> -> memref<!tpu.dma_semaphore, #tpu.memory_space<semaphore_mem>>
    tpu.wait_dma2 semaphore(%412 : memref<!tpu.dma_semaphore, #tpu.memory_space<semaphore_mem>>) src(%arg5 : memref<256x1024xbf16, #tpu.memory_space<any>>) dst(%arg14 : memref<256x1024xbf16, #tpu.memory_space<vmem>>)
    %c1_i32_87 = arith.constant 1 : i32
    %413 = tpu.memref_slice %arg18[%c1_i32_87] : memref<4x!tpu.dma_semaphore, #tpu.memory_space<semaphore_mem>> -> memref<1x!tpu.dma_semaphore, #tpu.memory_space<semaphore_mem>>
    %414 = tpu.memref_squeeze %413 : memref<1x!tpu.dma_semaphore, #tpu.memory_space<semaphore_mem>> -> memref<!tpu.dma_semaphore, #tpu.memory_space<semaphore_mem>>
    tpu.wait_dma2 semaphore(%414 : memref<!tpu.dma_semaphore, #tpu.memory_space<semaphore_mem>>) src(%arg6 : memref<128x512xbf16, #tpu.memory_space<any>>) dst(%arg15 : memref<128x512xbf16, #tpu.memory_space<vmem>>)
    %c2_i32_88 = arith.constant 2 : i32
    %415 = tpu.memref_slice %arg18[%c2_i32_88] : memref<4x!tpu.dma_semaphore, #tpu.memory_space<semaphore_mem>> -> memref<1x!tpu.dma_semaphore, #tpu.memory_space<semaphore_mem>>
    %416 = tpu.memref_squeeze %415 : memref<1x!tpu.dma_semaphore, #tpu.memory_space<semaphore_mem>> -> memref<!tpu.dma_semaphore, #tpu.memory_space<semaphore_mem>>
    tpu.wait_dma2 semaphore(%416 : memref<!tpu.dma_semaphore, #tpu.memory_space<semaphore_mem>>) src(%arg7 : memref<128x512xbf16, #tpu.memory_space<any>>) dst(%arg16 : memref<128x512xbf16, #tpu.memory_space<vmem>>)
    %c3_i32_89 = arith.constant 3 : i32
    %417 = tpu.memref_slice %arg18[%c3_i32_89] : memref<4x!tpu.dma_semaphore, #tpu.memory_space<semaphore_mem>> -> memref<1x!tpu.dma_semaphore, #tpu.memory_space<semaphore_mem>>
    %418 = tpu.memref_squeeze %417 : memref<1x!tpu.dma_semaphore, #tpu.memory_space<semaphore_mem>> -> memref<!tpu.dma_semaphore, #tpu.memory_space<semaphore_mem>>
    tpu.wait_dma2 semaphore(%418 : memref<!tpu.dma_semaphore, #tpu.memory_space<semaphore_mem>>) src(%arg8 : memref<1x1024xf32, #tpu.memory_space<any>>) dst(%arg17 : memref<1x1024xf32, #tpu.memory_space<vmem>>)
    %c0_90 = arith.constant 0 : index
    %c0_91 = arith.constant 0 : index
    %419 = vector.load %arg13[%c0_90, %c0_91] : memref<8x256xbf16, #tpu.memory_space<vmem>>, vector<8x256xbf16>
    %c0_92 = arith.constant 0 : index
    %c0_93 = arith.constant 0 : index
    %420 = vector.load %arg14[%c0_92, %c0_93] : memref<256x1024xbf16, #tpu.memory_space<vmem>>, vector<256x1024xbf16>
    %c0_94 = arith.constant 0 : index
    %c0_95 = arith.constant 0 : index
    %421 = vector.load %arg15[%c0_94, %c0_95] : memref<128x512xbf16, #tpu.memory_space<vmem>>, vector<128x512xbf16>
    %c0_96 = arith.constant 0 : index
    %c0_97 = arith.constant 0 : index
    %422 = vector.load %arg16[%c0_96, %c0_97] : memref<128x512xbf16, #tpu.memory_space<vmem>>, vector<128x512xbf16>
    %c0_98 = arith.constant 0 : index
    %c0_99 = arith.constant 0 : index
    %423 = vector.load %arg17[%c0_98, %c0_99] : memref<1x1024xf32, #tpu.memory_space<vmem>>, vector<1x1024xf32>
    %cst_100 = arith.constant dense<0.000000e+00> : vector<8x1024xf32>
    %424 = tpu.matmul %419, %420, %cst_100 {dimension_numbers = #tpu.dot_dimension_numbers<[1], [0], [0], [1], [0, 0, 1, 1], [], []>} : vector<8x256xbf16>, vector<256x1024xbf16>, vector<8x1024xf32> -> vector<8x1024xf32>
    %425 = vector.broadcast %423 : vector<1x1024xf32> to vector<8x1024xf32>
    %426 = arith.addf %424, %425 : vector<8x1024xf32>
    %c0_101 = arith.constant 0 : index
    %c0_102 = arith.constant 0 : index
    %427 = vector.load %arg12[%c0_101, %c0_102] : memref<8x1024xf32, #tpu.memory_space<vmem>>, vector<8x1024xf32>
    tpu.vector_store %arg12[%c0_101, %c0_102], %426 {strides = array<i32>} : memref<8x1024xf32, #tpu.memory_space<vmem>>, vector<8x1024xf32>,
    %cst_103 = arith.constant 0.000000e+00 : f32
    %428 = vector.broadcast %cst_103 : f32 to vector<1x128xf32>
    %c0_i32_104 = arith.constant 0 : i32
    %c7_i32_105 = arith.constant 7 : i32
    %429 = arith.subi %c7_i32_105, %c0_i32_104 : i32
    %430 = arith.truncf %428 : vector<1x128xf32> to vector<1x128xbf16>
    %cst_106 = arith.constant dense<0.000000e+00> : vector<1x512xf32>
    %431 = tpu.matmul %430, %421, %cst_106 {dimension_numbers = #tpu.dot_dimension_numbers<[1], [0], [0], [1], [0, 0, 1, 1], [], []>} : vector<1x128xbf16>, vector<128x512xbf16>, vector<1x512xf32> -> vector<1x512xf32>
    %432 = arith.truncf %428 : vector<1x128xf32> to vector<1x128xbf16>
    %cst_107 = arith.constant dense<0.000000e+00> : vector<1x512xf32>
    %433 = tpu.matmul %432, %422, %cst_107 {dimension_numbers = #tpu.dot_dimension_numbers<[1], [0], [0], [1], [0, 0, 1, 1], [], []>} : vector<1x128xbf16>, vector<128x512xbf16>, vector<1x512xf32> -> vector<1x512xf32>
    %434 = arith.index_cast %c0_i32_104 : i32 to index
    %c0_108 = arith.constant 0 : index
    %435 = vector.load %arg12[%434, %c0_108] : memref<8x1024xf32, #tpu.memory_space<vmem>>, vector<1x512xf32>
    %436 = arith.addf %435, %431 : vector<1x512xf32>
    %437 = arith.index_cast %429 : i32 to index
    %c512_109 = arith.constant 512 : index
    %438 = vector.load %arg12[%437, %c512_109] : memref<8x1024xf32, #tpu.memory_space<vmem>>, vector<1x512xf32>
    %439 = arith.addf %438, %433 : vector<1x512xf32>
    %440 = vector.extract_strided_slice %436 {offsets = [0, 0], sizes = [1, 384], strides = [1, 1]} : vector<1x512xf32> to vector<1x384xf32>
    %441 = arith.negf %440 : vector<1x384xf32>
    %442 = math.exp %441 : vector<1x384xf32>
    %cst_110 = arith.constant 1.000000e+00 : f32
    %443 = vector.broadcast %cst_110 : f32 to vector<1x384xf32>
    %444 = arith.addf %443, %442 : vector<1x384xf32>
    %445 = arith.divf %443, %444 : vector<1x384xf32>
    %446 = vector.extract_strided_slice %436 {offsets = [0, 384], sizes = [1, 128], strides = [1, 1]} : vector<1x512xf32> to vector<1x128xf32>
    %447 = math.tanh %446 : vector<1x128xf32>
    %448 = vector.extract_strided_slice %445 {offsets = [0, 128], sizes = [1, 128], strides = [1, 1]} : vector<1x384xf32> to vector<1x128xf32>
    %449 = arith.mulf %448, %428 : vector<1x128xf32>
    %450 = vector.extract_strided_slice %445 {offsets = [0, 0], sizes = [1, 128], strides = [1, 1]} : vector<1x384xf32> to vector<1x128xf32>
    %451 = arith.mulf %450, %447 : vector<1x128xf32>
    %452 = arith.addf %449, %451 : vector<1x128xf32>
    %453 = vector.extract_strided_slice %445 {offsets = [0, 256], sizes = [1, 128], strides = [1, 1]} : vector<1x384xf32> to vector<1x128xf32>
    %454 = math.tanh %452 : vector<1x128xf32>
    %455 = arith.mulf %453, %454 : vector<1x128xf32>
    %456 = vector.extract_strided_slice %439 {offsets = [0, 0], sizes = [1, 384], strides = [1, 1]} : vector<1x512xf32> to vector<1x384xf32>
    %457 = arith.negf %456 : vector<1x384xf32>
    %458 = math.exp %457 : vector<1x384xf32>
    %cst_111 = arith.constant 1.000000e+00 : f32
    %459 = vector.broadcast %cst_111 : f32 to vector<1x384xf32>
    %460 = arith.addf %459, %458 : vector<1x384xf32>
    %461 = arith.divf %459, %460 : vector<1x384xf32>
    %462 = vector.extract_strided_slice %439 {offsets = [0, 384], sizes = [1, 128], strides = [1, 1]} : vector<1x512xf32> to vector<1x128xf32>
    %463 = math.tanh %462 : vector<1x128xf32>
    %464 = vector.extract_strided_slice %461 {offsets = [0, 128], sizes = [1, 128], strides = [1, 1]} : vector<1x384xf32> to vector<1x128xf32>
    %465 = arith.mulf %464, %428 : vector<1x128xf32>
    %466 = vector.extract_strided_slice %461 {offsets = [0, 0], sizes = [1, 128], strides = [1, 1]} : vector<1x384xf32> to vector<1x128xf32>
    %467 = arith.mulf %466, %463 : vector<1x128xf32>
    %468 = arith.addf %465, %467 : vector<1x128xf32>
    %469 = vector.extract_strided_slice %461 {offsets = [0, 256], sizes = [1, 128], strides = [1, 1]} : vector<1x384xf32> to vector<1x128xf32>
    %470 = math.tanh %468 : vector<1x128xf32>
    %471 = arith.mulf %469, %470 : vector<1x128xf32>
    %472 = arith.index_cast %c0_i32_104 : i32 to index
    %c0_112 = arith.constant 0 : index
    %473 = vector.load %arg9[%472, %c0_112] : memref<8x256xf32, #tpu.memory_space<vmem>>, vector<1x128xf32>
    tpu.vector_store %arg9[%472, %c0_112], %455 {strides = array<i32>} : memref<8x256xf32, #tpu.memory_space<vmem>>, vector<1x128xf32>,
    %474 = arith.index_cast %429 : i32 to index
    %c128_113 = arith.constant 128 : index
    %475 = vector.load %arg9[%474, %c128_113] : memref<8x256xf32, #tpu.memory_space<vmem>>, vector<1x128xf32>
    tpu.vector_store %arg9[%474, %c128_113], %471 {strides = array<i32>} : memref<8x256xf32, #tpu.memory_space<vmem>>, vector<1x128xf32>,
    %c1_i32_114 = arith.constant 1 : i32
    %c7_i32_115 = arith.constant 7 : i32
    %476 = arith.subi %c7_i32_115, %c1_i32_114 : i32
    %477 = arith.truncf %455 : vector<1x128xf32> to vector<1x128xbf16>
    %cst_116 = arith.constant dense<0.000000e+00> : vector<1x512xf32>
    %478 = tpu.matmul %477, %421, %cst_116 {dimension_numbers = #tpu.dot_dimension_numbers<[1], [0], [0], [1], [0, 0, 1, 1], [], []>} : vector<1x128xbf16>, vector<128x512xbf16>, vector<1x512xf32> -> vector<1x512xf32>
    %479 = arith.truncf %471 : vector<1x128xf32> to vector<1x128xbf16>
    %cst_117 = arith.constant dense<0.000000e+00> : vector<1x512xf32>
    %480 = tpu.matmul %479, %422, %cst_117 {dimension_numbers = #tpu.dot_dimension_numbers<[1], [0], [0], [1], [0, 0, 1, 1], [], []>} : vector<1x128xbf16>, vector<128x512xbf16>, vector<1x512xf32> -> vector<1x512xf32>
    %481 = arith.index_cast %c1_i32_114 : i32 to index
    %c0_118 = arith.constant 0 : index
    %482 = vector.load %arg12[%481, %c0_118] : memref<8x1024xf32, #tpu.memory_space<vmem>>, vector<1x512xf32>
    %483 = arith.addf %482, %478 : vector<1x512xf32>
    %484 = arith.index_cast %476 : i32 to index
    %c512_119 = arith.constant 512 : index
    %485 = vector.load %arg12[%484, %c512_119] : memref<8x1024xf32, #tpu.memory_space<vmem>>, vector<1x512xf32>
    %486 = arith.addf %485, %480 : vector<1x512xf32>
    %487 = vector.extract_strided_slice %483 {offsets = [0, 0], sizes = [1, 384], strides = [1, 1]} : vector<1x512xf32> to vector<1x384xf32>
    %488 = arith.negf %487 : vector<1x384xf32>
    %489 = math.exp %488 : vector<1x384xf32>
    %cst_120 = arith.constant 1.000000e+00 : f32
    %490 = vector.broadcast %cst_120 : f32 to vector<1x384xf32>
    %491 = arith.addf %490, %489 : vector<1x384xf32>
    %492 = arith.divf %490, %491 : vector<1x384xf32>
    %493 = vector.extract_strided_slice %483 {offsets = [0, 384], sizes = [1, 128], strides = [1, 1]} : vector<1x512xf32> to vector<1x128xf32>
    %494 = math.tanh %493 : vector<1x128xf32>
    %495 = vector.extract_strided_slice %492 {offsets = [0, 128], sizes = [1, 128], strides = [1, 1]} : vector<1x384xf32> to vector<1x128xf32>
    %496 = arith.mulf %495, %452 : vector<1x128xf32>
    %497 = vector.extract_strided_slice %492 {offsets = [0, 0], sizes = [1, 128], strides = [1, 1]} : vector<1x384xf32> to vector<1x128xf32>
    %498 = arith.mulf %497, %494 : vector<1x128xf32>
    %499 = arith.addf %496, %498 : vector<1x128xf32>
    %500 = vector.extract_strided_slice %492 {offsets = [0, 256], sizes = [1, 128], strides = [1, 1]} : vector<1x384xf32> to vector<1x128xf32>
    %501 = math.tanh %499 : vector<1x128xf32>
    %502 = arith.mulf %500, %501 : vector<1x128xf32>
    %503 = vector.extract_strided_slice %486 {offsets = [0, 0], sizes = [1, 384], strides = [1, 1]} : vector<1x512xf32> to vector<1x384xf32>
    %504 = arith.negf %503 : vector<1x384xf32>
    %505 = math.exp %504 : vector<1x384xf32>
    %cst_121 = arith.constant 1.000000e+00 : f32
    %506 = vector.broadcast %cst_121 : f32 to vector<1x384xf32>
    %507 = arith.addf %506, %505 : vector<1x384xf32>
    %508 = arith.divf %506, %507 : vector<1x384xf32>
    %509 = vector.extract_strided_slice %486 {offsets = [0, 384], sizes = [1, 128], strides = [1, 1]} : vector<1x512xf32> to vector<1x128xf32>
    %510 = math.tanh %509 : vector<1x128xf32>
    %511 = vector.extract_strided_slice %508 {offsets = [0, 128], sizes = [1, 128], strides = [1, 1]} : vector<1x384xf32> to vector<1x128xf32>
    %512 = arith.mulf %511, %468 : vector<1x128xf32>
    %513 = vector.extract_strided_slice %508 {offsets = [0, 0], sizes = [1, 128], strides = [1, 1]} : vector<1x384xf32> to vector<1x128xf32>
    %514 = arith.mulf %513, %510 : vector<1x128xf32>
    %515 = arith.addf %512, %514 : vector<1x128xf32>
    %516 = vector.extract_strided_slice %508 {offsets = [0, 256], sizes = [1, 128], strides = [1, 1]} : vector<1x384xf32> to vector<1x128xf32>
    %517 = math.tanh %515 : vector<1x128xf32>
    %518 = arith.mulf %516, %517 : vector<1x128xf32>
    %519 = arith.index_cast %c1_i32_114 : i32 to index
    %c0_122 = arith.constant 0 : index
    %520 = vector.load %arg9[%519, %c0_122] : memref<8x256xf32, #tpu.memory_space<vmem>>, vector<1x128xf32>
    tpu.vector_store %arg9[%519, %c0_122], %502 {strides = array<i32>} : memref<8x256xf32, #tpu.memory_space<vmem>>, vector<1x128xf32>,
    %521 = arith.index_cast %476 : i32 to index
    %c128_123 = arith.constant 128 : index
    %522 = vector.load %arg9[%521, %c128_123] : memref<8x256xf32, #tpu.memory_space<vmem>>, vector<1x128xf32>
    tpu.vector_store %arg9[%521, %c128_123], %518 {strides = array<i32>} : memref<8x256xf32, #tpu.memory_space<vmem>>, vector<1x128xf32>,
    %c2_i32_124 = arith.constant 2 : i32
    %c7_i32_125 = arith.constant 7 : i32
    %523 = arith.subi %c7_i32_125, %c2_i32_124 : i32
    %524 = arith.truncf %502 : vector<1x128xf32> to vector<1x128xbf16>
    %cst_126 = arith.constant dense<0.000000e+00> : vector<1x512xf32>
    %525 = tpu.matmul %524, %421, %cst_126 {dimension_numbers = #tpu.dot_dimension_numbers<[1], [0], [0], [1], [0, 0, 1, 1], [], []>} : vector<1x128xbf16>, vector<128x512xbf16>, vector<1x512xf32> -> vector<1x512xf32>
    %526 = arith.truncf %518 : vector<1x128xf32> to vector<1x128xbf16>
    %cst_127 = arith.constant dense<0.000000e+00> : vector<1x512xf32>
    %527 = tpu.matmul %526, %422, %cst_127 {dimension_numbers = #tpu.dot_dimension_numbers<[1], [0], [0], [1], [0, 0, 1, 1], [], []>} : vector<1x128xbf16>, vector<128x512xbf16>, vector<1x512xf32> -> vector<1x512xf32>
    %528 = arith.index_cast %c2_i32_124 : i32 to index
    %c0_128 = arith.constant 0 : index
    %529 = vector.load %arg12[%528, %c0_128] : memref<8x1024xf32, #tpu.memory_space<vmem>>, vector<1x512xf32>
    %530 = arith.addf %529, %525 : vector<1x512xf32>
    %531 = arith.index_cast %523 : i32 to index
    %c512_129 = arith.constant 512 : index
    %532 = vector.load %arg12[%531, %c512_129] : memref<8x1024xf32, #tpu.memory_space<vmem>>, vector<1x512xf32>
    %533 = arith.addf %532, %527 : vector<1x512xf32>
    %534 = vector.extract_strided_slice %530 {offsets = [0, 0], sizes = [1, 384], strides = [1, 1]} : vector<1x512xf32> to vector<1x384xf32>
    %535 = arith.negf %534 : vector<1x384xf32>
    %536 = math.exp %535 : vector<1x384xf32>
    %cst_130 = arith.constant 1.000000e+00 : f32
    %537 = vector.broadcast %cst_130 : f32 to vector<1x384xf32>
    %538 = arith.addf %537, %536 : vector<1x384xf32>
    %539 = arith.divf %537, %538 : vector<1x384xf32>
    %540 = vector.extract_strided_slice %530 {offsets = [0, 384], sizes = [1, 128], strides = [1, 1]} : vector<1x512xf32> to vector<1x128xf32>
    %541 = math.tanh %540 : vector<1x128xf32>
    %542 = vector.extract_strided_slice %539 {offsets = [0, 128], sizes = [1, 128], strides = [1, 1]} : vector<1x384xf32> to vector<1x128xf32>
    %543 = arith.mulf %542, %499 : vector<1x128xf32>
    %544 = vector.extract_strided_slice %539 {offsets = [0, 0], sizes = [1, 128], strides = [1, 1]} : vector<1x384xf32> to vector<1x128xf32>
    %545 = arith.mulf %544, %541 : vector<1x128xf32>
    %546 = arith.addf %543, %545 : vector<1x128xf32>
    %547 = vector.extract_strided_slice %539 {offsets = [0, 256], sizes = [1, 128], strides = [1, 1]} : vector<1x384xf32> to vector<1x128xf32>
    %548 = math.tanh %546 : vector<1x128xf32>
    %549 = arith.mulf %547, %548 : vector<1x128xf32>
    %550 = vector.extract_strided_slice %533 {offsets = [0, 0], sizes = [1, 384], strides = [1, 1]} : vector<1x512xf32> to vector<1x384xf32>
    %551 = arith.negf %550 : vector<1x384xf32>
    %552 = math.exp %551 : vector<1x384xf32>
    %cst_131 = arith.constant 1.000000e+00 : f32
    %553 = vector.broadcast %cst_131 : f32 to vector<1x384xf32>
    %554 = arith.addf %553, %552 : vector<1x384xf32>
    %555 = arith.divf %553, %554 : vector<1x384xf32>
    %556 = vector.extract_strided_slice %533 {offsets = [0, 384], sizes = [1, 128], strides = [1, 1]} : vector<1x512xf32> to vector<1x128xf32>
    %557 = math.tanh %556 : vector<1x128xf32>
    %558 = vector.extract_strided_slice %555 {offsets = [0, 128], sizes = [1, 128], strides = [1, 1]} : vector<1x384xf32> to vector<1x128xf32>
    %559 = arith.mulf %558, %515 : vector<1x128xf32>
    %560 = vector.extract_strided_slice %555 {offsets = [0, 0], sizes = [1, 128], strides = [1, 1]} : vector<1x384xf32> to vector<1x128xf32>
    %561 = arith.mulf %560, %557 : vector<1x128xf32>
    %562 = arith.addf %559, %561 : vector<1x128xf32>
    %563 = vector.extract_strided_slice %555 {offsets = [0, 256], sizes = [1, 128], strides = [1, 1]} : vector<1x384xf32> to vector<1x128xf32>
    %564 = math.tanh %562 : vector<1x128xf32>
    %565 = arith.mulf %563, %564 : vector<1x128xf32>
    %566 = arith.index_cast %c2_i32_124 : i32 to index
    %c0_132 = arith.constant 0 : index
    %567 = vector.load %arg9[%566, %c0_132] : memref<8x256xf32, #tpu.memory_space<vmem>>, vector<1x128xf32>
    tpu.vector_store %arg9[%566, %c0_132], %549 {strides = array<i32>} : memref<8x256xf32, #tpu.memory_space<vmem>>, vector<1x128xf32>,
    %568 = arith.index_cast %523 : i32 to index
    %c128_133 = arith.constant 128 : index
    %569 = vector.load %arg9[%568, %c128_133] : memref<8x256xf32, #tpu.memory_space<vmem>>, vector<1x128xf32>
    tpu.vector_store %arg9[%568, %c128_133], %565 {strides = array<i32>} : memref<8x256xf32, #tpu.memory_space<vmem>>, vector<1x128xf32>,
    %c3_i32_134 = arith.constant 3 : i32
    %c7_i32_135 = arith.constant 7 : i32
    %570 = arith.subi %c7_i32_135, %c3_i32_134 : i32
    %571 = arith.truncf %549 : vector<1x128xf32> to vector<1x128xbf16>
    %cst_136 = arith.constant dense<0.000000e+00> : vector<1x512xf32>
    %572 = tpu.matmul %571, %421, %cst_136 {dimension_numbers = #tpu.dot_dimension_numbers<[1], [0], [0], [1], [0, 0, 1, 1], [], []>} : vector<1x128xbf16>, vector<128x512xbf16>, vector<1x512xf32> -> vector<1x512xf32>
    %573 = arith.truncf %565 : vector<1x128xf32> to vector<1x128xbf16>
    %cst_137 = arith.constant dense<0.000000e+00> : vector<1x512xf32>
    %574 = tpu.matmul %573, %422, %cst_137 {dimension_numbers = #tpu.dot_dimension_numbers<[1], [0], [0], [1], [0, 0, 1, 1], [], []>} : vector<1x128xbf16>, vector<128x512xbf16>, vector<1x512xf32> -> vector<1x512xf32>
    %575 = arith.index_cast %c3_i32_134 : i32 to index
    %c0_138 = arith.constant 0 : index
    %576 = vector.load %arg12[%575, %c0_138] : memref<8x1024xf32, #tpu.memory_space<vmem>>, vector<1x512xf32>
    %577 = arith.addf %576, %572 : vector<1x512xf32>
    %578 = arith.index_cast %570 : i32 to index
    %c512_139 = arith.constant 512 : index
    %579 = vector.load %arg12[%578, %c512_139] : memref<8x1024xf32, #tpu.memory_space<vmem>>, vector<1x512xf32>
    %580 = arith.addf %579, %574 : vector<1x512xf32>
    %581 = vector.extract_strided_slice %577 {offsets = [0, 0], sizes = [1, 384], strides = [1, 1]} : vector<1x512xf32> to vector<1x384xf32>
    %582 = arith.negf %581 : vector<1x384xf32>
    %583 = math.exp %582 : vector<1x384xf32>
    %cst_140 = arith.constant 1.000000e+00 : f32
    %584 = vector.broadcast %cst_140 : f32 to vector<1x384xf32>
    %585 = arith.addf %584, %583 : vector<1x384xf32>
    %586 = arith.divf %584, %585 : vector<1x384xf32>
    %587 = vector.extract_strided_slice %577 {offsets = [0, 384], sizes = [1, 128], strides = [1, 1]} : vector<1x512xf32> to vector<1x128xf32>
    %588 = math.tanh %587 : vector<1x128xf32>
    %589 = vector.extract_strided_slice %586 {offsets = [0, 128], sizes = [1, 128], strides = [1, 1]} : vector<1x384xf32> to vector<1x128xf32>
    %590 = arith.mulf %589, %546 : vector<1x128xf32>
    %591 = vector.extract_strided_slice %586 {offsets = [0, 0], sizes = [1, 128], strides = [1, 1]} : vector<1x384xf32> to vector<1x128xf32>
    %592 = arith.mulf %591, %588 : vector<1x128xf32>
    %593 = arith.addf %590, %592 : vector<1x128xf32>
    %594 = vector.extract_strided_slice %586 {offsets = [0, 256], sizes = [1, 128], strides = [1, 1]} : vector<1x384xf32> to vector<1x128xf32>
    %595 = math.tanh %593 : vector<1x128xf32>
    %596 = arith.mulf %594, %595 : vector<1x128xf32>
    %597 = vector.extract_strided_slice %580 {offsets = [0, 0], sizes = [1, 384], strides = [1, 1]} : vector<1x512xf32> to vector<1x384xf32>
    %598 = arith.negf %597 : vector<1x384xf32>
    %599 = math.exp %598 : vector<1x384xf32>
    %cst_141 = arith.constant 1.000000e+00 : f32
    %600 = vector.broadcast %cst_141 : f32 to vector<1x384xf32>
    %601 = arith.addf %600, %599 : vector<1x384xf32>
    %602 = arith.divf %600, %601 : vector<1x384xf32>
    %603 = vector.extract_strided_slice %580 {offsets = [0, 384], sizes = [1, 128], strides = [1, 1]} : vector<1x512xf32> to vector<1x128xf32>
    %604 = math.tanh %603 : vector<1x128xf32>
    %605 = vector.extract_strided_slice %602 {offsets = [0, 128], sizes = [1, 128], strides = [1, 1]} : vector<1x384xf32> to vector<1x128xf32>
    %606 = arith.mulf %605, %562 : vector<1x128xf32>
    %607 = vector.extract_strided_slice %602 {offsets = [0, 0], sizes = [1, 128], strides = [1, 1]} : vector<1x384xf32> to vector<1x128xf32>
    %608 = arith.mulf %607, %604 : vector<1x128xf32>
    %609 = arith.addf %606, %608 : vector<1x128xf32>
    %610 = vector.extract_strided_slice %602 {offsets = [0, 256], sizes = [1, 128], strides = [1, 1]} : vector<1x384xf32> to vector<1x128xf32>
    %611 = math.tanh %609 : vector<1x128xf32>
    %612 = arith.mulf %610, %611 : vector<1x128xf32>
    %613 = arith.index_cast %c3_i32_134 : i32 to index
    %c0_142 = arith.constant 0 : index
    %614 = vector.load %arg9[%613, %c0_142] : memref<8x256xf32, #tpu.memory_space<vmem>>, vector<1x128xf32>
    tpu.vector_store %arg9[%613, %c0_142], %596 {strides = array<i32>} : memref<8x256xf32, #tpu.memory_space<vmem>>, vector<1x128xf32>,
    %615 = arith.index_cast %570 : i32 to index
    %c128_143 = arith.constant 128 : index
    %616 = vector.load %arg9[%615, %c128_143] : memref<8x256xf32, #tpu.memory_space<vmem>>, vector<1x128xf32>
    tpu.vector_store %arg9[%615, %c128_143], %612 {strides = array<i32>} : memref<8x256xf32, #tpu.memory_space<vmem>>, vector<1x128xf32>,
    %c4_i32_144 = arith.constant 4 : i32
    %c7_i32_145 = arith.constant 7 : i32
    %617 = arith.subi %c7_i32_145, %c4_i32_144 : i32
    %618 = arith.truncf %596 : vector<1x128xf32> to vector<1x128xbf16>
    %cst_146 = arith.constant dense<0.000000e+00> : vector<1x512xf32>
    %619 = tpu.matmul %618, %421, %cst_146 {dimension_numbers = #tpu.dot_dimension_numbers<[1], [0], [0], [1], [0, 0, 1, 1], [], []>} : vector<1x128xbf16>, vector<128x512xbf16>, vector<1x512xf32> -> vector<1x512xf32>
    %620 = arith.truncf %612 : vector<1x128xf32> to vector<1x128xbf16>
    %cst_147 = arith.constant dense<0.000000e+00> : vector<1x512xf32>
    %621 = tpu.matmul %620, %422, %cst_147 {dimension_numbers = #tpu.dot_dimension_numbers<[1], [0], [0], [1], [0, 0, 1, 1], [], []>} : vector<1x128xbf16>, vector<128x512xbf16>, vector<1x512xf32> -> vector<1x512xf32>
    %622 = arith.index_cast %c4_i32_144 : i32 to index
    %c0_148 = arith.constant 0 : index
    %623 = vector.load %arg12[%622, %c0_148] : memref<8x1024xf32, #tpu.memory_space<vmem>>, vector<1x512xf32>
    %624 = arith.addf %623, %619 : vector<1x512xf32>
    %625 = arith.index_cast %617 : i32 to index
    %c512_149 = arith.constant 512 : index
    %626 = vector.load %arg12[%625, %c512_149] : memref<8x1024xf32, #tpu.memory_space<vmem>>, vector<1x512xf32>
    %627 = arith.addf %626, %621 : vector<1x512xf32>
    %628 = vector.extract_strided_slice %624 {offsets = [0, 0], sizes = [1, 384], strides = [1, 1]} : vector<1x512xf32> to vector<1x384xf32>
    %629 = arith.negf %628 : vector<1x384xf32>
    %630 = math.exp %629 : vector<1x384xf32>
    %cst_150 = arith.constant 1.000000e+00 : f32
    %631 = vector.broadcast %cst_150 : f32 to vector<1x384xf32>
    %632 = arith.addf %631, %630 : vector<1x384xf32>
    %633 = arith.divf %631, %632 : vector<1x384xf32>
    %634 = vector.extract_strided_slice %624 {offsets = [0, 384], sizes = [1, 128], strides = [1, 1]} : vector<1x512xf32> to vector<1x128xf32>
    %635 = math.tanh %634 : vector<1x128xf32>
    %636 = vector.extract_strided_slice %633 {offsets = [0, 128], sizes = [1, 128], strides = [1, 1]} : vector<1x384xf32> to vector<1x128xf32>
    %637 = arith.mulf %636, %593 : vector<1x128xf32>
    %638 = vector.extract_strided_slice %633 {offsets = [0, 0], sizes = [1, 128], strides = [1, 1]} : vector<1x384xf32> to vector<1x128xf32>
    %639 = arith.mulf %638, %635 : vector<1x128xf32>
    %640 = arith.addf %637, %639 : vector<1x128xf32>
    %641 = vector.extract_strided_slice %633 {offsets = [0, 256], sizes = [1, 128], strides = [1, 1]} : vector<1x384xf32> to vector<1x128xf32>
    %642 = math.tanh %640 : vector<1x128xf32>
    %643 = arith.mulf %641, %642 : vector<1x128xf32>
    %644 = vector.extract_strided_slice %627 {offsets = [0, 0], sizes = [1, 384], strides = [1, 1]} : vector<1x512xf32> to vector<1x384xf32>
    %645 = arith.negf %644 : vector<1x384xf32>
    %646 = math.exp %645 : vector<1x384xf32>
    %cst_151 = arith.constant 1.000000e+00 : f32
    %647 = vector.broadcast %cst_151 : f32 to vector<1x384xf32>
    %648 = arith.addf %647, %646 : vector<1x384xf32>
    %649 = arith.divf %647, %648 : vector<1x384xf32>
    %650 = vector.extract_strided_slice %627 {offsets = [0, 384], sizes = [1, 128], strides = [1, 1]} : vector<1x512xf32> to vector<1x128xf32>
    %651 = math.tanh %650 : vector<1x128xf32>
    %652 = vector.extract_strided_slice %649 {offsets = [0, 128], sizes = [1, 128], strides = [1, 1]} : vector<1x384xf32> to vector<1x128xf32>
    %653 = arith.mulf %652, %609 : vector<1x128xf32>
    %654 = vector.extract_strided_slice %649 {offsets = [0, 0], sizes = [1, 128], strides = [1, 1]} : vector<1x384xf32> to vector<1x128xf32>
    %655 = arith.mulf %654, %651 : vector<1x128xf32>
    %656 = arith.addf %653, %655 : vector<1x128xf32>
    %657 = vector.extract_strided_slice %649 {offsets = [0, 256], sizes = [1, 128], strides = [1, 1]} : vector<1x384xf32> to vector<1x128xf32>
    %658 = math.tanh %656 : vector<1x128xf32>
    %659 = arith.mulf %657, %658 : vector<1x128xf32>
    %660 = arith.index_cast %c4_i32_144 : i32 to index
    %c0_152 = arith.constant 0 : index
    %661 = vector.load %arg9[%660, %c0_152] : memref<8x256xf32, #tpu.memory_space<vmem>>, vector<1x128xf32>
    tpu.vector_store %arg9[%660, %c0_152], %643 {strides = array<i32>} : memref<8x256xf32, #tpu.memory_space<vmem>>, vector<1x128xf32>,
    %662 = arith.index_cast %617 : i32 to index
    %c128_153 = arith.constant 128 : index
    %663 = vector.load %arg9[%662, %c128_153] : memref<8x256xf32, #tpu.memory_space<vmem>>, vector<1x128xf32>
    tpu.vector_store %arg9[%662, %c128_153], %659 {strides = array<i32>} : memref<8x256xf32, #tpu.memory_space<vmem>>, vector<1x128xf32>,
    %c5_i32_154 = arith.constant 5 : i32
    %c7_i32_155 = arith.constant 7 : i32
    %664 = arith.subi %c7_i32_155, %c5_i32_154 : i32
    %665 = arith.truncf %643 : vector<1x128xf32> to vector<1x128xbf16>
    %cst_156 = arith.constant dense<0.000000e+00> : vector<1x512xf32>
    %666 = tpu.matmul %665, %421, %cst_156 {dimension_numbers = #tpu.dot_dimension_numbers<[1], [0], [0], [1], [0, 0, 1, 1], [], []>} : vector<1x128xbf16>, vector<128x512xbf16>, vector<1x512xf32> -> vector<1x512xf32>
    %667 = arith.truncf %659 : vector<1x128xf32> to vector<1x128xbf16>
    %cst_157 = arith.constant dense<0.000000e+00> : vector<1x512xf32>
    %668 = tpu.matmul %667, %422, %cst_157 {dimension_numbers = #tpu.dot_dimension_numbers<[1], [0], [0], [1], [0, 0, 1, 1], [], []>} : vector<1x128xbf16>, vector<128x512xbf16>, vector<1x512xf32> -> vector<1x512xf32>
    %669 = arith.index_cast %c5_i32_154 : i32 to index
    %c0_158 = arith.constant 0 : index
    %670 = vector.load %arg12[%669, %c0_158] : memref<8x1024xf32, #tpu.memory_space<vmem>>, vector<1x512xf32>
    %671 = arith.addf %670, %666 : vector<1x512xf32>
    %672 = arith.index_cast %664 : i32 to index
    %c512_159 = arith.constant 512 : index
    %673 = vector.load %arg12[%672, %c512_159] : memref<8x1024xf32, #tpu.memory_space<vmem>>, vector<1x512xf32>
    %674 = arith.addf %673, %668 : vector<1x512xf32>
    %675 = vector.extract_strided_slice %671 {offsets = [0, 0], sizes = [1, 384], strides = [1, 1]} : vector<1x512xf32> to vector<1x384xf32>
    %676 = arith.negf %675 : vector<1x384xf32>
    %677 = math.exp %676 : vector<1x384xf32>
    %cst_160 = arith.constant 1.000000e+00 : f32
    %678 = vector.broadcast %cst_160 : f32 to vector<1x384xf32>
    %679 = arith.addf %678, %677 : vector<1x384xf32>
    %680 = arith.divf %678, %679 : vector<1x384xf32>
    %681 = vector.extract_strided_slice %671 {offsets = [0, 384], sizes = [1, 128], strides = [1, 1]} : vector<1x512xf32> to vector<1x128xf32>
    %682 = math.tanh %681 : vector<1x128xf32>
    %683 = vector.extract_strided_slice %680 {offsets = [0, 128], sizes = [1, 128], strides = [1, 1]} : vector<1x384xf32> to vector<1x128xf32>
    %684 = arith.mulf %683, %640 : vector<1x128xf32>
    %685 = vector.extract_strided_slice %680 {offsets = [0, 0], sizes = [1, 128], strides = [1, 1]} : vector<1x384xf32> to vector<1x128xf32>
    %686 = arith.mulf %685, %682 : vector<1x128xf32>
    %687 = arith.addf %684, %686 : vector<1x128xf32>
    %688 = vector.extract_strided_slice %680 {offsets = [0, 256], sizes = [1, 128], strides = [1, 1]} : vector<1x384xf32> to vector<1x128xf32>
    %689 = math.tanh %687 : vector<1x128xf32>
    %690 = arith.mulf %688, %689 : vector<1x128xf32>
    %691 = vector.extract_strided_slice %674 {offsets = [0, 0], sizes = [1, 384], strides = [1, 1]} : vector<1x512xf32> to vector<1x384xf32>
    %692 = arith.negf %691 : vector<1x384xf32>
    %693 = math.exp %692 : vector<1x384xf32>
    %cst_161 = arith.constant 1.000000e+00 : f32
    %694 = vector.broadcast %cst_161 : f32 to vector<1x384xf32>
    %695 = arith.addf %694, %693 : vector<1x384xf32>
    %696 = arith.divf %694, %695 : vector<1x384xf32>
    %697 = vector.extract_strided_slice %674 {offsets = [0, 384], sizes = [1, 128], strides = [1, 1]} : vector<1x512xf32> to vector<1x128xf32>
    %698 = math.tanh %697 : vector<1x128xf32>
    %699 = vector.extract_strided_slice %696 {offsets = [0, 128], sizes = [1, 128], strides = [1, 1]} : vector<1x384xf32> to vector<1x128xf32>
    %700 = arith.mulf %699, %656 : vector<1x128xf32>
    %701 = vector.extract_strided_slice %696 {offsets = [0, 0], sizes = [1, 128], strides = [1, 1]} : vector<1x384xf32> to vector<1x128xf32>
    %702 = arith.mulf %701, %698 : vector<1x128xf32>
    %703 = arith.addf %700, %702 : vector<1x128xf32>
    %704 = vector.extract_strided_slice %696 {offsets = [0, 256], sizes = [1, 128], strides = [1, 1]} : vector<1x384xf32> to vector<1x128xf32>
    %705 = math.tanh %703 : vector<1x128xf32>
    %706 = arith.mulf %704, %705 : vector<1x128xf32>
    %707 = arith.index_cast %c5_i32_154 : i32 to index
    %c0_162 = arith.constant 0 : index
    %708 = vector.load %arg9[%707, %c0_162] : memref<8x256xf32, #tpu.memory_space<vmem>>, vector<1x128xf32>
    tpu.vector_store %arg9[%707, %c0_162], %690 {strides = array<i32>} : memref<8x256xf32, #tpu.memory_space<vmem>>, vector<1x128xf32>,
    %709 = arith.index_cast %664 : i32 to index
    %c128_163 = arith.constant 128 : index
    %710 = vector.load %arg9[%709, %c128_163] : memref<8x256xf32, #tpu.memory_space<vmem>>, vector<1x128xf32>
    tpu.vector_store %arg9[%709, %c128_163], %706 {strides = array<i32>} : memref<8x256xf32, #tpu.memory_space<vmem>>, vector<1x128xf32>,
    %c6_i32_164 = arith.constant 6 : i32
    %c7_i32_165 = arith.constant 7 : i32
    %711 = arith.subi %c7_i32_165, %c6_i32_164 : i32
    %712 = arith.truncf %690 : vector<1x128xf32> to vector<1x128xbf16>
    %cst_166 = arith.constant dense<0.000000e+00> : vector<1x512xf32>
    %713 = tpu.matmul %712, %421, %cst_166 {dimension_numbers = #tpu.dot_dimension_numbers<[1], [0], [0], [1], [0, 0, 1, 1], [], []>} : vector<1x128xbf16>, vector<128x512xbf16>, vector<1x512xf32> -> vector<1x512xf32>
    %714 = arith.truncf %706 : vector<1x128xf32> to vector<1x128xbf16>
    %cst_167 = arith.constant dense<0.000000e+00> : vector<1x512xf32>
    %715 = tpu.matmul %714, %422, %cst_167 {dimension_numbers = #tpu.dot_dimension_numbers<[1], [0], [0], [1], [0, 0, 1, 1], [], []>} : vector<1x128xbf16>, vector<128x512xbf16>, vector<1x512xf32> -> vector<1x512xf32>
    %716 = arith.index_cast %c6_i32_164 : i32 to index
    %c0_168 = arith.constant 0 : index
    %717 = vector.load %arg12[%716, %c0_168] : memref<8x1024xf32, #tpu.memory_space<vmem>>, vector<1x512xf32>
    %718 = arith.addf %717, %713 : vector<1x512xf32>
    %719 = arith.index_cast %711 : i32 to index
    %c512_169 = arith.constant 512 : index
    %720 = vector.load %arg12[%719, %c512_169] : memref<8x1024xf32, #tpu.memory_space<vmem>>, vector<1x512xf32>
    %721 = arith.addf %720, %715 : vector<1x512xf32>
    %722 = vector.extract_strided_slice %718 {offsets = [0, 0], sizes = [1, 384], strides = [1, 1]} : vector<1x512xf32> to vector<1x384xf32>
    %723 = arith.negf %722 : vector<1x384xf32>
    %724 = math.exp %723 : vector<1x384xf32>
    %cst_170 = arith.constant 1.000000e+00 : f32
    %725 = vector.broadcast %cst_170 : f32 to vector<1x384xf32>
    %726 = arith.addf %725, %724 : vector<1x384xf32>
    %727 = arith.divf %725, %726 : vector<1x384xf32>
    %728 = vector.extract_strided_slice %718 {offsets = [0, 384], sizes = [1, 128], strides = [1, 1]} : vector<1x512xf32> to vector<1x128xf32>
    %729 = math.tanh %728 : vector<1x128xf32>
    %730 = vector.extract_strided_slice %727 {offsets = [0, 128], sizes = [1, 128], strides = [1, 1]} : vector<1x384xf32> to vector<1x128xf32>
    %731 = arith.mulf %730, %687 : vector<1x128xf32>
    %732 = vector.extract_strided_slice %727 {offsets = [0, 0], sizes = [1, 128], strides = [1, 1]} : vector<1x384xf32> to vector<1x128xf32>
    %733 = arith.mulf %732, %729 : vector<1x128xf32>
    %734 = arith.addf %731, %733 : vector<1x128xf32>
    %735 = vector.extract_strided_slice %727 {offsets = [0, 256], sizes = [1, 128], strides = [1, 1]} : vector<1x384xf32> to vector<1x128xf32>
    %736 = math.tanh %734 : vector<1x128xf32>
    %737 = arith.mulf %735, %736 : vector<1x128xf32>
    %738 = vector.extract_strided_slice %721 {offsets = [0, 0], sizes = [1, 384], strides = [1, 1]} : vector<1x512xf32> to vector<1x384xf32>
    %739 = arith.negf %738 : vector<1x384xf32>
    %740 = math.exp %739 : vector<1x384xf32>
    %cst_171 = arith.constant 1.000000e+00 : f32
    %741 = vector.broadcast %cst_171 : f32 to vector<1x384xf32>
    %742 = arith.addf %741, %740 : vector<1x384xf32>
    %743 = arith.divf %741, %742 : vector<1x384xf32>
    %744 = vector.extract_strided_slice %721 {offsets = [0, 384], sizes = [1, 128], strides = [1, 1]} : vector<1x512xf32> to vector<1x128xf32>
    %745 = math.tanh %744 : vector<1x128xf32>
    %746 = vector.extract_strided_slice %743 {offsets = [0, 128], sizes = [1, 128], strides = [1, 1]} : vector<1x384xf32> to vector<1x128xf32>
    %747 = arith.mulf %746, %703 : vector<1x128xf32>
    %748 = vector.extract_strided_slice %743 {offsets = [0, 0], sizes = [1, 128], strides = [1, 1]} : vector<1x384xf32> to vector<1x128xf32>
    %749 = arith.mulf %748, %745 : vector<1x128xf32>
    %750 = arith.addf %747, %749 : vector<1x128xf32>
    %751 = vector.extract_strided_slice %743 {offsets = [0, 256], sizes = [1, 128], strides = [1, 1]} : vector<1x384xf32> to vector<1x128xf32>
    %752 = math.tanh %750 : vector<1x128xf32>
    %753 = arith.mulf %751, %752 : vector<1x128xf32>
    %754 = arith.index_cast %c6_i32_164 : i32 to index
    %c0_172 = arith.constant 0 : index
    %755 = vector.load %arg9[%754, %c0_172] : memref<8x256xf32, #tpu.memory_space<vmem>>, vector<1x128xf32>
    tpu.vector_store %arg9[%754, %c0_172], %737 {strides = array<i32>} : memref<8x256xf32, #tpu.memory_space<vmem>>, vector<1x128xf32>,
    %756 = arith.index_cast %711 : i32 to index
    %c128_173 = arith.constant 128 : index
    %757 = vector.load %arg9[%756, %c128_173] : memref<8x256xf32, #tpu.memory_space<vmem>>, vector<1x128xf32>
    tpu.vector_store %arg9[%756, %c128_173], %753 {strides = array<i32>} : memref<8x256xf32, #tpu.memory_space<vmem>>, vector<1x128xf32>,
    %c7_i32_174 = arith.constant 7 : i32
    %c7_i32_175 = arith.constant 7 : i32
    %758 = arith.subi %c7_i32_175, %c7_i32_174 : i32
    %759 = arith.truncf %737 : vector<1x128xf32> to vector<1x128xbf16>
    %cst_176 = arith.constant dense<0.000000e+00> : vector<1x512xf32>
    %760 = tpu.matmul %759, %421, %cst_176 {dimension_numbers = #tpu.dot_dimension_numbers<[1], [0], [0], [1], [0, 0, 1, 1], [], []>} : vector<1x128xbf16>, vector<128x512xbf16>, vector<1x512xf32> -> vector<1x512xf32>
    %761 = arith.truncf %753 : vector<1x128xf32> to vector<1x128xbf16>
    %cst_177 = arith.constant dense<0.000000e+00> : vector<1x512xf32>
    %762 = tpu.matmul %761, %422, %cst_177 {dimension_numbers = #tpu.dot_dimension_numbers<[1], [0], [0], [1], [0, 0, 1, 1], [], []>} : vector<1x128xbf16>, vector<128x512xbf16>, vector<1x512xf32> -> vector<1x512xf32>
    %763 = arith.index_cast %c7_i32_174 : i32 to index
    %c0_178 = arith.constant 0 : index
    %764 = vector.load %arg12[%763, %c0_178] : memref<8x1024xf32, #tpu.memory_space<vmem>>, vector<1x512xf32>
    %765 = arith.addf %764, %760 : vector<1x512xf32>
    %766 = arith.index_cast %758 : i32 to index
    %c512_179 = arith.constant 512 : index
    %767 = vector.load %arg12[%766, %c512_179] : memref<8x1024xf32, #tpu.memory_space<vmem>>, vector<1x512xf32>
    %768 = arith.addf %767, %762 : vector<1x512xf32>
    %769 = vector.extract_strided_slice %765 {offsets = [0, 0], sizes = [1, 384], strides = [1, 1]} : vector<1x512xf32> to vector<1x384xf32>
    %770 = arith.negf %769 : vector<1x384xf32>
    %771 = math.exp %770 : vector<1x384xf32>
    %cst_180 = arith.constant 1.000000e+00 : f32
    %772 = vector.broadcast %cst_180 : f32 to vector<1x384xf32>
    %773 = arith.addf %772, %771 : vector<1x384xf32>
    %774 = arith.divf %772, %773 : vector<1x384xf32>
    %775 = vector.extract_strided_slice %765 {offsets = [0, 384], sizes = [1, 128], strides = [1, 1]} : vector<1x512xf32> to vector<1x128xf32>
    %776 = math.tanh %775 : vector<1x128xf32>
    %777 = vector.extract_strided_slice %774 {offsets = [0, 128], sizes = [1, 128], strides = [1, 1]} : vector<1x384xf32> to vector<1x128xf32>
    %778 = arith.mulf %777, %734 : vector<1x128xf32>
    %779 = vector.extract_strided_slice %774 {offsets = [0, 0], sizes = [1, 128], strides = [1, 1]} : vector<1x384xf32> to vector<1x128xf32>
    %780 = arith.mulf %779, %776 : vector<1x128xf32>
    %781 = arith.addf %778, %780 : vector<1x128xf32>
    %782 = vector.extract_strided_slice %774 {offsets = [0, 256], sizes = [1, 128], strides = [1, 1]} : vector<1x384xf32> to vector<1x128xf32>
    %783 = math.tanh %781 : vector<1x128xf32>
    %784 = arith.mulf %782, %783 : vector<1x128xf32>
    %785 = vector.extract_strided_slice %768 {offsets = [0, 0], sizes = [1, 384], strides = [1, 1]} : vector<1x512xf32> to vector<1x384xf32>
    %786 = arith.negf %785 : vector<1x384xf32>
    %787 = math.exp %786 : vector<1x384xf32>
    %cst_181 = arith.constant 1.000000e+00 : f32
    %788 = vector.broadcast %cst_181 : f32 to vector<1x384xf32>
    %789 = arith.addf %788, %787 : vector<1x384xf32>
    %790 = arith.divf %788, %789 : vector<1x384xf32>
    %791 = vector.extract_strided_slice %768 {offsets = [0, 384], sizes = [1, 128], strides = [1, 1]} : vector<1x512xf32> to vector<1x128xf32>
    %792 = math.tanh %791 : vector<1x128xf32>
    %793 = vector.extract_strided_slice %790 {offsets = [0, 128], sizes = [1, 128], strides = [1, 1]} : vector<1x384xf32> to vector<1x128xf32>
    %794 = arith.mulf %793, %750 : vector<1x128xf32>
    %795 = vector.extract_strided_slice %790 {offsets = [0, 0], sizes = [1, 128], strides = [1, 1]} : vector<1x384xf32> to vector<1x128xf32>
    %796 = arith.mulf %795, %792 : vector<1x128xf32>
    %797 = arith.addf %794, %796 : vector<1x128xf32>
    %798 = vector.extract_strided_slice %790 {offsets = [0, 256], sizes = [1, 128], strides = [1, 1]} : vector<1x384xf32> to vector<1x128xf32>
    %799 = math.tanh %797 : vector<1x128xf32>
    %800 = arith.mulf %798, %799 : vector<1x128xf32>
    %801 = arith.index_cast %c7_i32_174 : i32 to index
    %c0_182 = arith.constant 0 : index
    %802 = vector.load %arg9[%801, %c0_182] : memref<8x256xf32, #tpu.memory_space<vmem>>, vector<1x128xf32>
    tpu.vector_store %arg9[%801, %c0_182], %784 {strides = array<i32>} : memref<8x256xf32, #tpu.memory_space<vmem>>, vector<1x128xf32>,
    %803 = arith.index_cast %758 : i32 to index
    %c128_183 = arith.constant 128 : index
    %804 = vector.load %arg9[%803, %c128_183] : memref<8x256xf32, #tpu.memory_space<vmem>>, vector<1x128xf32>
    tpu.vector_store %arg9[%803, %c128_183], %800 {strides = array<i32>} : memref<8x256xf32, #tpu.memory_space<vmem>>, vector<1x128xf32>,
    %c8_i32_184 = arith.constant 8 : i32
    %805 = tpu.concatenate %388, %784 in 0 : vector<1x128xf32>, vector<1x128xf32> -> vector<2x128xf32>
    %c0_185 = arith.constant 0 : index
    %c0_186 = arith.constant 0 : index
    %806 = vector.load %arg10[%c0_185, %c0_186] : memref<2x128xf32, #tpu.memory_space<vmem>>, vector<2x128xf32>
    tpu.vector_store %arg10[%c0_185, %c0_186], %805 {strides = array<i32>} : memref<2x128xf32, #tpu.memory_space<vmem>>, vector<2x128xf32>,
    %807 = tpu.concatenate %385, %781 in 0 : vector<1x128xf32>, vector<1x128xf32> -> vector<2x128xf32>
    %c0_187 = arith.constant 0 : index
    %c0_188 = arith.constant 0 : index
    %808 = vector.load %arg11[%c0_187, %c0_188] : memref<2x128xf32, #tpu.memory_space<vmem>>, vector<2x128xf32>
    tpu.vector_store %arg11[%c0_187, %c0_188], %807 {strides = array<i32>} : memref<2x128xf32, #tpu.memory_space<vmem>>, vector<2x128xf32>,
    return
  }
}

</mosaic_0001>

<bundles_post_ra>
// kernel: seq2seq_forward.1
= control target key start
LH: loop header
LB: loop body
LE: loop exit
PB: predicated region body
PF: predicated region fallthrough
CT: control target
= control target key end

     0   :  { %17 = vsyncpa [#allocation10], 0  ;;  %s9033_s0 = inlined_call_operand.vmem [shape: f32[8,64], index: 0, kind: input, shape index: {}]   ;;  %s9034_s1 = inlined_call_operand.hbm [shape: bf16[64,1024], index: 1, kind: input, shape index: {}]   ;;  %s9035_s2 = inlined_call_operand.hbm [shape: bf16[128,512], index: 2, kind: input, shape index: {}]   ;;  %s9036_s3 = inlined_call_operand.hbm [shape: bf16[128,512], index: 3, kind: input, shape index: {}]   ;;  %s9037_s4 = inlined_call_operand.vmem [shape: f32[1,1024], index: 4, kind: input, shape index: {}]   ;;  %s9038_s5 = inlined_call_operand.hbm [shape: bf16[256,1024], index: 5, kind: input, shape index: {}]   ;;  %s9039_s6 = inlined_call_operand.hbm [shape: bf16[128,512], index: 6, kind: input, shape index: {}]   ;;  %s9040_s7 = inlined_call_operand.hbm [shape: bf16[128,512], index: 7, kind: input, shape index: {}]   ;;  %s9041_s8 = inlined_call_operand.vmem [shape: f32[1,1024], index: 8, kind: input, shape index: {}]   ;;  %s9042_s9 = inlined_call_operand.hbm [shape: f32[8,256], index: 9, kind: output, shape index: {0}]   ;;  %s9043_s10 = inlined_call_operand.hbm [shape: f32[2,128], index: 10, kind: output, shape index: {1}]   ;;  %s9044_s11 = inlined_call_operand.hbm [shape: f32[2,128], index: 11, kind: output, shape index: {2}]  }
   0x1   :  { %18 = vsyncpa [#allocation13], 0 }
   0x2   :  { %19 = vsyncpa [#allocation11], 0 }
   0x3   :  { %20 = vsyncpa [#allocation17], 0  ;;  %s6879_s17 = smov [#allocation12]   ;;  %s6731_s21 = scalar_lea.hbm %s9035_s2, 4096 }
   0x4   :  { %s40_s18 = sshll.u32 %s6879_s17, 4  ;;  %p6732_p0 = scmp.ne.s32.totalorder %s9035_s2, %s6731_s21  ;;  %s41_s18 = int_to_ptr.vmem [resolvable:$true] %s40_s18 }
   0x5   :  { %p6735_p1 = scmp.lt.u32.totalorder %s6731_s21, %s9035_s2 }
   0x7   :  { %p6737_p2 = pnand %p6735_p1, %p6732_p0 }
   0x9   :  { %6740 = shalt.err (!%p6737_p2)
}
   0xa   :  { %s6741_s26 = scalar_lea.vmem %s41_s18, 4096  ;;  %p6746_p4 = scmp.lt.s32.totalorder %s41_s18, %s41_s18 }
   0xb   :  { %p6742_p3 = scmp.ne.s32.totalorder %s41_s18, %s6741_s26  ;;  %p6747_p5 = scmp.lt.s32.totalorder %s6741_s26, %s6741_s26 }
   0xd   :  { %p6748_p6 = por %p6747_p5, %p6746_p4 }
   0xf   :  { %p6749_p7 = pnand %p6748_p6, %p6742_p3 }
  0x11   :  { %6752 = shalt.err (!%p6749_p7)
}
  0x12   :  { %s6880_s27 = smov 256   ;;  %s6881_s28 = smov 16  }
  0x13   :  { %46 = dma.hbm_to_vmem [thread:$0]  %s9035_s2, 4096, %s41_s18, [#allocation13], %s6880_s27, %s6880_s27, %s6881_s28  }
  0x14   :  { %s6882_s12 = smov [#allocation9]   ;;  %s6753_s16 = scalar_lea.hbm %s9034_s1, 4096 }
  0x15   :  { %s28_s13 = sshll.u32 %s6882_s12, 4  ;;  %p6754_p8 = scmp.ne.s32.totalorder %s9034_s1, %s6753_s16  ;;  %s29_s13 = int_to_ptr.vmem [resolvable:$true] %s28_s13 }
  0x16   :  { %p6757_p9 = scmp.lt.u32.totalorder %s6753_s16, %s9034_s1 }
  0x18   :  { %p6759_p10 = pnand %p6757_p9, %p6754_p8 }
  0x1a   :  { %6762 = shalt.err (!%p6759_p10)
}
  0x1b   :  { %s6763_s22 = scalar_lea.vmem %s29_s13, 4096  ;;  %p6768_p12 = scmp.lt.s32.totalorder %s29_s13, %s29_s13 }
  0x1c   :  { %p6764_p11 = scmp.ne.s32.totalorder %s29_s13, %s6763_s22  ;;  %p6769_p13 = scmp.lt.s32.totalorder %s6763_s22, %s6763_s22 }
  0x1e   :  { %p6770_p0 = por %p6769_p13, %p6768_p12 }
  0x20   :  { %p6771_p1 = pnand %p6770_p0, %p6764_p11 }
  0x22   :  { %6774 = shalt.err (!%p6771_p1)
}
  0x23   :  { %s6883_s2 = smov 512   ;;  %s6884_s18 = smov 32  }
  0x24   :  { %34 = dma.hbm_to_vmem [thread:$0]  %s9034_s1, 4096, %s29_s13, [#allocation10], %s6883_s2, %s6883_s2, %s6884_s18  }
  0x25   :  { %s6885_s25 = smov [#allocation14]   ;;  %s6775_s12 = scalar_lea.hbm %s9036_s3, 4096 }
  0x26   :  { %s52_s26 = sshll.u32 %s6885_s25, 4  ;;  %p6776_p2 = scmp.ne.s32.totalorder %s9036_s3, %s6775_s12  ;;  %s53_s26 = int_to_ptr.vmem [resolvable:$true] %s52_s26 }
  0x27   :  { %p6779_p3 = scmp.lt.u32.totalorder %s6775_s12, %s9036_s3 }
  0x29   :  { %p6781_p4 = pnand %p6779_p3, %p6776_p2 }
  0x2b   :  { %6784 = shalt.err (!%p6781_p4)
}
  0x2c   :  { %s6785_s19 = scalar_lea.vmem %s53_s26, 4096  ;;  %p6790_p6 = scmp.lt.s32.totalorder %s53_s26, %s53_s26 }
  0x2d   :  { %p6786_p5 = scmp.ne.s32.totalorder %s53_s26, %s6785_s19  ;;  %p6791_p7 = scmp.lt.s32.totalorder %s6785_s19, %s6785_s19 }
  0x2f   :  { %p6792_p8 = por %p6791_p7, %p6790_p6 }
  0x31   :  { %p6793_p9 = pnand %p6792_p8, %p6786_p5 }
  0x33   :  { %6796 = shalt.err (!%p6793_p9)
}
  0x34   :  { %58 = dma.hbm_to_vmem [thread:$0]  %s9036_s3, 4096, %s53_s26, [#allocation13], %s6880_s27, %s6880_s27, %s6881_s28  }
  0x35   :  { %6863 = dma.done.wait [#allocation10], 4096  }
  0x36   :  { %6864 = vsyncadd [#allocation10], 4294963200 }
  0x37   :  { %6865 = dma.done.wait [#allocation13], 8192  }
  0x38   :  { %6866 = vsyncadd [#allocation13], 4294959104  ;;  %s75_s20 = sld [smem:[#allocation0]]   ;;  %s6886_s21 = smov 1024  }
  0x39   :  { %87 = sst [smem:[#allocation20]] %s6886_s21  ;;  %s6887_s22 = smov 8  }
  0x3a   :  { %89 = sst [smem:[#allocation20 + $0x1]] %s6886_s21  ;;  %s6888_s18 = smov 64  }
  0x3b   :  { %91 = sst [smem:[#allocation20 + $0x2]] %s6887_s22  ;;  %s6889_s23 = smov [#allocation4]  }
  0x3c   :  { %93 = sst [smem:[#allocation20 + $0x3]] %s6888_s18  ;;  %s83_s24 = sshll.u32 %s6889_s23, 4  ;;  %s84_s24 = int_to_ptr.vmem [resolvable:$true] %s83_s24 }
  0x3d   :  { %99 = sst [smem:[#allocation20 + $0x6]] %s6883_s2  ;;  %s6890_s28 = smov 4  }
  0x3e   :  { %101 = sst [smem:[#allocation20 + $0x7]] %s6888_s18  ;;  %s6014_s3 = sshll.u32 %s75_s20, 26 }
  0x3f   :  { %103 = sst [smem:[#allocation20 + $0x8]] %s6890_s28  ;;  %s7014_s25 = sadd.s32 134217728, %s6014_s3 }
  0x40   :  { %s6891_s26 = smov 128   ;;  %s6892_s29 = smov 2  }
  0x41   :  { %95 = sst [smem:[#allocation20 + $0x4]] %s6891_s26  ;;  %s6893_s30 = smov [#allocation8]  }
  0x42   :  { %97 = sst [smem:[#allocation20 + $0x5]] %s6892_s29  ;;  %s6894_s12 = smov [#allocation19]  }
  0x43   :  { %105 = dma.general %s9038_s5, 16384, %s84_s24, %s6893_s30, %s6894_s12, [#allocation20], %s7014_s25, 0  }
  0x44   :  { %122 = sst [smem:[#allocation22]] %s6883_s2  ;;  %s6895_s16 = smov [#allocation5]  }
  0x45   :  { %124 = sst [smem:[#allocation22 + $0x1]] %s6883_s2  ;;  %s118_s17 = sshll.u32 %s6895_s16, 4  ;;  %s119_s17 = int_to_ptr.vmem [resolvable:$true] %s118_s17 }
  0x46   :  { %126 = sst [smem:[#allocation22 + $0x2]] %s6890_s28  ;;  %s6896_s5 = smov [#allocation8 + $0x1]  }
  0x47   :  { %128 = sst [smem:[#allocation22 + $0x3]] %s6888_s18  ;;  %s6897_s19 = smov [#allocation21]  }
  0x48   :  { %130 = sst [smem:[#allocation22 + $0x4]] %s6891_s26  ;;  %s6898_s20 = smov [#allocation6]  }
  0x49   :  { %132 = sst [smem:[#allocation22 + $0x5]] %s6892_s29  ;;  %s153_s21 = sshll.u32 %s6898_s20, 4  ;;  %s154_s21 = int_to_ptr.vmem [resolvable:$true] %s153_s21 }
  0x4a   :  { %134 = sst [smem:[#allocation22 + $0x6]] %s6880_s27  ;;  %s6900_s22 = smov [#allocation23]  }
  0x4b   :  { %136 = sst [smem:[#allocation22 + $0x7]] %s6888_s18 }
  0x4c   :  { %138 = sst [smem:[#allocation22 + $0x8]] %s6890_s28 }
  0x4d   :  { %140 = dma.general %s9039_s6, 4096, %s119_s17, %s6896_s5, %s6897_s19, [#allocation22], %s7014_s25, 0  }
  0x4e   :  { %157 = sst [smem:[#allocation24]] %s6883_s2  ;;  %s6899_s6 = smov [#allocation8 + $0x2]  }
  0x4f   :  { %159 = sst [smem:[#allocation24 + $0x1]] %s6883_s2 }
  0x50   :  { %161 = sst [smem:[#allocation24 + $0x2]] %s6890_s28 }
  0x51   :  { %163 = sst [smem:[#allocation24 + $0x3]] %s6888_s18 }
  0x52   :  { %165 = sst [smem:[#allocation24 + $0x4]] %s6891_s26 }
  0x53   :  { %167 = sst [smem:[#allocation24 + $0x5]] %s6892_s29 }
  0x54   :  { %169 = sst [smem:[#allocation24 + $0x6]] %s6880_s27 }
  0x55   :  { %171 = sst [smem:[#allocation24 + $0x7]] %s6888_s18 }
  0x56   :  { %173 = sst [smem:[#allocation24 + $0x8]] %s6890_s28 }
  0x57   :  { %175 = dma.general %s9040_s7, 4096, %s154_s21, %s6899_s6, %s6900_s22, [#allocation24], %s7014_s25, 0  }
  0x58   :  { %v7045_v0 = vld [vmem:[%s9041_s8] sm:$0xff] }
  0x59   :  { %9270 = vst [vmem:[#allocation34_spill] sm:$0xff] %v7045_v0 }
  0x5a   :  { %218 = vsyncadd [#allocation8 + $0x3], 128  ;;  %v220_v1 = vld [vmem:[#allocation9] sm:$0xff]  ;;  %v221_v4 = vld [vmem:[#allocation9 + $0x8] sm:$0xff]  ;;  %v9045_v8 = vmov 0   ;;  %vm519_vm0 = vcmask 523264  }
  0x5b   :  { %v224_v2 = vld [vmem:[#allocation9 + $0x20] sm:$0xff]  ;;  %v225_v5 = vld [vmem:[#allocation9 + $0x28] sm:$0xff]  ;;  %555 = vmatprep.mubr.bf16.mxu0 %v9045_v8  ;;  %596 = vmatprep.mubr.bf16.mxu1 %v9045_v8  ;;  %v222_v32 = vld [vmem:[#allocation9 + $0x10] sm:$0xff]  ;;  %vm1283_vm1 = vcmask 1040384   ;;  %vm1284_vm2 = vsmask.f32 256 }
  0x5c   :  { %v6021_v3 = vcombine.high %v220_v1, %v224_v2  ;;  %v6020_v6 = vcombine.low %v220_v1, %v224_v2  ;;  %v228_v7 = vld [vmem:[#allocation9 + $0x40] sm:$0xff]  ;;  %v6023_v9 = vcombine.high %v221_v4, %v225_v5  ;;  %v6022_v10 = vcombine.low %v221_v4, %v225_v5  ;;  %v229_v12 = vld [vmem:[#allocation9 + $0x48] sm:$0xff]  ;;  %v226_v33 = vld [vmem:[#allocation9 + $0x30] sm:$0xff] }
  0x5d   :  { %v232_v11 = vld [vmem:[#allocation9 + $0x60] sm:$0xff]  ;;  %v233_v13 = vld [vmem:[#allocation9 + $0x68] sm:$0xff]  ;;  %v223_v34 = vld [vmem:[#allocation9 + $0x18] sm:$0xff]  ;;  %v6025_v39 = vcombine.high %v222_v32, %v226_v33  ;;  %v6024_v46 = vcombine.low %v222_v32, %v226_v33  ;;  %vm1298_vm4 = vcmask 1043459   ;;  %vm1299_vm5 = vsmask.f32 7950 }
  0x5e   :  { %523 = vmatprep.subr.bf16.mxu0 %v6021_v3  ;;  %v6029_v14 = vcombine.high %v228_v7, %v232_v11  ;;  %v6031_v15 = vcombine.high %v229_v12, %v233_v13  ;;  %v236_v16 = vld [vmem:[#allocation9 + $0x80] sm:$0xff]  ;;  %v237_v18 = vld [vmem:[#allocation9 + $0x88] sm:$0xff]  ;;  %564 = vmatprep.subr.bf16.mxu1 %v6023_v9  ;;  %v6028_v19 = vcombine.low %v228_v7, %v232_v11  ;;  %v227_v35 = vld [vmem:[#allocation9 + $0x38] sm:$0xff]  ;;  %vm1580_vm7 = vsmask.f32 7938 }
  0x5f   :  { %v240_v17 = vld [vmem:[#allocation9 + $0xa0] sm:$0xff]  ;;  %524 = vmatpush1.bf16.msra.mxu0 %v6020_v6  ;;  %v241_v20 = vld [vmem:[#allocation9 + $0xa8] sm:$0xff]  ;;  %565 = vmatpush1.bf16.msra.mxu1 %v6022_v10  ;;  %v6030_v21 = vcombine.low %v229_v12, %v233_v13  ;;  %v219_v37 = vld [vmem:[%s9033_s0] sm:$0xff]  ;;  %v6027_v42 = vcombine.high %v223_v34, %v227_v35  ;;  %v6026_v47 = vcombine.low %v223_v34, %v227_v35  ;;  %vm1591_vm9 = vsmask.f32 3328 }
  0x60   :  { %525 = vmatprep.subr.bf16.mxu0 %v6029_v14  ;;  %v6037_v22 = vcombine.high %v236_v16, %v240_v17  ;;  %566 = vmatprep.subr.bf16.mxu1 %v6031_v15  ;;  %v6039_v23 = vcombine.high %v237_v18, %v241_v20  ;;  %v244_v24 = vld [vmem:[#allocation9 + $0xc0] sm:$0xff]  ;;  %v245_v26 = vld [vmem:[#allocation9 + $0xc8] sm:$0xff]  ;;  %v6036_v28 = vcombine.low %v236_v16, %v240_v17  ;;  %v230_v40 = vld [vmem:[#allocation9 + $0x50] sm:$0xff]  ;;  %vm1870_vm11 = vcmask 1041409  }
  0x61   :  { %v248_v25 = vld [vmem:[#allocation9 + $0xe0] sm:$0xff]  ;;  %v249_v27 = vld [vmem:[#allocation9 + $0xe8] sm:$0xff]  ;;  %v6038_v29 = vcombine.low %v237_v18, %v241_v20  ;;  %v234_v41 = vld [vmem:[#allocation9 + $0x70] sm:$0xff]  ;;  %v317_v44 = vpack.c.bf16 %v219_v37, %v219_v37  ;;  %vm1871_vm12 = vsmask.f32 1280  ;;  %vm1885_vm14 = vcmask 1042434  }
  0x62   :  { %v6045_v30 = vcombine.high %v244_v24, %v248_v25  ;;  %v6047_v31 = vcombine.high %v245_v26, %v249_v27  ;;  %v6044_v36 = vcombine.low %v244_v24, %v248_v25  ;;  %v6046_v38 = vcombine.low %v245_v26, %v249_v27  ;;  %v231_v43 = vld [vmem:[#allocation9 + $0x58] sm:$0xff]  ;;  %v238_v49 = vld [vmem:[#allocation9 + $0x90] sm:$0xff]  ;;  %vm7337_vm3 = vmand %vm1283_vm1, %vm1284_vm2 }
  0x63   :  { %526 = vmatpush1.bf16.msra.mxu0 %v6028_v19  ;;  %567 = vmatpush1.bf16.msra.mxu1 %v6030_v21  ;;  %v235_v45 = vld [vmem:[#allocation9 + $0x78] sm:$0xff]  ;;  %v6033_v48 = vcombine.high %v230_v40, %v234_v41  ;;  %v242_v51 = vld [vmem:[#allocation9 + $0xb0] sm:$0xff]  ;;  %v6032_v54 = vcombine.low %v230_v40, %v234_v41  ;;  %vm7381_vm6 = vmand %vm1298_vm4, %vm1299_vm5  ;;  %vm1886_vm15 = vsmask.f32 7946  ;;  %vm2168_vm2 = vsmask.f32 7942 }
  0x64   :  { %527 = vmatprep.subr.bf16.mxu0 %v6037_v22  ;;  %568 = vmatprep.subr.bf16.mxu1 %v6039_v23  ;;  %v6035_v50 = vcombine.high %v231_v43, %v235_v45  ;;  %v239_v52 = vld [vmem:[#allocation9 + $0x98] sm:$0xff]  ;;  %v6034_v55 = vcombine.low %v231_v43, %v235_v45  ;;  %v6041_v56 = vcombine.high %v238_v49, %v242_v51  ;;  %v246_v57 = vld [vmem:[#allocation9 + $0xd0] sm:$0xff]  ;;  %vm7432_vm8 = vmand %vm1283_vm1, %vm1580_vm7  ;;  %vm2179_vm5 = vsmask.f32 2304 }
  0x65   :  { %v243_v53 = vld [vmem:[#allocation9 + $0xb8] sm:$0xff]  ;;  %v250_v58 = vld [vmem:[#allocation9 + $0xf0] sm:$0xff]  ;;  %v6040_v62 = vcombine.low %v238_v49, %v242_v51  ;;  %vm7481_vm10 = vmand %vm1298_vm4, %vm1591_vm9 }
  0x66   :  { %v6043_v59 = vcombine.high %v239_v52, %v243_v53  ;;  %v247_v60 = vld [vmem:[#allocation9 + $0xd8] sm:$0xff]  ;;  %v6042_v63 = vcombine.low %v239_v52, %v243_v53  ;;  %v6049_v1 = vcombine.high %v246_v57, %v250_v58  ;;  %v6048_v3 = vcombine.low %v246_v57, %v250_v58  ;;  %v7056_v5 = vld [vmem:[#allocation12 + $0x4] ss:$16 sps:$4 sm:$0xff]   ;;  %v7060_v7 = vld [vmem:[#allocation12] ss:$16 sps:$4 sm:$0xff]  }
  0x67   :  { %528 = vmatpush1.bf16.msra.mxu0 %v6036_v28  ;;  %569 = vmatpush1.bf16.msra.mxu1 %v6038_v29  ;;  %v251_v61 = vld [vmem:[#allocation9 + $0xf8] sm:$0xff]  ;;  %v7065_v10 = vld [vmem:[#allocation12 + $0x24] ss:$16 sps:$4 sm:$0xff]   ;;  %v7073_v12 = vld [vmem:[#allocation12 + $0x20] ss:$16 sps:$4 sm:$0xff]  }
  0x68   :  { %529 = vmatprep.subr.bf16.mxu0 %v6045_v30  ;;  %570 = vmatprep.subr.bf16.mxu1 %v6047_v31  ;;  %v6051_v2 = vcombine.high %v247_v60, %v251_v61  ;;  %v6050_v4 = vcombine.low %v247_v60, %v251_v61  ;;  %v7058_v6 = vld [vmem:[#allocation12 + $0xc] ss:$16 sps:$4 sm:$0xff]   ;;  %v7062_v9 = vld [vmem:[#allocation12 + $0x8] ss:$16 sps:$4 sm:$0xff]   ;;  %v7079_v14 = vld [vmem:[#allocation12 + $0x44] ss:$16 sps:$4 sm:$0xff]  }
  0x69   :  { %v7068_v11 = vld [vmem:[#allocation12 + $0x2c] ss:$16 sps:$4 sm:$0xff]   ;;  %v7077_v13 = vld [vmem:[#allocation12 + $0x28] ss:$16 sps:$4 sm:$0xff]   ;;  %v7087_v16 = vld [vmem:[#allocation12 + $0x40] ss:$16 sps:$4 sm:$0xff]  }
  0x6a   :  { %v7082_v15 = vld [vmem:[#allocation12 + $0x4c] ss:$16 sps:$4 sm:$0xff]   ;;  %v7089_v17 = vld [vmem:[#allocation12 + $0x48] ss:$16 sps:$4 sm:$0xff]   ;;  %v7093_v18 = vld [vmem:[#allocation12 + $0x64] ss:$16 sps:$4 sm:$0xff]  }
  0x6b   :  { %530 = vmatpush1.bf16.msra.mxu0 %v6044_v36  ;;  %571 = vmatpush1.bf16.msra.mxu1 %v6046_v38  ;;  %9271 = vst [vmem:[#allocation35_spill] sm:$0xff] %v7093_v18  ;;  %v7096_v19 = vld [vmem:[#allocation12 + $0x6c] ss:$16 sps:$4 sm:$0xff]   ;;  %v7099_v20 = vld [vmem:[#allocation12 + $0x60] ss:$16 sps:$4 sm:$0xff]   ;;  %vm7548_vm13 = vmand %vm1870_vm11, %vm1871_vm12 }
  0x6c   :  { %605 = vmatprep.subr.bf16.mxu0 %v6025_v39  ;;  %646 = vmatprep.subr.bf16.mxu1 %v6027_v42  ;;  %9272 = vst [vmem:[#allocation36_spill] sm:$0xff] %v7096_v19  ;;  %9273 = vst [vmem:[#allocation37_spill] sm:$0xff] %v7099_v20  ;;  %v7103_v21 = vld [vmem:[#allocation12 + $0x68] ss:$16 sps:$4 sm:$0xff]   ;;  %v7105_v22 = vld [vmem:[#allocation12 + $0x84] ss:$16 sps:$4 sm:$0xff]  }
  0x6d   :  { %9274 = vst [vmem:[#allocation38_spill] sm:$0xff] %v7103_v21  ;;  %9275 = vst [vmem:[#allocation39_spill] sm:$0xff] %v7105_v22  ;;  %v7108_v23 = vld [vmem:[#allocation12 + $0x8c] ss:$16 sps:$4 sm:$0xff]   ;;  %v7111_v24 = vld [vmem:[#allocation12 + $0x80] ss:$16 sps:$4 sm:$0xff]  }
  0x6e   :  { %6052 = vmatmul.mubr.msk.bf16.vlgmr.msra.gmra.mrb[0].mxu0 %vm519_vm0, %v317_v44  ;;  %6053 = vmatmul.mubr.msk.bf16.vlgmr.msra.gmra.mrb[0].mxu1 %vm519_vm0, %v317_v44  ;;  %9276 = vst [vmem:[#allocation40_spill] sm:$0xff] %v7108_v23  ;;  %9277 = vst [vmem:[#allocation41_spill] sm:$0xff] %v7111_v24  ;;  %v7113_v25 = vld [vmem:[#allocation12 + $0x88] ss:$16 sps:$4 sm:$0xff]   ;;  %v7117_v26 = vld [vmem:[#allocation12 + $0xa4] ss:$16 sps:$4 sm:$0xff]  }
  0x6f   :  { %606 = vmatpush1.bf16.msra.mxu0 %v6024_v46  ;;  %647 = vmatpush1.bf16.msra.mxu1 %v6026_v47  ;;  %9278 = vst [vmem:[#allocation42_spill] sm:$0xff] %v7113_v25  ;;  %9279 = vst [vmem:[#allocation43_spill] sm:$0xff] %v7117_v26  ;;  %v7120_v27 = vld [vmem:[#allocation12 + $0xac] ss:$16 sps:$4 sm:$0xff]   ;;  %v7123_v28 = vld [vmem:[#allocation12 + $0xa0] ss:$16 sps:$4 sm:$0xff]  }
  0x70   :  { %607 = vmatprep.subr.bf16.mxu0 %v6033_v48  ;;  %648 = vmatprep.subr.bf16.mxu1 %v6035_v50  ;;  %9280 = vst [vmem:[#allocation44_spill] sm:$0xff] %v7120_v27  ;;  %9281 = vst [vmem:[#allocation45_spill] sm:$0xff] %v7123_v28  ;;  %v7127_v29 = vld [vmem:[#allocation12 + $0xa8] ss:$16 sps:$4 sm:$0xff]   ;;  %v7129_v30 = vld [vmem:[#allocation12 + $0xc4] ss:$16 sps:$4 sm:$0xff]  }
  0x71   :  { %637 = vmatprep.mubr.bf16.mxu0 %v9045_v8  ;;  %678 = vmatprep.mubr.bf16.mxu1 %v9045_v8  ;;  %9282 = vst [vmem:[#allocation46_spill] sm:$0xff] %v7127_v29  ;;  %9283 = vst [vmem:[#allocation47_spill] sm:$0xff] %v7129_v30  ;;  %v7132_v31 = vld [vmem:[#allocation12 + $0xcc] ss:$16 sps:$4 sm:$0xff]   ;;  %v7135_v32 = vld [vmem:[#allocation12 + $0xc0] ss:$16 sps:$4 sm:$0xff]  }
  0x72   :  { %9284 = vst [vmem:[#allocation48_spill] sm:$0xff] %v7132_v31  ;;  %9285 = vst [vmem:[#allocation49_spill] sm:$0xff] %v7135_v32  ;;  %v7139_v33 = vld [vmem:[#allocation12 + $0xc8] ss:$16 sps:$4 sm:$0xff]   ;;  %v7141_v34 = vld [vmem:[#allocation12 + $0xe4] ss:$16 sps:$4 sm:$0xff]  }
  0x73   :  { %608 = vmatpush1.bf16.msra.mxu0 %v6032_v54  ;;  %649 = vmatpush1.bf16.msra.mxu1 %v6034_v55  ;;  %9286 = vst [vmem:[#allocation50_spill] sm:$0xff] %v7139_v33  ;;  %9287 = vst [vmem:[#allocation51_spill] sm:$0xff] %v7141_v34  ;;  %v7144_v35 = vld [vmem:[#allocation12 + $0xec] ss:$16 sps:$4 sm:$0xff]   ;;  %v7147_v36 = vld [vmem:[#allocation12 + $0xe0] ss:$16 sps:$4 sm:$0xff]  }
  0x74   :  { %609 = vmatprep.subr.bf16.mxu0 %v6041_v56  ;;  %650 = vmatprep.subr.bf16.mxu1 %v6043_v59  ;;  %9288 = vst [vmem:[#allocation52_spill] sm:$0xff] %v7144_v35  ;;  %9289 = vst [vmem:[#allocation53_spill] sm:$0xff] %v7147_v36  ;;  %v7151_v37 = vld [vmem:[#allocation12 + $0xe8] ss:$16 sps:$4 sm:$0xff]   ;;  %v7153_v38 = vld [vmem:[#allocation14 + $0x4] ss:$16 sps:$4 sm:$0xff]  }
  0x75   :  { %9290 = vst [vmem:[#allocation54_spill] sm:$0xff] %v7151_v37  ;;  %9291 = vst [vmem:[#allocation55_spill] sm:$0xff] %v7153_v38  ;;  %v7156_v39 = vld [vmem:[#allocation14 + $0xc] ss:$16 sps:$4 sm:$0xff]   ;;  %v7159_v40 = vld [vmem:[#allocation14] ss:$16 sps:$4 sm:$0xff]  }
  0x76   :  { %9292 = vst [vmem:[#allocation56_spill] sm:$0xff] %v7156_v39  ;;  %v7163_v41 = vld [vmem:[#allocation14 + $0x8] ss:$16 sps:$4 sm:$0xff]   ;;  %v7165_v42 = vld [vmem:[#allocation14 + $0x24] ss:$16 sps:$4 sm:$0xff]   ;;  %vm7744_vm4 = vmand %vm1870_vm11, %vm2168_vm2 }
  0x77   :  { %610 = vmatpush1.bf16.msra.mxu0 %v6040_v62  ;;  %651 = vmatpush1.bf16.msra.mxu1 %v6042_v63  ;;  %v7168_v43 = vld [vmem:[#allocation14 + $0x2c] ss:$16 sps:$4 sm:$0xff]   ;;  %v7177_v45 = vld [vmem:[#allocation14 + $0x28] ss:$16 sps:$4 sm:$0xff]   ;;  %v7179_v46 = vld [vmem:[#allocation14 + $0x44] ss:$16 sps:$4 sm:$0xff]  }
  0x78   :  { %611 = vmatprep.subr.bf16.mxu0 %v6049_v1  ;;  %652 = vmatprep.subr.bf16.mxu1 %v6051_v2  ;;  %v7182_v47 = vld [vmem:[#allocation14 + $0x4c] ss:$16 sps:$4 sm:$0xff]   ;;  %v7187_v48 = vld [vmem:[#allocation14 + $0x40] ss:$16 sps:$4 sm:$0xff]   ;;  %v7191_v49 = vld [vmem:[#allocation14 + $0x48] ss:$16 sps:$4 sm:$0xff]  }
  0x79   :  { %v7193_v50 = vld [vmem:[#allocation14 + $0x64] ss:$16 sps:$4 sm:$0xff]   ;;  %v7196_v51 = vld [vmem:[#allocation14 + $0x6c] ss:$16 sps:$4 sm:$0xff]   ;;  %v7199_v52 = vld [vmem:[#allocation14 + $0x60] ss:$16 sps:$4 sm:$0xff]  }
  0x7a   :  { %v7203_v53 = vld [vmem:[#allocation14 + $0x68] ss:$16 sps:$4 sm:$0xff]   ;;  %v7205_v54 = vld [vmem:[#allocation14 + $0x84] ss:$16 sps:$4 sm:$0xff]   ;;  %v7208_v55 = vld [vmem:[#allocation14 + $0x8c] ss:$16 sps:$4 sm:$0xff]  }
  0x7b   :  { %612 = vmatpush1.bf16.msra.mxu0 %v6048_v3  ;;  %653 = vmatpush1.bf16.msra.mxu1 %v6050_v4  ;;  %v7211_v56 = vld [vmem:[#allocation14 + $0x80] ss:$16 sps:$4 sm:$0xff]   ;;  %v7215_v57 = vld [vmem:[#allocation14 + $0x88] ss:$16 sps:$4 sm:$0xff]   ;;  %v7217_v58 = vld [vmem:[#allocation14 + $0xa4] ss:$16 sps:$4 sm:$0xff]  }
  0x7c   :  { %855 = vmatprep.subr.bf16.mxu0 %v7056_v5  ;;  %896 = vmatprep.subr.bf16.mxu1 %v7058_v6  ;;  %v7220_v59 = vld [vmem:[#allocation14 + $0xac] ss:$16 sps:$4 sm:$0xff]   ;;  %v7223_v60 = vld [vmem:[#allocation14 + $0xa0] ss:$16 sps:$4 sm:$0xff]   ;;  %v7227_v61 = vld [vmem:[#allocation14 + $0xa8] ss:$16 sps:$4 sm:$0xff]  }
  0x7d   :  { %v7229_v62 = vld [vmem:[#allocation14 + $0xc4] ss:$16 sps:$4 sm:$0xff]   ;;  %v7232_v63 = vld [vmem:[#allocation14 + $0xcc] ss:$16 sps:$4 sm:$0xff]   ;;  %v7235_v1 = vld [vmem:[#allocation14 + $0xc0] ss:$16 sps:$4 sm:$0xff]  }
  0x7e   :  { %6054 = vmatmul.mubr.msk.bf16.vlgmr.msra.gmra.mrb[4].mxu0 %vm519_vm0, %v317_v44  ;;  %6055 = vmatmul.mubr.msk.bf16.vlgmr.msra.gmra.mrb[4].mxu1 %vm519_vm0, %v317_v44  ;;  %v7173_v44 = vld [vmem:[#allocation14 + $0x20] ss:$16 sps:$4 sm:$0xff]   ;;  %9293 = vst [vmem:[#allocation57_spill] sm:$0xff] %v7232_v63  ;;  %v7239_v2 = vld [vmem:[#allocation14 + $0xc8] ss:$16 sps:$4 sm:$0xff]   ;;  %vm7645_vm0 = vmand %vm1885_vm14, %vm1886_vm15 }
  0x7f   :  { %856 = vmatpush1.bf16.msra.mxu0 %v7060_v7  ;;  %897 = vmatpush1.bf16.msra.mxu1 %v7062_v9  ;;  %v7241_v3 = vld [vmem:[#allocation14 + $0xe4] ss:$16 sps:$4 sm:$0xff]   ;;  %v7244_v4 = vld [vmem:[#allocation14 + $0xec] ss:$16 sps:$4 sm:$0xff]   ;;  %v7251_v0 = vld [vmem:[#allocation14 + $0xe8] ss:$16 sps:$4 sm:$0xff]  }
  0x80   :  { %857 = vmatprep.subr.bf16.mxu0 %v7065_v10  ;;  %898 = vmatprep.subr.bf16.mxu1 %v7068_v11  ;;  %vm7797_vm7 = vmand %vm1885_vm14, %vm2179_vm5 }
  0x81   :  { %887 = vmatprep.mubr.bf16.mxu0 %v9045_v8  ;;  %928 = vmatprep.mubr.bf16.mxu1 %v9045_v8 }
  0x83   :  { %858 = vmatpush1.bf16.msra.mxu0 %v7073_v12  ;;  %899 = vmatpush1.bf16.msra.mxu1 %v7077_v13 }
  0x84   :  { %859 = vmatprep.subr.bf16.mxu0 %v7079_v14  ;;  %900 = vmatprep.subr.bf16.mxu1 %v7082_v15 }
  0x87   :  { %860 = vmatpush1.bf16.msra.mxu0 %v7087_v16  ;;  %901 = vmatpush1.bf16.msra.mxu1 %v7089_v17 }
  0x88   :  { %861 = vmatprep.subr.bf16.mxu0 %v7093_v18  ;;  %902 = vmatprep.subr.bf16.mxu1 %v7096_v19 }
  0x8b   :  { %862 = vmatpush1.bf16.msra.mxu0 %v7099_v20  ;;  %903 = vmatpush1.bf16.msra.mxu1 %v7103_v21 }
  0x8c   :  { %863 = vmatprep.subr.bf16.mxu0 %v7105_v22  ;;  %904 = vmatprep.subr.bf16.mxu1 %v7108_v23 }
  0x8f   :  { %864 = vmatpush1.bf16.msra.mxu0 %v7111_v24  ;;  %905 = vmatpush1.bf16.msra.mxu1 %v7113_v25 }
  0x90   :  { %865 = vmatprep.subr.bf16.mxu0 %v7117_v26  ;;  %906 = vmatprep.subr.bf16.mxu1 %v7120_v27 }
  0x93   :  { %866 = vmatpush1.bf16.msra.mxu0 %v7123_v28  ;;  %907 = vmatpush1.bf16.msra.mxu1 %v7127_v29 }
  0x94   :  { %867 = vmatprep.subr.bf16.mxu0 %v7129_v30  ;;  %908 = vmatprep.subr.bf16.mxu1 %v7132_v31 }
  0x97   :  { %868 = vmatpush1.bf16.msra.mxu0 %v7135_v32  ;;  %909 = vmatpush1.bf16.msra.mxu1 %v7139_v33 }
  0x98   :  { %869 = vmatprep.subr.bf16.mxu0 %v7141_v34  ;;  %910 = vmatprep.subr.bf16.mxu1 %v7144_v35 }
  0x9b   :  { %870 = vmatpush1.bf16.msra.mxu0 %v7147_v36  ;;  %911 = vmatpush1.bf16.msra.mxu1 %v7151_v37 }
  0x9c   :  { %1097 = vmatprep.subr.bf16.mxu0 %v7153_v38  ;;  %1138 = vmatprep.subr.bf16.mxu1 %v7156_v39 }
  0x9e   :  { %888 = vmatmul.mubr.bf16.vlgmr.msra.gmra.mrb[8].mxu0 %v9045_v8  ;;  %929 = vmatmul.mubr.bf16.vlgmr.msra.gmra.mrb[8].mxu1 %v9045_v8 }
  0x9f   :  { %1098 = vmatpush1.bf16.msra.mxu0 %v7159_v40  ;;  %1139 = vmatpush1.bf16.msra.mxu1 %v7163_v41 }
  0xa0   :  { %1099 = vmatprep.subr.bf16.mxu0 %v7165_v42  ;;  %1140 = vmatprep.subr.bf16.mxu1 %v7168_v43 }
  0xa1   :  { %1129 = vmatprep.mubr.bf16.mxu0 %v9045_v8  ;;  %1170 = vmatprep.mubr.bf16.mxu1 %v9045_v8  ;;  %v7247_v8 = vld [vmem:[#allocation14 + $0xe0] ss:$16 sps:$4 sm:$0xff]  }
  0xa3   :  { %1100 = vmatpush1.bf16.msra.mxu0 %v7173_v44  ;;  %1141 = vmatpush1.bf16.msra.mxu1 %v7177_v45 }
  0xa4   :  { %1101 = vmatprep.subr.bf16.mxu0 %v7179_v46  ;;  %1142 = vmatprep.subr.bf16.mxu1 %v7182_v47 }
  0xa7   :  { %1102 = vmatpush1.bf16.msra.mxu0 %v7187_v48  ;;  %1143 = vmatpush1.bf16.msra.mxu1 %v7191_v49 }
  0xa8   :  { %1103 = vmatprep.subr.bf16.mxu0 %v7193_v50  ;;  %1144 = vmatprep.subr.bf16.mxu1 %v7196_v51 }
  0xab   :  { %1104 = vmatpush1.bf16.msra.mxu0 %v7199_v52  ;;  %1145 = vmatpush1.bf16.msra.mxu1 %v7203_v53 }
  0xac   :  { %1105 = vmatprep.subr.bf16.mxu0 %v7205_v54  ;;  %1146 = vmatprep.subr.bf16.mxu1 %v7208_v55 }
  0xaf   :  { %1106 = vmatpush1.bf16.msra.mxu0 %v7211_v56  ;;  %1147 = vmatpush1.bf16.msra.mxu1 %v7215_v57 }
  0xb0   :  { %1107 = vmatprep.subr.bf16.mxu0 %v7217_v58  ;;  %1148 = vmatprep.subr.bf16.mxu1 %v7220_v59 }
  0xb3   :  { %1108 = vmatpush1.bf16.msra.mxu0 %v7223_v60  ;;  %1149 = vmatpush1.bf16.msra.mxu1 %v7227_v61 }
  0xb4   :  { %1109 = vmatprep.subr.bf16.mxu0 %v7229_v62  ;;  %1150 = vmatprep.subr.bf16.mxu1 %v7232_v63  ;;  %v9294_v63 = vmov 0  }
  0xb7   :  { %1110 = vmatpush1.bf16.msra.mxu0 %v7235_v1  ;;  %1151 = vmatpush1.bf16.msra.mxu1 %v7239_v2 }
  0xb8   :  { %1111 = vmatprep.subr.bf16.mxu0 %v7241_v3  ;;  %1152 = vmatprep.subr.bf16.mxu1 %v7244_v4 }
  0xbb   :  { %1112 = vmatpush1.bf16.msra.mxu0 %v7247_v8  ;;  %1153 = vmatpush1.bf16.msra.mxu1 %v7251_v0 }
  0xbc   :  { %1304 = vmatprep.subr.bf16.mxu0 %v7056_v5  ;;  %1345 = vmatprep.subr.bf16.mxu1 %v7058_v6 }
  0xbe   :  { %1130 = vmatmul.mubr.bf16.vlgmr.msra.gmra.mrb[12].mxu0 %v9294_v63  ;;  %1171 = vmatmul.mubr.bf16.vlgmr.msra.gmra.mrb[12].mxu1 %v9294_v63 }
  0xbf   :  { %1305 = vmatpush1.bf16.msra.mxu0 %v7060_v7  ;;  %1346 = vmatpush1.bf16.msra.mxu1 %v7062_v9 }
  0xc0   :  { %1306 = vmatprep.subr.bf16.mxu0 %v7065_v10  ;;  %1347 = vmatprep.subr.bf16.mxu1 %v7068_v11 }
  0xc1   :  { %1336 = vmatprep.mubr.bf16.mxu0 %v9294_v63  ;;  %1377 = vmatprep.mubr.bf16.mxu1 %v9294_v63 }
  0xc3   :  { %1307 = vmatpush1.bf16.msra.mxu0 %v7073_v12  ;;  %1348 = vmatpush1.bf16.msra.mxu1 %v7077_v13 }
  0xc4   :  { %1308 = vmatprep.subr.bf16.mxu0 %v7079_v14  ;;  %1349 = vmatprep.subr.bf16.mxu1 %v7082_v15 }
  0xc7   :  { %1309 = vmatpush1.bf16.msra.mxu0 %v7087_v16  ;;  %1350 = vmatpush1.bf16.msra.mxu1 %v7089_v17 }
  0xc8   :  { %1310 = vmatprep.subr.bf16.mxu0 %v7093_v18  ;;  %1351 = vmatprep.subr.bf16.mxu1 %v7096_v19 }
  0xcb   :  { %1311 = vmatpush1.bf16.msra.mxu0 %v7099_v20  ;;  %1352 = vmatpush1.bf16.msra.mxu1 %v7103_v21 }
  0xcc   :  { %1312 = vmatprep.subr.bf16.mxu0 %v7105_v22  ;;  %1353 = vmatprep.subr.bf16.mxu1 %v7108_v23 }
  0xcf   :  { %1313 = vmatpush1.bf16.msra.mxu0 %v7111_v24  ;;  %1354 = vmatpush1.bf16.msra.mxu1 %v7113_v25 }
  0xd0   :  { %1314 = vmatprep.subr.bf16.mxu0 %v7117_v26  ;;  %1355 = vmatprep.subr.bf16.mxu1 %v7120_v27 }
  0xd3   :  { %1315 = vmatpush1.bf16.msra.mxu0 %v7123_v28  ;;  %1356 = vmatpush1.bf16.msra.mxu1 %v7127_v29  ;;  %v319_v29 = vlaneseq }
  0xd4   :  { %1316 = vmatprep.subr.bf16.mxu0 %v7129_v30  ;;  %1357 = vmatprep.subr.bf16.mxu1 %v7132_v31 }
  0xd5   :  { %v7294_v30 = vshrl.u32 %v319_v29, 7 }
  0xd7   :  { %1317 = vmatpush1.bf16.msra.mxu0 %v7135_v32  ;;  %1358 = vmatpush1.bf16.msra.mxu1 %v7139_v33  ;;  %9295 = vst [vmem:[#allocation58_spill] sm:$0xff] %v7294_v30  ;;  %v7297_v31 = vsub.s32 0, %v7294_v30 }
  0xd8   :  { %1318 = vmatprep.subr.bf16.mxu0 %v7141_v34  ;;  %1359 = vmatprep.subr.bf16.mxu1 %v7144_v35  ;;  %v316_v34 = vld [vmem:[%s9037_s4] sm:$0xff]  ;;  %v9092_v35 = vsub.s32 2, %v7294_v30 }
  0xd9   :  { %9296 = vst [vmem:[#allocation59_spill] sm:$0xff] %v7297_v31 }
  0xdb   :  { %1319 = vmatpush1.bf16.msra.mxu0 %v7147_v36  ;;  %1360 = vmatpush1.bf16.msra.mxu1 %v7151_v37  ;;  %v9093_v36 = vsub.s32 1, %v7294_v30  ;;  %v9094_v37 = vsub.s32 3, %v7294_v30 }
  0xdc   :  { %1386 = vmatprep.subr.bf16.mxu0 %v7153_v38  ;;  %1427 = vmatprep.subr.bf16.mxu1 %v7156_v39  ;;  %v322_v38 = vrot.slane %v316_v34, %v7297_v31  ;;  %v330_v39 = vrot.slane %v316_v34, %v9092_v35 }
  0xdd   :  { %v326_v29 = vrot.slane %v316_v34, %v9093_v36  ;;  %v334_v33 = vrot.slane %v316_v34, %v9094_v37  ;;  %v9095_v36 = vsub.s32 4, %v7294_v30  ;;  %v9096_v37 = vsub.s32 6, %v7294_v30 }
 0x141   :  { %v557_v32 = vpop.f32.mrb[0].mxu0  ;;  %v598_v27 = vpop.f32.mrb[0].mxu1 }
 0x142   :  { %v558_v28 = vadd.f32 %v557_v32, %v322_v38  ;;  %v559_v26 = vpop.f32.mrb[1].mxu0  ;;  %v599_v25 = vadd.f32 %v598_v27, %v330_v39  ;;  %v600_v23 = vpop.f32.mrb[1].mxu1  ;;  %v9097_v32 = vsub.s32 5, %v7294_v30  ;;  %v9102_v38 = vsub.s32 7, %v7294_v30 }
 0x143   :  { %v560_v24 = vadd.f32 %v559_v26, %v326_v29  ;;  %v561_v22 = vpop.f32.mrb[2].mxu0  ;;  %v601_v21 = vadd.f32 %v600_v23, %v334_v33  ;;  %v602_v31 = vpop.f32.mrb[2].mxu1  ;;  %v338_v26 = vrot.slane %v316_v34, %v9095_v36 }
 0x144   :  { %687 = vst [vmem:[#allocation2] sm:$0xff] %v558_v28  ;;  %v562_v20 = vpop.f32.mrb[3].mxu0  ;;  %689 = vst [vmem:[#allocation2 + $0x10] sm:$0xff] %v599_v25  ;;  %v603_v35 = vpop.f32.mrb[3].mxu1  ;;  %v346_v22 = vrot.slane %v316_v34, %v9096_v37 }
 0x145   :  { %688 = vst [vmem:[#allocation2 + $0x8] sm:$0xff] %v560_v24  ;;  %690 = vst [vmem:[#allocation2 + $0x18] sm:$0xff] %v601_v21  ;;  %v342_v20 = vrot.slane %v316_v34, %v9097_v32  ;;  %v350_v21 = vrot.slane %v316_v34, %v9102_v38  ;;  %v6902_v32 = vmov 1966171168  }
 0x146   :  { %v1187_v19 = vunpack.c.l.s4 %v6902_v32 }
 0x148   :  { %v1188_v18 = vunpack.c.0.s8 %v1187_v19 }
 0x14a   :  { %v7325_v34 = vsub.s32 %v1188_v18, %v7294_v30 }
 0x14c   :  { %v1179_v32 = vld [vmem:[#allocation2] ss:$8 sm:$0xf] }
 0x151   :  { %v639_v23 = vpop.f32.mrb[4].mxu0  ;;  %v680_v25 = vpop.f32.mrb[4].mxu1 }
 0x152   :  { %v640_v24 = vadd.f32 %v639_v23, %v338_v26  ;;  %v641_v27 = vpop.f32.mrb[5].mxu0  ;;  %v681_v28 = vadd.f32 %v680_v25, %v346_v22  ;;  %v682_v33 = vpop.f32.mrb[5].mxu1 }
 0x153   :  { %v642_v31 = vadd.f32 %v641_v27, %v342_v20  ;;  %v643_v35 = vpop.f32.mrb[6].mxu0  ;;  %v683_v39 = vadd.f32 %v682_v33, %v350_v21  ;;  %v684_v29 = vpop.f32.mrb[6].mxu1 }
 0x154   :  { %691 = vst [vmem:[#allocation2 + $0x20] sm:$0xff] %v640_v24  ;;  %v644_v36 = vpop.f32.mrb[7].mxu0  ;;  %693 = vst [vmem:[#allocation2 + $0x30] sm:$0xff] %v681_v28  ;;  %v685_v37 = vpop.f32.mrb[7].mxu1 }
 0x155   :  { %692 = vst [vmem:[#allocation2 + $0x28] sm:$0xff] %v642_v31  ;;  %694 = vst [vmem:[#allocation2 + $0x38] sm:$0xff] %v683_v39 }
 0x15c   :  { %v1211_v38 = vld [vmem:[#allocation2 + $0x27] ss:$8 sm:$0xf] }
 0x171   :  { %v889_v26 = vpop.f32.mrb[8].mxu0  ;;  %v930_v23 = vpop.f32.mrb[8].mxu1 }
 0x172   :  { %v891_v22 = vpop.f32.mrb[9].mxu0  ;;  %v932_v25 = vpop.f32.mrb[9].mxu1 }
 0x173   :  { %v1184_v20 = vcombine.low %v889_v26, %v891_v22  ;;  %v893_v27 = vpop.f32.mrb[10].mxu0  ;;  %v1185_v24 = vcombine.low %v930_v23, %v932_v25  ;;  %v934_v21 = vpop.f32.mrb[10].mxu1 }
 0x174   :  { %v894_v33 = vpop.f32.mrb[11].mxu0  ;;  %v935_v28 = vpop.f32.mrb[11].mxu1 }
 0x175   :  { %v1192_v36 = vrot.slane %v1184_v20, %v7325_v34  ;;  %v1199_v37 = vrot.slane %v1185_v24, %v7325_v34 }
 0x177   :  { %v1200_v31 = vcombine.low %v1192_v36, %v1199_v37 }
 0x179   :  { %v1207_v19 = vrot.slane %v1200_v31, %v7325_v34 }
 0x17b   :  { %v1209_v18 = vadd.f32 %v1207_v19, %v1179_v32 }
 0x17d   :  { %v6120_v35 = vmul.f32 -1.442695, %v1209_v18  ;;  %v1249_v26 = vrot.slane %v1209_v18, 3 }
 0x17f   :  { %6309 = vpow2.f32 %v6120_v35 }
 0x189   :  { %v6310_v39 = vpop.eup %6309 }
 0x18a   :  { %v1245_v29 = vadd.f32 1.0, %v6310_v39 }
 0x18c   :  { %6311 = vrcp.f32 %v1245_v29 }
 0x18d   :  { %6313 = vtanh.f32 %v1249_v26 }
 0x191   :  { %v1131_v23 = vpop.f32.mrb[12].mxu0  ;;  %v1172_v22 = vpop.f32.mrb[12].mxu1 }
 0x192   :  { %v1133_v25 = vpop.f32.mrb[13].mxu0  ;;  %v1174_v20 = vpop.f32.mrb[13].mxu1 }
 0x193   :  { %v1216_v27 = vcombine.low %v1131_v23, %v1133_v25  ;;  %v1135_v21 = vpop.f32.mrb[14].mxu0  ;;  %v1217_v33 = vcombine.low %v1172_v22, %v1174_v20  ;;  %v1176_v24 = vpop.f32.mrb[14].mxu1 }
 0x194   :  { %v1136_v36 = vpop.f32.mrb[15].mxu0  ;;  %v1177_v37 = vpop.f32.mrb[15].mxu1  ;;  %v9297_v24 = vmov 0 }
 0x195   :  { %v1224_v28 = vrot.slane %v1216_v27, %v7325_v34  ;;  %v1231_v31 = vrot.slane %v1217_v33, %v7325_v34  ;;  %v9298_v24 = vsel %vm7337_vm3, 4294967295, %v9297_v24  ;;  %v1286_v36 = vld [vmem:[#allocation3] sm:$0x1] }
 0x196   :  { %v6312_v19 = vpop.eup %6311  ;;  %9299 = vst [vmem:[#allocation60_spill] sm:$0xff] %v9298_v24 }
 0x197   :  { %v1232_v32 = vcombine.low %v1224_v28, %v1231_v31  ;;  %v1253_v35 = vrot.slane %v6312_v19, 1  ;;  %v6314_v18 = vpop.eup %6313  ;;  %v1259_v27 = vrot.slane %v6312_v19, 2 }
 0x198   :  { %v1256_v39 = vmul.f32 %v6314_v18, %v6312_v19 }
 0x199   :  { %v1239_v29 = vrot.slane %v1232_v32, %v7325_v34  ;;  %v1255_v26 = vmul.f32 0.0, %v1253_v35 }
 0x19b   :  { %v1241_v23 = vadd.f32 %v1239_v29, %v1211_v38  ;;  %v7333_v25 = vadd.f32 %v1256_v39, %v1255_v26  ;;  %v9300_v26 = vld [vmem:[#allocation57_spill] sm:$0xff] }
 0x19d   :  { %v6121_v22 = vmul.f32 -1.442695, %v1241_v23  ;;  %6315 = vtanh.f32 %v7333_v25  ;;  %v1269_v38 = vrot.slane %v1241_v23, 3 }
 0x19f   :  { %6317 = vpow2.f32 %v6121_v22 }
 0x1a7   :  { %v6316_v20 = vpop.eup %6315 }
 0x1a8   :  { %v1261_v21 = vmul.f32 %v6316_v20, %v1259_v27 }
 0x1a9   :  { %v6318_v33 = vpop.eup %6317 }
 0x1aa   :  { %v1265_v28 = vadd.f32 1.0, %v6318_v33  ;;  %v1282_v37 = vpack.c.bf16 %v1261_v21, %v1261_v21  ;;  %v9301_v33 = vmov 0 }
 0x1ab   :  { %v9302_v33 = vsel %vm7381_vm6, 4294967295, %v9301_v33 }
 0x1ac   :  { %6319 = vrcp.f32 %v1265_v28  ;;  %v1287_v31 = vsel %vm7337_vm3, %v1282_v37, %v1286_v36  ;;  %1337 = vmatmul.mubr.bf16.vlgmr.msra.gmra.mrb[16].mxu0 %v1282_v37  ;;  %1378 = vmatmul.mubr.bf16.vlgmr.msra.gmra.mrb[16].mxu1 %v1282_v37  ;;  %9303 = vst [vmem:[#allocation57_spill] sm:$0xff] %v9302_v33  ;;  %v1301_v36 = vld [vmem:[#allocation3 + $0x4] sm:$0x8]  ;;  %v9314_v37 = vld [vmem:[#allocation45_spill] sm:$0xff] }
 0x1ad   :  { %1288 = vst [vmem:[#allocation3] sm:$0x1] %v1287_v31  ;;  %1387 = vmatpush1.bf16.msra.mxu0 %v7159_v40  ;;  %1428 = vmatpush1.bf16.msra.mxu1 %v7163_v41  ;;  %6321 = vtanh.f32 %v1269_v38  ;;  %v9313_v38 = vld [vmem:[#allocation44_spill] sm:$0xff]  ;;  %v9315_v31 = vld [vmem:[#allocation46_spill] sm:$0xff] }
 0x1ae   :  { %1388 = vmatprep.subr.bf16.mxu0 %v7165_v42  ;;  %1429 = vmatprep.subr.bf16.mxu1 %v7168_v43 }
 0x1af   :  { %1418 = vmatprep.mubr.bf16.mxu0 %v9294_v63  ;;  %1459 = vmatprep.mubr.bf16.mxu1 %v9294_v63 }
 0x1b1   :  { %1389 = vmatpush1.bf16.msra.mxu0 %v7173_v44  ;;  %1430 = vmatpush1.bf16.msra.mxu1 %v7177_v45 }
 0x1b2   :  { %1390 = vmatprep.subr.bf16.mxu0 %v7179_v46  ;;  %1431 = vmatprep.subr.bf16.mxu1 %v7182_v47 }
 0x1b5   :  { %1391 = vmatpush1.bf16.msra.mxu0 %v7187_v48  ;;  %1432 = vmatpush1.bf16.msra.mxu1 %v7191_v49 }
 0x1b6   :  { %v6320_v19 = vpop.eup %6319  ;;  %1392 = vmatprep.subr.bf16.mxu0 %v7193_v50  ;;  %1433 = vmatprep.subr.bf16.mxu1 %v7196_v51 }
 0x1b7   :  { %v1273_v32 = vrot.slane %v6320_v19, 1  ;;  %v6322_v35 = vpop.eup %6321  ;;  %v1279_v23 = vrot.slane %v6320_v19, 2 }
 0x1b8   :  { %v1276_v18 = vmul.f32 %v6322_v35, %v6320_v19  ;;  %v9316_v19 = vld [vmem:[#allocation47_spill] sm:$0xff]  ;;  %v9318_v35 = vld [vmem:[#allocation49_spill] sm:$0xff] }
 0x1b9   :  { %1393 = vmatpush1.bf16.msra.mxu0 %v7199_v52  ;;  %1434 = vmatpush1.bf16.msra.mxu1 %v7203_v53  ;;  %v1275_v39 = vmul.f32 0.0, %v1273_v32  ;;  %v9317_v32 = vld [vmem:[#allocation48_spill] sm:$0xff] }
 0x1ba   :  { %1394 = vmatprep.subr.bf16.mxu0 %v7205_v54  ;;  %1435 = vmatprep.subr.bf16.mxu1 %v7208_v55 }
 0x1bb   :  { %v7361_v29 = vadd.f32 %v1276_v18, %v1275_v39  ;;  %v9319_v18 = vld [vmem:[#allocation50_spill] sm:$0xff]  ;;  %v9320_v39 = vld [vmem:[#allocation51_spill] sm:$0xff] }
 0x1bd   :  { %1395 = vmatpush1.bf16.msra.mxu0 %v7211_v56  ;;  %1436 = vmatpush1.bf16.msra.mxu1 %v7215_v57  ;;  %6323 = vtanh.f32 %v7361_v29 }
 0x1be   :  { %1396 = vmatprep.subr.bf16.mxu0 %v7217_v58  ;;  %1437 = vmatprep.subr.bf16.mxu1 %v7220_v59 }
 0x1c1   :  { %1397 = vmatpush1.bf16.msra.mxu0 %v7223_v60  ;;  %1438 = vmatpush1.bf16.msra.mxu1 %v7227_v61 }
 0x1c2   :  { %1398 = vmatprep.subr.bf16.mxu0 %v7229_v62  ;;  %1439 = vmatprep.subr.bf16.mxu1 %v9300_v26 }
 0x1c5   :  { %1399 = vmatpush1.bf16.msra.mxu0 %v7235_v1  ;;  %1440 = vmatpush1.bf16.msra.mxu1 %v7239_v2 }
 0x1c6   :  { %1400 = vmatprep.subr.bf16.mxu0 %v7241_v3  ;;  %1441 = vmatprep.subr.bf16.mxu1 %v7244_v4 }
 0x1c7   :  { %v6324_v22 = vpop.eup %6323 }
 0x1c8   :  { %v1281_v27 = vmul.f32 %v6324_v22, %v1279_v23  ;;  %v9321_v23 = vld [vmem:[#allocation52_spill] sm:$0xff]  ;;  %v9322_v22 = vld [vmem:[#allocation53_spill] sm:$0xff] }
 0x1c9   :  { %1401 = vmatpush1.bf16.msra.mxu0 %v7247_v8  ;;  %1442 = vmatpush1.bf16.msra.mxu1 %v7251_v0 }
 0x1ca   :  { %v1289_v20 = vpack.c.bf16 %v1281_v27, %v1281_v27  ;;  %1596 = vmatprep.subr.bf16.mxu0 %v7056_v5  ;;  %1637 = vmatprep.subr.bf16.mxu1 %v7058_v6  ;;  %v9304_v6 = vld [vmem:[#allocation35_spill] sm:$0xff]  ;;  %v9323_v27 = vld [vmem:[#allocation54_spill] sm:$0xff] }
 0x1cc   :  { %v1294_v21 = vshll.u32 %v1289_v20, 16  ;;  %1419 = vmatmul.mubr.bf16.vlgmr.msra.gmra.mrb[20].mxu0 %v1289_v20  ;;  %1460 = vmatmul.mubr.bf16.vlgmr.msra.gmra.mrb[20].mxu1 %v1289_v20  ;;  %v9324_v20 = vld [vmem:[#allocation55_spill] sm:$0xff] }
 0x1cd   :  { %1597 = vmatpush1.bf16.msra.mxu0 %v7060_v7  ;;  %1638 = vmatpush1.bf16.msra.mxu1 %v7062_v9  ;;  %v9305_v7 = vld [vmem:[#allocation36_spill] sm:$0xff]  ;;  %v9306_v9 = vld [vmem:[#allocation37_spill] sm:$0xff] }
 0x1ce   :  { %v1296_v28 = vrot.slane %v1294_v21, 5  ;;  %1598 = vmatprep.subr.bf16.mxu0 %v7065_v10  ;;  %1639 = vmatprep.subr.bf16.mxu1 %v7068_v11  ;;  %v9307_v10 = vld [vmem:[#allocation38_spill] sm:$0xff]  ;;  %v9308_v11 = vld [vmem:[#allocation39_spill] sm:$0xff]  ;;  %v9325_v21 = vld [vmem:[#allocation56_spill] sm:$0xff] }
 0x1cf   :  { %1628 = vmatprep.mubr.bf16.mxu0 %v9294_v63  ;;  %1669 = vmatprep.mubr.bf16.mxu1 %v9294_v63 }
 0x1d0   :  { %v1302_v5 = vsel %vm7381_vm6, %v1296_v28, %v1301_v36 }
 0x1d1   :  { %1303 = vst [vmem:[#allocation3 + $0x4] sm:$0x8] %v1302_v5  ;;  %1599 = vmatpush1.bf16.msra.mxu0 %v7073_v12  ;;  %1640 = vmatpush1.bf16.msra.mxu1 %v7077_v13  ;;  %v9309_v12 = vld [vmem:[#allocation40_spill] sm:$0xff]  ;;  %v9310_v13 = vld [vmem:[#allocation41_spill] sm:$0xff] }
 0x1d2   :  { %1600 = vmatprep.subr.bf16.mxu0 %v7079_v14  ;;  %1641 = vmatprep.subr.bf16.mxu1 %v7082_v15  ;;  %v9311_v14 = vld [vmem:[#allocation42_spill] sm:$0xff]  ;;  %v9312_v15 = vld [vmem:[#allocation43_spill] sm:$0xff] }
 0x1d5   :  { %1601 = vmatpush1.bf16.msra.mxu0 %v7087_v16  ;;  %1642 = vmatpush1.bf16.msra.mxu1 %v7089_v17 }
 0x1d6   :  { %1602 = vmatprep.subr.bf16.mxu0 %v9304_v6  ;;  %1643 = vmatprep.subr.bf16.mxu1 %v9305_v7 }
 0x1d9   :  { %1603 = vmatpush1.bf16.msra.mxu0 %v9306_v9  ;;  %1644 = vmatpush1.bf16.msra.mxu1 %v9307_v10 }
 0x1da   :  { %1604 = vmatprep.subr.bf16.mxu0 %v9308_v11  ;;  %1645 = vmatprep.subr.bf16.mxu1 %v9309_v12 }
 0x1dd   :  { %1605 = vmatpush1.bf16.msra.mxu0 %v9310_v13  ;;  %1646 = vmatpush1.bf16.msra.mxu1 %v9311_v14 }
 0x1de   :  { %1606 = vmatprep.subr.bf16.mxu0 %v9312_v15  ;;  %1647 = vmatprep.subr.bf16.mxu1 %v9313_v38 }
 0x1e1   :  { %1607 = vmatpush1.bf16.msra.mxu0 %v9314_v37  ;;  %1648 = vmatpush1.bf16.msra.mxu1 %v9315_v31 }
 0x1e2   :  { %1608 = vmatprep.subr.bf16.mxu0 %v9316_v19  ;;  %1649 = vmatprep.subr.bf16.mxu1 %v9317_v32 }
 0x1e5   :  { %1609 = vmatpush1.bf16.msra.mxu0 %v9318_v35  ;;  %1650 = vmatpush1.bf16.msra.mxu1 %v9319_v18 }
 0x1e6   :  { %1610 = vmatprep.subr.bf16.mxu0 %v9320_v39  ;;  %1651 = vmatprep.subr.bf16.mxu1 %v9321_v23 }
 0x1e9   :  { %1611 = vmatpush1.bf16.msra.mxu0 %v9322_v22  ;;  %1652 = vmatpush1.bf16.msra.mxu1 %v9323_v27 }
 0x1ea   :  { %1678 = vmatprep.subr.bf16.mxu0 %v9324_v20  ;;  %1719 = vmatprep.subr.bf16.mxu1 %v9325_v21  ;;  %v1469_v20 = vld [vmem:[#allocation2 + $0x1] ss:$8 sm:$0xf] }
 0x27f   :  { %v1338_v36 = vpop.f32.mrb[16].mxu0  ;;  %v1379_v28 = vpop.f32.mrb[16].mxu1 }
 0x280   :  { %v1340_v5 = vpop.f32.mrb[17].mxu0  ;;  %v1381_v30 = vpop.f32.mrb[17].mxu1 }
 0x281   :  { %v1474_v24 = vcombine.low %v1338_v36, %v1340_v5  ;;  %v1475_v33 = vcombine.low %v1379_v28, %v1381_v30  ;;  %v1342_v35 = vpop.f32.mrb[18].mxu0  ;;  %v1383_v18 = vpop.f32.mrb[18].mxu1  ;;  %v1501_v5 = vld [vmem:[#allocation2 + $0x26] ss:$8 sm:$0xf] }
 0x282   :  { %v1343_v32 = vpop.f32.mrb[19].mxu0  ;;  %v1384_v39 = vpop.f32.mrb[19].mxu1 }
 0x283   :  { %v1482_v23 = vrot.slane %v1474_v24, %v7325_v34  ;;  %v1489_v22 = vrot.slane %v1475_v33, %v7325_v34 }
 0x285   :  { %v1490_v19 = vcombine.low %v1482_v23, %v1489_v22 }
 0x287   :  { %v1497_v27 = vrot.slane %v1490_v19, %v7325_v34 }
 0x289   :  { %v1499_v31 = vadd.f32 %v1497_v27, %v1469_v20 }
 0x28b   :  { %v6123_v21 = vmul.f32 -1.442695, %v1499_v31  ;;  %v1539_v15 = vrot.slane %v1499_v31, 3 }
 0x28d   :  { %6325 = vpow2.f32 %v6123_v21 }
 0x297   :  { %v6326_v37 = vpop.eup %6325 }
 0x298   :  { %v1535_v38 = vadd.f32 1.0, %v6326_v37 }
 0x29a   :  { %6327 = vrcp.f32 %v1535_v38 }
 0x29b   :  { %6329 = vtanh.f32 %v1539_v15 }
 0x29f   :  { %v1420_v30 = vpop.f32.mrb[20].mxu0  ;;  %v1461_v35 = vpop.f32.mrb[20].mxu1 }
 0x2a0   :  { %v1422_v32 = vpop.f32.mrb[21].mxu0  ;;  %v1463_v18 = vpop.f32.mrb[21].mxu1 }
 0x2a1   :  { %v1506_v39 = vcombine.low %v1420_v30, %v1422_v32  ;;  %v1507_v24 = vcombine.low %v1461_v35, %v1463_v18  ;;  %v1424_v36 = vpop.f32.mrb[22].mxu0  ;;  %v1465_v33 = vpop.f32.mrb[22].mxu1 }
 0x2a2   :  { %v1425_v23 = vpop.f32.mrb[23].mxu0  ;;  %v1466_v22 = vpop.f32.mrb[23].mxu1 }
 0x2a3   :  { %v1514_v19 = vrot.slane %v1506_v39, %v7325_v34  ;;  %v1521_v27 = vrot.slane %v1507_v24, %v7325_v34 }
 0x2a4   :  { %v6328_v20 = vpop.eup %6327 }
 0x2a5   :  { %v1522_v21 = vcombine.low %v1514_v19, %v1521_v27  ;;  %v1543_v37 = vrot.slane %v6328_v20, 1  ;;  %v6330_v31 = vpop.eup %6329  ;;  %v1549_v18 = vrot.slane %v6328_v20, 2  ;;  %v9326_v19 = vmov 0  ;;  %v1582_v27 = vld [vmem:[#allocation3] sm:$0x1] }
 0x2a6   :  { %v1546_v38 = vmul.f32 %v6330_v31, %v6328_v20  ;;  %v9327_v19 = vsel %vm7432_vm8, 4294967295, %v9326_v19 }
 0x2a7   :  { %v1529_v15 = vrot.slane %v1522_v21, %v7325_v34  ;;  %v1545_v28 = vmul.f32 %v1543_v37, %v7333_v25  ;;  %9328 = vst [vmem:[#allocation35_spill] sm:$0xff] %v9327_v19  ;;  %v9347_v21 = vld [vmem:[#allocation56_spill] sm:$0xff]  ;;  %v7721_v19 = vld [vmem:[#allocation12 + $0xe0] ss:$16 sps:$4 sm:$0xff]  }
 0x2a8   :  { %9374 = vst [vmem:[#allocation65_spill] sm:$0xff] %v7721_v19 }
 0x2a9   :  { %v1531_v30 = vadd.f32 %v1529_v15, %v1501_v5  ;;  %v7428_v35 = vadd.f32 %v1546_v38, %v1545_v28 }
 0x2ab   :  { %v6124_v32 = vmul.f32 -1.442695, %v1531_v30  ;;  %6331 = vtanh.f32 %v7428_v35  ;;  %v1559_v23 = vrot.slane %v1531_v30, 3 }
 0x2ad   :  { %6333 = vpow2.f32 %v6124_v32 }
 0x2b5   :  { %v6332_v39 = vpop.eup %6331 }
 0x2b6   :  { %v1551_v24 = vmul.f32 %v6332_v39, %v1549_v18 }
 0x2b7   :  { %v6334_v36 = vpop.eup %6333 }
 0x2b8   :  { %v1555_v33 = vadd.f32 1.0, %v6334_v36  ;;  %v1572_v22 = vpack.c.bf16 %v1551_v24, %v1551_v24 }
 0x2ba   :  { %6335 = vrcp.f32 %v1555_v33  ;;  %v1577_v25 = vshll.u32 %v1572_v22, 16  ;;  %1629 = vmatmul.mubr.bf16.vlgmr.msra.gmra.mrb[24].mxu0 %v1572_v22  ;;  %1670 = vmatmul.mubr.bf16.vlgmr.msra.gmra.mrb[24].mxu1 %v1572_v22  ;;  %v1761_v22 = vld [vmem:[#allocation2 + $0x2] ss:$8 sm:$0xf] }
 0x2bb   :  { %1679 = vmatpush1.bf16.msra.mxu0 %v7159_v40  ;;  %1720 = vmatpush1.bf16.msra.mxu1 %v7163_v41  ;;  %6337 = vtanh.f32 %v1559_v23 }
 0x2bc   :  { %v1583_v20 = vsel %vm7432_vm8, %v1577_v25, %v1582_v27  ;;  %1680 = vmatprep.subr.bf16.mxu0 %v7165_v42  ;;  %1721 = vmatprep.subr.bf16.mxu1 %v7168_v43 }
 0x2bd   :  { %1584 = vst [vmem:[#allocation3] sm:$0x1] %v1583_v20  ;;  %1710 = vmatprep.mubr.bf16.mxu0 %v9294_v63  ;;  %1751 = vmatprep.mubr.bf16.mxu1 %v9294_v63 }
 0x2bf   :  { %1681 = vmatpush1.bf16.msra.mxu0 %v7173_v44  ;;  %1722 = vmatpush1.bf16.msra.mxu1 %v7177_v45 }
 0x2c0   :  { %1682 = vmatprep.subr.bf16.mxu0 %v7179_v46  ;;  %1723 = vmatprep.subr.bf16.mxu1 %v7182_v47 }
 0x2c3   :  { %1683 = vmatpush1.bf16.msra.mxu0 %v7187_v48  ;;  %1724 = vmatpush1.bf16.msra.mxu1 %v7191_v49 }
 0x2c4   :  { %v6336_v40 = vpop.eup %6335  ;;  %1684 = vmatprep.subr.bf16.mxu0 %v7193_v50  ;;  %1725 = vmatprep.subr.bf16.mxu1 %v7196_v51  ;;  %v7474_v50 = vld [vmem:[#allocation12 + $0x4] ss:$16 sps:$4 sm:$0xff]   ;;  %v7477_v51 = vld [vmem:[#allocation12 + $0xc] ss:$16 sps:$4 sm:$0xff]  }
 0x2c5   :  { %v1563_v41 = vrot.slane %v6336_v40, 1  ;;  %v6338_v42 = vpop.eup %6337  ;;  %v1569_v46 = vrot.slane %v6336_v40, 2 }
 0x2c6   :  { %v1566_v43 = vmul.f32 %v6338_v42, %v6336_v40 }
 0x2c7   :  { %1685 = vmatpush1.bf16.msra.mxu0 %v7199_v52  ;;  %1726 = vmatpush1.bf16.msra.mxu1 %v7203_v53  ;;  %v1565_v44 = vmul.f32 %v1563_v41, %v7361_v29  ;;  %v9329_v52 = vmov 0  ;;  %v9337_v29 = vld [vmem:[#allocation46_spill] sm:$0xff] }
 0x2c8   :  { %1686 = vmatprep.subr.bf16.mxu0 %v7205_v54  ;;  %1727 = vmatprep.subr.bf16.mxu1 %v7208_v55  ;;  %v9330_v52 = vsel %vm7481_vm10, 4294967295, %v9329_v52  ;;  %v7485_v54 = vld [vmem:[#allocation12] ss:$16 sps:$4 sm:$0xff]   ;;  %v7488_v55 = vld [vmem:[#allocation12 + $0x8] ss:$16 sps:$4 sm:$0xff]  }
 0x2c9   :  { %v7457_v45 = vadd.f32 %v1566_v43, %v1565_v44  ;;  %9331 = vst [vmem:[#allocation36_spill] sm:$0xff] %v9330_v52  ;;  %v7724_v52 = vld [vmem:[#allocation12 + $0xe8] ss:$16 sps:$4 sm:$0xff]  }
 0x2ca   :  { %9375 = vst [vmem:[#allocation66_spill] sm:$0xff] %v7724_v52 }
 0x2cb   :  { %1687 = vmatpush1.bf16.msra.mxu0 %v7211_v56  ;;  %1728 = vmatpush1.bf16.msra.mxu1 %v7215_v57  ;;  %6339 = vtanh.f32 %v7457_v45  ;;  %v7493_v57 = vld [vmem:[#allocation12 + $0x24] ss:$16 sps:$4 sm:$0xff]  }
 0x2cc   :  { %1688 = vmatprep.subr.bf16.mxu0 %v7217_v58  ;;  %1729 = vmatprep.subr.bf16.mxu1 %v7220_v59  ;;  %v7496_v58 = vld [vmem:[#allocation12 + $0x2c] ss:$16 sps:$4 sm:$0xff]   ;;  %v7501_v59 = vld [vmem:[#allocation12 + $0x20] ss:$16 sps:$4 sm:$0xff]  }
 0x2cf   :  { %1689 = vmatpush1.bf16.msra.mxu0 %v7223_v60  ;;  %1730 = vmatpush1.bf16.msra.mxu1 %v7227_v61  ;;  %v7504_v60 = vld [vmem:[#allocation12 + $0x28] ss:$16 sps:$4 sm:$0xff]   ;;  %v7507_v61 = vld [vmem:[#allocation12 + $0x44] ss:$16 sps:$4 sm:$0xff]  }
 0x2d0   :  { %1690 = vmatprep.subr.bf16.mxu0 %v7229_v62  ;;  %1731 = vmatprep.subr.bf16.mxu1 %v9300_v26  ;;  %9332 = vst [vmem:[#allocation37_spill] sm:$0xff] %v7507_v61  ;;  %v7510_v62 = vld [vmem:[#allocation12 + $0x4c] ss:$16 sps:$4 sm:$0xff]  }
 0x2d1   :  { %9333 = vst [vmem:[#allocation38_spill] sm:$0xff] %v7510_v62  ;;  %v9338_v26 = vld [vmem:[#allocation47_spill] sm:$0xff] }
 0x2d3   :  { %1691 = vmatpush1.bf16.msra.mxu0 %v7235_v1  ;;  %1732 = vmatpush1.bf16.msra.mxu1 %v7239_v2  ;;  %v9334_v1 = vld [vmem:[#allocation43_spill] sm:$0xff] }
 0x2d4   :  { %1692 = vmatprep.subr.bf16.mxu0 %v7241_v3  ;;  %1733 = vmatprep.subr.bf16.mxu1 %v7244_v4 }
 0x2d5   :  { %v6340_v47 = vpop.eup %6339 }
 0x2d6   :  { %v1571_v48 = vmul.f32 %v6340_v47, %v1569_v46 }
 0x2d7   :  { %1693 = vmatpush1.bf16.msra.mxu0 %v7247_v8  ;;  %1734 = vmatpush1.bf16.msra.mxu1 %v7251_v0  ;;  %v1593_v8 = vld [vmem:[#allocation3 + $0x4] sm:$0x8] }
 0x2d8   :  { %v1585_v49 = vpack.c.bf16 %v1571_v48, %v1571_v48  ;;  %1891 = vmatprep.subr.bf16.mxu0 %v7474_v50  ;;  %1932 = vmatprep.subr.bf16.mxu1 %v7477_v51 }
 0x2da   :  { %v1589_v53 = vrot.slane %v1585_v49, 5  ;;  %1711 = vmatmul.mubr.bf16.vlgmr.msra.gmra.mrb[28].mxu0 %v1585_v49  ;;  %1752 = vmatmul.mubr.bf16.vlgmr.msra.gmra.mrb[28].mxu1 %v1585_v49 }
 0x2db   :  { %1892 = vmatpush1.bf16.msra.mxu0 %v7485_v54  ;;  %1933 = vmatpush1.bf16.msra.mxu1 %v7488_v55 }
 0x2dc   :  { %v1594_v56 = vsel %vm7481_vm10, %v1589_v53, %v1593_v8  ;;  %1893 = vmatprep.subr.bf16.mxu0 %v7493_v57  ;;  %1934 = vmatprep.subr.bf16.mxu1 %v7496_v58 }
 0x2dd   :  { %1595 = vst [vmem:[#allocation3 + $0x4] sm:$0x8] %v1594_v56  ;;  %1923 = vmatprep.mubr.bf16.mxu0 %v9294_v63  ;;  %1964 = vmatprep.mubr.bf16.mxu1 %v9294_v63 }
 0x2df   :  { %1894 = vmatpush1.bf16.msra.mxu0 %v7501_v59  ;;  %1935 = vmatpush1.bf16.msra.mxu1 %v7504_v60 }
 0x2e0   :  { %1895 = vmatprep.subr.bf16.mxu0 %v7507_v61  ;;  %1936 = vmatprep.subr.bf16.mxu1 %v7510_v62 }
 0x2e3   :  { %1896 = vmatpush1.bf16.msra.mxu0 %v7087_v16  ;;  %1937 = vmatpush1.bf16.msra.mxu1 %v7089_v17  ;;  %v9335_v16 = vld [vmem:[#allocation44_spill] sm:$0xff]  ;;  %v9336_v17 = vld [vmem:[#allocation45_spill] sm:$0xff] }
 0x2e4   :  { %1897 = vmatprep.subr.bf16.mxu0 %v9304_v6  ;;  %1938 = vmatprep.subr.bf16.mxu1 %v9305_v7  ;;  %v9339_v6 = vld [vmem:[#allocation48_spill] sm:$0xff]  ;;  %v9340_v7 = vld [vmem:[#allocation49_spill] sm:$0xff] }
 0x2e7   :  { %1898 = vmatpush1.bf16.msra.mxu0 %v9306_v9  ;;  %1939 = vmatpush1.bf16.msra.mxu1 %v9307_v10  ;;  %v9341_v9 = vld [vmem:[#allocation50_spill] sm:$0xff]  ;;  %v9342_v10 = vld [vmem:[#allocation51_spill] sm:$0xff] }
 0x2e8   :  { %1899 = vmatprep.subr.bf16.mxu0 %v9308_v11  ;;  %1940 = vmatprep.subr.bf16.mxu1 %v9309_v12  ;;  %v9343_v11 = vld [vmem:[#allocation52_spill] sm:$0xff]  ;;  %v9344_v12 = vld [vmem:[#allocation53_spill] sm:$0xff] }
 0x2eb   :  { %1900 = vmatpush1.bf16.msra.mxu0 %v9310_v13  ;;  %1941 = vmatpush1.bf16.msra.mxu1 %v9311_v14  ;;  %v9345_v13 = vld [vmem:[#allocation54_spill] sm:$0xff]  ;;  %v9346_v14 = vld [vmem:[#allocation55_spill] sm:$0xff] }
 0x2ec   :  { %1901 = vmatprep.subr.bf16.mxu0 %v9334_v1  ;;  %1942 = vmatprep.subr.bf16.mxu1 %v9335_v16 }
 0x2ef   :  { %1902 = vmatpush1.bf16.msra.mxu0 %v9336_v17  ;;  %1943 = vmatpush1.bf16.msra.mxu1 %v9337_v29 }
 0x2f0   :  { %1903 = vmatprep.subr.bf16.mxu0 %v9338_v26  ;;  %1944 = vmatprep.subr.bf16.mxu1 %v9339_v6 }
 0x2f3   :  { %1904 = vmatpush1.bf16.msra.mxu0 %v9340_v7  ;;  %1945 = vmatpush1.bf16.msra.mxu1 %v9341_v9 }
 0x2f4   :  { %1905 = vmatprep.subr.bf16.mxu0 %v9342_v10  ;;  %1946 = vmatprep.subr.bf16.mxu1 %v9343_v11  ;;  %v1793_v11 = vld [vmem:[#allocation2 + $0x25] ss:$8 sm:$0xf] }
 0x2f7   :  { %1906 = vmatpush1.bf16.msra.mxu0 %v9344_v12  ;;  %1947 = vmatpush1.bf16.msra.mxu1 %v9345_v13 }
 0x2f8   :  { %1973 = vmatprep.subr.bf16.mxu0 %v9346_v14  ;;  %2014 = vmatprep.subr.bf16.mxu1 %v9347_v21 }
 0x38d   :  { %v1630_v37 = vpop.f32.mrb[24].mxu0  ;;  %v1671_v31 = vpop.f32.mrb[24].mxu1 }
 0x38e   :  { %v1632_v38 = vpop.f32.mrb[25].mxu0  ;;  %v1673_v15 = vpop.f32.mrb[25].mxu1 }
 0x38f   :  { %v1766_v28 = vcombine.low %v1630_v37, %v1632_v38  ;;  %v1767_v5 = vcombine.low %v1671_v31, %v1673_v15  ;;  %v1634_v30 = vpop.f32.mrb[26].mxu0  ;;  %v1675_v32 = vpop.f32.mrb[26].mxu1 }
 0x390   :  { %v1635_v18 = vpop.f32.mrb[27].mxu0  ;;  %v1676_v39 = vpop.f32.mrb[27].mxu1  ;;  %v1873_v30 = vld [vmem:[#allocation3] sm:$0x2] }
 0x391   :  { %v1774_v24 = vrot.slane %v1766_v28, %v7325_v34  ;;  %v1781_v36 = vrot.slane %v1767_v5, %v7325_v34  ;;  %v7552_v18 = vld [vmem:[#allocation14] ss:$16 sps:$4 sm:$0xff]   ;;  %v7555_v39 = vld [vmem:[#allocation14 + $0x8] ss:$16 sps:$4 sm:$0xff]  }
 0x393   :  { %v1782_v33 = vcombine.low %v1774_v24, %v1781_v36  ;;  %v7560_v36 = vld [vmem:[#allocation14 + $0x24] ss:$16 sps:$4 sm:$0xff]  }
 0x395   :  { %v1789_v23 = vrot.slane %v1782_v33, %v7325_v34  ;;  %v7563_v33 = vld [vmem:[#allocation14 + $0x2c] ss:$16 sps:$4 sm:$0xff]  }
 0x397   :  { %v1791_v25 = vadd.f32 %v1789_v23, %v1761_v22  ;;  %v7568_v23 = vld [vmem:[#allocation14 + $0x20] ss:$16 sps:$4 sm:$0xff]   ;;  %v7571_v22 = vld [vmem:[#allocation14 + $0x28] ss:$16 sps:$4 sm:$0xff]  }
 0x399   :  { %v6127_v27 = vmul.f32 -1.442695, %v1791_v25  ;;  %v1831_v41 = vrot.slane %v1791_v25, 3  ;;  %v7574_v25 = vld [vmem:[#allocation14 + $0x44] ss:$16 sps:$4 sm:$0xff]  }
 0x39b   :  { %6341 = vpow2.f32 %v6127_v27  ;;  %v7577_v27 = vld [vmem:[#allocation14 + $0x4c] ss:$16 sps:$4 sm:$0xff]  }
 0x3a5   :  { %v6342_v20 = vpop.eup %6341 }
 0x3a6   :  { %v1827_v40 = vadd.f32 1.0, %v6342_v20  ;;  %v7580_v20 = vld [vmem:[#allocation14 + $0x40] ss:$16 sps:$4 sm:$0xff]  }
 0x3a8   :  { %6343 = vrcp.f32 %v1827_v40  ;;  %v7583_v40 = vld [vmem:[#allocation14 + $0x48] ss:$16 sps:$4 sm:$0xff]  }
 0x3a9   :  { %6345 = vtanh.f32 %v1831_v41 }
 0x3ad   :  { %v1712_v42 = vpop.f32.mrb[28].mxu0  ;;  %v1753_v43 = vpop.f32.mrb[28].mxu1 }
 0x3ae   :  { %v1714_v44 = vpop.f32.mrb[29].mxu0  ;;  %v1755_v46 = vpop.f32.mrb[29].mxu1 }
 0x3af   :  { %v1798_v47 = vcombine.low %v1712_v42, %v1714_v44  ;;  %v1799_v48 = vcombine.low %v1753_v43, %v1755_v46  ;;  %v1716_v49 = vpop.f32.mrb[30].mxu0  ;;  %v1757_v53 = vpop.f32.mrb[30].mxu1  ;;  %v7586_v42 = vld [vmem:[#allocation14 + $0x64] ss:$16 sps:$4 sm:$0xff]   ;;  %v7589_v43 = vld [vmem:[#allocation14 + $0x6c] ss:$16 sps:$4 sm:$0xff]  }
 0x3b0   :  { %v1717_v8 = vpop.f32.mrb[31].mxu0  ;;  %v1758_v56 = vpop.f32.mrb[31].mxu1  ;;  %v7595_v49 = vld [vmem:[#allocation14 + $0x68] ss:$16 sps:$4 sm:$0xff]  }
 0x3b1   :  { %v1806_v1 = vrot.slane %v1798_v47, %v7325_v34  ;;  %v1813_v16 = vrot.slane %v1799_v48, %v7325_v34  ;;  %v7592_v48 = vld [vmem:[#allocation14 + $0x60] ss:$16 sps:$4 sm:$0xff]   ;;  %v7599_v8 = vld [vmem:[#allocation14 + $0x84] ss:$16 sps:$4 sm:$0xff]   ;;  %v7602_v56 = vld [vmem:[#allocation14 + $0x8c] ss:$16 sps:$4 sm:$0xff]  }
 0x3b2   :  { %v6344_v17 = vpop.eup %6343 }
 0x3b3   :  { %v1814_v29 = vcombine.low %v1806_v1, %v1813_v16  ;;  %v1835_v26 = vrot.slane %v6344_v17, 1  ;;  %v6346_v6 = vpop.eup %6345  ;;  %v1841_v21 = vrot.slane %v6344_v17, 2  ;;  %v7607_v16 = vld [vmem:[#allocation14 + $0x80] ss:$16 sps:$4 sm:$0xff]  }
 0x3b4   :  { %v1838_v7 = vmul.f32 %v6346_v6, %v6344_v17  ;;  %v7610_v17 = vld [vmem:[#allocation14 + $0x88] ss:$16 sps:$4 sm:$0xff]  }
 0x3b5   :  { %v1821_v9 = vrot.slane %v1814_v29, %v7325_v34  ;;  %v1837_v10 = vmul.f32 %v1835_v26, %v7428_v35  ;;  %v9348_v35 = vmov 0  ;;  %v7617_v29 = vld [vmem:[#allocation14 + $0xac] ss:$16 sps:$4 sm:$0xff]   ;;  %v7620_v26 = vld [vmem:[#allocation14 + $0xa0] ss:$16 sps:$4 sm:$0xff]  }
 0x3b6   :  { %v9349_v35 = vsel %vm7548_vm13, 4294967295, %v9348_v35  ;;  %v7623_v6 = vld [vmem:[#allocation14 + $0xa8] ss:$16 sps:$4 sm:$0xff]  }
 0x3b7   :  { %v1823_v12 = vadd.f32 %v1821_v9, %v1793_v11  ;;  %v7544_v13 = vadd.f32 %v1838_v7, %v1837_v10  ;;  %9350 = vst [vmem:[#allocation39_spill] sm:$0xff] %v9349_v35  ;;  %v7626_v7 = vld [vmem:[#allocation14 + $0xc4] ss:$16 sps:$4 sm:$0xff]   ;;  %v7629_v9 = vld [vmem:[#allocation14 + $0xcc] ss:$16 sps:$4 sm:$0xff]  }
 0x3b8   :  { %v7632_v10 = vld [vmem:[#allocation14 + $0xc0] ss:$16 sps:$4 sm:$0xff]   ;;  %v7727_v35 = vld [vmem:[#allocation14 + $0x4] ss:$16 sps:$4 sm:$0xff]  }
 0x3b9   :  { %v6128_v14 = vmul.f32 -1.442695, %v1823_v12  ;;  %6347 = vtanh.f32 %v7544_v13  ;;  %v1851_v28 = vrot.slane %v1823_v12, 3  ;;  %9376 = vst [vmem:[#allocation67_spill] sm:$0xff] %v7727_v35 }
 0x3bb   :  { %6349 = vpow2.f32 %v6128_v14 }
 0x3c3   :  { %v6348_v37 = vpop.eup %6347 }
 0x3c4   :  { %v1843_v31 = vmul.f32 %v6348_v37, %v1841_v21  ;;  %v7638_v21 = vld [vmem:[#allocation14 + $0xe0] ss:$16 sps:$4 sm:$0xff]  }
 0x3c5   :  { %v6350_v38 = vpop.eup %6349 }
 0x3c6   :  { %v1847_v15 = vadd.f32 1.0, %v6350_v38  ;;  %v1864_v5 = vpack.c.bf16 %v1843_v31, %v1843_v31  ;;  %v7661_v38 = vld [vmem:[#allocation12 + $0x40] ss:$16 sps:$4 sm:$0xff]  }
 0x3c7   :  { %9354 = vst [vmem:[#allocation41_spill] sm:$0xff] %v7661_v38 }
 0x3c8   :  { %6351 = vrcp.f32 %v1847_v15  ;;  %v1868_v32 = vrot.slane %v1864_v5, 7  ;;  %1924 = vmatmul.mubr.bf16.vlgmr.msra.gmra.mrb[32].mxu0 %v1864_v5  ;;  %1965 = vmatmul.mubr.bf16.vlgmr.msra.gmra.mrb[32].mxu1 %v1864_v5  ;;  %v7664_v15 = vld [vmem:[#allocation12 + $0x48] ss:$16 sps:$4 sm:$0xff]   ;;  %v7670_v5 = vld [vmem:[#allocation12 + $0x6c] ss:$16 sps:$4 sm:$0xff]  }
 0x3c9   :  { %1974 = vmatpush1.bf16.msra.mxu0 %v7552_v18  ;;  %2015 = vmatpush1.bf16.msra.mxu1 %v7555_v39  ;;  %6353 = vtanh.f32 %v1851_v28  ;;  %9355 = vst [vmem:[#allocation42_spill] sm:$0xff] %v7664_v15  ;;  %v7667_v28 = vld [vmem:[#allocation12 + $0x64] ss:$16 sps:$4 sm:$0xff]   ;;  %9357 = vst [vmem:[#allocation44_spill] sm:$0xff] %v7670_v5 }
 0x3ca   :  { %v1874_v24 = vsel %vm7548_vm13, %v1868_v32, %v1873_v30  ;;  %1975 = vmatprep.subr.bf16.mxu0 %v7560_v36  ;;  %2016 = vmatprep.subr.bf16.mxu1 %v7563_v33  ;;  %9356 = vst [vmem:[#allocation43_spill] sm:$0xff] %v7667_v28  ;;  %v7673_v30 = vld [vmem:[#allocation12 + $0x60] ss:$16 sps:$4 sm:$0xff]   ;;  %v7676_v32 = vld [vmem:[#allocation12 + $0x68] ss:$16 sps:$4 sm:$0xff]  }
 0x3cb   :  { %1875 = vst [vmem:[#allocation3] sm:$0x2] %v1874_v24  ;;  %2005 = vmatprep.mubr.bf16.mxu0 %v9294_v63  ;;  %2046 = vmatprep.mubr.bf16.mxu1 %v9294_v63  ;;  %9358 = vst [vmem:[#allocation45_spill] sm:$0xff] %v7673_v30  ;;  %v7679_v24 = vld [vmem:[#allocation12 + $0x84] ss:$16 sps:$4 sm:$0xff]  }
 0x3cc   :  { %9359 = vst [vmem:[#allocation46_spill] sm:$0xff] %v7676_v32  ;;  %9360 = vst [vmem:[#allocation47_spill] sm:$0xff] %v7679_v24 }
 0x3cd   :  { %1976 = vmatpush1.bf16.msra.mxu0 %v7568_v23  ;;  %2017 = vmatpush1.bf16.msra.mxu1 %v7571_v22 }
 0x3ce   :  { %1977 = vmatprep.subr.bf16.mxu0 %v7574_v25  ;;  %2018 = vmatprep.subr.bf16.mxu1 %v7577_v27 }
 0x3d1   :  { %1978 = vmatpush1.bf16.msra.mxu0 %v7580_v20  ;;  %2019 = vmatpush1.bf16.msra.mxu1 %v7583_v40 }
 0x3d2   :  { %v6352_v41 = vpop.eup %6351  ;;  %1979 = vmatprep.subr.bf16.mxu0 %v7586_v42  ;;  %2020 = vmatprep.subr.bf16.mxu1 %v7589_v43 }
 0x3d3   :  { %v1855_v44 = vrot.slane %v6352_v41, 1  ;;  %v6354_v46 = vpop.eup %6353  ;;  %v1861_v11 = vrot.slane %v6352_v41, 2 }
 0x3d4   :  { %v1858_v47 = vmul.f32 %v6354_v46, %v6352_v41  ;;  %v7682_v41 = vld [vmem:[#allocation12 + $0x8c] ss:$16 sps:$4 sm:$0xff]   ;;  %v7688_v46 = vld [vmem:[#allocation12 + $0x88] ss:$16 sps:$4 sm:$0xff]  }
 0x3d5   :  { %1980 = vmatpush1.bf16.msra.mxu0 %v7592_v48  ;;  %2021 = vmatpush1.bf16.msra.mxu1 %v7595_v49  ;;  %v1857_v53 = vmul.f32 %v1855_v44, %v7457_v45  ;;  %v7614_v45 = vld [vmem:[#allocation14 + $0xa4] ss:$16 sps:$4 sm:$0xff]   ;;  %9361 = vst [vmem:[#allocation48_spill] sm:$0xff] %v7682_v41  ;;  %v7685_v44 = vld [vmem:[#allocation12 + $0x80] ss:$16 sps:$4 sm:$0xff]   ;;  %9363 = vst [vmem:[#allocation50_spill] sm:$0xff] %v7688_v46 }
 0x3d6   :  { %1981 = vmatprep.subr.bf16.mxu0 %v7599_v8  ;;  %2022 = vmatprep.subr.bf16.mxu1 %v7602_v56  ;;  %9362 = vst [vmem:[#allocation49_spill] sm:$0xff] %v7685_v44 }
 0x3d7   :  { %v7605_v1 = vadd.f32 %v1858_v47, %v1857_v53  ;;  %v7691_v47 = vld [vmem:[#allocation12 + $0xa4] ss:$16 sps:$4 sm:$0xff]   ;;  %v7694_v53 = vld [vmem:[#allocation12 + $0xac] ss:$16 sps:$4 sm:$0xff]  }
 0x3d8   :  { %9364 = vst [vmem:[#allocation51_spill] sm:$0xff] %v7691_v47  ;;  %9365 = vst [vmem:[#allocation52_spill] sm:$0xff] %v7694_v53 }
 0x3d9   :  { %1982 = vmatpush1.bf16.msra.mxu0 %v7607_v16  ;;  %2023 = vmatpush1.bf16.msra.mxu1 %v7610_v17  ;;  %6355 = vtanh.f32 %v7605_v1 }
 0x3da   :  { %1983 = vmatprep.subr.bf16.mxu0 %v7614_v45  ;;  %2024 = vmatprep.subr.bf16.mxu1 %v7617_v29 }
 0x3dd   :  { %1984 = vmatpush1.bf16.msra.mxu0 %v7620_v26  ;;  %2025 = vmatpush1.bf16.msra.mxu1 %v7623_v6 }
 0x3de   :  { %1985 = vmatprep.subr.bf16.mxu0 %v7626_v7  ;;  %2026 = vmatprep.subr.bf16.mxu1 %v7629_v9 }
 0x3e1   :  { %1986 = vmatpush1.bf16.msra.mxu0 %v7632_v10  ;;  %2027 = vmatpush1.bf16.msra.mxu1 %v7239_v2 }
 0x3e2   :  { %1987 = vmatprep.subr.bf16.mxu0 %v7241_v3  ;;  %2028 = vmatprep.subr.bf16.mxu1 %v7244_v4  ;;  %v9351_v3 = vmov 0  ;;  %v1888_v4 = vld [vmem:[#allocation3 + $0x4] sm:$0x4] }
 0x3e3   :  { %v6356_v12 = vpop.eup %6355  ;;  %v9352_v3 = vsel %vm7645_vm0, 4294967295, %v9351_v3 }
 0x3e4   :  { %v1863_v14 = vmul.f32 %v6356_v12, %v1861_v11  ;;  %9353 = vst [vmem:[#allocation40_spill] sm:$0xff] %v9352_v3  ;;  %v7697_v11 = vld [vmem:[#allocation12 + $0xa0] ss:$16 sps:$4 sm:$0xff]   ;;  %v7700_v12 = vld [vmem:[#allocation12 + $0xa8] ss:$16 sps:$4 sm:$0xff]  }
 0x3e5   :  { %1988 = vmatpush1.bf16.msra.mxu0 %v7638_v21  ;;  %2029 = vmatpush1.bf16.msra.mxu1 %v7251_v0  ;;  %9366 = vst [vmem:[#allocation53_spill] sm:$0xff] %v7697_v11  ;;  %9367 = vst [vmem:[#allocation54_spill] sm:$0xff] %v7700_v12  ;;  %v7730_v3 = vld [vmem:[#allocation14 + $0xc] ss:$16 sps:$4 sm:$0xff]  }
 0x3e6   :  { %v1876_v37 = vpack.c.bf16 %v1863_v14, %v1863_v14  ;;  %2184 = vmatprep.subr.bf16.mxu0 %v7474_v50  ;;  %2225 = vmatprep.subr.bf16.mxu1 %v7477_v51  ;;  %v7703_v14 = vld [vmem:[#allocation12 + $0xc4] ss:$16 sps:$4 sm:$0xff]   ;;  %9377 = vst [vmem:[#allocation68_spill] sm:$0xff] %v7730_v3 }
 0x3e7   :  { %9368 = vst [vmem:[#allocation55_spill] sm:$0xff] %v7703_v14 }
 0x3e8   :  { %v1881_v2 = vshll.u32 %v1876_v37, 16  ;;  %2006 = vmatmul.mubr.bf16.vlgmr.msra.gmra.mrb[36].mxu0 %v1876_v37  ;;  %2047 = vmatmul.mubr.bf16.vlgmr.msra.gmra.mrb[36].mxu1 %v1876_v37  ;;  %v7706_v37 = vld [vmem:[#allocation12 + $0xcc] ss:$16 sps:$4 sm:$0xff]  }
 0x3e9   :  { %2185 = vmatpush1.bf16.msra.mxu0 %v7485_v54  ;;  %2226 = vmatpush1.bf16.msra.mxu1 %v7488_v55  ;;  %9369 = vst [vmem:[#allocation56_spill] sm:$0xff] %v7706_v37 }
 0x3ea   :  { %v1883_v0 = vrot.slane %v1881_v2, 6  ;;  %2186 = vmatprep.subr.bf16.mxu0 %v7493_v57  ;;  %2227 = vmatprep.subr.bf16.mxu1 %v7496_v58  ;;  %v7709_v2 = vld [vmem:[#allocation12 + $0xc0] ss:$16 sps:$4 sm:$0xff]  }
 0x3eb   :  { %2216 = vmatprep.mubr.bf16.mxu0 %v9294_v63  ;;  %2257 = vmatprep.mubr.bf16.mxu1 %v9294_v63  ;;  %9370 = vst [vmem:[#allocation61_spill] sm:$0xff] %v7709_v2 }
 0x3ec   :  { %v1889_v31 = vsel %vm7645_vm0, %v1883_v0, %v1888_v4  ;;  %v7712_v4 = vld [vmem:[#allocation12 + $0xc8] ss:$16 sps:$4 sm:$0xff]   ;;  %v7715_v0 = vld [vmem:[#allocation12 + $0xe4] ss:$16 sps:$4 sm:$0xff]  }
 0x3ed   :  { %1890 = vst [vmem:[#allocation3 + $0x4] sm:$0x4] %v1889_v31  ;;  %2187 = vmatpush1.bf16.msra.mxu0 %v7501_v59  ;;  %2228 = vmatpush1.bf16.msra.mxu1 %v7504_v60  ;;  %9371 = vst [vmem:[#allocation62_spill] sm:$0xff] %v7712_v4  ;;  %v7718_v31 = vld [vmem:[#allocation12 + $0xec] ss:$16 sps:$4 sm:$0xff]  }
 0x3ee   :  { %2188 = vmatprep.subr.bf16.mxu0 %v7507_v61  ;;  %2229 = vmatprep.subr.bf16.mxu1 %v7510_v62  ;;  %9372 = vst [vmem:[#allocation63_spill] sm:$0xff] %v7715_v0  ;;  %9373 = vst [vmem:[#allocation64_spill] sm:$0xff] %v7718_v31 }
 0x3f1   :  { %2189 = vmatpush1.bf16.msra.mxu0 %v7661_v38  ;;  %2230 = vmatpush1.bf16.msra.mxu1 %v7664_v15 }
 0x3f2   :  { %2190 = vmatprep.subr.bf16.mxu0 %v7667_v28  ;;  %2231 = vmatprep.subr.bf16.mxu1 %v7670_v5 }
 0x3f5   :  { %2191 = vmatpush1.bf16.msra.mxu0 %v7673_v30  ;;  %2232 = vmatpush1.bf16.msra.mxu1 %v7676_v32 }
 0x3f6   :  { %2192 = vmatprep.subr.bf16.mxu0 %v7679_v24  ;;  %2233 = vmatprep.subr.bf16.mxu1 %v7682_v41 }
 0x3f9   :  { %2193 = vmatpush1.bf16.msra.mxu0 %v7685_v44  ;;  %2234 = vmatpush1.bf16.msra.mxu1 %v7688_v46  ;;  %v2056_v44 = vld [vmem:[#allocation2 + $0x3] ss:$8 sm:$0xf] }
 0x3fa   :  { %2194 = vmatprep.subr.bf16.mxu0 %v7691_v47  ;;  %2235 = vmatprep.subr.bf16.mxu1 %v7694_v53 }
 0x3fd   :  { %2195 = vmatpush1.bf16.msra.mxu0 %v7697_v11  ;;  %2236 = vmatpush1.bf16.msra.mxu1 %v7700_v12 }
 0x3fe   :  { %2196 = vmatprep.subr.bf16.mxu0 %v7703_v14  ;;  %2237 = vmatprep.subr.bf16.mxu1 %v7706_v37 }
 0x401   :  { %2197 = vmatpush1.bf16.msra.mxu0 %v7709_v2  ;;  %2238 = vmatpush1.bf16.msra.mxu1 %v7712_v4 }
 0x402   :  { %2198 = vmatprep.subr.bf16.mxu0 %v7715_v0  ;;  %2239 = vmatprep.subr.bf16.mxu1 %v7718_v31 }
 0x405   :  { %2199 = vmatpush1.bf16.msra.mxu0 %v7721_v19  ;;  %2240 = vmatpush1.bf16.msra.mxu1 %v7724_v52 }
 0x406   :  { %2266 = vmatprep.subr.bf16.mxu0 %v7727_v35  ;;  %2307 = vmatprep.subr.bf16.mxu1 %v7730_v3 }
 0x49b   :  { %v1925_v0 = vpop.f32.mrb[32].mxu0  ;;  %v1966_v4 = vpop.f32.mrb[32].mxu1 }
 0x49c   :  { %v1927_v2 = vpop.f32.mrb[33].mxu0  ;;  %v1968_v31 = vpop.f32.mrb[33].mxu1 }
 0x49d   :  { %v2061_v37 = vcombine.low %v1925_v0, %v1927_v2  ;;  %v2062_v14 = vcombine.low %v1966_v4, %v1968_v31  ;;  %v1929_v12 = vpop.f32.mrb[34].mxu0  ;;  %v1970_v19 = vpop.f32.mrb[34].mxu1  ;;  %v2088_v31 = vld [vmem:[#allocation2 + $0x24] ss:$8 sm:$0xf] }
 0x49e   :  { %v1930_v11 = vpop.f32.mrb[35].mxu0  ;;  %v1971_v53 = vpop.f32.mrb[35].mxu1 }
 0x49f   :  { %v2069_v52 = vrot.slane %v2061_v37, %v7325_v34  ;;  %v2076_v47 = vrot.slane %v2062_v14, %v7325_v34 }
 0x4a1   :  { %v2077_v46 = vcombine.low %v2069_v52, %v2076_v47 }
 0x4a3   :  { %v2084_v35 = vrot.slane %v2077_v46, %v7325_v34 }
 0x4a5   :  { %v2086_v41 = vadd.f32 %v2084_v35, %v2056_v44 }
 0x4a7   :  { %v6131_v3 = vmul.f32 -1.442695, %v2086_v41  ;;  %v2126_v30 = vrot.slane %v2086_v41, 3 }
 0x4a9   :  { %6357 = vpow2.f32 %v6131_v3 }
 0x4b3   :  { %v6358_v24 = vpop.eup %6357 }
 0x4b4   :  { %v2122_v32 = vadd.f32 1.0, %v6358_v24 }
 0x4b6   :  { %6359 = vrcp.f32 %v2122_v32 }
 0x4b7   :  { %6361 = vtanh.f32 %v2126_v30 }
 0x4bb   :  { %v2007_v12 = vpop.f32.mrb[36].mxu0  ;;  %v2048_v19 = vpop.f32.mrb[36].mxu1 }
 0x4bc   :  { %v2009_v11 = vpop.f32.mrb[37].mxu0  ;;  %v2050_v53 = vpop.f32.mrb[37].mxu1 }
 0x4bd   :  { %v2093_v2 = vcombine.low %v2007_v12, %v2009_v11  ;;  %v2094_v37 = vcombine.low %v2048_v19, %v2050_v53  ;;  %v2011_v4 = vpop.f32.mrb[38].mxu0  ;;  %v2052_v14 = vpop.f32.mrb[38].mxu1 }
 0x4be   :  { %v2012_v52 = vpop.f32.mrb[39].mxu0  ;;  %v2053_v47 = vpop.f32.mrb[39].mxu1 }
 0x4bf   :  { %v2101_v46 = vrot.slane %v2093_v2, %v7325_v34  ;;  %v2108_v35 = vrot.slane %v2094_v37, %v7325_v34 }
 0x4c0   :  { %v6360_v3 = vpop.eup %6359 }
 0x4c1   :  { %v2109_v44 = vcombine.low %v2101_v46, %v2108_v35  ;;  %v2130_v24 = vrot.slane %v6360_v3, 1  ;;  %v6362_v41 = vpop.eup %6361  ;;  %v2136_v53 = vrot.slane %v6360_v3, 2 }
 0x4c2   :  { %v2133_v32 = vmul.f32 %v6362_v41, %v6360_v3  ;;  %v2170_v3 = vld [vmem:[#allocation3] sm:$0x2] }
 0x4c3   :  { %v2116_v30 = vrot.slane %v2109_v44, %v7325_v34  ;;  %v2132_v0 = vmul.f32 %v2130_v24, %v7544_v13  ;;  %v9409_v13 = vld [vmem:[#allocation46_spill] sm:$0xff] }
 0x4c5   :  { %v2118_v12 = vadd.f32 %v2116_v30, %v2088_v31  ;;  %v7740_v19 = vadd.f32 %v2133_v32, %v2132_v0 }
 0x4c7   :  { %v6132_v11 = vmul.f32 -1.442695, %v2118_v12  ;;  %6363 = vtanh.f32 %v7740_v19  ;;  %v2146_v52 = vrot.slane %v2118_v12, 3  ;;  %v7784_v12 = vld [vmem:[#allocation14 + $0xe4] ss:$16 sps:$4 sm:$0xff]  }
 0x4c9   :  { %6365 = vpow2.f32 %v6132_v11  ;;  %v7787_v11 = vld [vmem:[#allocation14 + $0xec] ss:$16 sps:$4 sm:$0xff]  }
 0x4d1   :  { %v6364_v2 = vpop.eup %6363 }
 0x4d2   :  { %v2138_v37 = vmul.f32 %v6364_v2, %v2136_v53 }
 0x4d3   :  { %v6366_v4 = vpop.eup %6365 }
 0x4d4   :  { %v2142_v14 = vadd.f32 1.0, %v6366_v4  ;;  %v2159_v47 = vpack.c.bf16 %v2138_v37, %v2138_v37  ;;  %v7791_v4 = vld [vmem:[#allocation14 + $0xe8] ss:$16 sps:$4 sm:$0xff]  }
 0x4d6   :  { %6367 = vrcp.f32 %v2142_v14  ;;  %v2164_v46 = vshll.u32 %v2159_v47, 16  ;;  %2217 = vmatmul.mubr.bf16.vlgmr.msra.gmra.mrb[40].mxu0 %v2159_v47  ;;  %2258 = vmatmul.mubr.bf16.vlgmr.msra.gmra.mrb[40].mxu1 %v2159_v47 }
 0x4d7   :  { %2267 = vmatpush1.bf16.msra.mxu0 %v7552_v18  ;;  %2308 = vmatpush1.bf16.msra.mxu1 %v7555_v39  ;;  %6369 = vtanh.f32 %v2146_v52 }
 0x4d8   :  { %v2166_v35 = vrot.slane %v2164_v46, 7  ;;  %2268 = vmatprep.subr.bf16.mxu0 %v7560_v36  ;;  %2309 = vmatprep.subr.bf16.mxu1 %v7563_v33  ;;  %v2181_v46 = vld [vmem:[#allocation3 + $0x4] sm:$0x4] }
 0x4d9   :  { %2298 = vmatprep.mubr.bf16.mxu0 %v9294_v63  ;;  %2339 = vmatprep.mubr.bf16.mxu1 %v9294_v63 }
 0x4da   :  { %v2171_v44 = vsel %vm7744_vm4, %v2166_v35, %v2170_v3  ;;  %v9382_v3 = vld [vmem:[#allocation45_spill] sm:$0xff] }
 0x4db   :  { %2172 = vst [vmem:[#allocation3] sm:$0x2] %v2171_v44  ;;  %2269 = vmatpush1.bf16.msra.mxu0 %v7568_v23  ;;  %2310 = vmatpush1.bf16.msra.mxu1 %v7571_v22  ;;  %v9383_v44 = vld [vmem:[#allocation46_spill] sm:$0xff] }
 0x4dc   :  { %2270 = vmatprep.subr.bf16.mxu0 %v7574_v25  ;;  %2311 = vmatprep.subr.bf16.mxu1 %v7577_v27 }
 0x4df   :  { %2271 = vmatpush1.bf16.msra.mxu0 %v7580_v20  ;;  %2312 = vmatpush1.bf16.msra.mxu1 %v7583_v40 }
 0x4e0   :  { %v6368_v24 = vpop.eup %6367  ;;  %2272 = vmatprep.subr.bf16.mxu0 %v7586_v42  ;;  %2313 = vmatprep.subr.bf16.mxu1 %v7589_v43 }
 0x4e1   :  { %v2150_v41 = vrot.slane %v6368_v24, 1  ;;  %v6370_v32 = vpop.eup %6369  ;;  %v2156_v53 = vrot.slane %v6368_v24, 2 }
 0x4e2   :  { %v2153_v30 = vmul.f32 %v6370_v32, %v6368_v24  ;;  %v9384_v24 = vld [vmem:[#allocation47_spill] sm:$0xff]  ;;  %v9386_v32 = vld [vmem:[#allocation49_spill] sm:$0xff] }
 0x4e3   :  { %2273 = vmatpush1.bf16.msra.mxu0 %v7592_v48  ;;  %2314 = vmatpush1.bf16.msra.mxu1 %v7595_v49  ;;  %v2152_v0 = vmul.f32 %v2150_v41, %v7605_v1  ;;  %v7781_v1 = vld [vmem:[#allocation14 + $0xc8] ss:$16 sps:$4 sm:$0xff]  }
 0x4e4   :  { %2274 = vmatprep.subr.bf16.mxu0 %v7599_v8  ;;  %2315 = vmatprep.subr.bf16.mxu1 %v7602_v56  ;;  %v9385_v41 = vld [vmem:[#allocation48_spill] sm:$0xff] }
 0x4e5   :  { %v7769_v31 = vadd.f32 %v2153_v30, %v2152_v0  ;;  %v9387_v30 = vld [vmem:[#allocation50_spill] sm:$0xff]  ;;  %v9388_v0 = vld [vmem:[#allocation51_spill] sm:$0xff] }
 0x4e7   :  { %2275 = vmatpush1.bf16.msra.mxu0 %v7607_v16  ;;  %2316 = vmatpush1.bf16.msra.mxu1 %v7610_v17  ;;  %6371 = vtanh.f32 %v7769_v31 }
 0x4e8   :  { %2276 = vmatprep.subr.bf16.mxu0 %v7614_v45  ;;  %2317 = vmatprep.subr.bf16.mxu1 %v7617_v29 }
 0x4eb   :  { %2277 = vmatpush1.bf16.msra.mxu0 %v7620_v26  ;;  %2318 = vmatpush1.bf16.msra.mxu1 %v7623_v6 }
 0x4ec   :  { %2278 = vmatprep.subr.bf16.mxu0 %v7626_v7  ;;  %2319 = vmatprep.subr.bf16.mxu1 %v7629_v9 }
 0x4ef   :  { %2279 = vmatpush1.bf16.msra.mxu0 %v7632_v10  ;;  %2320 = vmatpush1.bf16.msra.mxu1 %v7781_v1 }
 0x4f0   :  { %2280 = vmatprep.subr.bf16.mxu0 %v7784_v12  ;;  %2321 = vmatprep.subr.bf16.mxu1 %v7787_v11 }
 0x4f1   :  { %v6372_v2 = vpop.eup %6371 }
 0x4f2   :  { %v2158_v37 = vmul.f32 %v6372_v2, %v2156_v53  ;;  %v9389_v53 = vld [vmem:[#allocation52_spill] sm:$0xff]  ;;  %v9390_v2 = vld [vmem:[#allocation53_spill] sm:$0xff] }
 0x4f3   :  { %2281 = vmatpush1.bf16.msra.mxu0 %v7638_v21  ;;  %2322 = vmatpush1.bf16.msra.mxu1 %v7791_v4 }
 0x4f4   :  { %v2173_v14 = vpack.c.bf16 %v2158_v37, %v2158_v37  ;;  %2473 = vmatprep.subr.bf16.mxu0 %v7474_v50  ;;  %2514 = vmatprep.subr.bf16.mxu1 %v7477_v51  ;;  %v9391_v37 = vld [vmem:[#allocation54_spill] sm:$0xff] }
 0x4f6   :  { %v2177_v47 = vrot.slane %v2173_v14, 6  ;;  %2299 = vmatmul.mubr.bf16.vlgmr.msra.gmra.mrb[44].mxu0 %v2173_v14  ;;  %2340 = vmatmul.mubr.bf16.vlgmr.msra.gmra.mrb[44].mxu1 %v2173_v14  ;;  %v9392_v14 = vld [vmem:[#allocation55_spill] sm:$0xff] }
 0x4f7   :  { %2474 = vmatpush1.bf16.msra.mxu0 %v7485_v54  ;;  %2515 = vmatpush1.bf16.msra.mxu1 %v7488_v55 }
 0x4f8   :  { %v2182_v35 = vsel %vm7797_vm7, %v2177_v47, %v2181_v46  ;;  %2475 = vmatprep.subr.bf16.mxu0 %v7493_v57  ;;  %2516 = vmatprep.subr.bf16.mxu1 %v7496_v58  ;;  %v9393_v47 = vld [vmem:[#allocation56_spill] sm:$0xff]  ;;  %v9394_v46 = vld [vmem:[#allocation61_spill] sm:$0xff] }
 0x4f9   :  { %2183 = vst [vmem:[#allocation3 + $0x4] sm:$0x4] %v2182_v35  ;;  %2505 = vmatprep.mubr.bf16.mxu0 %v9294_v63  ;;  %2546 = vmatprep.mubr.bf16.mxu1 %v9294_v63  ;;  %v9395_v35 = vld [vmem:[#allocation62_spill] sm:$0xff] }
 0x4fb   :  { %2476 = vmatpush1.bf16.msra.mxu0 %v7501_v59  ;;  %2517 = vmatpush1.bf16.msra.mxu1 %v7504_v60 }
 0x4fc   :  { %2477 = vmatprep.subr.bf16.mxu0 %v7507_v61  ;;  %2518 = vmatprep.subr.bf16.mxu1 %v7510_v62 }
 0x4ff   :  { %2478 = vmatpush1.bf16.msra.mxu0 %v7661_v38  ;;  %2519 = vmatpush1.bf16.msra.mxu1 %v7664_v15 }
 0x500   :  { %2479 = vmatprep.subr.bf16.mxu0 %v7667_v28  ;;  %2520 = vmatprep.subr.bf16.mxu1 %v7670_v5 }
 0x503   :  { %2480 = vmatpush1.bf16.msra.mxu0 %v9382_v3  ;;  %2521 = vmatpush1.bf16.msra.mxu1 %v9383_v44 }
 0x504   :  { %2481 = vmatprep.subr.bf16.mxu0 %v9384_v24  ;;  %2522 = vmatprep.subr.bf16.mxu1 %v9385_v41  ;;  %v9396_v41 = vld [vmem:[#allocation63_spill] sm:$0xff] }
 0x507   :  { %2482 = vmatpush1.bf16.msra.mxu0 %v9386_v32  ;;  %2523 = vmatpush1.bf16.msra.mxu1 %v9387_v30  ;;  %v9397_v32 = vld [vmem:[#allocation64_spill] sm:$0xff]  ;;  %v9398_v30 = vld [vmem:[#allocation65_spill] sm:$0xff] }
 0x508   :  { %2483 = vmatprep.subr.bf16.mxu0 %v9388_v0  ;;  %2524 = vmatprep.subr.bf16.mxu1 %v9389_v53  ;;  %v9399_v0 = vld [vmem:[#allocation66_spill] sm:$0xff]  ;;  %v9400_v53 = vld [vmem:[#allocation67_spill] sm:$0xff] }
 0x50b   :  { %2484 = vmatpush1.bf16.msra.mxu0 %v9390_v2  ;;  %2525 = vmatpush1.bf16.msra.mxu1 %v9391_v37  ;;  %v9401_v2 = vld [vmem:[#allocation68_spill] sm:$0xff] }
 0x50c   :  { %2485 = vmatprep.subr.bf16.mxu0 %v9392_v14  ;;  %2526 = vmatprep.subr.bf16.mxu1 %v9393_v47 }
 0x50f   :  { %2486 = vmatpush1.bf16.msra.mxu0 %v9394_v46  ;;  %2527 = vmatpush1.bf16.msra.mxu1 %v9395_v35 }
 0x510   :  { %2487 = vmatprep.subr.bf16.mxu0 %v9396_v41  ;;  %2528 = vmatprep.subr.bf16.mxu1 %v9397_v32 }
 0x513   :  { %2488 = vmatpush1.bf16.msra.mxu0 %v9398_v30  ;;  %2529 = vmatpush1.bf16.msra.mxu1 %v9399_v0 }
 0x514   :  { %2555 = vmatprep.subr.bf16.mxu0 %v9400_v53  ;;  %2596 = vmatprep.subr.bf16.mxu1 %v9401_v2  ;;  %v2349_v53 = vld [vmem:[#allocation2 + $0x4] ss:$8 sm:$0xf] }
 0x5a9   :  { %v2218_v37 = vpop.f32.mrb[40].mxu0  ;;  %v2259_v14 = vpop.f32.mrb[40].mxu1 }
 0x5aa   :  { %v2220_v24 = vpop.f32.mrb[41].mxu0  ;;  %v2261_v47 = vpop.f32.mrb[41].mxu1 }
 0x5ab   :  { %v2354_v44 = vcombine.low %v2218_v37, %v2220_v24  ;;  %v2355_v46 = vcombine.low %v2259_v14, %v2261_v47  ;;  %v2222_v3 = vpop.f32.mrb[42].mxu0  ;;  %v2263_v35 = vpop.f32.mrb[42].mxu1 }
 0x5ac   :  { %v2223_v5 = vpop.f32.mrb[43].mxu0  ;;  %v2264_v41 = vpop.f32.mrb[43].mxu1  ;;  %v2381_v35 = vld [vmem:[#allocation2 + $0x23] ss:$8 sm:$0xf] }
 0x5ad   :  { %v2362_v32 = vrot.slane %v2354_v44, %v7325_v34  ;;  %v2369_v30 = vrot.slane %v2355_v46, %v7325_v34 }
 0x5af   :  { %v2370_v28 = vcombine.low %v2362_v32, %v2369_v30 }
 0x5b1   :  { %v2377_v0 = vrot.slane %v2370_v28, %v7325_v34 }
 0x5b3   :  { %v2379_v15 = vadd.f32 %v2377_v0, %v2349_v53 }
 0x5b5   :  { %v6135_v2 = vmul.f32 -1.442695, %v2379_v15  ;;  %v2419_v61 = vrot.slane %v2379_v15, 3 }
 0x5b7   :  { %6373 = vpow2.f32 %v6135_v2 }
 0x5c1   :  { %v6374_v38 = vpop.eup %6373 }
 0x5c2   :  { %v2415_v62 = vadd.f32 1.0, %v6374_v38 }
 0x5c4   :  { %6375 = vrcp.f32 %v2415_v62 }
 0x5c5   :  { %6377 = vtanh.f32 %v2419_v61 }
 0x5c9   :  { %v2300_v3 = vpop.f32.mrb[44].mxu0  ;;  %v2341_v24 = vpop.f32.mrb[44].mxu1 }
 0x5ca   :  { %v2302_v5 = vpop.f32.mrb[45].mxu0  ;;  %v2343_v41 = vpop.f32.mrb[45].mxu1 }
 0x5cb   :  { %v2386_v37 = vcombine.low %v2300_v3, %v2302_v5  ;;  %v2387_v44 = vcombine.low %v2341_v24, %v2343_v41  ;;  %v2304_v14 = vpop.f32.mrb[46].mxu0  ;;  %v2345_v47 = vpop.f32.mrb[46].mxu1 }
 0x5cc   :  { %v2305_v32 = vpop.f32.mrb[47].mxu0  ;;  %v2346_v30 = vpop.f32.mrb[47].mxu1 }
 0x5cd   :  { %v2394_v28 = vrot.slane %v2386_v37, %v7325_v34  ;;  %v2401_v0 = vrot.slane %v2387_v44, %v7325_v34 }
 0x5ce   :  { %v6376_v53 = vpop.eup %6375 }
 0x5cf   :  { %v2402_v2 = vcombine.low %v2394_v28, %v2401_v0  ;;  %v2423_v38 = vrot.slane %v6376_v53, 1  ;;  %v6378_v15 = vpop.eup %6377  ;;  %v2429_v41 = vrot.slane %v6376_v53, 2  ;;  %v2458_v28 = vld [vmem:[#allocation3] sm:$0x4] }
 0x5d0   :  { %v2426_v62 = vmul.f32 %v6378_v15, %v6376_v53 }
 0x5d1   :  { %v2409_v61 = vrot.slane %v2402_v2, %v7325_v34  ;;  %v2425_v46 = vmul.f32 %v2423_v38, %v7740_v19 }
 0x5d3   :  { %v2411_v3 = vadd.f32 %v2409_v61, %v2381_v35  ;;  %v7844_v24 = vadd.f32 %v2426_v62, %v2425_v46 }
 0x5d5   :  { %v6136_v5 = vmul.f32 -1.442695, %v2411_v3  ;;  %6379 = vtanh.f32 %v7844_v24  ;;  %v2439_v32 = vrot.slane %v2411_v3, 3 }
 0x5d7   :  { %6381 = vpow2.f32 %v6136_v5  ;;  %v2470_v5 = vld [vmem:[#allocation3 + $0x4] sm:$0x2] }
 0x5df   :  { %v6380_v37 = vpop.eup %6379 }
 0x5e0   :  { %v2431_v44 = vmul.f32 %v6380_v37, %v2429_v41  ;;  %v9407_v37 = vld [vmem:[#allocation44_spill] sm:$0xff] }
 0x5e1   :  { %v6382_v14 = vpop.eup %6381 }
 0x5e2   :  { %v2435_v47 = vadd.f32 1.0, %v6382_v14  ;;  %v2452_v30 = vpack.c.bf16 %v2431_v44, %v2431_v44  ;;  %v9408_v44 = vld [vmem:[#allocation45_spill] sm:$0xff]  ;;  %v9410_v14 = vld [vmem:[#allocation47_spill] sm:$0xff] }
 0x5e4   :  { %6383 = vrcp.f32 %v2435_v47  ;;  %v2456_v0 = vrot.slane %v2452_v30, 6  ;;  %2506 = vmatmul.mubr.bf16.vlgmr.msra.gmra.mrb[48].mxu0 %v2452_v30  ;;  %2547 = vmatmul.mubr.bf16.vlgmr.msra.gmra.mrb[48].mxu1 %v2452_v30  ;;  %v9413_v47 = vld [vmem:[#allocation50_spill] sm:$0xff]  ;;  %v9415_v30 = vld [vmem:[#allocation52_spill] sm:$0xff] }
 0x5e5   :  { %2556 = vmatpush1.bf16.msra.mxu0 %v7552_v18  ;;  %2597 = vmatpush1.bf16.msra.mxu1 %v7555_v39  ;;  %6385 = vtanh.f32 %v2439_v32  ;;  %v9414_v32 = vld [vmem:[#allocation51_spill] sm:$0xff] }
 0x5e6   :  { %v2459_v19 = vsel %vm7797_vm7, %v2456_v0, %v2458_v28  ;;  %2557 = vmatprep.subr.bf16.mxu0 %v7560_v36  ;;  %2598 = vmatprep.subr.bf16.mxu1 %v7563_v33  ;;  %v9416_v28 = vld [vmem:[#allocation53_spill] sm:$0xff]  ;;  %v9417_v0 = vld [vmem:[#allocation54_spill] sm:$0xff] }
 0x5e7   :  { %2460 = vst [vmem:[#allocation3] sm:$0x4] %v2459_v19  ;;  %2587 = vmatprep.mubr.bf16.mxu0 %v9294_v63  ;;  %2628 = vmatprep.mubr.bf16.mxu1 %v9294_v63  ;;  %v9418_v19 = vld [vmem:[#allocation55_spill] sm:$0xff] }
 0x5e9   :  { %2558 = vmatpush1.bf16.msra.mxu0 %v7568_v23  ;;  %2599 = vmatpush1.bf16.msra.mxu1 %v7571_v22 }
 0x5ea   :  { %2559 = vmatprep.subr.bf16.mxu0 %v7574_v25  ;;  %2600 = vmatprep.subr.bf16.mxu1 %v7577_v27 }
 0x5ed   :  { %2560 = vmatpush1.bf16.msra.mxu0 %v7580_v20  ;;  %2601 = vmatpush1.bf16.msra.mxu1 %v7583_v40 }
 0x5ee   :  { %v6384_v52 = vpop.eup %6383  ;;  %2561 = vmatprep.subr.bf16.mxu0 %v7586_v42  ;;  %2602 = vmatprep.subr.bf16.mxu1 %v7589_v43 }
 0x5ef   :  { %v2443_v53 = vrot.slane %v6384_v52, 1  ;;  %v6386_v2 = vpop.eup %6385 }
 0x5f0   :  { %v2446_v38 = vmul.f32 %v6386_v2, %v6384_v52  ;;  %v9421_v2 = vld [vmem:[#allocation62_spill] sm:$0xff] }
 0x5f1   :  { %2562 = vmatpush1.bf16.msra.mxu0 %v7592_v48  ;;  %2603 = vmatpush1.bf16.msra.mxu1 %v7595_v49  ;;  %v2445_v15 = vmul.f32 %v2443_v53, %v7769_v31  ;;  %v2449_v31 = vrot.slane %v6384_v52, 2  ;;  %v9419_v52 = vld [vmem:[#allocation56_spill] sm:$0xff]  ;;  %v9420_v53 = vld [vmem:[#allocation61_spill] sm:$0xff] }
 0x5f2   :  { %2563 = vmatprep.subr.bf16.mxu0 %v7599_v8  ;;  %2604 = vmatprep.subr.bf16.mxu1 %v7602_v56 }
 0x5f3   :  { %v7868_v62 = vadd.f32 %v2446_v38, %v2445_v15  ;;  %v9422_v38 = vld [vmem:[#allocation63_spill] sm:$0xff]  ;;  %v9423_v15 = vld [vmem:[#allocation64_spill] sm:$0xff] }
 0x5f5   :  { %2564 = vmatpush1.bf16.msra.mxu0 %v7607_v16  ;;  %2605 = vmatpush1.bf16.msra.mxu1 %v7610_v17  ;;  %6387 = vtanh.f32 %v7868_v62 }
 0x5f6   :  { %2565 = vmatprep.subr.bf16.mxu0 %v7614_v45  ;;  %2606 = vmatprep.subr.bf16.mxu1 %v7617_v29 }
 0x5f9   :  { %2566 = vmatpush1.bf16.msra.mxu0 %v7620_v26  ;;  %2607 = vmatpush1.bf16.msra.mxu1 %v7623_v6 }
 0x5fa   :  { %2567 = vmatprep.subr.bf16.mxu0 %v7626_v7  ;;  %2608 = vmatprep.subr.bf16.mxu1 %v7629_v9 }
 0x5fd   :  { %2568 = vmatpush1.bf16.msra.mxu0 %v7632_v10  ;;  %2609 = vmatpush1.bf16.msra.mxu1 %v7781_v1 }
 0x5fe   :  { %2569 = vmatprep.subr.bf16.mxu0 %v7784_v12  ;;  %2610 = vmatprep.subr.bf16.mxu1 %v7787_v11 }
 0x5ff   :  { %v6388_v61 = vpop.eup %6387 }
 0x600   :  { %v2451_v46 = vmul.f32 %v6388_v61, %v2449_v31  ;;  %v9424_v31 = vld [vmem:[#allocation65_spill] sm:$0xff]  ;;  %v9425_v61 = vld [vmem:[#allocation66_spill] sm:$0xff] }
 0x601   :  { %2570 = vmatpush1.bf16.msra.mxu0 %v7638_v21  ;;  %2611 = vmatpush1.bf16.msra.mxu1 %v7791_v4 }
 0x602   :  { %v2461_v35 = vpack.c.bf16 %v2451_v46, %v2451_v46  ;;  %2762 = vmatprep.subr.bf16.mxu0 %v7474_v50  ;;  %2803 = vmatprep.subr.bf16.mxu1 %v7477_v51  ;;  %v9402_v51 = vld [vmem:[#allocation37_spill] sm:$0xff]  ;;  %v9426_v46 = vld [vmem:[#allocation67_spill] sm:$0xff] }
 0x604   :  { %v2466_v3 = vshll.u32 %v2461_v35, 16  ;;  %2588 = vmatmul.mubr.bf16.vlgmr.msra.gmra.mrb[52].mxu0 %v2461_v35  ;;  %2629 = vmatmul.mubr.bf16.vlgmr.msra.gmra.mrb[52].mxu1 %v2461_v35  ;;  %v9427_v35 = vld [vmem:[#allocation68_spill] sm:$0xff] }
 0x605   :  { %2763 = vmatpush1.bf16.msra.mxu0 %v7485_v54  ;;  %2804 = vmatpush1.bf16.msra.mxu1 %v7488_v55  ;;  %v9403_v54 = vld [vmem:[#allocation38_spill] sm:$0xff]  ;;  %v9404_v55 = vld [vmem:[#allocation41_spill] sm:$0xff] }
 0x606   :  { %v2468_v41 = vrot.slane %v2466_v3, 7  ;;  %2764 = vmatprep.subr.bf16.mxu0 %v7493_v57  ;;  %2805 = vmatprep.subr.bf16.mxu1 %v7496_v58  ;;  %v9405_v57 = vld [vmem:[#allocation42_spill] sm:$0xff]  ;;  %v9406_v58 = vld [vmem:[#allocation43_spill] sm:$0xff] }
 0x607   :  { %2794 = vmatprep.mubr.bf16.mxu0 %v9294_v63  ;;  %2835 = vmatprep.mubr.bf16.mxu1 %v9294_v63 }
 0x608   :  { %v2471_v50 = vsel %vm7744_vm4, %v2468_v41, %v2470_v5 }
 0x609   :  { %2472 = vst [vmem:[#allocation3 + $0x4] sm:$0x2] %v2471_v50  ;;  %2765 = vmatpush1.bf16.msra.mxu0 %v7501_v59  ;;  %2806 = vmatpush1.bf16.msra.mxu1 %v7504_v60  ;;  %v9411_v59 = vld [vmem:[#allocation48_spill] sm:$0xff]  ;;  %v9412_v60 = vld [vmem:[#allocation49_spill] sm:$0xff] }
 0x60a   :  { %2766 = vmatprep.subr.bf16.mxu0 %v9402_v51  ;;  %2807 = vmatprep.subr.bf16.mxu1 %v9403_v54 }
 0x60d   :  { %2767 = vmatpush1.bf16.msra.mxu0 %v9404_v55  ;;  %2808 = vmatpush1.bf16.msra.mxu1 %v9405_v57 }
 0x60e   :  { %2768 = vmatprep.subr.bf16.mxu0 %v9406_v58  ;;  %2809 = vmatprep.subr.bf16.mxu1 %v9407_v37 }
 0x611   :  { %2769 = vmatpush1.bf16.msra.mxu0 %v9408_v44  ;;  %2810 = vmatpush1.bf16.msra.mxu1 %v9409_v13 }
 0x612   :  { %2770 = vmatprep.subr.bf16.mxu0 %v9410_v14  ;;  %2811 = vmatprep.subr.bf16.mxu1 %v9411_v59 }
 0x615   :  { %2771 = vmatpush1.bf16.msra.mxu0 %v9412_v60  ;;  %2812 = vmatpush1.bf16.msra.mxu1 %v9413_v47 }
 0x616   :  { %2772 = vmatprep.subr.bf16.mxu0 %v9414_v32  ;;  %2813 = vmatprep.subr.bf16.mxu1 %v9415_v30 }
 0x619   :  { %2773 = vmatpush1.bf16.msra.mxu0 %v9416_v28  ;;  %2814 = vmatpush1.bf16.msra.mxu1 %v9417_v0 }
 0x61a   :  { %2774 = vmatprep.subr.bf16.mxu0 %v9418_v19  ;;  %2815 = vmatprep.subr.bf16.mxu1 %v9419_v52 }
 0x61d   :  { %2775 = vmatpush1.bf16.msra.mxu0 %v9420_v53  ;;  %2816 = vmatpush1.bf16.msra.mxu1 %v9421_v2 }
 0x61e   :  { %2776 = vmatprep.subr.bf16.mxu0 %v9422_v38  ;;  %2817 = vmatprep.subr.bf16.mxu1 %v9423_v15 }
 0x621   :  { %2777 = vmatpush1.bf16.msra.mxu0 %v9424_v31  ;;  %2818 = vmatpush1.bf16.msra.mxu1 %v9425_v61 }
 0x622   :  { %2844 = vmatprep.subr.bf16.mxu0 %v9426_v46  ;;  %2885 = vmatprep.subr.bf16.mxu1 %v9427_v35  ;;  %v2638_v46 = vld [vmem:[#allocation2 + $0x5] ss:$8 sm:$0xf] }
 0x6b7   :  { %v2507_v3 = vpop.f32.mrb[48].mxu0  ;;  %v2548_v5 = vpop.f32.mrb[48].mxu1 }
 0x6b8   :  { %v2509_v41 = vpop.f32.mrb[49].mxu0  ;;  %v2550_v50 = vpop.f32.mrb[49].mxu1 }
 0x6b9   :  { %v2643_v51 = vcombine.low %v2507_v3, %v2509_v41  ;;  %v2644_v54 = vcombine.low %v2548_v5, %v2550_v50  ;;  %v2511_v53 = vpop.f32.mrb[50].mxu0  ;;  %v2552_v2 = vpop.f32.mrb[50].mxu1 }
 0x6ba   :  { %v2512_v52 = vpop.f32.mrb[51].mxu0  ;;  %v2553_v38 = vpop.f32.mrb[51].mxu1 }
 0x6bb   :  { %v2651_v15 = vrot.slane %v2643_v51, %v7325_v34  ;;  %v2658_v31 = vrot.slane %v2644_v54, %v7325_v34  ;;  %v2670_v54 = vld [vmem:[#allocation2 + $0x22] ss:$8 sm:$0xf] }
 0x6bd   :  { %v2659_v19 = vcombine.low %v2651_v15, %v2658_v31 }
 0x6bf   :  { %v2666_v61 = vrot.slane %v2659_v19, %v7325_v34 }
 0x6c1   :  { %v2668_v0 = vadd.f32 %v2666_v61, %v2638_v46 }
 0x6c3   :  { %v6139_v35 = vmul.f32 -1.442695, %v2668_v0  ;;  %v2708_v32 = vrot.slane %v2668_v0, 3 }
 0x6c5   :  { %6389 = vpow2.f32 %v6139_v35 }
 0x6cf   :  { %v6390_v28 = vpop.eup %6389 }
 0x6d0   :  { %v2704_v30 = vadd.f32 1.0, %v6390_v28 }
 0x6d2   :  { %6391 = vrcp.f32 %v2704_v30 }
 0x6d3   :  { %6393 = vtanh.f32 %v2708_v32 }
 0x6d7   :  { %v2589_v53 = vpop.f32.mrb[52].mxu0  ;;  %v2630_v2 = vpop.f32.mrb[52].mxu1 }
 0x6d8   :  { %v2591_v52 = vpop.f32.mrb[53].mxu0  ;;  %v2632_v38 = vpop.f32.mrb[53].mxu1 }
 0x6d9   :  { %v2675_v3 = vcombine.low %v2589_v53, %v2591_v52  ;;  %v2676_v5 = vcombine.low %v2630_v2, %v2632_v38  ;;  %v2593_v41 = vpop.f32.mrb[54].mxu0  ;;  %v2634_v50 = vpop.f32.mrb[54].mxu1 }
 0x6da   :  { %v2594_v15 = vpop.f32.mrb[55].mxu0  ;;  %v2635_v31 = vpop.f32.mrb[55].mxu1 }
 0x6db   :  { %v2683_v19 = vrot.slane %v2675_v3, %v7325_v34  ;;  %v2690_v61 = vrot.slane %v2676_v5, %v7325_v34 }
 0x6dc   :  { %v6392_v46 = vpop.eup %6391 }
 0x6dd   :  { %v2691_v35 = vcombine.low %v2683_v19, %v2690_v61  ;;  %v2712_v28 = vrot.slane %v6392_v46, 1  ;;  %v6394_v0 = vpop.eup %6393  ;;  %v2718_v38 = vrot.slane %v6392_v46, 2  ;;  %v2750_v61 = vld [vmem:[#allocation3] sm:$0x4] }
 0x6de   :  { %v2715_v30 = vmul.f32 %v6394_v0, %v6392_v46 }
 0x6df   :  { %v2698_v32 = vrot.slane %v2691_v35, %v7325_v34  ;;  %v2714_v51 = vmul.f32 %v2712_v28, %v7844_v24  ;;  %v9443_v28 = vld [vmem:[#allocation68_spill] sm:$0xff] }
 0x6e1   :  { %v2700_v53 = vadd.f32 %v2698_v32, %v2670_v54  ;;  %v7930_v2 = vadd.f32 %v2715_v30, %v2714_v51 }
 0x6e3   :  { %v6140_v52 = vmul.f32 -1.442695, %v2700_v53  ;;  %6395 = vtanh.f32 %v7930_v2  ;;  %v2728_v15 = vrot.slane %v2700_v53, 3 }
 0x6e5   :  { %6397 = vpow2.f32 %v6140_v52 }
 0x6ed   :  { %v6396_v3 = vpop.eup %6395 }
 0x6ee   :  { %v2720_v5 = vmul.f32 %v6396_v3, %v2718_v38 }
 0x6ef   :  { %v6398_v41 = vpop.eup %6397 }
 0x6f0   :  { %v2724_v50 = vadd.f32 1.0, %v6398_v41  ;;  %v2741_v31 = vpack.c.bf16 %v2720_v5, %v2720_v5 }
 0x6f2   :  { %6399 = vrcp.f32 %v2724_v50  ;;  %v2746_v19 = vshll.u32 %v2741_v31, 16  ;;  %2795 = vmatmul.mubr.bf16.vlgmr.msra.gmra.mrb[56].mxu0 %v2741_v31  ;;  %2836 = vmatmul.mubr.bf16.vlgmr.msra.gmra.mrb[56].mxu1 %v2741_v31 }
 0x6f3   :  { %2845 = vmatpush1.bf16.msra.mxu0 %v7552_v18  ;;  %2886 = vmatpush1.bf16.msra.mxu1 %v7555_v39  ;;  %6401 = vtanh.f32 %v2728_v15 }
 0x6f4   :  { %v2748_v24 = vrot.slane %v2746_v19, 6  ;;  %2846 = vmatprep.subr.bf16.mxu0 %v7560_v36  ;;  %2887 = vmatprep.subr.bf16.mxu1 %v7563_v33  ;;  %v2927_v19 = vld [vmem:[#allocation2 + $0x6] ss:$8 sm:$0xf] }
 0x6f5   :  { %2876 = vmatprep.mubr.bf16.mxu0 %v9294_v63  ;;  %2917 = vmatprep.mubr.bf16.mxu1 %v9294_v63 }
 0x6f6   :  { %v2751_v35 = vsel %vm7645_vm0, %v2748_v24, %v2750_v61 }
 0x6f7   :  { %2752 = vst [vmem:[#allocation3] sm:$0x4] %v2751_v35  ;;  %2847 = vmatpush1.bf16.msra.mxu0 %v7568_v23  ;;  %2888 = vmatpush1.bf16.msra.mxu1 %v7571_v22 }
 0x6f8   :  { %2848 = vmatprep.subr.bf16.mxu0 %v7574_v25  ;;  %2889 = vmatprep.subr.bf16.mxu1 %v7577_v27 }
 0x6fb   :  { %2849 = vmatpush1.bf16.msra.mxu0 %v7580_v20  ;;  %2890 = vmatpush1.bf16.msra.mxu1 %v7583_v40 }
 0x6fc   :  { %v6400_v18 = vpop.eup %6399  ;;  %2850 = vmatprep.subr.bf16.mxu0 %v7586_v42  ;;  %2891 = vmatprep.subr.bf16.mxu1 %v7589_v43  ;;  %v6501_v42 = vld [vmem:[#allocation12 + $0x4] ss:$16 sps:$4 sm:$0xff]   ;;  %v6502_v43 = vld [vmem:[#allocation12 + $0xc] ss:$16 sps:$4 sm:$0xff]  }
 0x6fd   :  { %v2732_v39 = vrot.slane %v6400_v18, 1  ;;  %v6402_v36 = vpop.eup %6401  ;;  %v2738_v25 = vrot.slane %v6400_v18, 2 }
 0x6fe   :  { %v2735_v33 = vmul.f32 %v6402_v36, %v6400_v18 }
 0x6ff   :  { %2851 = vmatpush1.bf16.msra.mxu0 %v7592_v48  ;;  %2892 = vmatpush1.bf16.msra.mxu1 %v7595_v49  ;;  %v2734_v23 = vmul.f32 %v2732_v39, %v7868_v62  ;;  %v2759_v49 = vld [vmem:[#allocation3 + $0x4] sm:$0x2]  ;;  %v9432_v62 = vld [vmem:[#allocation53_spill] sm:$0xff] }
 0x700   :  { %2852 = vmatprep.subr.bf16.mxu0 %v7599_v8  ;;  %2893 = vmatprep.subr.bf16.mxu1 %v7602_v56  ;;  %v6503_v8 = vld [vmem:[#allocation12] ss:$16 sps:$4 sm:$0xff]   ;;  %v6504_v56 = vld [vmem:[#allocation12 + $0x8] ss:$16 sps:$4 sm:$0xff]  }
 0x701   :  { %v7954_v22 = vadd.f32 %v2735_v33, %v2734_v23 }
 0x703   :  { %2853 = vmatpush1.bf16.msra.mxu0 %v7607_v16  ;;  %2894 = vmatpush1.bf16.msra.mxu1 %v7610_v17  ;;  %6403 = vtanh.f32 %v7954_v22 }
 0x704   :  { %2854 = vmatprep.subr.bf16.mxu0 %v7614_v45  ;;  %2895 = vmatprep.subr.bf16.mxu1 %v7617_v29  ;;  %v6505_v45 = vld [vmem:[#allocation12 + $0x24] ss:$16 sps:$4 sm:$0xff]   ;;  %v6506_v29 = vld [vmem:[#allocation12 + $0x2c] ss:$16 sps:$4 sm:$0xff]  }
 0x707   :  { %2855 = vmatpush1.bf16.msra.mxu0 %v7620_v26  ;;  %2896 = vmatpush1.bf16.msra.mxu1 %v7623_v6  ;;  %v6507_v26 = vld [vmem:[#allocation12 + $0x20] ss:$16 sps:$4 sm:$0xff]   ;;  %v6508_v6 = vld [vmem:[#allocation12 + $0x28] ss:$16 sps:$4 sm:$0xff]  }
 0x708   :  { %2856 = vmatprep.subr.bf16.mxu0 %v7626_v7  ;;  %2897 = vmatprep.subr.bf16.mxu1 %v7629_v9  ;;  %v6509_v7 = vld [vmem:[#allocation12 + $0x44] ss:$16 sps:$4 sm:$0xff]   ;;  %v6510_v9 = vld [vmem:[#allocation12 + $0x4c] ss:$16 sps:$4 sm:$0xff]  }
 0x70b   :  { %2857 = vmatpush1.bf16.msra.mxu0 %v7632_v10  ;;  %2898 = vmatpush1.bf16.msra.mxu1 %v7781_v1  ;;  %v9430_v10 = vld [vmem:[#allocation51_spill] sm:$0xff] }
 0x70c   :  { %2858 = vmatprep.subr.bf16.mxu0 %v7784_v12  ;;  %2899 = vmatprep.subr.bf16.mxu1 %v7787_v11 }
 0x70d   :  { %v6404_v27 = vpop.eup %6403 }
 0x70e   :  { %v2740_v20 = vmul.f32 %v6404_v27, %v2738_v25 }
 0x70f   :  { %2859 = vmatpush1.bf16.msra.mxu0 %v7638_v21  ;;  %2900 = vmatpush1.bf16.msra.mxu1 %v7791_v4  ;;  %v9431_v21 = vld [vmem:[#allocation52_spill] sm:$0xff] }
 0x710   :  { %v2753_v40 = vpack.c.bf16 %v2740_v20, %v2740_v20  ;;  %3050 = vmatprep.subr.bf16.mxu0 %v6501_v42  ;;  %3091 = vmatprep.subr.bf16.mxu1 %v6502_v43 }
 0x712   :  { %v2757_v48 = vrot.slane %v2753_v40, 7  ;;  %2877 = vmatmul.mubr.bf16.vlgmr.msra.gmra.mrb[60].mxu0 %v2753_v40  ;;  %2918 = vmatmul.mubr.bf16.vlgmr.msra.gmra.mrb[60].mxu1 %v2753_v40 }
 0x713   :  { %3051 = vmatpush1.bf16.msra.mxu0 %v6503_v8  ;;  %3092 = vmatpush1.bf16.msra.mxu1 %v6504_v56 }
 0x714   :  { %v2760_v17 = vsel %vm7548_vm13, %v2757_v48, %v2759_v49  ;;  %3052 = vmatprep.subr.bf16.mxu0 %v6505_v45  ;;  %3093 = vmatprep.subr.bf16.mxu1 %v6506_v29 }
 0x715   :  { %2761 = vst [vmem:[#allocation3 + $0x4] sm:$0x2] %v2760_v17  ;;  %3082 = vmatprep.mubr.bf16.mxu0 %v9294_v63  ;;  %3123 = vmatprep.mubr.bf16.mxu1 %v9294_v63 }
 0x717   :  { %3053 = vmatpush1.bf16.msra.mxu0 %v6507_v26  ;;  %3094 = vmatpush1.bf16.msra.mxu1 %v6508_v6  ;;  %v2959_v6 = vld [vmem:[#allocation2 + $0x21] ss:$8 sm:$0xf] }
 0x718   :  { %3054 = vmatprep.subr.bf16.mxu0 %v6509_v7  ;;  %3095 = vmatprep.subr.bf16.mxu1 %v6510_v9 }
 0x71b   :  { %3055 = vmatpush1.bf16.msra.mxu0 %v9404_v55  ;;  %3096 = vmatpush1.bf16.msra.mxu1 %v9405_v57  ;;  %v9433_v55 = vld [vmem:[#allocation54_spill] sm:$0xff]  ;;  %v9434_v57 = vld [vmem:[#allocation55_spill] sm:$0xff] }
 0x71c   :  { %3056 = vmatprep.subr.bf16.mxu0 %v9406_v58  ;;  %3097 = vmatprep.subr.bf16.mxu1 %v9407_v37  ;;  %v9435_v58 = vld [vmem:[#allocation56_spill] sm:$0xff]  ;;  %v9436_v37 = vld [vmem:[#allocation61_spill] sm:$0xff] }
 0x71f   :  { %3057 = vmatpush1.bf16.msra.mxu0 %v9408_v44  ;;  %3098 = vmatpush1.bf16.msra.mxu1 %v9409_v13  ;;  %v9437_v44 = vld [vmem:[#allocation62_spill] sm:$0xff]  ;;  %v9438_v13 = vld [vmem:[#allocation63_spill] sm:$0xff] }
 0x720   :  { %3058 = vmatprep.subr.bf16.mxu0 %v9410_v14  ;;  %3099 = vmatprep.subr.bf16.mxu1 %v9411_v59  ;;  %v9439_v14 = vld [vmem:[#allocation64_spill] sm:$0xff]  ;;  %v9440_v59 = vld [vmem:[#allocation65_spill] sm:$0xff] }
 0x723   :  { %3059 = vmatpush1.bf16.msra.mxu0 %v9412_v60  ;;  %3100 = vmatpush1.bf16.msra.mxu1 %v9413_v47  ;;  %v9441_v60 = vld [vmem:[#allocation66_spill] sm:$0xff]  ;;  %v9442_v47 = vld [vmem:[#allocation67_spill] sm:$0xff] }
 0x724   :  { %3060 = vmatprep.subr.bf16.mxu0 %v9430_v10  ;;  %3101 = vmatprep.subr.bf16.mxu1 %v9431_v21 }
 0x727   :  { %3061 = vmatpush1.bf16.msra.mxu0 %v9432_v62  ;;  %3102 = vmatpush1.bf16.msra.mxu1 %v9433_v55 }
 0x728   :  { %3062 = vmatprep.subr.bf16.mxu0 %v9434_v57  ;;  %3103 = vmatprep.subr.bf16.mxu1 %v9435_v58 }
 0x72b   :  { %3063 = vmatpush1.bf16.msra.mxu0 %v9436_v37  ;;  %3104 = vmatpush1.bf16.msra.mxu1 %v9437_v44 }
 0x72c   :  { %3064 = vmatprep.subr.bf16.mxu0 %v9438_v13  ;;  %3105 = vmatprep.subr.bf16.mxu1 %v9439_v14  ;;  %v3036_v13 = vld [vmem:[#allocation3] sm:$0x8] }
 0x72f   :  { %3065 = vmatpush1.bf16.msra.mxu0 %v9440_v59  ;;  %3106 = vmatpush1.bf16.msra.mxu1 %v9441_v60  ;;  %v6512_v59 = vld [vmem:[#allocation14 + $0x8] ss:$16 sps:$4 sm:$0xff]  }
 0x730   :  { %3132 = vmatprep.subr.bf16.mxu0 %v9442_v47  ;;  %3173 = vmatprep.subr.bf16.mxu1 %v9443_v28  ;;  %v6513_v28 = vld [vmem:[#allocation14 + $0x24] ss:$16 sps:$4 sm:$0xff]  }
 0x7c5   :  { %v2796_v0 = vpop.f32.mrb[56].mxu0  ;;  %v2837_v30 = vpop.f32.mrb[56].mxu1 }
 0x7c6   :  { %v2798_v32 = vpop.f32.mrb[57].mxu0  ;;  %v2839_v51 = vpop.f32.mrb[57].mxu1 }
 0x7c7   :  { %v2932_v54 = vcombine.low %v2796_v0, %v2798_v32  ;;  %v2933_v53 = vcombine.low %v2837_v30, %v2839_v51  ;;  %v2800_v52 = vpop.f32.mrb[58].mxu0  ;;  %v2841_v38 = vpop.f32.mrb[58].mxu1  ;;  %v6514_v0 = vld [vmem:[#allocation14 + $0x2c] ss:$16 sps:$4 sm:$0xff]   ;;  %v6515_v30 = vld [vmem:[#allocation14 + $0x20] ss:$16 sps:$4 sm:$0xff]  }
 0x7c8   :  { %v2801_v3 = vpop.f32.mrb[59].mxu0  ;;  %v2842_v5 = vpop.f32.mrb[59].mxu1  ;;  %v6516_v32 = vld [vmem:[#allocation14 + $0x28] ss:$16 sps:$4 sm:$0xff]   ;;  %v6517_v51 = vld [vmem:[#allocation14 + $0x44] ss:$16 sps:$4 sm:$0xff]  }
 0x7c9   :  { %v2940_v41 = vrot.slane %v2932_v54, %v7325_v34  ;;  %v2947_v50 = vrot.slane %v2933_v53, %v7325_v34  ;;  %v6518_v54 = vld [vmem:[#allocation14 + $0x4c] ss:$16 sps:$4 sm:$0xff]   ;;  %v6519_v53 = vld [vmem:[#allocation14 + $0x40] ss:$16 sps:$4 sm:$0xff]   ;;  %v6520_v52 = vld [vmem:[#allocation14 + $0x48] ss:$16 sps:$4 sm:$0xff]  }
 0x7ca   :  { %v6521_v3 = vld [vmem:[#allocation14 + $0x64] ss:$16 sps:$4 sm:$0xff]   ;;  %v6522_v5 = vld [vmem:[#allocation14 + $0x6c] ss:$16 sps:$4 sm:$0xff]  }
 0x7cb   :  { %v2948_v15 = vcombine.low %v2940_v41, %v2947_v50 }
 0x7cd   :  { %v2955_v31 = vrot.slane %v2948_v15, %v7325_v34 }
 0x7cf   :  { %v2957_v24 = vadd.f32 %v2955_v31, %v2927_v19  ;;  %v6523_v31 = vld [vmem:[#allocation14 + $0x60] ss:$16 sps:$4 sm:$0xff]   ;;  %v6524_v19 = vld [vmem:[#allocation14 + $0x68] ss:$16 sps:$4 sm:$0xff]  }
 0x7d1   :  { %v6143_v61 = vmul.f32 -1.442695, %v2957_v24  ;;  %v2997_v18 = vrot.slane %v2957_v24, 3 }
 0x7d3   :  { %6405 = vpow2.f32 %v6143_v61  ;;  %v6525_v61 = vld [vmem:[#allocation14 + $0x84] ss:$16 sps:$4 sm:$0xff]  }
 0x7dd   :  { %v6406_v46 = vpop.eup %6405 }
 0x7de   :  { %v2993_v35 = vadd.f32 1.0, %v6406_v46  ;;  %v6526_v46 = vld [vmem:[#allocation14 + $0x8c] ss:$16 sps:$4 sm:$0xff]  }
 0x7e0   :  { %6407 = vrcp.f32 %v2993_v35 }
 0x7e1   :  { %6409 = vtanh.f32 %v2997_v18  ;;  %v6527_v18 = vld [vmem:[#allocation14 + $0x80] ss:$16 sps:$4 sm:$0xff]  }
 0x7e5   :  { %v2878_v39 = vpop.f32.mrb[60].mxu0  ;;  %v2919_v36 = vpop.f32.mrb[60].mxu1 }
 0x7e6   :  { %v2880_v33 = vpop.f32.mrb[61].mxu0  ;;  %v2921_v23 = vpop.f32.mrb[61].mxu1 }
 0x7e7   :  { %v2964_v25 = vcombine.low %v2878_v39, %v2880_v33  ;;  %v2965_v27 = vcombine.low %v2919_v36, %v2921_v23  ;;  %v2882_v20 = vpop.f32.mrb[62].mxu0  ;;  %v2923_v40 = vpop.f32.mrb[62].mxu1  ;;  %v6528_v39 = vld [vmem:[#allocation14 + $0x88] ss:$16 sps:$4 sm:$0xff]   ;;  %v6529_v36 = vld [vmem:[#allocation14 + $0xa4] ss:$16 sps:$4 sm:$0xff]  }
 0x7e8   :  { %v2883_v42 = vpop.f32.mrb[63].mxu0  ;;  %v2924_v43 = vpop.f32.mrb[63].mxu1  ;;  %v6530_v33 = vld [vmem:[#allocation14 + $0xac] ss:$16 sps:$4 sm:$0xff]   ;;  %v6531_v23 = vld [vmem:[#allocation14 + $0xa0] ss:$16 sps:$4 sm:$0xff]  }
 0x7e9   :  { %v2972_v48 = vrot.slane %v2964_v25, %v7325_v34  ;;  %v2979_v49 = vrot.slane %v2965_v27, %v7325_v34  ;;  %v6532_v25 = vld [vmem:[#allocation14 + $0xa8] ss:$16 sps:$4 sm:$0xff]   ;;  %v6534_v27 = vld [vmem:[#allocation14 + $0xcc] ss:$16 sps:$4 sm:$0xff]   ;;  %v6535_v20 = vld [vmem:[#allocation14 + $0xc0] ss:$16 sps:$4 sm:$0xff]  }
 0x7ea   :  { %v6408_v8 = vpop.eup %6407 }
 0x7eb   :  { %v2980_v56 = vcombine.low %v2972_v48, %v2979_v49  ;;  %v3001_v16 = vrot.slane %v6408_v8, 1  ;;  %v6410_v17 = vpop.eup %6409  ;;  %v3007_v21 = vrot.slane %v6408_v8, 2  ;;  %v6536_v48 = vld [vmem:[#allocation14 + $0xe0] ss:$16 sps:$4 sm:$0xff]  }
 0x7ec   :  { %v3004_v45 = vmul.f32 %v6410_v17, %v6408_v8  ;;  %v3047_v8 = vld [vmem:[#allocation3 + $0x4] sm:$0x1] }
 0x7ed   :  { %v2987_v29 = vrot.slane %v2980_v56, %v7325_v34  ;;  %v3003_v26 = vmul.f32 %v3001_v16, %v7930_v2  ;;  %v6511_v2 = vld [vmem:[#allocation14] ss:$16 sps:$4 sm:$0xff]  }
 0x7ef   :  { %v2989_v7 = vadd.f32 %v2987_v29, %v2959_v6  ;;  %v8006_v9 = vadd.f32 %v3004_v45, %v3003_v26 }
 0x7f1   :  { %v6144_v10 = vmul.f32 -1.442695, %v2989_v7  ;;  %6411 = vtanh.f32 %v8006_v9  ;;  %v3017_v37 = vrot.slane %v2989_v7, 3 }
 0x7f3   :  { %6413 = vpow2.f32 %v6144_v10 }
 0x7fb   :  { %v6412_v62 = vpop.eup %6411 }
 0x7fc   :  { %v3009_v55 = vmul.f32 %v6412_v62, %v3007_v21 }
 0x7fd   :  { %v6414_v57 = vpop.eup %6413 }
 0x7fe   :  { %v3013_v58 = vadd.f32 1.0, %v6414_v57  ;;  %v3030_v44 = vpack.c.bf16 %v3009_v55, %v3009_v55 }
 0x800   :  { %6415 = vrcp.f32 %v3013_v58  ;;  %v3034_v14 = vrot.slane %v3030_v44, 5  ;;  %3083 = vmatmul.mubr.bf16.vlgmr.msra.gmra.mrb[64].mxu0 %v3030_v44  ;;  %3124 = vmatmul.mubr.bf16.vlgmr.msra.gmra.mrb[64].mxu1 %v3030_v44  ;;  %v3215_v58 = vld [vmem:[#allocation2 + $0x7] ss:$8 sm:$0xf] }
 0x801   :  { %3133 = vmatpush1.bf16.msra.mxu0 %v6511_v2  ;;  %3174 = vmatpush1.bf16.msra.mxu1 %v6512_v59  ;;  %6417 = vtanh.f32 %v3017_v37 }
 0x802   :  { %v3037_v47 = vsel %vm7481_vm10, %v3034_v14, %v3036_v13  ;;  %3134 = vmatprep.subr.bf16.mxu0 %v6513_v28  ;;  %3175 = vmatprep.subr.bf16.mxu1 %v6514_v0 }
 0x803   :  { %3038 = vst [vmem:[#allocation3] sm:$0x8] %v3037_v47  ;;  %3164 = vmatprep.mubr.bf16.mxu0 %v9294_v63  ;;  %3205 = vmatprep.mubr.bf16.mxu1 %v9294_v63 }
 0x805   :  { %3135 = vmatpush1.bf16.msra.mxu0 %v6515_v30  ;;  %3176 = vmatpush1.bf16.msra.mxu1 %v6516_v32 }
 0x806   :  { %3136 = vmatprep.subr.bf16.mxu0 %v6517_v51  ;;  %3177 = vmatprep.subr.bf16.mxu1 %v6518_v54 }
 0x809   :  { %3137 = vmatpush1.bf16.msra.mxu0 %v6519_v53  ;;  %3178 = vmatpush1.bf16.msra.mxu1 %v6520_v52 }
 0x80a   :  { %v6416_v38 = vpop.eup %6415  ;;  %3138 = vmatprep.subr.bf16.mxu0 %v6521_v3  ;;  %3179 = vmatprep.subr.bf16.mxu1 %v6522_v5 }
 0x80b   :  { %v3021_v41 = vrot.slane %v6416_v38, 1  ;;  %v6418_v50 = vpop.eup %6417  ;;  %v3027_v40 = vrot.slane %v6416_v38, 2 }
 0x80c   :  { %v3024_v15 = vmul.f32 %v6418_v50, %v6416_v38 }
 0x80d   :  { %3139 = vmatpush1.bf16.msra.mxu0 %v6523_v31  ;;  %3180 = vmatpush1.bf16.msra.mxu1 %v6524_v19  ;;  %v3023_v24 = vmul.f32 %v3021_v41, %v7954_v22  ;;  %v6533_v22 = vld [vmem:[#allocation14 + $0xc4] ss:$16 sps:$4 sm:$0xff]  }
 0x80e   :  { %3140 = vmatprep.subr.bf16.mxu0 %v6525_v61  ;;  %3181 = vmatprep.subr.bf16.mxu1 %v6526_v46 }
 0x80f   :  { %v8014_v35 = vadd.f32 %v3024_v15, %v3023_v24  ;;  %v3247_v24 = vld [vmem:[#allocation2 + $0x20] ss:$8 sm:$0xf] }
 0x811   :  { %3141 = vmatpush1.bf16.msra.mxu0 %v6527_v18  ;;  %3182 = vmatpush1.bf16.msra.mxu1 %v6528_v39  ;;  %6419 = vtanh.f32 %v8014_v35 }
 0x812   :  { %3142 = vmatprep.subr.bf16.mxu0 %v6529_v36  ;;  %3183 = vmatprep.subr.bf16.mxu1 %v6530_v33 }
 0x815   :  { %3143 = vmatpush1.bf16.msra.mxu0 %v6531_v23  ;;  %3184 = vmatpush1.bf16.msra.mxu1 %v6532_v25 }
 0x816   :  { %3144 = vmatprep.subr.bf16.mxu0 %v6533_v22  ;;  %3185 = vmatprep.subr.bf16.mxu1 %v6534_v27 }
 0x819   :  { %3145 = vmatpush1.bf16.msra.mxu0 %v6535_v20  ;;  %3186 = vmatpush1.bf16.msra.mxu1 %v7781_v1 }
 0x81a   :  { %3146 = vmatprep.subr.bf16.mxu0 %v7784_v12  ;;  %3187 = vmatprep.subr.bf16.mxu1 %v7787_v11 }
 0x81b   :  { %v6420_v42 = vpop.eup %6419 }
 0x81c   :  { %v3029_v43 = vmul.f32 %v6420_v42, %v3027_v40  ;;  %v3327_v40 = vld [vmem:[#allocation3] sm:$0x8] }
 0x81d   :  { %3147 = vmatpush1.bf16.msra.mxu0 %v6536_v48  ;;  %3188 = vmatpush1.bf16.msra.mxu1 %v7791_v4 }
 0x81e   :  { %v3039_v49 = vpack.c.bf16 %v3029_v43, %v3029_v43 }
 0x820   :  { %v3044_v56 = vshll.u32 %v3039_v49, 16  ;;  %3165 = vmatmul.mubr.bf16.vlgmr.msra.gmra.mrb[68].mxu0 %v3039_v49  ;;  %3206 = vmatmul.mubr.bf16.vlgmr.msra.gmra.mrb[68].mxu1 %v3039_v49 }
 0x822   :  { %v3048_v17 = vsel %vm7432_vm8, %v3044_v56, %v3047_v8 }
 0x823   :  { %3049 = vst [vmem:[#allocation3 + $0x4] sm:$0x1] %v3048_v17 }
 0x8d3   :  { %v3084_v1 = vpop.f32.mrb[64].mxu0  ;;  %v3125_v12 = vpop.f32.mrb[64].mxu1 }
 0x8d4   :  { %v3086_v45 = vpop.f32.mrb[65].mxu0  ;;  %v3127_v11 = vpop.f32.mrb[65].mxu1 }
 0x8d5   :  { %v3220_v29 = vcombine.low %v3084_v1, %v3086_v45  ;;  %v3221_v26 = vcombine.low %v3125_v12, %v3127_v11  ;;  %v3088_v6 = vpop.f32.mrb[66].mxu0  ;;  %v3129_v7 = vpop.f32.mrb[66].mxu1 }
 0x8d6   :  { %v3089_v10 = vpop.f32.mrb[67].mxu0  ;;  %v3130_v21 = vpop.f32.mrb[67].mxu1 }
 0x8d7   :  { %v3228_v4 = vrot.slane %v3220_v29, %v7325_v34  ;;  %v3235_v62 = vrot.slane %v3221_v26, %v7325_v34  ;;  %v3331_v29 = vld [vmem:[#allocation3 + $0x4] sm:$0x1] }
 0x8d9   :  { %v3236_v55 = vcombine.low %v3228_v4, %v3235_v62 }
 0x8db   :  { %v3243_v57 = vrot.slane %v3236_v55, %v7325_v34 }
 0x8dd   :  { %v3245_v37 = vadd.f32 %v3243_v57, %v3215_v58 }
 0x8df   :  { %v6147_v44 = vmul.f32 -1.442695, %v3245_v37  ;;  %v3285_v2 = vrot.slane %v3245_v37, 3 }
 0x8e1   :  { %6421 = vpow2.f32 %v6147_v44 }
 0x8eb   :  { %v6422_v13 = vpop.eup %6421 }
 0x8ec   :  { %v3281_v14 = vadd.f32 1.0, %v6422_v13 }
 0x8ee   :  { %6423 = vrcp.f32 %v3281_v14 }
 0x8ef   :  { %6425 = vtanh.f32 %v3285_v2 }
 0x8f3   :  { %v3166_v59 = vpop.f32.mrb[68].mxu0  ;;  %v3207_v60 = vpop.f32.mrb[68].mxu1 }
 0x8f4   :  { %v3168_v47 = vpop.f32.mrb[69].mxu0  ;;  %v3209_v28 = vpop.f32.mrb[69].mxu1 }
 0x8f5   :  { %v3252_v0 = vcombine.low %v3166_v59, %v3168_v47  ;;  %v3253_v30 = vcombine.low %v3207_v60, %v3209_v28  ;;  %v3170_v32 = vpop.f32.mrb[70].mxu0  ;;  %v3211_v51 = vpop.f32.mrb[70].mxu1 }
 0x8f6   :  { %v3171_v54 = vpop.f32.mrb[71].mxu0  ;;  %v3212_v53 = vpop.f32.mrb[71].mxu1 }
 0x8f7   :  { %v3260_v52 = vrot.slane %v3252_v0, %v7325_v34  ;;  %v3267_v38 = vrot.slane %v3253_v30, %v7325_v34 }
 0x8f8   :  { %v6424_v3 = vpop.eup %6423 }
 0x8f9   :  { %v3289_v5 = vrot.slane %v6424_v3, 1  ;;  %v3268_v41 = vcombine.low %v3260_v52, %v3267_v38  ;;  %v6426_v50 = vpop.eup %6425  ;;  %v3295_v39 = vrot.slane %v6424_v3, 2 }
 0x8fa   :  { %v3292_v31 = vmul.f32 %v6426_v50, %v6424_v3 }
 0x8fb   :  { %v3291_v15 = vmul.f32 %v3289_v5, %v8006_v9  ;;  %v3275_v19 = vrot.slane %v3268_v41, %v7325_v34 }
 0x8fd   :  { %v8030_v61 = vadd.f32 %v3292_v31, %v3291_v15  ;;  %v3277_v46 = vadd.f32 %v3275_v19, %v3247_v24 }
 0x8ff   :  { %9446 = vst [vmem:[#allocation37_spill] sm:$0xff] %v8030_v61  ;;  %6427 = vtanh.f32 %v8030_v61  ;;  %v6148_v18 = vmul.f32 -1.442695, %v3277_v46  ;;  %v3305_v22 = vrot.slane %v3277_v46, 3 }
 0x901   :  { %6429 = vpow2.f32 %v6148_v18 }
 0x909   :  { %v6428_v36 = vpop.eup %6427 }
 0x90a   :  { %v8033_v33 = vmul.f32 %v6428_v36, %v3295_v39 }
 0x90b   :  { %v6430_v23 = vpop.eup %6429 }
 0x90c   :  { %9447 = vst [vmem:[#allocation38_spill] sm:$0xff] %v8033_v33  ;;  %v6185_v25 = vpack.c.bf16 %v8033_v33, %v8033_v33  ;;  %v3301_v9 = vadd.f32 1.0, %v6430_v23 }
 0x90e   :  { %v3323_v27 = vshll.u32 %v6185_v25, 16  ;;  %6431 = vrcp.f32 %v3301_v9 }
 0x90f   :  { %6433 = vtanh.f32 %v3305_v22 }
 0x910   :  { %v3325_v20 = vrot.slane %v3323_v27, 5 }
 0x912   :  { %v3328_v43 = vsel %vm7381_vm6, %v3325_v20, %v3327_v40 }
 0x913   :  { %3329 = vst [vmem:[#allocation3] sm:$0x8] %v3328_v43 }
 0x918   :  { %v6432_v48 = vpop.eup %6431 }
 0x919   :  { %v3309_v49 = vrot.slane %v6432_v48, 1  ;;  %v6434_v8 = vpop.eup %6433  ;;  %v3315_v1 = vrot.slane %v6432_v48, 2 }
 0x91a   :  { %v3312_v16 = vmul.f32 %v6434_v8, %v6432_v48 }
 0x91b   :  { %v3311_v56 = vmul.f32 %v3309_v49, %v8014_v35 }
 0x91d   :  { %v3313_v17 = vadd.f32 %v3312_v16, %v3311_v56 }
 0x91f   :  { %6435 = vtanh.f32 %v3313_v17 }
 0x929   :  { %v6436_v12 = vpop.eup %6435 }
 0x92a   :  { %v3317_v45 = vmul.f32 %v6436_v12, %v3315_v1 }
 0x92c   :  { %v3330_v11 = vpack.c.bf16 %v3317_v45, %v3317_v45 }
 0x92e   :  { %v3332_v6 = vsel %vm7337_vm3, %v3330_v11, %v3331_v29 }
 0x92f   :  { %3333 = vst [vmem:[#allocation3 + $0x4] sm:$0x1] %v3332_v6 }
 0x930   :  { %6867 = dma.done.wait [#allocation8], 16384 }
 0x931   :  { %6868 = vsyncadd [#allocation8], 4294950912 }
 0x932   :  { %6869 = dma.done.wait [#allocation8 + $0x1], 4096 }
 0x933   :  { %6870 = vsyncadd [#allocation8 + $0x1], 4294963200 }
 0x934   :  { %6871 = dma.done.wait [#allocation8 + $0x2], 4096 }
 0x935   :  { %6872 = vsyncadd [#allocation8 + $0x2], 4294963200 }
 0x936   :  { %6873 = dma.done.wait [#allocation8 + $0x3], 128 }
 0x937   :  { %6874 = vsyncadd [#allocation8 + $0x3], 4294967168  ;;  %v3349_v35 = vld [vmem:[#allocation4 + $0x8] sm:$0xff]  ;;  %v3351_v7 = vld [vmem:[#allocation4 + $0x18] sm:$0xff]  ;;  %s6903_s4 = smov [#allocation16]   ;;  %s6904_s28 = smov [#allocation18]  }
 0x938   :  { %v3348_v10 = vld [vmem:[#allocation4] sm:$0xff]  ;;  %3589 = vmatprep.subr.bf16.mxu0 %v3349_v35  ;;  %3630 = vmatprep.subr.bf16.mxu1 %v3351_v7  ;;  %v3350_v21 = vld [vmem:[#allocation4 + $0x10] sm:$0xff]  ;;  %v3357_v4 = vld [vmem:[#allocation4 + $0x48] sm:$0xff]  ;;  %s5952_s18 = sshll.u32 %s6903_s4, 4  ;;  %s5962_s25 = sshll.u32 %s6904_s28, 4  ;;  %s5953_s18 = int_to_ptr.vmem [resolvable:$true] %s5952_s18  ;;  %s5963_s25 = int_to_ptr.vmem [resolvable:$true] %s5962_s25 }
 0x939   :  { %v3359_v62 = vld [vmem:[#allocation4 + $0x58] sm:$0xff]  ;;  %3590 = vmatpush1.bf16.msra.mxu0 %v3348_v10  ;;  %3631 = vmatpush1.bf16.msra.mxu1 %v3350_v21  ;;  %v3356_v55 = vld [vmem:[#allocation4 + $0x40] sm:$0xff]  ;;  %v3358_v57 = vld [vmem:[#allocation4 + $0x50] sm:$0xff]  ;;  %s6797_s26 = scalar_lea.vmem %s5953_s18, 32  ;;  %p6802_p11 = scmp.lt.s32.totalorder %s5953_s18, %s5953_s18 }
 0x93a   :  { %3591 = vmatprep.subr.bf16.mxu0 %v3357_v4  ;;  %3632 = vmatprep.subr.bf16.mxu1 %v3359_v62  ;;  %v3365_v58 = vld [vmem:[#allocation4 + $0x88] sm:$0xff]  ;;  %v3367_v37 = vld [vmem:[#allocation4 + $0x98] sm:$0xff]  ;;  %v3364_v44 = vld [vmem:[#allocation4 + $0x80] sm:$0xff]  ;;  %p6798_p10 = scmp.ne.s32.totalorder %s5953_s18, %s6797_s26  ;;  %p6803_p12 = scmp.lt.s32.totalorder %s6797_s26, %s6797_s26 }
 0x93b   :  { %v3366_v13 = vld [vmem:[#allocation4 + $0x90] sm:$0xff]  ;;  %v3373_v14 = vld [vmem:[#allocation4 + $0xc8] sm:$0xff]  ;;  %v3375_v2 = vld [vmem:[#allocation4 + $0xd8] sm:$0xff] }
 0x93c   :  { %v3372_v59 = vld [vmem:[#allocation4 + $0xc0] sm:$0xff]  ;;  %v3374_v60 = vld [vmem:[#allocation4 + $0xd0] sm:$0xff]  ;;  %v3381_v47 = vld [vmem:[#allocation4 + $0x108] sm:$0xff]  ;;  %p6804_p13 = por %p6803_p12, %p6802_p11 }
 0x93d   :  { %3592 = vmatpush1.bf16.msra.mxu0 %v3356_v55  ;;  %3633 = vmatpush1.bf16.msra.mxu1 %v3358_v57  ;;  %v3383_v28 = vld [vmem:[#allocation4 + $0x118] sm:$0xff]  ;;  %v3380_v0 = vld [vmem:[#allocation4 + $0x100] sm:$0xff]  ;;  %v3382_v30 = vld [vmem:[#allocation4 + $0x110] sm:$0xff] }
 0x93e   :  { %3593 = vmatprep.subr.bf16.mxu0 %v3365_v58  ;;  %3634 = vmatprep.subr.bf16.mxu1 %v3367_v37  ;;  %v3389_v32 = vld [vmem:[#allocation4 + $0x148] sm:$0xff]  ;;  %v3391_v51 = vld [vmem:[#allocation4 + $0x158] sm:$0xff]  ;;  %v3388_v54 = vld [vmem:[#allocation4 + $0x140] sm:$0xff]  ;;  %p6805_p0 = pnand %p6804_p13, %p6798_p10 }
 0x93f   :  { %v3390_v53 = vld [vmem:[#allocation4 + $0x150] sm:$0xff]  ;;  %v3397_v52 = vld [vmem:[#allocation4 + $0x188] sm:$0xff]  ;;  %v3399_v38 = vld [vmem:[#allocation4 + $0x198] sm:$0xff] }
 0x940   :  { %v8042_v3 = vld [vmem:[#allocation3] sm:$0xff]  ;;  %v3396_v41 = vld [vmem:[#allocation4 + $0x180] sm:$0xff]  ;;  %v3398_v50 = vld [vmem:[#allocation4 + $0x190] sm:$0xff] }
 0x941   :  { %3594 = vmatpush1.bf16.msra.mxu0 %v3364_v44  ;;  %3635 = vmatpush1.bf16.msra.mxu1 %v3366_v13  ;;  %v8046_v5 = vcombine.high %v8042_v3, %v8042_v3  ;;  %v3405_v15 = vld [vmem:[#allocation4 + $0x1c8] sm:$0xff]  ;;  %v3407_v31 = vld [vmem:[#allocation4 + $0x1d8] sm:$0xff]  ;;  %v3404_v19 = vld [vmem:[#allocation4 + $0x1c0] sm:$0xff]  ;;  %v8052_v58 = vcombine.low %v8042_v3, %v8042_v3 }
 0x942   :  { %3595 = vmatprep.subr.bf16.mxu0 %v3373_v14  ;;  %3636 = vmatprep.subr.bf16.mxu1 %v3375_v2  ;;  %v3406_v24 = vld [vmem:[#allocation4 + $0x1d0] sm:$0xff]  ;;  %v3413_v46 = vld [vmem:[#allocation4 + $0x208] sm:$0xff]  ;;  %v3415_v18 = vld [vmem:[#allocation4 + $0x218] sm:$0xff] }
 0x943   :  { %3621 = vmatprep.mubr.bf16.mxu0 %v8046_v5  ;;  %3662 = vmatprep.mubr.bf16.mxu1 %v8046_v5  ;;  %v3412_v39 = vld [vmem:[#allocation4 + $0x200] sm:$0xff]  ;;  %v3414_v36 = vld [vmem:[#allocation4 + $0x210] sm:$0xff]  ;;  %v3421_v23 = vld [vmem:[#allocation4 + $0x248] sm:$0xff] }
 0x944   :  { %v3423_v25 = vld [vmem:[#allocation4 + $0x258] sm:$0xff]  ;;  %v3420_v9 = vld [vmem:[#allocation4 + $0x240] sm:$0xff]  ;;  %v3422_v22 = vld [vmem:[#allocation4 + $0x250] sm:$0xff] }
 0x945   :  { %3596 = vmatpush1.bf16.msra.mxu0 %v3372_v59  ;;  %3637 = vmatpush1.bf16.msra.mxu1 %v3374_v60  ;;  %v3429_v27 = vld [vmem:[#allocation4 + $0x288] sm:$0xff]  ;;  %v3431_v20 = vld [vmem:[#allocation4 + $0x298] sm:$0xff]  ;;  %v3428_v40 = vld [vmem:[#allocation4 + $0x280] sm:$0xff] }
 0x946   :  { %3597 = vmatprep.subr.bf16.mxu0 %v3381_v47  ;;  %3638 = vmatprep.subr.bf16.mxu1 %v3383_v28  ;;  %v3430_v42 = vld [vmem:[#allocation4 + $0x290] sm:$0xff]  ;;  %v3437_v43 = vld [vmem:[#allocation4 + $0x2c8] sm:$0xff]  ;;  %v3439_v48 = vld [vmem:[#allocation4 + $0x2d8] sm:$0xff] }
 0x947   :  { %v3436_v49 = vld [vmem:[#allocation4 + $0x2c0] sm:$0xff]  ;;  %v3438_v8 = vld [vmem:[#allocation4 + $0x2d0] sm:$0xff]  ;;  %v3445_v56 = vld [vmem:[#allocation4 + $0x308] sm:$0xff] }
 0x948   :  { %v3447_v16 = vld [vmem:[#allocation4 + $0x318] sm:$0xff]  ;;  %v3444_v17 = vld [vmem:[#allocation4 + $0x300] sm:$0xff]  ;;  %v3446_v1 = vld [vmem:[#allocation4 + $0x310] sm:$0xff] }
 0x949   :  { %3598 = vmatpush1.bf16.msra.mxu0 %v3380_v0  ;;  %3639 = vmatpush1.bf16.msra.mxu1 %v3382_v30  ;;  %v3453_v12 = vld [vmem:[#allocation4 + $0x348] sm:$0xff]  ;;  %v3455_v45 = vld [vmem:[#allocation4 + $0x358] sm:$0xff]  ;;  %v3452_v11 = vld [vmem:[#allocation4 + $0x340] sm:$0xff] }
 0x94a   :  { %3599 = vmatprep.subr.bf16.mxu0 %v3389_v32  ;;  %3640 = vmatprep.subr.bf16.mxu1 %v3391_v51  ;;  %v3454_v29 = vld [vmem:[#allocation4 + $0x350] sm:$0xff]  ;;  %v3461_v26 = vld [vmem:[#allocation4 + $0x388] sm:$0xff]  ;;  %v3463_v6 = vld [vmem:[#allocation4 + $0x398] sm:$0xff] }
 0x94b   :  { %v3460_v35 = vld [vmem:[#allocation4 + $0x380] sm:$0xff]  ;;  %v3462_v7 = vld [vmem:[#allocation4 + $0x390] sm:$0xff]  ;;  %v3469_v10 = vld [vmem:[#allocation4 + $0x3c8] sm:$0xff] }
 0x94c   :  { %v3471_v21 = vld [vmem:[#allocation4 + $0x3d8] sm:$0xff]  ;;  %v3468_v4 = vld [vmem:[#allocation4 + $0x3c0] sm:$0xff]  ;;  %v3470_v62 = vld [vmem:[#allocation4 + $0x3d0] sm:$0xff] }
 0x94d   :  { %3600 = vmatpush1.bf16.msra.mxu0 %v3388_v54  ;;  %3641 = vmatpush1.bf16.msra.mxu1 %v3390_v53  ;;  %v3353_v55 = vld [vmem:[#allocation4 + $0x28] sm:$0xff]  ;;  %v3355_v57 = vld [vmem:[#allocation4 + $0x38] sm:$0xff]  ;;  %v3352_v37 = vld [vmem:[#allocation4 + $0x20] sm:$0xff] }
 0x94e   :  { %3601 = vmatprep.subr.bf16.mxu0 %v3397_v52  ;;  %3642 = vmatprep.subr.bf16.mxu1 %v3399_v38  ;;  %v3354_v44 = vld [vmem:[#allocation4 + $0x30] sm:$0xff]  ;;  %v3361_v13 = vld [vmem:[#allocation4 + $0x68] sm:$0xff]  ;;  %v3363_v14 = vld [vmem:[#allocation4 + $0x78] sm:$0xff] }
 0x94f   :  { %v3360_v2 = vld [vmem:[#allocation4 + $0x60] sm:$0xff]  ;;  %v3362_v59 = vld [vmem:[#allocation4 + $0x70] sm:$0xff]  ;;  %v3369_v60 = vld [vmem:[#allocation4 + $0xa8] sm:$0xff] }
 0x950   :  { %v3371_v47 = vld [vmem:[#allocation4 + $0xb8] sm:$0xff]  ;;  %v3368_v28 = vld [vmem:[#allocation4 + $0xa0] sm:$0xff]  ;;  %v3370_v0 = vld [vmem:[#allocation4 + $0xb0] sm:$0xff] }
 0x951   :  { %3602 = vmatpush1.bf16.msra.mxu0 %v3396_v41  ;;  %3643 = vmatpush1.bf16.msra.mxu1 %v3398_v50  ;;  %v3377_v30 = vld [vmem:[#allocation4 + $0xe8] sm:$0xff]  ;;  %v3379_v32 = vld [vmem:[#allocation4 + $0xf8] sm:$0xff]  ;;  %v3376_v51 = vld [vmem:[#allocation4 + $0xe0] sm:$0xff] }
 0x952   :  { %3603 = vmatprep.subr.bf16.mxu0 %v3405_v15  ;;  %3644 = vmatprep.subr.bf16.mxu1 %v3407_v31  ;;  %v3378_v54 = vld [vmem:[#allocation4 + $0xf0] sm:$0xff]  ;;  %v3385_v53 = vld [vmem:[#allocation4 + $0x128] sm:$0xff]  ;;  %v3387_v52 = vld [vmem:[#allocation4 + $0x138] sm:$0xff] }
 0x953   :  { %v3384_v38 = vld [vmem:[#allocation4 + $0x120] sm:$0xff]  ;;  %v3386_v3 = vld [vmem:[#allocation4 + $0x130] sm:$0xff]  ;;  %v3395_v41 = vld [vmem:[#allocation4 + $0x178] sm:$0xff] }
 0x954   :  { %v3392_v50 = vld [vmem:[#allocation4 + $0x160] sm:$0xff]  ;;  %v3394_v15 = vld [vmem:[#allocation4 + $0x170] sm:$0xff]  ;;  %v3401_v31 = vld [vmem:[#allocation4 + $0x1a8] sm:$0xff] }
 0x955   :  { %3604 = vmatpush1.bf16.msra.mxu0 %v3404_v19  ;;  %3645 = vmatpush1.bf16.msra.mxu1 %v3406_v24  ;;  %v3403_v19 = vld [vmem:[#allocation4 + $0x1b8] sm:$0xff]  ;;  %v3400_v24 = vld [vmem:[#allocation4 + $0x1a0] sm:$0xff]  ;;  %v8244_v33 = vld [vmem:[#allocation6 + $0xe8] sm:$0xff] }
 0x956   :  { %3605 = vmatprep.subr.bf16.mxu0 %v3413_v46  ;;  %3646 = vmatprep.subr.bf16.mxu1 %v3415_v18  ;;  %v3402_v46 = vld [vmem:[#allocation4 + $0x1b0] sm:$0xff]  ;;  %v3409_v18 = vld [vmem:[#allocation4 + $0x1e8] sm:$0xff]  ;;  %v8246_v61 = vld [vmem:[#allocation6 + $0xf8] sm:$0xff] }
 0x959   :  { %3606 = vmatpush1.bf16.msra.mxu0 %v3412_v39  ;;  %3647 = vmatpush1.bf16.msra.mxu1 %v3414_v36  ;;  %v3411_v39 = vld [vmem:[#allocation4 + $0x1f8] sm:$0xff]  ;;  %v3408_v36 = vld [vmem:[#allocation4 + $0x1e0] sm:$0xff] }
 0x95a   :  { %3607 = vmatprep.subr.bf16.mxu0 %v3421_v23  ;;  %3648 = vmatprep.subr.bf16.mxu1 %v3423_v25  ;;  %v3410_v23 = vld [vmem:[#allocation4 + $0x1f0] sm:$0xff]  ;;  %v3417_v25 = vld [vmem:[#allocation4 + $0x228] sm:$0xff] }
 0x95d   :  { %3608 = vmatpush1.bf16.msra.mxu0 %v3420_v9  ;;  %3649 = vmatpush1.bf16.msra.mxu1 %v3422_v22  ;;  %v3419_v9 = vld [vmem:[#allocation4 + $0x238] sm:$0xff]  ;;  %v3416_v22 = vld [vmem:[#allocation4 + $0x220] sm:$0xff] }
 0x95e   :  { %3609 = vmatprep.subr.bf16.mxu0 %v3429_v27  ;;  %3650 = vmatprep.subr.bf16.mxu1 %v3431_v20  ;;  %v3418_v27 = vld [vmem:[#allocation4 + $0x230] sm:$0xff]  ;;  %v3425_v20 = vld [vmem:[#allocation4 + $0x268] sm:$0xff] }
 0x961   :  { %3610 = vmatpush1.bf16.msra.mxu0 %v3428_v40  ;;  %3651 = vmatpush1.bf16.msra.mxu1 %v3430_v42  ;;  %v3427_v40 = vld [vmem:[#allocation4 + $0x278] sm:$0xff]  ;;  %v3424_v42 = vld [vmem:[#allocation4 + $0x260] sm:$0xff] }
 0x962   :  { %3611 = vmatprep.subr.bf16.mxu0 %v3437_v43  ;;  %3652 = vmatprep.subr.bf16.mxu1 %v3439_v48  ;;  %v3426_v43 = vld [vmem:[#allocation4 + $0x270] sm:$0xff]  ;;  %v3433_v48 = vld [vmem:[#allocation4 + $0x2a8] sm:$0xff] }
 0x965   :  { %3612 = vmatpush1.bf16.msra.mxu0 %v3436_v49  ;;  %3653 = vmatpush1.bf16.msra.mxu1 %v3438_v8  ;;  %v3435_v49 = vld [vmem:[#allocation4 + $0x2b8] sm:$0xff]  ;;  %v3432_v8 = vld [vmem:[#allocation4 + $0x2a0] sm:$0xff] }
 0x966   :  { %3613 = vmatprep.subr.bf16.mxu0 %v3445_v56  ;;  %3654 = vmatprep.subr.bf16.mxu1 %v3447_v16  ;;  %v3434_v56 = vld [vmem:[#allocation4 + $0x2b0] sm:$0xff]  ;;  %v3441_v16 = vld [vmem:[#allocation4 + $0x2e8] sm:$0xff] }
 0x969   :  { %3614 = vmatpush1.bf16.msra.mxu0 %v3444_v17  ;;  %3655 = vmatpush1.bf16.msra.mxu1 %v3446_v1  ;;  %v3443_v17 = vld [vmem:[#allocation4 + $0x2f8] sm:$0xff]  ;;  %v3440_v1 = vld [vmem:[#allocation4 + $0x2e0] sm:$0xff] }
 0x96a   :  { %3615 = vmatprep.subr.bf16.mxu0 %v3453_v12  ;;  %3656 = vmatprep.subr.bf16.mxu1 %v3455_v45  ;;  %v3442_v12 = vld [vmem:[#allocation4 + $0x2f0] sm:$0xff]  ;;  %v3449_v45 = vld [vmem:[#allocation4 + $0x328] sm:$0xff] }
 0x96d   :  { %3616 = vmatpush1.bf16.msra.mxu0 %v3452_v11  ;;  %3657 = vmatpush1.bf16.msra.mxu1 %v3454_v29  ;;  %v3451_v11 = vld [vmem:[#allocation4 + $0x338] sm:$0xff]  ;;  %v3448_v29 = vld [vmem:[#allocation4 + $0x320] sm:$0xff] }
 0x96e   :  { %3617 = vmatprep.subr.bf16.mxu0 %v3461_v26  ;;  %3658 = vmatprep.subr.bf16.mxu1 %v3463_v6  ;;  %v3450_v26 = vld [vmem:[#allocation4 + $0x330] sm:$0xff]  ;;  %v3457_v6 = vld [vmem:[#allocation4 + $0x368] sm:$0xff] }
 0x971   :  { %3618 = vmatpush1.bf16.msra.mxu0 %v3460_v35  ;;  %3659 = vmatpush1.bf16.msra.mxu1 %v3462_v7  ;;  %v3459_v35 = vld [vmem:[#allocation4 + $0x378] sm:$0xff]  ;;  %v3456_v7 = vld [vmem:[#allocation4 + $0x360] sm:$0xff] }
 0x972   :  { %3619 = vmatprep.subr.bf16.mxu0 %v3469_v10  ;;  %3660 = vmatprep.subr.bf16.mxu1 %v3471_v21  ;;  %v3458_v10 = vld [vmem:[#allocation4 + $0x370] sm:$0xff]  ;;  %v3465_v21 = vld [vmem:[#allocation4 + $0x3a8] sm:$0xff] }
 0x975   :  { %3620 = vmatpush1.bf16.msra.mxu0 %v3468_v4  ;;  %3661 = vmatpush1.bf16.msra.mxu1 %v3470_v62  ;;  %v3467_v4 = vld [vmem:[#allocation4 + $0x3b8] sm:$0xff]  ;;  %v3464_v62 = vld [vmem:[#allocation4 + $0x3a0] sm:$0xff] }
 0x976   :  { %3671 = vmatprep.subr.bf16.mxu0 %v3353_v55  ;;  %3712 = vmatprep.subr.bf16.mxu1 %v3355_v57  ;;  %v3466_v55 = vld [vmem:[#allocation4 + $0x3b0] sm:$0xff]  ;;  %v3473_v57 = vld [vmem:[#allocation4 + $0x3e8] sm:$0xff] }
 0x978   :  { %3622 = vmatmul.mubr.bf16.vlgmr.msra.gmra.mrb[72].mxu0 %v8052_v58  ;;  %3663 = vmatmul.mubr.bf16.vlgmr.msra.gmra.mrb[72].mxu1 %v8052_v58 }
 0x979   :  { %3672 = vmatpush1.bf16.msra.mxu0 %v3352_v37  ;;  %3713 = vmatpush1.bf16.msra.mxu1 %v3354_v44  ;;  %v3475_v37 = vld [vmem:[#allocation4 + $0x3f8] sm:$0xff]  ;;  %v3472_v44 = vld [vmem:[#allocation4 + $0x3e0] sm:$0xff] }
 0x97a   :  { %3673 = vmatprep.subr.bf16.mxu0 %v3361_v13  ;;  %3714 = vmatprep.subr.bf16.mxu1 %v3363_v14  ;;  %v3474_v13 = vld [vmem:[#allocation4 + $0x3f0] sm:$0xff]  ;;  %v8058_v14 = vld [vmem:[#allocation5 + $0x8] sm:$0xff] }
 0x97b   :  { %3703 = vmatprep.mubr.bf16.mxu0 %v8046_v5  ;;  %3744 = vmatprep.mubr.bf16.mxu1 %v8046_v5  ;;  %v3393_v5 = vld [vmem:[#allocation4 + $0x168] sm:$0xff] }
 0x97d   :  { %3674 = vmatpush1.bf16.msra.mxu0 %v3360_v2  ;;  %3715 = vmatpush1.bf16.msra.mxu1 %v3362_v59  ;;  %v8060_v2 = vld [vmem:[#allocation5 + $0x18] sm:$0xff]  ;;  %v8064_v59 = vld [vmem:[#allocation5] sm:$0xff] }
 0x97e   :  { %3675 = vmatprep.subr.bf16.mxu0 %v3369_v60  ;;  %3716 = vmatprep.subr.bf16.mxu1 %v3371_v47  ;;  %v8066_v60 = vld [vmem:[#allocation5 + $0x10] sm:$0xff]  ;;  %v8068_v47 = vld [vmem:[#allocation5 + $0x28] sm:$0xff] }
 0x981   :  { %3676 = vmatpush1.bf16.msra.mxu0 %v3368_v28  ;;  %3717 = vmatpush1.bf16.msra.mxu1 %v3370_v0  ;;  %v8070_v28 = vld [vmem:[#allocation5 + $0x38] sm:$0xff]  ;;  %v8078_v0 = vld [vmem:[#allocation5 + $0x20] sm:$0xff] }
 0x982   :  { %3677 = vmatprep.subr.bf16.mxu0 %v3377_v30  ;;  %3718 = vmatprep.subr.bf16.mxu1 %v3379_v32  ;;  %v8080_v30 = vld [vmem:[#allocation5 + $0x30] sm:$0xff]  ;;  %v8082_v32 = vld [vmem:[#allocation5 + $0x48] sm:$0xff] }
 0x985   :  { %3678 = vmatpush1.bf16.msra.mxu0 %v3376_v51  ;;  %3719 = vmatpush1.bf16.msra.mxu1 %v3378_v54  ;;  %v8084_v51 = vld [vmem:[#allocation5 + $0x58] sm:$0xff]  ;;  %v8094_v54 = vld [vmem:[#allocation5 + $0x50] sm:$0xff] }
 0x986   :  { %3679 = vmatprep.subr.bf16.mxu0 %v3385_v53  ;;  %3720 = vmatprep.subr.bf16.mxu1 %v3387_v52  ;;  %9451 = vst [vmem:[#allocation42_spill] sm:$0xff] %v8094_v54  ;;  %v8096_v53 = vld [vmem:[#allocation5 + $0x68] sm:$0xff]  ;;  %v8098_v52 = vld [vmem:[#allocation5 + $0x78] sm:$0xff] }
 0x987   :  { %9452 = vst [vmem:[#allocation43_spill] sm:$0xff] %v8096_v53  ;;  %9453 = vst [vmem:[#allocation44_spill] sm:$0xff] %v8098_v52 }
 0x989   :  { %3680 = vmatpush1.bf16.msra.mxu0 %v3384_v38  ;;  %3721 = vmatpush1.bf16.msra.mxu1 %v3386_v3  ;;  %v8104_v38 = vld [vmem:[#allocation5 + $0x60] sm:$0xff]  ;;  %v8106_v3 = vld [vmem:[#allocation5 + $0x70] sm:$0xff] }
 0x98a   :  { %3681 = vmatprep.subr.bf16.mxu0 %v3393_v5  ;;  %3722 = vmatprep.subr.bf16.mxu1 %v3395_v41  ;;  %9454 = vst [vmem:[#allocation45_spill] sm:$0xff] %v8104_v38  ;;  %9455 = vst [vmem:[#allocation46_spill] sm:$0xff] %v8106_v3  ;;  %v8108_v5 = vld [vmem:[#allocation5 + $0x88] sm:$0xff]  ;;  %v8110_v41 = vld [vmem:[#allocation5 + $0x98] sm:$0xff] }
 0x98b   :  { %9456 = vst [vmem:[#allocation47_spill] sm:$0xff] %v8108_v5  ;;  %9457 = vst [vmem:[#allocation48_spill] sm:$0xff] %v8110_v41 }
 0x98d   :  { %3682 = vmatpush1.bf16.msra.mxu0 %v3392_v50  ;;  %3723 = vmatpush1.bf16.msra.mxu1 %v3394_v15  ;;  %v8116_v50 = vld [vmem:[#allocation5 + $0x80] sm:$0xff]  ;;  %v8118_v15 = vld [vmem:[#allocation5 + $0x90] sm:$0xff] }
 0x98e   :  { %3683 = vmatprep.subr.bf16.mxu0 %v3401_v31  ;;  %3724 = vmatprep.subr.bf16.mxu1 %v3403_v19  ;;  %9458 = vst [vmem:[#allocation49_spill] sm:$0xff] %v8116_v50  ;;  %9459 = vst [vmem:[#allocation50_spill] sm:$0xff] %v8118_v15  ;;  %v8120_v31 = vld [vmem:[#allocation5 + $0xa8] sm:$0xff]  ;;  %v8122_v19 = vld [vmem:[#allocation5 + $0xb8] sm:$0xff] }
 0x98f   :  { %9460 = vst [vmem:[#allocation40_spill] sm:$0xff] %v8120_v31  ;;  %9461 = vst [vmem:[#allocation39_spill] sm:$0xff] %v8122_v19 }
 0x991   :  { %3684 = vmatpush1.bf16.msra.mxu0 %v3400_v24  ;;  %3725 = vmatpush1.bf16.msra.mxu1 %v3402_v46  ;;  %v8128_v24 = vld [vmem:[#allocation5 + $0xa0] sm:$0xff]  ;;  %v8130_v46 = vld [vmem:[#allocation5 + $0xb0] sm:$0xff] }
 0x992   :  { %3685 = vmatprep.subr.bf16.mxu0 %v3409_v18  ;;  %3726 = vmatprep.subr.bf16.mxu1 %v3411_v39  ;;  %9462 = vst [vmem:[#allocation51_spill] sm:$0xff] %v8128_v24  ;;  %9463 = vst [vmem:[#allocation52_spill] sm:$0xff] %v8130_v46  ;;  %v8132_v18 = vld [vmem:[#allocation5 + $0xc8] sm:$0xff]  ;;  %v8134_v39 = vld [vmem:[#allocation5 + $0xd8] sm:$0xff] }
 0x993   :  { %9464 = vst [vmem:[#allocation53_spill] sm:$0xff] %v8132_v18  ;;  %9465 = vst [vmem:[#allocation54_spill] sm:$0xff] %v8134_v39 }
 0x995   :  { %3686 = vmatpush1.bf16.msra.mxu0 %v3408_v36  ;;  %3727 = vmatpush1.bf16.msra.mxu1 %v3410_v23  ;;  %v8140_v36 = vld [vmem:[#allocation5 + $0xc0] sm:$0xff]  ;;  %v8142_v23 = vld [vmem:[#allocation5 + $0xd0] sm:$0xff] }
 0x996   :  { %3687 = vmatprep.subr.bf16.mxu0 %v3417_v25  ;;  %3728 = vmatprep.subr.bf16.mxu1 %v3419_v9  ;;  %9466 = vst [vmem:[#allocation55_spill] sm:$0xff] %v8140_v36  ;;  %9467 = vst [vmem:[#allocation56_spill] sm:$0xff] %v8142_v23  ;;  %v8144_v25 = vld [vmem:[#allocation5 + $0xe8] sm:$0xff]  ;;  %v8146_v9 = vld [vmem:[#allocation5 + $0xf8] sm:$0xff] }
 0x997   :  { %9468 = vst [vmem:[#allocation61_spill] sm:$0xff] %v8144_v25  ;;  %9469 = vst [vmem:[#allocation62_spill] sm:$0xff] %v8146_v9 }
 0x999   :  { %3688 = vmatpush1.bf16.msra.mxu0 %v3416_v22  ;;  %3729 = vmatpush1.bf16.msra.mxu1 %v3418_v27  ;;  %v8152_v22 = vld [vmem:[#allocation5 + $0xe0] sm:$0xff]  ;;  %v8154_v27 = vld [vmem:[#allocation5 + $0xf0] sm:$0xff] }
 0x99a   :  { %3689 = vmatprep.subr.bf16.mxu0 %v3425_v20  ;;  %3730 = vmatprep.subr.bf16.mxu1 %v3427_v40  ;;  %9470 = vst [vmem:[#allocation63_spill] sm:$0xff] %v8152_v22  ;;  %9471 = vst [vmem:[#allocation64_spill] sm:$0xff] %v8154_v27  ;;  %v8156_v20 = vld [vmem:[#allocation6 + $0x8] sm:$0xff]  ;;  %v8158_v40 = vld [vmem:[#allocation6 + $0x18] sm:$0xff] }
 0x99b   :  { %9472 = vst [vmem:[#allocation65_spill] sm:$0xff] %v8156_v20  ;;  %9473 = vst [vmem:[#allocation66_spill] sm:$0xff] %v8158_v40 }
 0x99d   :  { %3690 = vmatpush1.bf16.msra.mxu0 %v3424_v42  ;;  %3731 = vmatpush1.bf16.msra.mxu1 %v3426_v43  ;;  %v8164_v42 = vld [vmem:[#allocation6] sm:$0xff]  ;;  %v8166_v43 = vld [vmem:[#allocation6 + $0x10] sm:$0xff] }
 0x99e   :  { %3691 = vmatprep.subr.bf16.mxu0 %v3433_v48  ;;  %3732 = vmatprep.subr.bf16.mxu1 %v3435_v49  ;;  %v8168_v48 = vld [vmem:[#allocation6 + $0x28] sm:$0xff]  ;;  %v8170_v49 = vld [vmem:[#allocation6 + $0x38] sm:$0xff] }
 0x9a1   :  { %3692 = vmatpush1.bf16.msra.mxu0 %v3432_v8  ;;  %3733 = vmatpush1.bf16.msra.mxu1 %v3434_v56  ;;  %v8178_v8 = vld [vmem:[#allocation6 + $0x20] sm:$0xff]  ;;  %v8180_v56 = vld [vmem:[#allocation6 + $0x30] sm:$0xff] }
 0x9a2   :  { %3693 = vmatprep.subr.bf16.mxu0 %v3441_v16  ;;  %3734 = vmatprep.subr.bf16.mxu1 %v3443_v17  ;;  %v8182_v16 = vld [vmem:[#allocation6 + $0x48] sm:$0xff]  ;;  %v8184_v17 = vld [vmem:[#allocation6 + $0x58] sm:$0xff] }
 0x9a5   :  { %3694 = vmatpush1.bf16.msra.mxu0 %v3440_v1  ;;  %3735 = vmatpush1.bf16.msra.mxu1 %v3442_v12  ;;  %v8192_v1 = vld [vmem:[#allocation6 + $0x40] sm:$0xff]  ;;  %v8194_v12 = vld [vmem:[#allocation6 + $0x50] sm:$0xff] }
 0x9a6   :  { %3695 = vmatprep.subr.bf16.mxu0 %v3449_v45  ;;  %3736 = vmatprep.subr.bf16.mxu1 %v3451_v11  ;;  %v8196_v45 = vld [vmem:[#allocation6 + $0x68] sm:$0xff]  ;;  %v8198_v11 = vld [vmem:[#allocation6 + $0x78] sm:$0xff] }
 0x9a9   :  { %3696 = vmatpush1.bf16.msra.mxu0 %v3448_v29  ;;  %3737 = vmatpush1.bf16.msra.mxu1 %v3450_v26  ;;  %v8204_v29 = vld [vmem:[#allocation6 + $0x60] sm:$0xff]  ;;  %v8206_v26 = vld [vmem:[#allocation6 + $0x70] sm:$0xff] }
 0x9aa   :  { %3697 = vmatprep.subr.bf16.mxu0 %v3457_v6  ;;  %3738 = vmatprep.subr.bf16.mxu1 %v3459_v35  ;;  %v8208_v6 = vld [vmem:[#allocation6 + $0x88] sm:$0xff]  ;;  %v8210_v35 = vld [vmem:[#allocation6 + $0x98] sm:$0xff] }
 0x9ad   :  { %3698 = vmatpush1.bf16.msra.mxu0 %v3456_v7  ;;  %3739 = vmatpush1.bf16.msra.mxu1 %v3458_v10  ;;  %v8216_v7 = vld [vmem:[#allocation6 + $0x80] sm:$0xff]  ;;  %v8218_v10 = vld [vmem:[#allocation6 + $0x90] sm:$0xff] }
 0x9ae   :  { %3699 = vmatprep.subr.bf16.mxu0 %v3465_v21  ;;  %3740 = vmatprep.subr.bf16.mxu1 %v3467_v4  ;;  %v8220_v21 = vld [vmem:[#allocation6 + $0xa8] sm:$0xff]  ;;  %v8222_v4 = vld [vmem:[#allocation6 + $0xb8] sm:$0xff] }
 0x9b1   :  { %3700 = vmatpush1.bf16.msra.mxu0 %v3464_v62  ;;  %3741 = vmatpush1.bf16.msra.mxu1 %v3466_v55  ;;  %v8228_v62 = vld [vmem:[#allocation6 + $0xa0] sm:$0xff]  ;;  %v8230_v55 = vld [vmem:[#allocation6 + $0xb0] sm:$0xff] }
 0x9b2   :  { %3701 = vmatprep.subr.bf16.mxu0 %v3473_v57  ;;  %3742 = vmatprep.subr.bf16.mxu1 %v3475_v37  ;;  %9474 = vst [vmem:[#allocation67_spill] sm:$0xff] %v8230_v55  ;;  %v8232_v57 = vld [vmem:[#allocation6 + $0xc8] sm:$0xff]  ;;  %v8234_v37 = vld [vmem:[#allocation6 + $0xd8] sm:$0xff] }
 0x9b3   :  { %9475 = vst [vmem:[#allocation68_spill] sm:$0xff] %v8232_v57 }
 0x9b5   :  { %3702 = vmatpush1.bf16.msra.mxu0 %v3472_v44  ;;  %3743 = vmatpush1.bf16.msra.mxu1 %v3474_v13  ;;  %v8240_v44 = vld [vmem:[#allocation6 + $0xc0] sm:$0xff]  ;;  %v8242_v13 = vld [vmem:[#allocation6 + $0xd0] sm:$0xff] }
 0x9b6   :  { %3761 = vmatprep.subr.bf16.mxu0 %v8058_v14  ;;  %3802 = vmatprep.subr.bf16.mxu1 %v8060_v2 }
 0x9b8   :  { %3704 = vmatmul.mubr.bf16.vlgmr.msra.gmra.mrb[76].mxu0 %v8052_v58  ;;  %3745 = vmatmul.mubr.bf16.vlgmr.msra.gmra.mrb[76].mxu1 %v8052_v58  ;;  %v8092_v58 = vld [vmem:[#allocation5 + $0x40] sm:$0xff] }
 0x9b9   :  { %3762 = vmatpush1.bf16.msra.mxu0 %v8064_v59  ;;  %3803 = vmatpush1.bf16.msra.mxu1 %v8066_v60  ;;  %9450 = vst [vmem:[#allocation41_spill] sm:$0xff] %v8092_v58 }
 0x9ba   :  { %3763 = vmatprep.subr.bf16.mxu0 %v8068_v47  ;;  %3804 = vmatprep.subr.bf16.mxu1 %v8070_v28 }
 0x9bb   :  { %3793 = vmatprep.mubr.bf16.mxu0 %v9294_v63  ;;  %3834 = vmatprep.mubr.bf16.mxu1 %v9294_v63 }
 0x9bd   :  { %3764 = vmatpush1.bf16.msra.mxu0 %v8078_v0  ;;  %3805 = vmatpush1.bf16.msra.mxu1 %v8080_v30 }
 0x9be   :  { %3765 = vmatprep.subr.bf16.mxu0 %v8082_v32  ;;  %3806 = vmatprep.subr.bf16.mxu1 %v8084_v51 }
 0x9c1   :  { %3766 = vmatpush1.bf16.msra.mxu0 %v8092_v58  ;;  %3807 = vmatpush1.bf16.msra.mxu1 %v8094_v54 }
 0x9c2   :  { %3767 = vmatprep.subr.bf16.mxu0 %v8096_v53  ;;  %3808 = vmatprep.subr.bf16.mxu1 %v8098_v52 }
 0x9c5   :  { %3768 = vmatpush1.bf16.msra.mxu0 %v8104_v38  ;;  %3809 = vmatpush1.bf16.msra.mxu1 %v8106_v3 }
 0x9c6   :  { %3769 = vmatprep.subr.bf16.mxu0 %v8108_v5  ;;  %3810 = vmatprep.subr.bf16.mxu1 %v8110_v41 }
 0x9c9   :  { %3770 = vmatpush1.bf16.msra.mxu0 %v8116_v50  ;;  %3811 = vmatpush1.bf16.msra.mxu1 %v8118_v15 }
 0x9ca   :  { %3771 = vmatprep.subr.bf16.mxu0 %v8120_v31  ;;  %3812 = vmatprep.subr.bf16.mxu1 %v8122_v19 }
 0x9cd   :  { %3772 = vmatpush1.bf16.msra.mxu0 %v8128_v24  ;;  %3813 = vmatpush1.bf16.msra.mxu1 %v8130_v46 }
 0x9ce   :  { %3773 = vmatprep.subr.bf16.mxu0 %v8132_v18  ;;  %3814 = vmatprep.subr.bf16.mxu1 %v8134_v39 }
 0x9d1   :  { %3774 = vmatpush1.bf16.msra.mxu0 %v8140_v36  ;;  %3815 = vmatpush1.bf16.msra.mxu1 %v8142_v23 }
 0x9d2   :  { %3775 = vmatprep.subr.bf16.mxu0 %v8144_v25  ;;  %3816 = vmatprep.subr.bf16.mxu1 %v8146_v9 }
 0x9d5   :  { %3776 = vmatpush1.bf16.msra.mxu0 %v8152_v22  ;;  %3817 = vmatpush1.bf16.msra.mxu1 %v8154_v27 }
 0x9d6   :  { %3843 = vmatprep.subr.bf16.mxu0 %v8156_v20  ;;  %3884 = vmatprep.subr.bf16.mxu1 %v8158_v40 }
 0x9d8   :  { %3794 = vmatmul.mubr.bf16.vlgmr.msra.gmra.mrb[80].mxu0 %v9294_v63  ;;  %3835 = vmatmul.mubr.bf16.vlgmr.msra.gmra.mrb[80].mxu1 %v9294_v63 }
 0x9d9   :  { %3844 = vmatpush1.bf16.msra.mxu0 %v8164_v42  ;;  %3885 = vmatpush1.bf16.msra.mxu1 %v8166_v43 }
 0x9da   :  { %3845 = vmatprep.subr.bf16.mxu0 %v8168_v48  ;;  %3886 = vmatprep.subr.bf16.mxu1 %v8170_v49 }
 0x9db   :  { %3875 = vmatprep.mubr.bf16.mxu0 %v9294_v63  ;;  %3916 = vmatprep.mubr.bf16.mxu1 %v9294_v63 }
 0x9dd   :  { %3846 = vmatpush1.bf16.msra.mxu0 %v8178_v8  ;;  %3887 = vmatpush1.bf16.msra.mxu1 %v8180_v56 }
 0x9de   :  { %3847 = vmatprep.subr.bf16.mxu0 %v8182_v16  ;;  %3888 = vmatprep.subr.bf16.mxu1 %v8184_v17 }
 0x9e1   :  { %3848 = vmatpush1.bf16.msra.mxu0 %v8192_v1  ;;  %3889 = vmatpush1.bf16.msra.mxu1 %v8194_v12 }
 0x9e2   :  { %3849 = vmatprep.subr.bf16.mxu0 %v8196_v45  ;;  %3890 = vmatprep.subr.bf16.mxu1 %v8198_v11 }
 0x9e5   :  { %3850 = vmatpush1.bf16.msra.mxu0 %v8204_v29  ;;  %3891 = vmatpush1.bf16.msra.mxu1 %v8206_v26 }
 0x9e6   :  { %3851 = vmatprep.subr.bf16.mxu0 %v8208_v6  ;;  %3892 = vmatprep.subr.bf16.mxu1 %v8210_v35 }
 0x9e9   :  { %3852 = vmatpush1.bf16.msra.mxu0 %v8216_v7  ;;  %3893 = vmatpush1.bf16.msra.mxu1 %v8218_v10 }
 0x9ea   :  { %3853 = vmatprep.subr.bf16.mxu0 %v8220_v21  ;;  %3894 = vmatprep.subr.bf16.mxu1 %v8222_v4 }
 0x9ed   :  { %3854 = vmatpush1.bf16.msra.mxu0 %v8228_v62  ;;  %3895 = vmatpush1.bf16.msra.mxu1 %v8230_v55  ;;  %v8252_v55 = vld [vmem:[#allocation6 + $0xe0] sm:$0xff] }
 0x9ee   :  { %3855 = vmatprep.subr.bf16.mxu0 %v8232_v57  ;;  %3896 = vmatprep.subr.bf16.mxu1 %v8234_v37  ;;  %v8254_v57 = vld [vmem:[#allocation6 + $0xf0] sm:$0xff] }
 0x9f1   :  { %3856 = vmatpush1.bf16.msra.mxu0 %v8240_v44  ;;  %3897 = vmatpush1.bf16.msra.mxu1 %v8242_v13 }
 0x9f2   :  { %3857 = vmatprep.subr.bf16.mxu0 %v8244_v33  ;;  %3898 = vmatprep.subr.bf16.mxu1 %v8246_v61 }
 0x9f5   :  { %3858 = vmatpush1.bf16.msra.mxu0 %v8252_v55  ;;  %3899 = vmatpush1.bf16.msra.mxu1 %v8254_v57 }
 0x9f6   :  { %4030 = vmatprep.subr.bf16.mxu0 %v8058_v14  ;;  %4071 = vmatprep.subr.bf16.mxu1 %v8060_v2 }
 0x9f8   :  { %3876 = vmatmul.mubr.bf16.vlgmr.msra.gmra.mrb[84].mxu0 %v9294_v63  ;;  %3917 = vmatmul.mubr.bf16.vlgmr.msra.gmra.mrb[84].mxu1 %v9294_v63 }
 0x9f9   :  { %4031 = vmatpush1.bf16.msra.mxu0 %v8064_v59  ;;  %4072 = vmatpush1.bf16.msra.mxu1 %v8066_v60 }
 0x9fa   :  { %4032 = vmatprep.subr.bf16.mxu0 %v8068_v47  ;;  %4073 = vmatprep.subr.bf16.mxu1 %v8070_v28 }
 0x9fb   :  { %4062 = vmatprep.mubr.bf16.mxu0 %v9294_v63  ;;  %4103 = vmatprep.mubr.bf16.mxu1 %v9294_v63 }
 0x9fd   :  { %4033 = vmatpush1.bf16.msra.mxu0 %v8078_v0  ;;  %4074 = vmatpush1.bf16.msra.mxu1 %v8080_v30 }
 0x9fe   :  { %4034 = vmatprep.subr.bf16.mxu0 %v8082_v32  ;;  %4075 = vmatprep.subr.bf16.mxu1 %v8084_v51 }
 0xa01   :  { %4035 = vmatpush1.bf16.msra.mxu0 %v8092_v58  ;;  %4076 = vmatpush1.bf16.msra.mxu1 %v8094_v54 }
 0xa02   :  { %4036 = vmatprep.subr.bf16.mxu0 %v8096_v53  ;;  %4077 = vmatprep.subr.bf16.mxu1 %v8098_v52 }
 0xa05   :  { %4037 = vmatpush1.bf16.msra.mxu0 %v8104_v38  ;;  %4078 = vmatpush1.bf16.msra.mxu1 %v8106_v3 }
 0xa06   :  { %4038 = vmatprep.subr.bf16.mxu0 %v8108_v5  ;;  %4079 = vmatprep.subr.bf16.mxu1 %v8110_v41 }
 0xa09   :  { %4039 = vmatpush1.bf16.msra.mxu0 %v8116_v50  ;;  %4080 = vmatpush1.bf16.msra.mxu1 %v8118_v15 }
 0xa0a   :  { %4040 = vmatprep.subr.bf16.mxu0 %v8120_v31  ;;  %4081 = vmatprep.subr.bf16.mxu1 %v8122_v19 }
 0xa0d   :  { %4041 = vmatpush1.bf16.msra.mxu0 %v8128_v24  ;;  %4082 = vmatpush1.bf16.msra.mxu1 %v8130_v46  ;;  %v9476_v46 = vld [vmem:[#allocation59_spill] sm:$0xff] }
 0xa0e   :  { %4042 = vmatprep.subr.bf16.mxu0 %v8132_v18  ;;  %4083 = vmatprep.subr.bf16.mxu1 %v8134_v39  ;;  %v9477_v18 = vld [vmem:[#allocation34_spill] sm:$0xff] }
 0xa0f   :  { %v3545_v24 = vrot.slane %v9477_v18, %v9476_v46  ;;  %v9478_v39 = vld [vmem:[#allocation58_spill] sm:$0xff] }
 0xa10   :  { %v9479_v19 = vsub.s32 2, %v9478_v39  ;;  %v9483_v52 = vsub.s32 6, %v9478_v39 }
 0xa11   :  { %4043 = vmatpush1.bf16.msra.mxu0 %v8140_v36  ;;  %4084 = vmatpush1.bf16.msra.mxu1 %v8142_v23  ;;  %v9480_v23 = vsub.s32 1, %v9478_v39 }
 0xa12   :  { %4044 = vmatprep.subr.bf16.mxu0 %v8144_v25  ;;  %4085 = vmatprep.subr.bf16.mxu1 %v8146_v9  ;;  %v3553_v36 = vrot.slane %v9477_v18, %v9479_v19  ;;  %v9481_v9 = vsub.s32 3, %v9478_v39 }
 0xa13   :  { %v3549_v25 = vrot.slane %v9477_v18, %v9480_v23  ;;  %v9482_v23 = vsub.s32 4, %v9478_v39 }
 0xa15   :  { %4045 = vmatpush1.bf16.msra.mxu0 %v8152_v22  ;;  %4086 = vmatpush1.bf16.msra.mxu1 %v8154_v27  ;;  %v3557_v22 = vrot.slane %v9477_v18, %v9481_v9  ;;  %v3561_v9 = vrot.slane %v9477_v18, %v9482_v23 }
 0xa16   :  { %4113 = vmatprep.subr.bf16.mxu0 %v8156_v20  ;;  %4154 = vmatprep.subr.bf16.mxu1 %v8158_v40 }
 0xa4b   :  { %v3623_v27 = vpop.f32.mrb[72].mxu0  ;;  %v3664_v31 = vpop.f32.mrb[72].mxu1 }
 0xa4c   :  { %v3624_v20 = vadd.f32 %v3623_v27, %v3545_v24  ;;  %v3665_v15 = vadd.f32 %v3664_v31, %v3553_v36  ;;  %v3625_v40 = vpop.f32.mrb[73].mxu0  ;;  %v3666_v50 = vpop.f32.mrb[73].mxu1  ;;  %v3569_v31 = vrot.slane %v9477_v18, %v9483_v52  ;;  %v9484_v24 = vsub.s32 5, %v9478_v39 }
 0xa4d   :  { %v3626_v41 = vadd.f32 %v3625_v40, %v3549_v25  ;;  %v3667_v46 = vadd.f32 %v3666_v50, %v3557_v22  ;;  %v3627_v5 = vpop.f32.mrb[74].mxu0  ;;  %v3668_v3 = vpop.f32.mrb[74].mxu1 }
 0xa4e   :  { %3753 = vst [vmem:[#allocation2] sm:$0xff] %v3624_v20  ;;  %3755 = vst [vmem:[#allocation2 + $0x10] sm:$0xff] %v3665_v15  ;;  %v3628_v19 = vpop.f32.mrb[75].mxu0  ;;  %v3669_v38 = vpop.f32.mrb[75].mxu1  ;;  %v3565_v50 = vrot.slane %v9477_v18, %v9484_v24  ;;  %v9485_v3 = vsub.s32 7, %v9478_v39 }
 0xa4f   :  { %3754 = vst [vmem:[#allocation2 + $0x8] sm:$0xff] %v3626_v41  ;;  %3756 = vst [vmem:[#allocation2 + $0x18] sm:$0xff] %v3667_v46 }
 0xa50   :  { %v3573_v5 = vrot.slane %v9477_v18, %v9485_v3 }
 0xa8b   :  { %v3705_v15 = vpop.f32.mrb[76].mxu0  ;;  %v3746_v38 = vpop.f32.mrb[76].mxu1 }
 0xa8c   :  { %v3706_v41 = vadd.f32 %v3705_v15, %v3561_v9  ;;  %v3747_v46 = vadd.f32 %v3746_v38, %v3569_v31  ;;  %v3707_v36 = vpop.f32.mrb[77].mxu0  ;;  %v3748_v25 = vpop.f32.mrb[77].mxu1 }
 0xa8d   :  { %v3708_v22 = vadd.f32 %v3707_v36, %v3565_v50  ;;  %v3749_v27 = vadd.f32 %v3748_v25, %v3573_v5  ;;  %v3709_v20 = vpop.f32.mrb[78].mxu0  ;;  %v3750_v40 = vpop.f32.mrb[78].mxu1  ;;  %v3925_v36 = vld [vmem:[#allocation2] ss:$8 sm:$0xf] }
 0xa8e   :  { %3757 = vst [vmem:[#allocation2 + $0x20] sm:$0xff] %v3706_v41  ;;  %3759 = vst [vmem:[#allocation2 + $0x30] sm:$0xff] %v3747_v46  ;;  %v3710_v52 = vpop.f32.mrb[79].mxu0  ;;  %v3751_v19 = vpop.f32.mrb[79].mxu1 }
 0xa8f   :  { %3758 = vst [vmem:[#allocation2 + $0x28] sm:$0xff] %v3708_v22  ;;  %3760 = vst [vmem:[#allocation2 + $0x38] sm:$0xff] %v3749_v27 }
 0xaab   :  { %v3795_v23 = vpop.f32.mrb[80].mxu0  ;;  %v3836_v39 = vpop.f32.mrb[80].mxu1 }
 0xaac   :  { %v3797_v24 = vpop.f32.mrb[81].mxu0  ;;  %v3838_v18 = vpop.f32.mrb[81].mxu1 }
 0xaad   :  { %v3930_v3 = vcombine.low %v3795_v23, %v3797_v24  ;;  %v3931_v53 = vcombine.low %v3836_v39, %v3838_v18  ;;  %v3799_v9 = vpop.f32.mrb[82].mxu0  ;;  %v3840_v31 = vpop.f32.mrb[82].mxu1 }
 0xaae   :  { %v3800_v15 = vpop.f32.mrb[83].mxu0  ;;  %v3841_v38 = vpop.f32.mrb[83].mxu1 }
 0xaaf   :  { %v3938_v50 = vrot.slane %v3930_v3, %v7325_v34  ;;  %v3945_v5 = vrot.slane %v3931_v53, %v7325_v34 }
 0xab1   :  { %v3946_v41 = vcombine.low %v3938_v50, %v3945_v5 }
 0xab3   :  { %v3953_v46 = vrot.slane %v3946_v41, %v7325_v34 }
 0xab5   :  { %v3955_v25 = vadd.f32 %v3953_v46, %v3925_v36 }
 0xab7   :  { %v6152_v22 = vmul.f32 -1.442695, %v3955_v25  ;;  %v3994_v40 = vrot.slane %v3955_v25, 3 }
 0xab9   :  { %6539 = vpow2.f32 %v6152_v22 }
 0xac3   :  { %v6540_v27 = vpop.eup %6539 }
 0xac4   :  { %v3990_v20 = vadd.f32 1.0, %v6540_v27  ;;  %v3956_v27 = vld [vmem:[#allocation2 + $0x27] ss:$8 sm:$0xf] }
 0xac6   :  { %6541 = vrcp.f32 %v3990_v20 }
 0xac7   :  { %6543 = vtanh.f32 %v3994_v40 }
 0xacb   :  { %v3877_v52 = vpop.f32.mrb[84].mxu0  ;;  %v3918_v19 = vpop.f32.mrb[84].mxu1 }
 0xacc   :  { %v3879_v23 = vpop.f32.mrb[85].mxu0  ;;  %v3920_v39 = vpop.f32.mrb[85].mxu1 }
 0xacd   :  { %v3961_v24 = vcombine.low %v3877_v52, %v3879_v23  ;;  %v3962_v18 = vcombine.low %v3918_v19, %v3920_v39  ;;  %v3881_v3 = vpop.f32.mrb[86].mxu0  ;;  %v3922_v53 = vpop.f32.mrb[86].mxu1 }
 0xace   :  { %v3882_v9 = vpop.f32.mrb[87].mxu0  ;;  %v3923_v31 = vpop.f32.mrb[87].mxu1 }
 0xacf   :  { %v3969_v15 = vrot.slane %v3961_v24, %v7325_v34  ;;  %v3976_v38 = vrot.slane %v3962_v18, %v7325_v34 }
 0xad0   :  { %v6542_v50 = vpop.eup %6541 }
 0xad1   :  { %v3998_v5 = vrot.slane %v6542_v50, 1  ;;  %v3977_v41 = vcombine.low %v3969_v15, %v3976_v38  ;;  %v6544_v46 = vpop.eup %6543  ;;  %v4004_v19 = vrot.slane %v6542_v50, 2 }
 0xad2   :  { %v4001_v25 = vmul.f32 %v6544_v46, %v6542_v50  ;;  %v9487_v46 = vld [vmem:[#allocation68_spill] sm:$0xff] }
 0xad3   :  { %v4000_v36 = vmul.f32 0.0, %v3998_v5  ;;  %v3984_v22 = vrot.slane %v3977_v41, %v7325_v34  ;;  %v9486_v41 = vld [vmem:[#allocation67_spill] sm:$0xff] }
 0xad5   :  { %v8325_v20 = vadd.f32 %v4001_v25, %v4000_v36  ;;  %v3986_v40 = vadd.f32 %v3984_v22, %v3956_v27 }
 0xad7   :  { %v6153_v52 = vmul.f32 -1.442695, %v3986_v40  ;;  %6545 = vtanh.f32 %v8325_v20  ;;  %v4014_v3 = vrot.slane %v3986_v40, 3  ;;  %v9488_v40 = vld [vmem:[#allocation43_spill] sm:$0xff] }
 0xad9   :  { %6547 = vpow2.f32 %v6153_v52  ;;  %v9489_v52 = vld [vmem:[#allocation44_spill] sm:$0xff] }
 0xae1   :  { %v6546_v23 = vpop.eup %6545 }
 0xae2   :  { %v4006_v39 = vmul.f32 %v6546_v23, %v4004_v19  ;;  %v9490_v19 = vld [vmem:[#allocation45_spill] sm:$0xff]  ;;  %v9491_v23 = vld [vmem:[#allocation46_spill] sm:$0xff] }
 0xae3   :  { %v6548_v24 = vpop.eup %6547 }
 0xae4   :  { %v4010_v18 = vadd.f32 1.0, %v6548_v24  ;;  %4027 = vst [vmem:[#allocation15] sm:$0x1] %v4006_v39  ;;  %v4029_v53 = vpack.c.bf16 %v4006_v39, %v4006_v39  ;;  %v9492_v39 = vld [vmem:[#allocation47_spill] sm:$0xff]  ;;  %v9493_v24 = vld [vmem:[#allocation48_spill] sm:$0xff] }
 0xae6   :  { %6549 = vrcp.f32 %v4010_v18  ;;  %4063 = vmatmul.mubr.bf16.vlgmr.msra.gmra.mrb[88].mxu0 %v4029_v53  ;;  %4104 = vmatmul.mubr.bf16.vlgmr.msra.gmra.mrb[88].mxu1 %v4029_v53  ;;  %v9494_v18 = vld [vmem:[#allocation49_spill] sm:$0xff]  ;;  %v9496_v53 = vld [vmem:[#allocation40_spill] sm:$0xff] }
 0xae7   :  { %4114 = vmatpush1.bf16.msra.mxu0 %v8164_v42  ;;  %4155 = vmatpush1.bf16.msra.mxu1 %v8166_v43  ;;  %6551 = vtanh.f32 %v4014_v3  ;;  %v9495_v3 = vld [vmem:[#allocation50_spill] sm:$0xff] }
 0xae8   :  { %4115 = vmatprep.subr.bf16.mxu0 %v8168_v48  ;;  %4156 = vmatprep.subr.bf16.mxu1 %v8170_v49 }
 0xae9   :  { %4145 = vmatprep.mubr.bf16.mxu0 %v9294_v63  ;;  %4186 = vmatprep.mubr.bf16.mxu1 %v9294_v63 }
 0xaeb   :  { %4116 = vmatpush1.bf16.msra.mxu0 %v8178_v8  ;;  %4157 = vmatpush1.bf16.msra.mxu1 %v8180_v56 }
 0xaec   :  { %4117 = vmatprep.subr.bf16.mxu0 %v8182_v16  ;;  %4158 = vmatprep.subr.bf16.mxu1 %v8184_v17 }
 0xaef   :  { %4118 = vmatpush1.bf16.msra.mxu0 %v8192_v1  ;;  %4159 = vmatpush1.bf16.msra.mxu1 %v8194_v12 }
 0xaf0   :  { %v6550_v9 = vpop.eup %6549  ;;  %4119 = vmatprep.subr.bf16.mxu0 %v8196_v45  ;;  %4160 = vmatprep.subr.bf16.mxu1 %v8198_v11 }
 0xaf1   :  { %v4018_v31 = vrot.slane %v6550_v9, 1  ;;  %v6552_v15 = vpop.eup %6551  ;;  %v4024_v36 = vrot.slane %v6550_v9, 2 }
 0xaf2   :  { %v4021_v50 = vmul.f32 %v6552_v15, %v6550_v9  ;;  %v9497_v9 = vld [vmem:[#allocation39_spill] sm:$0xff]  ;;  %v9499_v15 = vld [vmem:[#allocation52_spill] sm:$0xff] }
 0xaf3   :  { %v4020_v38 = vmul.f32 0.0, %v4018_v31  ;;  %4120 = vmatpush1.bf16.msra.mxu0 %v8204_v29  ;;  %4161 = vmatpush1.bf16.msra.mxu1 %v8206_v26  ;;  %v9498_v31 = vld [vmem:[#allocation51_spill] sm:$0xff] }
 0xaf4   :  { %4121 = vmatprep.subr.bf16.mxu0 %v8208_v6  ;;  %4162 = vmatprep.subr.bf16.mxu1 %v8210_v35 }
 0xaf5   :  { %v8346_v5 = vadd.f32 %v4021_v50, %v4020_v38  ;;  %v9500_v38 = vld [vmem:[#allocation53_spill] sm:$0xff]  ;;  %v9501_v50 = vld [vmem:[#allocation54_spill] sm:$0xff] }
 0xaf7   :  { %4122 = vmatpush1.bf16.msra.mxu0 %v8216_v7  ;;  %4163 = vmatpush1.bf16.msra.mxu1 %v8218_v10  ;;  %6553 = vtanh.f32 %v8346_v5 }
 0xaf8   :  { %4123 = vmatprep.subr.bf16.mxu0 %v8220_v21  ;;  %4164 = vmatprep.subr.bf16.mxu1 %v8222_v4 }
 0xafb   :  { %4124 = vmatpush1.bf16.msra.mxu0 %v8228_v62  ;;  %4165 = vmatpush1.bf16.msra.mxu1 %v9486_v41 }
 0xafc   :  { %4125 = vmatprep.subr.bf16.mxu0 %v9487_v46  ;;  %4166 = vmatprep.subr.bf16.mxu1 %v8234_v37 }
 0xaff   :  { %4126 = vmatpush1.bf16.msra.mxu0 %v8240_v44  ;;  %4167 = vmatpush1.bf16.msra.mxu1 %v8242_v13 }
 0xb00   :  { %4127 = vmatprep.subr.bf16.mxu0 %v8244_v33  ;;  %4168 = vmatprep.subr.bf16.mxu1 %v8246_v61 }
 0xb01   :  { %v6554_v25 = vpop.eup %6553 }
 0xb02   :  { %v4026_v22 = vmul.f32 %v6554_v25, %v4024_v36  ;;  %v9502_v36 = vld [vmem:[#allocation55_spill] sm:$0xff]  ;;  %v9503_v25 = vld [vmem:[#allocation56_spill] sm:$0xff] }
 0xb03   :  { %4128 = vmatpush1.bf16.msra.mxu0 %v8252_v55  ;;  %4169 = vmatpush1.bf16.msra.mxu1 %v8254_v57 }
 0xb04   :  { %4028 = vst [vmem:[#allocation15 + $0xf] sm:$0x1] %v4026_v22  ;;  %v4112_v27 = vpack.c.bf16 %v4026_v22, %v4026_v22  ;;  %4300 = vmatprep.subr.bf16.mxu0 %v8058_v14  ;;  %4341 = vmatprep.subr.bf16.mxu1 %v8060_v2  ;;  %v9504_v22 = vld [vmem:[#allocation61_spill] sm:$0xff] }
 0xb06   :  { %4146 = vmatmul.mubr.bf16.vlgmr.msra.gmra.mrb[92].mxu0 %v4112_v27  ;;  %4187 = vmatmul.mubr.bf16.vlgmr.msra.gmra.mrb[92].mxu1 %v4112_v27  ;;  %v9505_v27 = vld [vmem:[#allocation62_spill] sm:$0xff] }
 0xb07   :  { %4301 = vmatpush1.bf16.msra.mxu0 %v8064_v59  ;;  %4342 = vmatpush1.bf16.msra.mxu1 %v8066_v60 }
 0xb08   :  { %4302 = vmatprep.subr.bf16.mxu0 %v8068_v47  ;;  %4343 = vmatprep.subr.bf16.mxu1 %v8070_v28 }
 0xb09   :  { %4332 = vmatprep.mubr.bf16.mxu0 %v9294_v63  ;;  %4373 = vmatprep.mubr.bf16.mxu1 %v9294_v63 }
 0xb0b   :  { %4303 = vmatpush1.bf16.msra.mxu0 %v8078_v0  ;;  %4344 = vmatpush1.bf16.msra.mxu1 %v8080_v30 }
 0xb0c   :  { %4304 = vmatprep.subr.bf16.mxu0 %v8082_v32  ;;  %4345 = vmatprep.subr.bf16.mxu1 %v8084_v51 }
 0xb0f   :  { %4305 = vmatpush1.bf16.msra.mxu0 %v8092_v58  ;;  %4346 = vmatpush1.bf16.msra.mxu1 %v8094_v54 }
 0xb10   :  { %4306 = vmatprep.subr.bf16.mxu0 %v9488_v40  ;;  %4347 = vmatprep.subr.bf16.mxu1 %v9489_v52 }
 0xb13   :  { %4307 = vmatpush1.bf16.msra.mxu0 %v9490_v19  ;;  %4348 = vmatpush1.bf16.msra.mxu1 %v9491_v23 }
 0xb14   :  { %4308 = vmatprep.subr.bf16.mxu0 %v9492_v39  ;;  %4349 = vmatprep.subr.bf16.mxu1 %v9493_v24 }
 0xb17   :  { %4309 = vmatpush1.bf16.msra.mxu0 %v9494_v18  ;;  %4350 = vmatpush1.bf16.msra.mxu1 %v9495_v3  ;;  %v9506_v3 = vld [vmem:[#allocation63_spill] sm:$0xff] }
 0xb18   :  { %4310 = vmatprep.subr.bf16.mxu0 %v9496_v53  ;;  %4351 = vmatprep.subr.bf16.mxu1 %v9497_v9  ;;  %v9507_v53 = vld [vmem:[#allocation64_spill] sm:$0xff]  ;;  %v9508_v9 = vld [vmem:[#allocation65_spill] sm:$0xff] }
 0xb1b   :  { %4311 = vmatpush1.bf16.msra.mxu0 %v9498_v31  ;;  %4352 = vmatpush1.bf16.msra.mxu1 %v9499_v15  ;;  %v9509_v31 = vld [vmem:[#allocation66_spill] sm:$0xff] }
 0xb1c   :  { %4312 = vmatprep.subr.bf16.mxu0 %v9500_v38  ;;  %4353 = vmatprep.subr.bf16.mxu1 %v9501_v50 }
 0xb1f   :  { %4313 = vmatpush1.bf16.msra.mxu0 %v9502_v36  ;;  %4354 = vmatpush1.bf16.msra.mxu1 %v9503_v25 }
 0xb20   :  { %4314 = vmatprep.subr.bf16.mxu0 %v9504_v22  ;;  %4355 = vmatprep.subr.bf16.mxu1 %v9505_v27 }
 0xb23   :  { %4315 = vmatpush1.bf16.msra.mxu0 %v9506_v3  ;;  %4356 = vmatpush1.bf16.msra.mxu1 %v9507_v53 }
 0xb24   :  { %4383 = vmatprep.subr.bf16.mxu0 %v9508_v9  ;;  %4424 = vmatprep.subr.bf16.mxu1 %v9509_v31  ;;  %v4195_v9 = vld [vmem:[#allocation2 + $0x1] ss:$8 sm:$0xf] }
 0xbb9   :  { %v4064_v15 = vpop.f32.mrb[88].mxu0  ;;  %v4105_v38 = vpop.f32.mrb[88].mxu1 }
 0xbba   :  { %v4066_v18 = vpop.f32.mrb[89].mxu0  ;;  %v4107_v50 = vpop.f32.mrb[89].mxu1 }
 0xbbb   :  { %v4200_v24 = vcombine.low %v4064_v15, %v4066_v18  ;;  %v4201_v36 = vcombine.low %v4105_v38, %v4107_v50  ;;  %v4068_v39 = vpop.f32.mrb[90].mxu0  ;;  %v4109_v25 = vpop.f32.mrb[90].mxu1 }
 0xbbc   :  { %v4069_v23 = vpop.f32.mrb[91].mxu0  ;;  %v4110_v22 = vpop.f32.mrb[91].mxu1 }
 0xbbd   :  { %v4208_v27 = vrot.slane %v4200_v24, %v7325_v34  ;;  %v4215_v3 = vrot.slane %v4201_v36, %v7325_v34 }
 0xbbf   :  { %v4216_v19 = vcombine.low %v4208_v27, %v4215_v3  ;;  %v4226_v27 = vld [vmem:[#allocation2 + $0x26] ss:$8 sm:$0xf] }
 0xbc1   :  { %v4223_v53 = vrot.slane %v4216_v19, %v7325_v34 }
 0xbc3   :  { %v4225_v52 = vadd.f32 %v4223_v53, %v4195_v9 }
 0xbc5   :  { %v6154_v31 = vmul.f32 -1.442695, %v4225_v52  ;;  %v4264_v58 = vrot.slane %v4225_v52, 3 }
 0xbc7   :  { %6555 = vpow2.f32 %v6154_v31 }
 0xbd1   :  { %v6556_v40 = vpop.eup %6555 }
 0xbd2   :  { %v4260_v54 = vadd.f32 1.0, %v6556_v40 }
 0xbd4   :  { %6557 = vrcp.f32 %v4260_v54 }
 0xbd5   :  { %6559 = vtanh.f32 %v4264_v58 }
 0xbd9   :  { %v4147_v39 = vpop.f32.mrb[92].mxu0  ;;  %v4188_v18 = vpop.f32.mrb[92].mxu1 }
 0xbda   :  { %v4149_v23 = vpop.f32.mrb[93].mxu0  ;;  %v4190_v15 = vpop.f32.mrb[93].mxu1 }
 0xbdb   :  { %v4231_v38 = vcombine.low %v4147_v39, %v4149_v23  ;;  %v4232_v24 = vcombine.low %v4188_v18, %v4190_v15  ;;  %v4151_v50 = vpop.f32.mrb[94].mxu0  ;;  %v4192_v36 = vpop.f32.mrb[94].mxu1 }
 0xbdc   :  { %v4152_v3 = vpop.f32.mrb[95].mxu0  ;;  %v4193_v25 = vpop.f32.mrb[95].mxu1 }
 0xbdd   :  { %v4239_v19 = vrot.slane %v4231_v38, %v7325_v34  ;;  %v4246_v53 = vrot.slane %v4232_v24, %v7325_v34 }
 0xbde   :  { %v6558_v9 = vpop.eup %6557 }
 0xbdf   :  { %v4268_v31 = vrot.slane %v6558_v9, 1  ;;  %v4247_v40 = vcombine.low %v4239_v19, %v4246_v53  ;;  %v6560_v52 = vpop.eup %6559  ;;  %v4274_v15 = vrot.slane %v6558_v9, 2 }
 0xbe0   :  { %v4271_v54 = vmul.f32 %v6560_v52, %v6558_v9 }
 0xbe1   :  { %v4270_v58 = vmul.f32 %v4268_v31, %v8325_v20  ;;  %v4254_v22 = vrot.slane %v4247_v40, %v7325_v34 }
 0xbe3   :  { %v8406_v39 = vadd.f32 %v4271_v54, %v4270_v58  ;;  %v4256_v18 = vadd.f32 %v4254_v22, %v4226_v27  ;;  %v9516_v22 = vld [vmem:[#allocation47_spill] sm:$0xff] }
 0xbe4   :  { %v9521_v27 = vld [vmem:[#allocation39_spill] sm:$0xff] }
 0xbe5   :  { %v6155_v23 = vmul.f32 -1.442695, %v4256_v18  ;;  %6561 = vtanh.f32 %v8406_v39  ;;  %v4284_v3 = vrot.slane %v4256_v18, 3  ;;  %v9522_v18 = vld [vmem:[#allocation51_spill] sm:$0xff] }
 0xbe7   :  { %6563 = vpow2.f32 %v6155_v23  ;;  %v9523_v23 = vld [vmem:[#allocation52_spill] sm:$0xff] }
 0xbef   :  { %v6562_v38 = vpop.eup %6561 }
 0xbf0   :  { %v4276_v24 = vmul.f32 %v6562_v38, %v4274_v15  ;;  %v9524_v15 = vld [vmem:[#allocation53_spill] sm:$0xff]  ;;  %v9525_v38 = vld [vmem:[#allocation54_spill] sm:$0xff] }
 0xbf1   :  { %v6564_v50 = vpop.eup %6563 }
 0xbf2   :  { %v4280_v36 = vadd.f32 1.0, %v6564_v50  ;;  %4297 = vst [vmem:[#allocation15 + $0x1] sm:$0x1] %v4276_v24  ;;  %v4299_v25 = vpack.c.bf16 %v4276_v24, %v4276_v24  ;;  %v9526_v24 = vld [vmem:[#allocation55_spill] sm:$0xff]  ;;  %v9527_v50 = vld [vmem:[#allocation56_spill] sm:$0xff] }
 0xbf4   :  { %6565 = vrcp.f32 %v4280_v36  ;;  %4333 = vmatmul.mubr.bf16.vlgmr.msra.gmra.mrb[96].mxu0 %v4299_v25  ;;  %4374 = vmatmul.mubr.bf16.vlgmr.msra.gmra.mrb[96].mxu1 %v4299_v25  ;;  %v9528_v36 = vld [vmem:[#allocation61_spill] sm:$0xff]  ;;  %v9530_v25 = vld [vmem:[#allocation63_spill] sm:$0xff] }
 0xbf5   :  { %4384 = vmatpush1.bf16.msra.mxu0 %v8164_v42  ;;  %4425 = vmatpush1.bf16.msra.mxu1 %v8166_v43  ;;  %6567 = vtanh.f32 %v4284_v3  ;;  %v9529_v3 = vld [vmem:[#allocation62_spill] sm:$0xff] }
 0xbf6   :  { %4385 = vmatprep.subr.bf16.mxu0 %v8168_v48  ;;  %4426 = vmatprep.subr.bf16.mxu1 %v8170_v49 }
 0xbf7   :  { %4415 = vmatprep.mubr.bf16.mxu0 %v9294_v63  ;;  %4456 = vmatprep.mubr.bf16.mxu1 %v9294_v63 }
 0xbf9   :  { %4386 = vmatpush1.bf16.msra.mxu0 %v8178_v8  ;;  %4427 = vmatpush1.bf16.msra.mxu1 %v8180_v56 }
 0xbfa   :  { %4387 = vmatprep.subr.bf16.mxu0 %v8182_v16  ;;  %4428 = vmatprep.subr.bf16.mxu1 %v8184_v17 }
 0xbfd   :  { %4388 = vmatpush1.bf16.msra.mxu0 %v8192_v1  ;;  %4429 = vmatpush1.bf16.msra.mxu1 %v8194_v12 }
 0xbfe   :  { %v6566_v20 = vpop.eup %6565  ;;  %4389 = vmatprep.subr.bf16.mxu0 %v8196_v45  ;;  %4430 = vmatprep.subr.bf16.mxu1 %v8198_v11 }
 0xbff   :  { %v4288_v19 = vrot.slane %v6566_v20, 1  ;;  %v6568_v53 = vpop.eup %6567 }
 0xc00   :  { %v4291_v31 = vmul.f32 %v6568_v53, %v6566_v20  ;;  %v9533_v53 = vld [vmem:[#allocation66_spill] sm:$0xff] }
 0xc01   :  { %v4290_v9 = vmul.f32 %v4288_v19, %v8346_v5  ;;  %4390 = vmatpush1.bf16.msra.mxu0 %v8204_v29  ;;  %4431 = vmatpush1.bf16.msra.mxu1 %v8206_v26  ;;  %v4294_v5 = vrot.slane %v6566_v20, 2  ;;  %v9531_v20 = vld [vmem:[#allocation64_spill] sm:$0xff]  ;;  %v9532_v19 = vld [vmem:[#allocation65_spill] sm:$0xff] }
 0xc02   :  { %4391 = vmatprep.subr.bf16.mxu0 %v8208_v6  ;;  %4432 = vmatprep.subr.bf16.mxu1 %v8210_v35 }
 0xc03   :  { %v8428_v40 = vadd.f32 %v4291_v31, %v4290_v9 }
 0xc05   :  { %4392 = vmatpush1.bf16.msra.mxu0 %v8216_v7  ;;  %4433 = vmatpush1.bf16.msra.mxu1 %v8218_v10  ;;  %6569 = vtanh.f32 %v8428_v40 }
 0xc06   :  { %4393 = vmatprep.subr.bf16.mxu0 %v8220_v21  ;;  %4434 = vmatprep.subr.bf16.mxu1 %v8222_v4 }
 0xc09   :  { %4394 = vmatpush1.bf16.msra.mxu0 %v8228_v62  ;;  %4435 = vmatpush1.bf16.msra.mxu1 %v9486_v41 }
 0xc0a   :  { %4395 = vmatprep.subr.bf16.mxu0 %v9487_v46  ;;  %4436 = vmatprep.subr.bf16.mxu1 %v8234_v37 }
 0xc0d   :  { %4396 = vmatpush1.bf16.msra.mxu0 %v8240_v44  ;;  %4437 = vmatpush1.bf16.msra.mxu1 %v8242_v13 }
 0xc0e   :  { %4397 = vmatprep.subr.bf16.mxu0 %v8244_v33  ;;  %4438 = vmatprep.subr.bf16.mxu1 %v8246_v61 }
 0xc0f   :  { %v6570_v52 = vpop.eup %6569 }
 0xc10   :  { %v4296_v58 = vmul.f32 %v6570_v52, %v4294_v5 }
 0xc11   :  { %4398 = vmatpush1.bf16.msra.mxu0 %v8252_v55  ;;  %4439 = vmatpush1.bf16.msra.mxu1 %v8254_v57 }
 0xc12   :  { %4298 = vst [vmem:[#allocation15 + $0xe] sm:$0x1] %v4296_v58  ;;  %v4382_v54 = vpack.c.bf16 %v4296_v58, %v4296_v58  ;;  %4570 = vmatprep.subr.bf16.mxu0 %v8058_v14  ;;  %4611 = vmatprep.subr.bf16.mxu1 %v8060_v2  ;;  %v9510_v14 = vld [vmem:[#allocation41_spill] sm:$0xff]  ;;  %v9511_v2 = vld [vmem:[#allocation42_spill] sm:$0xff] }
 0xc14   :  { %4416 = vmatmul.mubr.bf16.vlgmr.msra.gmra.mrb[100].mxu0 %v4382_v54  ;;  %4457 = vmatmul.mubr.bf16.vlgmr.msra.gmra.mrb[100].mxu1 %v4382_v54 }
 0xc15   :  { %4571 = vmatpush1.bf16.msra.mxu0 %v8064_v59  ;;  %4612 = vmatpush1.bf16.msra.mxu1 %v8066_v60  ;;  %v9512_v59 = vld [vmem:[#allocation43_spill] sm:$0xff]  ;;  %v9513_v60 = vld [vmem:[#allocation44_spill] sm:$0xff] }
 0xc16   :  { %4572 = vmatprep.subr.bf16.mxu0 %v8068_v47  ;;  %4613 = vmatprep.subr.bf16.mxu1 %v8070_v28  ;;  %v9514_v47 = vld [vmem:[#allocation45_spill] sm:$0xff]  ;;  %v9515_v28 = vld [vmem:[#allocation46_spill] sm:$0xff] }
 0xc17   :  { %4602 = vmatprep.mubr.bf16.mxu0 %v9294_v63  ;;  %4643 = vmatprep.mubr.bf16.mxu1 %v9294_v63 }
 0xc19   :  { %4573 = vmatpush1.bf16.msra.mxu0 %v8078_v0  ;;  %4614 = vmatpush1.bf16.msra.mxu1 %v8080_v30  ;;  %v9517_v0 = vld [vmem:[#allocation48_spill] sm:$0xff]  ;;  %v9518_v30 = vld [vmem:[#allocation49_spill] sm:$0xff] }
 0xc1a   :  { %4574 = vmatprep.subr.bf16.mxu0 %v8082_v32  ;;  %4615 = vmatprep.subr.bf16.mxu1 %v8084_v51  ;;  %v9519_v32 = vld [vmem:[#allocation50_spill] sm:$0xff]  ;;  %v9520_v51 = vld [vmem:[#allocation40_spill] sm:$0xff] }
 0xc1d   :  { %4575 = vmatpush1.bf16.msra.mxu0 %v9510_v14  ;;  %4616 = vmatpush1.bf16.msra.mxu1 %v9511_v2 }
 0xc1e   :  { %4576 = vmatprep.subr.bf16.mxu0 %v9512_v59  ;;  %4617 = vmatprep.subr.bf16.mxu1 %v9513_v60 }
 0xc21   :  { %4577 = vmatpush1.bf16.msra.mxu0 %v9514_v47  ;;  %4618 = vmatpush1.bf16.msra.mxu1 %v9515_v28 }
 0xc22   :  { %4578 = vmatprep.subr.bf16.mxu0 %v9516_v22  ;;  %4619 = vmatprep.subr.bf16.mxu1 %v9517_v0 }
 0xc25   :  { %4579 = vmatpush1.bf16.msra.mxu0 %v9518_v30  ;;  %4620 = vmatpush1.bf16.msra.mxu1 %v9519_v32  ;;  %v4465_v30 = vld [vmem:[#allocation2 + $0x2] ss:$8 sm:$0xf] }
 0xc26   :  { %4580 = vmatprep.subr.bf16.mxu0 %v9520_v51  ;;  %4621 = vmatprep.subr.bf16.mxu1 %v9521_v27 }
 0xc29   :  { %4581 = vmatpush1.bf16.msra.mxu0 %v9522_v18  ;;  %4622 = vmatpush1.bf16.msra.mxu1 %v9523_v23 }
 0xc2a   :  { %4582 = vmatprep.subr.bf16.mxu0 %v9524_v15  ;;  %4623 = vmatprep.subr.bf16.mxu1 %v9525_v38 }
 0xc2d   :  { %4583 = vmatpush1.bf16.msra.mxu0 %v9526_v24  ;;  %4624 = vmatpush1.bf16.msra.mxu1 %v9527_v50 }
 0xc2e   :  { %4584 = vmatprep.subr.bf16.mxu0 %v9528_v36  ;;  %4625 = vmatprep.subr.bf16.mxu1 %v9529_v3 }
 0xc31   :  { %4585 = vmatpush1.bf16.msra.mxu0 %v9530_v25  ;;  %4626 = vmatpush1.bf16.msra.mxu1 %v9531_v20 }
 0xc32   :  { %4653 = vmatprep.subr.bf16.mxu0 %v9532_v19  ;;  %4694 = vmatprep.subr.bf16.mxu1 %v9533_v53 }
 0xcc7   :  { %v4334_v9 = vpop.f32.mrb[96].mxu0  ;;  %v4375_v31 = vpop.f32.mrb[96].mxu1 }
 0xcc8   :  { %v4336_v5 = vpop.f32.mrb[97].mxu0  ;;  %v4377_v52 = vpop.f32.mrb[97].mxu1 }
 0xcc9   :  { %v4470_v58 = vcombine.low %v4334_v9, %v4336_v5  ;;  %v4471_v54 = vcombine.low %v4375_v31, %v4377_v52  ;;  %v4338_v14 = vpop.f32.mrb[98].mxu0  ;;  %v4379_v2 = vpop.f32.mrb[98].mxu1 }
 0xcca   :  { %v4339_v59 = vpop.f32.mrb[99].mxu0  ;;  %v4380_v60 = vpop.f32.mrb[99].mxu1 }
 0xccb   :  { %v4478_v47 = vrot.slane %v4470_v58, %v7325_v34  ;;  %v4485_v28 = vrot.slane %v4471_v54, %v7325_v34  ;;  %v4496_v60 = vld [vmem:[#allocation2 + $0x25] ss:$8 sm:$0xf] }
 0xccd   :  { %v4486_v22 = vcombine.low %v4478_v47, %v4485_v28 }
 0xccf   :  { %v4493_v0 = vrot.slane %v4486_v22, %v7325_v34 }
 0xcd1   :  { %v4495_v32 = vadd.f32 %v4493_v0, %v4465_v30 }
 0xcd3   :  { %v6156_v51 = vmul.f32 -1.442695, %v4495_v32  ;;  %v4534_v23 = vrot.slane %v4495_v32, 3 }
 0xcd5   :  { %6571 = vpow2.f32 %v6156_v51 }
 0xcdf   :  { %v6572_v27 = vpop.eup %6571 }
 0xce0   :  { %v4530_v18 = vadd.f32 1.0, %v6572_v27 }
 0xce2   :  { %6573 = vrcp.f32 %v4530_v18 }
 0xce3   :  { %6575 = vtanh.f32 %v4534_v23 }
 0xce7   :  { %v4417_v15 = vpop.f32.mrb[100].mxu0  ;;  %v4458_v38 = vpop.f32.mrb[100].mxu1 }
 0xce8   :  { %v4419_v24 = vpop.f32.mrb[101].mxu0  ;;  %v4460_v50 = vpop.f32.mrb[101].mxu1 }
 0xce9   :  { %v4501_v36 = vcombine.low %v4417_v15, %v4419_v24  ;;  %v4502_v3 = vcombine.low %v4458_v38, %v4460_v50  ;;  %v4421_v25 = vpop.f32.mrb[102].mxu0  ;;  %v4462_v20 = vpop.f32.mrb[102].mxu1  ;;  %v8595_v15 = vld [vmem:[#allocation5 + $0xa0] sm:$0xff]  ;;  %v8598_v38 = vld [vmem:[#allocation5 + $0xb0] sm:$0xff]  ;;  %v8601_v24 = vld [vmem:[#allocation5 + $0xc8] sm:$0xff] }
 0xcea   :  { %v4422_v19 = vpop.f32.mrb[103].mxu0  ;;  %v4463_v53 = vpop.f32.mrb[103].mxu1  ;;  %9546 = vst [vmem:[#allocation45_spill] sm:$0xff] %v8595_v15  ;;  %9547 = vst [vmem:[#allocation46_spill] sm:$0xff] %v8598_v38  ;;  %v8604_v50 = vld [vmem:[#allocation5 + $0xd8] sm:$0xff]  ;;  %v8613_v25 = vld [vmem:[#allocation5 + $0xe8] sm:$0xff] }
 0xceb   :  { %v4509_v9 = vrot.slane %v4501_v36, %v7325_v34  ;;  %v4516_v31 = vrot.slane %v4502_v3, %v7325_v34  ;;  %9548 = vst [vmem:[#allocation47_spill] sm:$0xff] %v8601_v24  ;;  %9549 = vst [vmem:[#allocation48_spill] sm:$0xff] %v8604_v50  ;;  %v8607_v36 = vld [vmem:[#allocation5 + $0xc0] sm:$0xff]  ;;  %v8610_v3 = vld [vmem:[#allocation5 + $0xd0] sm:$0xff] }
 0xcec   :  { %v6574_v5 = vpop.eup %6573  ;;  %9550 = vst [vmem:[#allocation49_spill] sm:$0xff] %v8607_v36  ;;  %9551 = vst [vmem:[#allocation50_spill] sm:$0xff] %v8610_v3  ;;  %v8616_v20 = vld [vmem:[#allocation5 + $0xf8] sm:$0xff]  ;;  %v8619_v19 = vld [vmem:[#allocation5 + $0xe0] sm:$0xff] }
 0xced   :  { %v4538_v52 = vrot.slane %v6574_v5, 1  ;;  %v4517_v58 = vcombine.low %v4509_v9, %v4516_v31  ;;  %v6576_v54 = vpop.eup %6575  ;;  %v4544_v0 = vrot.slane %v6574_v5, 2  ;;  %9552 = vst [vmem:[#allocation40_spill] sm:$0xff] %v8613_v25  ;;  %9553 = vst [vmem:[#allocation39_spill] sm:$0xff] %v8616_v20  ;;  %v8622_v53 = vld [vmem:[#allocation5 + $0xf0] sm:$0xff]  ;;  %v8625_v9 = vld [vmem:[#allocation6 + $0x8] sm:$0xff] }
 0xcee   :  { %v4541_v2 = vmul.f32 %v6576_v54, %v6574_v5  ;;  %9554 = vst [vmem:[#allocation51_spill] sm:$0xff] %v8619_v19  ;;  %9555 = vst [vmem:[#allocation52_spill] sm:$0xff] %v8622_v53  ;;  %v8628_v31 = vld [vmem:[#allocation6 + $0x18] sm:$0xff] }
 0xcef   :  { %v4540_v14 = vmul.f32 %v4538_v52, %v8406_v39  ;;  %v4524_v59 = vrot.slane %v4517_v58, %v7325_v34  ;;  %v8589_v39 = vld [vmem:[#allocation5 + $0xa8] sm:$0xff]  ;;  %9556 = vst [vmem:[#allocation53_spill] sm:$0xff] %v8625_v9  ;;  %9557 = vst [vmem:[#allocation54_spill] sm:$0xff] %v8628_v31 }
 0xcf0   :  { %9544 = vst [vmem:[#allocation43_spill] sm:$0xff] %v8589_v39 }
 0xcf1   :  { %v8488_v47 = vadd.f32 %v4541_v2, %v4540_v14  ;;  %v4526_v28 = vadd.f32 %v4524_v59, %v4496_v60 }
 0xcf3   :  { %v6157_v22 = vmul.f32 -1.442695, %v4526_v28  ;;  %6577 = vtanh.f32 %v8488_v47  ;;  %v4554_v18 = vrot.slane %v4526_v28, 3 }
 0xcf5   :  { %6579 = vpow2.f32 %v6157_v22 }
 0xcfd   :  { %v6578_v30 = vpop.eup %6577 }
 0xcfe   :  { %v4546_v32 = vmul.f32 %v6578_v30, %v4544_v0 }
 0xcff   :  { %v6580_v51 = vpop.eup %6579 }
 0xd00   :  { %v4550_v27 = vadd.f32 1.0, %v6580_v51  ;;  %4567 = vst [vmem:[#allocation15 + $0x2] sm:$0x1] %v4546_v32  ;;  %v4569_v23 = vpack.c.bf16 %v4546_v32, %v4546_v32 }
 0xd02   :  { %6581 = vrcp.f32 %v4550_v27  ;;  %4603 = vmatmul.mubr.bf16.vlgmr.msra.gmra.mrb[104].mxu0 %v4569_v23  ;;  %4644 = vmatmul.mubr.bf16.vlgmr.msra.gmra.mrb[104].mxu1 %v4569_v23  ;;  %v4735_v27 = vld [vmem:[#allocation2 + $0x3] ss:$8 sm:$0xf] }
 0xd03   :  { %4654 = vmatpush1.bf16.msra.mxu0 %v8164_v42  ;;  %4695 = vmatpush1.bf16.msra.mxu1 %v8166_v43  ;;  %6583 = vtanh.f32 %v4554_v18 }
 0xd04   :  { %4655 = vmatprep.subr.bf16.mxu0 %v8168_v48  ;;  %4696 = vmatprep.subr.bf16.mxu1 %v8170_v49 }
 0xd05   :  { %4685 = vmatprep.mubr.bf16.mxu0 %v9294_v63  ;;  %4726 = vmatprep.mubr.bf16.mxu1 %v9294_v63 }
 0xd07   :  { %4656 = vmatpush1.bf16.msra.mxu0 %v8178_v8  ;;  %4697 = vmatpush1.bf16.msra.mxu1 %v8180_v56 }
 0xd08   :  { %4657 = vmatprep.subr.bf16.mxu0 %v8182_v16  ;;  %4698 = vmatprep.subr.bf16.mxu1 %v8184_v17 }
 0xd0b   :  { %4658 = vmatpush1.bf16.msra.mxu0 %v8192_v1  ;;  %4699 = vmatpush1.bf16.msra.mxu1 %v8194_v12 }
 0xd0c   :  { %v6582_v42 = vpop.eup %6581  ;;  %4659 = vmatprep.subr.bf16.mxu0 %v8196_v45  ;;  %4700 = vmatprep.subr.bf16.mxu1 %v8198_v11  ;;  %v8527_v45 = vld [vmem:[#allocation5 + $0x8] sm:$0xff]  ;;  %v8530_v11 = vld [vmem:[#allocation5 + $0x18] sm:$0xff] }
 0xd0d   :  { %v4558_v43 = vrot.slane %v6582_v42, 1  ;;  %v6584_v48 = vpop.eup %6583  ;;  %v4564_v16 = vrot.slane %v6582_v42, 2 }
 0xd0e   :  { %v4561_v8 = vmul.f32 %v6584_v48, %v6582_v42 }
 0xd0f   :  { %v4560_v49 = vmul.f32 %v4558_v43, %v8428_v40  ;;  %4660 = vmatpush1.bf16.msra.mxu0 %v8204_v29  ;;  %4701 = vmatpush1.bf16.msra.mxu1 %v8206_v26  ;;  %v8539_v29 = vld [vmem:[#allocation5 + $0x28] sm:$0xff]  ;;  %v8542_v26 = vld [vmem:[#allocation5 + $0x38] sm:$0xff] }
 0xd10   :  { %4661 = vmatprep.subr.bf16.mxu0 %v8208_v6  ;;  %4702 = vmatprep.subr.bf16.mxu1 %v8210_v35  ;;  %v8547_v6 = vld [vmem:[#allocation5 + $0x20] sm:$0xff]  ;;  %v8550_v35 = vld [vmem:[#allocation5 + $0x30] sm:$0xff]  ;;  %v8592_v40 = vld [vmem:[#allocation5 + $0xb8] sm:$0xff] }
 0xd11   :  { %v8510_v56 = vadd.f32 %v4561_v8, %v4560_v49  ;;  %9545 = vst [vmem:[#allocation44_spill] sm:$0xff] %v8592_v40 }
 0xd13   :  { %4662 = vmatpush1.bf16.msra.mxu0 %v8216_v7  ;;  %4703 = vmatpush1.bf16.msra.mxu1 %v8218_v10  ;;  %6585 = vtanh.f32 %v8510_v56  ;;  %v8553_v7 = vld [vmem:[#allocation5 + $0x48] sm:$0xff]  ;;  %v8556_v10 = vld [vmem:[#allocation5 + $0x58] sm:$0xff] }
 0xd14   :  { %4663 = vmatprep.subr.bf16.mxu0 %v8220_v21  ;;  %4704 = vmatprep.subr.bf16.mxu1 %v8222_v4  ;;  %v8559_v21 = vld [vmem:[#allocation5 + $0x40] sm:$0xff]  ;;  %v8562_v4 = vld [vmem:[#allocation5 + $0x50] sm:$0xff] }
 0xd15   :  { %9534 = vst [vmem:[#allocation36_spill] sm:$0xff] %v8559_v21  ;;  %9535 = vst [vmem:[#allocation35_spill] sm:$0xff] %v8562_v4 }
 0xd17   :  { %4664 = vmatpush1.bf16.msra.mxu0 %v8228_v62  ;;  %4705 = vmatpush1.bf16.msra.mxu1 %v9486_v41  ;;  %v8565_v62 = vld [vmem:[#allocation5 + $0x68] sm:$0xff]  ;;  %v8583_v41 = vld [vmem:[#allocation5 + $0x80] sm:$0xff] }
 0xd18   :  { %4665 = vmatprep.subr.bf16.mxu0 %v9487_v46  ;;  %4706 = vmatprep.subr.bf16.mxu1 %v8234_v37  ;;  %9536 = vst [vmem:[#allocation57_spill] sm:$0xff] %v8565_v62  ;;  %v8574_v37 = vld [vmem:[#allocation5 + $0x70] sm:$0xff]  ;;  %9542 = vst [vmem:[#allocation41_spill] sm:$0xff] %v8583_v41 }
 0xd19   :  { %9539 = vst [vmem:[#allocation58_spill] sm:$0xff] %v8574_v37  ;;  %v8586_v46 = vld [vmem:[#allocation5 + $0x90] sm:$0xff] }
 0xd1a   :  { %9543 = vst [vmem:[#allocation42_spill] sm:$0xff] %v8586_v46 }
 0xd1b   :  { %4666 = vmatpush1.bf16.msra.mxu0 %v8240_v44  ;;  %4707 = vmatpush1.bf16.msra.mxu1 %v8242_v13  ;;  %v8577_v44 = vld [vmem:[#allocation5 + $0x88] sm:$0xff]  ;;  %v8580_v13 = vld [vmem:[#allocation5 + $0x98] sm:$0xff] }
 0xd1c   :  { %4667 = vmatprep.subr.bf16.mxu0 %v8244_v33  ;;  %4708 = vmatprep.subr.bf16.mxu1 %v8246_v61  ;;  %v8533_v61 = vld [vmem:[#allocation5] sm:$0xff]  ;;  %v8536_v33 = vld [vmem:[#allocation5 + $0x10] sm:$0xff]  ;;  %9540 = vst [vmem:[#allocation67_spill] sm:$0xff] %v8577_v44  ;;  %9541 = vst [vmem:[#allocation68_spill] sm:$0xff] %v8580_v13 }
 0xd1d   :  { %v6586_v17 = vpop.eup %6585 }
 0xd1e   :  { %v4566_v1 = vmul.f32 %v6586_v17, %v4564_v16 }
 0xd1f   :  { %4668 = vmatpush1.bf16.msra.mxu0 %v8252_v55  ;;  %4709 = vmatpush1.bf16.msra.mxu1 %v8254_v57  ;;  %v8568_v55 = vld [vmem:[#allocation5 + $0x78] sm:$0xff]  ;;  %v8571_v57 = vld [vmem:[#allocation5 + $0x60] sm:$0xff] }
 0xd20   :  { %4568 = vst [vmem:[#allocation15 + $0xd] sm:$0x1] %v4566_v1  ;;  %v4652_v12 = vpack.c.bf16 %v4566_v1, %v4566_v1  ;;  %4840 = vmatprep.subr.bf16.mxu0 %v8527_v45  ;;  %4881 = vmatprep.subr.bf16.mxu1 %v8530_v11  ;;  %9537 = vst [vmem:[#allocation60_spill] sm:$0xff] %v8568_v55 }
 0xd21   :  { %9538 = vst [vmem:[#allocation34_spill] sm:$0xff] %v8571_v57 }
 0xd22   :  { %4686 = vmatmul.mubr.bf16.vlgmr.msra.gmra.mrb[108].mxu0 %v4652_v12  ;;  %4727 = vmatmul.mubr.bf16.vlgmr.msra.gmra.mrb[108].mxu1 %v4652_v12 }
 0xd23   :  { %4841 = vmatpush1.bf16.msra.mxu0 %v8533_v61  ;;  %4882 = vmatpush1.bf16.msra.mxu1 %v8536_v33 }
 0xd24   :  { %4842 = vmatprep.subr.bf16.mxu0 %v8539_v29  ;;  %4883 = vmatprep.subr.bf16.mxu1 %v8542_v26 }
 0xd25   :  { %4872 = vmatprep.mubr.bf16.mxu0 %v9294_v63  ;;  %4913 = vmatprep.mubr.bf16.mxu1 %v9294_v63 }
 0xd27   :  { %4843 = vmatpush1.bf16.msra.mxu0 %v8547_v6  ;;  %4884 = vmatpush1.bf16.msra.mxu1 %v8550_v35 }
 0xd28   :  { %4844 = vmatprep.subr.bf16.mxu0 %v8553_v7  ;;  %4885 = vmatprep.subr.bf16.mxu1 %v8556_v10 }
 0xd2b   :  { %4845 = vmatpush1.bf16.msra.mxu0 %v8559_v21  ;;  %4886 = vmatpush1.bf16.msra.mxu1 %v8562_v4 }
 0xd2c   :  { %4846 = vmatprep.subr.bf16.mxu0 %v8565_v62  ;;  %4887 = vmatprep.subr.bf16.mxu1 %v8568_v55 }
 0xd2f   :  { %4847 = vmatpush1.bf16.msra.mxu0 %v8571_v57  ;;  %4888 = vmatpush1.bf16.msra.mxu1 %v8574_v37 }
 0xd30   :  { %4848 = vmatprep.subr.bf16.mxu0 %v8577_v44  ;;  %4889 = vmatprep.subr.bf16.mxu1 %v8580_v13 }
 0xd33   :  { %4849 = vmatpush1.bf16.msra.mxu0 %v8583_v41  ;;  %4890 = vmatpush1.bf16.msra.mxu1 %v8586_v46 }
 0xd34   :  { %4850 = vmatprep.subr.bf16.mxu0 %v8589_v39  ;;  %4891 = vmatprep.subr.bf16.mxu1 %v8592_v40 }
 0xd37   :  { %4851 = vmatpush1.bf16.msra.mxu0 %v8595_v15  ;;  %4892 = vmatpush1.bf16.msra.mxu1 %v8598_v38 }
 0xd38   :  { %4852 = vmatprep.subr.bf16.mxu0 %v8601_v24  ;;  %4893 = vmatprep.subr.bf16.mxu1 %v8604_v50 }
 0xd3b   :  { %4853 = vmatpush1.bf16.msra.mxu0 %v8607_v36  ;;  %4894 = vmatpush1.bf16.msra.mxu1 %v8610_v3 }
 0xd3c   :  { %4854 = vmatprep.subr.bf16.mxu0 %v8613_v25  ;;  %4895 = vmatprep.subr.bf16.mxu1 %v8616_v20 }
 0xd3f   :  { %4855 = vmatpush1.bf16.msra.mxu0 %v8619_v19  ;;  %4896 = vmatpush1.bf16.msra.mxu1 %v8622_v53 }
 0xd40   :  { %4923 = vmatprep.subr.bf16.mxu0 %v8625_v9  ;;  %4964 = vmatprep.subr.bf16.mxu1 %v8628_v31 }
 0xdd5   :  { %v4604_v5 = vpop.f32.mrb[104].mxu0  ;;  %v4645_v52 = vpop.f32.mrb[104].mxu1 }
 0xdd6   :  { %v4606_v58 = vpop.f32.mrb[105].mxu0  ;;  %v4647_v54 = vpop.f32.mrb[105].mxu1 }
 0xdd7   :  { %v4740_v14 = vcombine.low %v4604_v5, %v4606_v58  ;;  %v4741_v2 = vcombine.low %v4645_v52, %v4647_v54  ;;  %v4608_v59 = vpop.f32.mrb[106].mxu0  ;;  %v4649_v60 = vpop.f32.mrb[106].mxu1 }
 0xdd8   :  { %v4609_v28 = vpop.f32.mrb[107].mxu0  ;;  %v4650_v22 = vpop.f32.mrb[107].mxu1 }
 0xdd9   :  { %v4748_v0 = vrot.slane %v4740_v14, %v7325_v34  ;;  %v4755_v30 = vrot.slane %v4741_v2, %v7325_v34 }
 0xddb   :  { %v4756_v32 = vcombine.low %v4748_v0, %v4755_v30 }
 0xddd   :  { %v4763_v51 = vrot.slane %v4756_v32, %v7325_v34 }
 0xddf   :  { %v4765_v18 = vadd.f32 %v4763_v51, %v4735_v27  ;;  %v4766_v51 = vld [vmem:[#allocation2 + $0x24] ss:$8 sm:$0xf] }
 0xde1   :  { %v6158_v23 = vmul.f32 -1.442695, %v4765_v18  ;;  %v4804_v48 = vrot.slane %v4765_v18, 3 }
 0xde3   :  { %6587 = vpow2.f32 %v6158_v23 }
 0xded   :  { %v6588_v42 = vpop.eup %6587 }
 0xdee   :  { %v4800_v43 = vadd.f32 1.0, %v6588_v42 }
 0xdf0   :  { %6589 = vrcp.f32 %v4800_v43 }
 0xdf1   :  { %6591 = vtanh.f32 %v4804_v48 }
 0xdf5   :  { %v4687_v49 = vpop.f32.mrb[108].mxu0  ;;  %v4728_v8 = vpop.f32.mrb[108].mxu1 }
 0xdf6   :  { %v4689_v16 = vpop.f32.mrb[109].mxu0  ;;  %v4730_v17 = vpop.f32.mrb[109].mxu1 }
 0xdf7   :  { %v4771_v1 = vcombine.low %v4687_v49, %v4689_v16  ;;  %v4772_v12 = vcombine.low %v4728_v8, %v4730_v17  ;;  %v4691_v5 = vpop.f32.mrb[110].mxu0  ;;  %v4732_v52 = vpop.f32.mrb[110].mxu1 }
 0xdf8   :  { %v4692_v58 = vpop.f32.mrb[111].mxu0  ;;  %v4733_v54 = vpop.f32.mrb[111].mxu1  ;;  %v8650_v5 = vld [vmem:[#allocation6 + $0x38] sm:$0xff]  ;;  %v8655_v52 = vld [vmem:[#allocation6 + $0x20] sm:$0xff] }
 0xdf9   :  { %v4779_v14 = vrot.slane %v4771_v1, %v7325_v34  ;;  %v4786_v2 = vrot.slane %v4772_v12, %v7325_v34  ;;  %v8644_v1 = vld [vmem:[#allocation6 + $0x10] sm:$0xff]  ;;  %v8647_v12 = vld [vmem:[#allocation6 + $0x28] sm:$0xff] }
 0xdfa   :  { %v6590_v59 = vpop.eup %6589  ;;  %v8658_v58 = vld [vmem:[#allocation6 + $0x30] sm:$0xff]  ;;  %v8661_v54 = vld [vmem:[#allocation6 + $0x48] sm:$0xff] }
 0xdfb   :  { %v4808_v60 = vrot.slane %v6590_v59, 1  ;;  %v4787_v28 = vcombine.low %v4779_v14, %v4786_v2  ;;  %v6592_v22 = vpop.eup %6591  ;;  %v4814_v42 = vrot.slane %v6590_v59, 2  ;;  %v8664_v14 = vld [vmem:[#allocation6 + $0x58] sm:$0xff]  ;;  %v8667_v2 = vld [vmem:[#allocation6 + $0x40] sm:$0xff] }
 0xdfc   :  { %v4811_v30 = vmul.f32 %v6592_v22, %v6590_v59  ;;  %v8670_v59 = vld [vmem:[#allocation6 + $0x50] sm:$0xff]  ;;  %v8676_v22 = vld [vmem:[#allocation6 + $0x78] sm:$0xff] }
 0xdfd   :  { %v4810_v0 = vmul.f32 %v4808_v60, %v8488_v47  ;;  %v4794_v32 = vrot.slane %v4787_v28, %v7325_v34  ;;  %v8641_v47 = vld [vmem:[#allocation6] sm:$0xff]  ;;  %v8673_v28 = vld [vmem:[#allocation6 + $0x68] sm:$0xff] }
 0xdff   :  { %v8638_v27 = vadd.f32 %v4811_v30, %v4810_v0  ;;  %v4796_v18 = vadd.f32 %v4794_v32, %v4766_v51 }
 0xe01   :  { %v6159_v23 = vmul.f32 -1.442695, %v4796_v18  ;;  %6593 = vtanh.f32 %v8638_v27  ;;  %v4824_v16 = vrot.slane %v4796_v18, 3  ;;  %v8680_v18 = vld [vmem:[#allocation6 + $0x60] sm:$0xff] }
 0xe03   :  { %6595 = vpow2.f32 %v6159_v23  ;;  %v8683_v23 = vld [vmem:[#allocation6 + $0x70] sm:$0xff] }
 0xe0b   :  { %v6594_v43 = vpop.eup %6593 }
 0xe0c   :  { %v4816_v48 = vmul.f32 %v6594_v43, %v4814_v42  ;;  %v8686_v42 = vld [vmem:[#allocation6 + $0x88] sm:$0xff]  ;;  %v8689_v43 = vld [vmem:[#allocation6 + $0x98] sm:$0xff] }
 0xe0d   :  { %v6596_v49 = vpop.eup %6595 }
 0xe0e   :  { %v4820_v8 = vadd.f32 1.0, %v6596_v49  ;;  %4837 = vst [vmem:[#allocation15 + $0x3] sm:$0x1] %v4816_v48  ;;  %v4839_v17 = vpack.c.bf16 %v4816_v48, %v4816_v48  ;;  %v8697_v49 = vld [vmem:[#allocation6 + $0x90] sm:$0xff] }
 0xe0f   :  { %9558 = vst [vmem:[#allocation55_spill] sm:$0xff] %v8697_v49 }
 0xe10   :  { %6597 = vrcp.f32 %v4820_v8  ;;  %4873 = vmatmul.mubr.bf16.vlgmr.msra.gmra.mrb[112].mxu0 %v4839_v17  ;;  %4914 = vmatmul.mubr.bf16.vlgmr.msra.gmra.mrb[112].mxu1 %v4839_v17  ;;  %v8701_v8 = vld [vmem:[#allocation6 + $0xa8] sm:$0xff]  ;;  %v8707_v17 = vld [vmem:[#allocation6 + $0xa0] sm:$0xff] }
 0xe11   :  { %4924 = vmatpush1.bf16.msra.mxu0 %v8641_v47  ;;  %4965 = vmatpush1.bf16.msra.mxu1 %v8644_v1  ;;  %6599 = vtanh.f32 %v4824_v16  ;;  %9559 = vst [vmem:[#allocation56_spill] sm:$0xff] %v8701_v8  ;;  %v8704_v16 = vld [vmem:[#allocation6 + $0xb8] sm:$0xff]  ;;  %9561 = vst [vmem:[#allocation62_spill] sm:$0xff] %v8707_v17 }
 0xe12   :  { %4925 = vmatprep.subr.bf16.mxu0 %v8647_v12  ;;  %4966 = vmatprep.subr.bf16.mxu1 %v8650_v5  ;;  %9560 = vst [vmem:[#allocation61_spill] sm:$0xff] %v8704_v16 }
 0xe13   :  { %4955 = vmatprep.mubr.bf16.mxu0 %v9294_v63  ;;  %4996 = vmatprep.mubr.bf16.mxu1 %v9294_v63 }
 0xe15   :  { %4926 = vmatpush1.bf16.msra.mxu0 %v8655_v52  ;;  %4967 = vmatpush1.bf16.msra.mxu1 %v8658_v58 }
 0xe16   :  { %4927 = vmatprep.subr.bf16.mxu0 %v8661_v54  ;;  %4968 = vmatprep.subr.bf16.mxu1 %v8664_v14 }
 0xe19   :  { %4928 = vmatpush1.bf16.msra.mxu0 %v8667_v2  ;;  %4969 = vmatpush1.bf16.msra.mxu1 %v8670_v59 }
 0xe1a   :  { %v6598_v60 = vpop.eup %6597  ;;  %4929 = vmatprep.subr.bf16.mxu0 %v8673_v28  ;;  %4970 = vmatprep.subr.bf16.mxu1 %v8676_v22 }
 0xe1b   :  { %v4828_v0 = vrot.slane %v6598_v60, 1  ;;  %v6600_v30 = vpop.eup %6599 }
 0xe1c   :  { %v4831_v51 = vmul.f32 %v6600_v30, %v6598_v60  ;;  %v8713_v30 = vld [vmem:[#allocation6 + $0xc8] sm:$0xff] }
 0xe1d   :  { %v4830_v32 = vmul.f32 %v4828_v0, %v8510_v56  ;;  %4930 = vmatpush1.bf16.msra.mxu0 %v8680_v18  ;;  %4971 = vmatpush1.bf16.msra.mxu1 %v8683_v23  ;;  %v8694_v56 = vld [vmem:[#allocation6 + $0x80] sm:$0xff]  ;;  %v8710_v0 = vld [vmem:[#allocation6 + $0xb0] sm:$0xff]  ;;  %9563 = vst [vmem:[#allocation64_spill] sm:$0xff] %v8713_v30 }
 0xe1e   :  { %4931 = vmatprep.subr.bf16.mxu0 %v8686_v42  ;;  %4972 = vmatprep.subr.bf16.mxu1 %v8689_v43  ;;  %9562 = vst [vmem:[#allocation63_spill] sm:$0xff] %v8710_v0 }
 0xe1f   :  { %v8692_v48 = vadd.f32 %v4831_v51, %v4830_v32  ;;  %v8716_v32 = vld [vmem:[#allocation6 + $0xd8] sm:$0xff]  ;;  %v8719_v51 = vld [vmem:[#allocation6 + $0xc0] sm:$0xff] }
 0xe20   :  { %9564 = vst [vmem:[#allocation65_spill] sm:$0xff] %v8716_v32  ;;  %9565 = vst [vmem:[#allocation66_spill] sm:$0xff] %v8719_v51 }
 0xe21   :  { %4932 = vmatpush1.bf16.msra.mxu0 %v8694_v56  ;;  %4973 = vmatpush1.bf16.msra.mxu1 %v8697_v49  ;;  %6601 = vtanh.f32 %v8692_v48 }
 0xe22   :  { %4933 = vmatprep.subr.bf16.mxu0 %v8701_v8  ;;  %4974 = vmatprep.subr.bf16.mxu1 %v8704_v16  ;;  %v8722_v16 = vld [vmem:[#allocation6 + $0xd0] sm:$0xff] }
 0xe23   :  { %9566 = vst [vmem:[#allocation69_spill] sm:$0xff] %v8722_v16 }
 0xe25   :  { %4934 = vmatpush1.bf16.msra.mxu0 %v8707_v17  ;;  %4975 = vmatpush1.bf16.msra.mxu1 %v8710_v0  ;;  %v8725_v17 = vld [vmem:[#allocation6 + $0xe8] sm:$0xff]  ;;  %v8728_v0 = vld [vmem:[#allocation6 + $0xf8] sm:$0xff] }
 0xe26   :  { %4935 = vmatprep.subr.bf16.mxu0 %v8713_v30  ;;  %4976 = vmatprep.subr.bf16.mxu1 %v8716_v32  ;;  %v4834_v30 = vrot.slane %v6598_v60, 2  ;;  %v8731_v32 = vld [vmem:[#allocation6 + $0xe0] sm:$0xff] }
 0xe29   :  { %4936 = vmatpush1.bf16.msra.mxu0 %v8719_v51  ;;  %4977 = vmatpush1.bf16.msra.mxu1 %v8722_v16  ;;  %v8734_v51 = vld [vmem:[#allocation6 + $0xf0] sm:$0xff] }
 0xe2a   :  { %4937 = vmatprep.subr.bf16.mxu0 %v8725_v17  ;;  %4978 = vmatprep.subr.bf16.mxu1 %v8728_v0 }
 0xe2b   :  { %v6602_v8 = vpop.eup %6601 }
 0xe2c   :  { %v4836_v49 = vmul.f32 %v6602_v8, %v4834_v30 }
 0xe2d   :  { %4938 = vmatpush1.bf16.msra.mxu0 %v8731_v32  ;;  %4979 = vmatpush1.bf16.msra.mxu1 %v8734_v51 }
 0xe2e   :  { %4838 = vst [vmem:[#allocation15 + $0xc] sm:$0x1] %v4836_v49  ;;  %v4922_v16 = vpack.c.bf16 %v4836_v49, %v4836_v49  ;;  %5110 = vmatprep.subr.bf16.mxu0 %v8527_v45  ;;  %5151 = vmatprep.subr.bf16.mxu1 %v8530_v11 }
 0xe30   :  { %4956 = vmatmul.mubr.bf16.vlgmr.msra.gmra.mrb[116].mxu0 %v4922_v16  ;;  %4997 = vmatmul.mubr.bf16.vlgmr.msra.gmra.mrb[116].mxu1 %v4922_v16 }
 0xe31   :  { %5111 = vmatpush1.bf16.msra.mxu0 %v8533_v61  ;;  %5152 = vmatpush1.bf16.msra.mxu1 %v8536_v33 }
 0xe32   :  { %5112 = vmatprep.subr.bf16.mxu0 %v8539_v29  ;;  %5153 = vmatprep.subr.bf16.mxu1 %v8542_v26 }
 0xe33   :  { %5142 = vmatprep.mubr.bf16.mxu0 %v9294_v63  ;;  %5183 = vmatprep.mubr.bf16.mxu1 %v9294_v63 }
 0xe35   :  { %5113 = vmatpush1.bf16.msra.mxu0 %v8547_v6  ;;  %5154 = vmatpush1.bf16.msra.mxu1 %v8550_v35 }
 0xe36   :  { %5114 = vmatprep.subr.bf16.mxu0 %v8553_v7  ;;  %5155 = vmatprep.subr.bf16.mxu1 %v8556_v10 }
 0xe39   :  { %5115 = vmatpush1.bf16.msra.mxu0 %v8559_v21  ;;  %5156 = vmatpush1.bf16.msra.mxu1 %v8562_v4 }
 0xe3a   :  { %5116 = vmatprep.subr.bf16.mxu0 %v8565_v62  ;;  %5157 = vmatprep.subr.bf16.mxu1 %v8568_v55 }
 0xe3d   :  { %5117 = vmatpush1.bf16.msra.mxu0 %v8571_v57  ;;  %5158 = vmatpush1.bf16.msra.mxu1 %v8574_v37 }
 0xe3e   :  { %5118 = vmatprep.subr.bf16.mxu0 %v8577_v44  ;;  %5159 = vmatprep.subr.bf16.mxu1 %v8580_v13 }
 0xe41   :  { %5119 = vmatpush1.bf16.msra.mxu0 %v8583_v41  ;;  %5160 = vmatpush1.bf16.msra.mxu1 %v8586_v46 }
 0xe42   :  { %5120 = vmatprep.subr.bf16.mxu0 %v8589_v39  ;;  %5161 = vmatprep.subr.bf16.mxu1 %v8592_v40 }
 0xe45   :  { %5121 = vmatpush1.bf16.msra.mxu0 %v8595_v15  ;;  %5162 = vmatpush1.bf16.msra.mxu1 %v8598_v38 }
 0xe46   :  { %5122 = vmatprep.subr.bf16.mxu0 %v8601_v24  ;;  %5163 = vmatprep.subr.bf16.mxu1 %v8604_v50 }
 0xe49   :  { %5123 = vmatpush1.bf16.msra.mxu0 %v8607_v36  ;;  %5164 = vmatpush1.bf16.msra.mxu1 %v8610_v3 }
 0xe4a   :  { %5124 = vmatprep.subr.bf16.mxu0 %v8613_v25  ;;  %5165 = vmatprep.subr.bf16.mxu1 %v8616_v20 }
 0xe4d   :  { %5125 = vmatpush1.bf16.msra.mxu0 %v8619_v19  ;;  %5166 = vmatpush1.bf16.msra.mxu1 %v8622_v53 }
 0xe4e   :  { %5193 = vmatprep.subr.bf16.mxu0 %v8625_v9  ;;  %5234 = vmatprep.subr.bf16.mxu1 %v8628_v31  ;;  %v5005_v9 = vld [vmem:[#allocation2 + $0x4] ss:$8 sm:$0xf] }
 0xee3   :  { %v4874_v60 = vpop.f32.mrb[112].mxu0  ;;  %v4915_v49 = vpop.f32.mrb[112].mxu1 }
 0xee4   :  { %v4876_v8 = vpop.f32.mrb[113].mxu0  ;;  %v4917_v16 = vpop.f32.mrb[113].mxu1 }
 0xee5   :  { %v5010_v30 = vcombine.low %v4874_v60, %v4876_v8  ;;  %v5011_v36 = vcombine.low %v4915_v49, %v4917_v16  ;;  %v4878_v50 = vpop.f32.mrb[114].mxu0  ;;  %v4919_v3 = vpop.f32.mrb[114].mxu1 }
 0xee6   :  { %v4879_v24 = vpop.f32.mrb[115].mxu0  ;;  %v4920_v25 = vpop.f32.mrb[115].mxu1 }
 0xee7   :  { %v5018_v20 = vrot.slane %v5010_v30, %v7325_v34  ;;  %v5025_v19 = vrot.slane %v5011_v36, %v7325_v34  ;;  %v5036_v30 = vld [vmem:[#allocation2 + $0x23] ss:$8 sm:$0xf] }
 0xee9   :  { %v5026_v38 = vcombine.low %v5018_v20, %v5025_v19 }
 0xeeb   :  { %v5033_v53 = vrot.slane %v5026_v38, %v7325_v34 }
 0xeed   :  { %v5035_v15 = vadd.f32 %v5033_v53, %v5005_v9 }
 0xeef   :  { %v6160_v31 = vmul.f32 -1.442695, %v5035_v15  ;;  %v5074_v46 = vrot.slane %v5035_v15, 3 }
 0xef1   :  { %6603 = vpow2.f32 %v6160_v31 }
 0xefb   :  { %v6604_v40 = vpop.eup %6603 }
 0xefc   :  { %v5070_v39 = vadd.f32 1.0, %v6604_v40 }
 0xefe   :  { %6605 = vrcp.f32 %v5070_v39 }
 0xeff   :  { %6607 = vtanh.f32 %v5074_v46 }
 0xf03   :  { %v4957_v50 = vpop.f32.mrb[116].mxu0  ;;  %v4998_v3 = vpop.f32.mrb[116].mxu1 }
 0xf04   :  { %v4959_v24 = vpop.f32.mrb[117].mxu0  ;;  %v5000_v25 = vpop.f32.mrb[117].mxu1 }
 0xf05   :  { %v5041_v60 = vcombine.low %v4957_v50, %v4959_v24  ;;  %v5042_v49 = vcombine.low %v4998_v3, %v5000_v25  ;;  %v4961_v8 = vpop.f32.mrb[118].mxu0  ;;  %v5002_v36 = vpop.f32.mrb[118].mxu1 }
 0xf06   :  { %v4962_v20 = vpop.f32.mrb[119].mxu0  ;;  %v5003_v19 = vpop.f32.mrb[119].mxu1 }
 0xf07   :  { %v5049_v38 = vrot.slane %v5041_v60, %v7325_v34  ;;  %v5056_v53 = vrot.slane %v5042_v49, %v7325_v34 }
 0xf08   :  { %v6606_v9 = vpop.eup %6605 }
 0xf09   :  { %v5078_v31 = vrot.slane %v6606_v9, 1  ;;  %v5057_v40 = vcombine.low %v5049_v38, %v5056_v53  ;;  %v6608_v15 = vpop.eup %6607  ;;  %v5084_v25 = vrot.slane %v6606_v9, 2 }
 0xf0a   :  { %v5081_v39 = vmul.f32 %v6608_v15, %v6606_v9  ;;  %v9567_v15 = vld [vmem:[#allocation55_spill] sm:$0xff] }
 0xf0b   :  { %v5080_v46 = vmul.f32 %v5078_v31, %v8638_v27  ;;  %v5064_v16 = vrot.slane %v5057_v40, %v7325_v34 }
 0xf0d   :  { %v8780_v50 = vadd.f32 %v5081_v39, %v5080_v46  ;;  %v5066_v3 = vadd.f32 %v5064_v16, %v5036_v30  ;;  %v9568_v46 = vld [vmem:[#allocation56_spill] sm:$0xff]  ;;  %v9570_v39 = vld [vmem:[#allocation62_spill] sm:$0xff]  ;;  %v9571_v16 = vld [vmem:[#allocation63_spill] sm:$0xff] }
 0xf0e   :  { %v9572_v30 = vld [vmem:[#allocation64_spill] sm:$0xff] }
 0xf0f   :  { %v6161_v24 = vmul.f32 -1.442695, %v5066_v3  ;;  %6609 = vtanh.f32 %v8780_v50  ;;  %v5094_v20 = vrot.slane %v5066_v3, 3  ;;  %v9573_v3 = vld [vmem:[#allocation65_spill] sm:$0xff] }
 0xf11   :  { %6611 = vpow2.f32 %v6161_v24  ;;  %v9574_v24 = vld [vmem:[#allocation66_spill] sm:$0xff] }
 0xf19   :  { %v6610_v60 = vpop.eup %6609 }
 0xf1a   :  { %v5086_v49 = vmul.f32 %v6610_v60, %v5084_v25  ;;  %v9575_v25 = vld [vmem:[#allocation69_spill] sm:$0xff] }
 0xf1b   :  { %v6612_v8 = vpop.eup %6611 }
 0xf1c   :  { %v5090_v36 = vadd.f32 1.0, %v6612_v8  ;;  %5107 = vst [vmem:[#allocation15 + $0x4] sm:$0x1] %v5086_v49  ;;  %v5109_v19 = vpack.c.bf16 %v5086_v49, %v5086_v49 }
 0xf1e   :  { %6613 = vrcp.f32 %v5090_v36  ;;  %5143 = vmatmul.mubr.bf16.vlgmr.msra.gmra.mrb[120].mxu0 %v5109_v19  ;;  %5184 = vmatmul.mubr.bf16.vlgmr.msra.gmra.mrb[120].mxu1 %v5109_v19  ;;  %v9577_v19 = vld [vmem:[#allocation43_spill] sm:$0xff] }
 0xf1f   :  { %5194 = vmatpush1.bf16.msra.mxu0 %v8641_v47  ;;  %5235 = vmatpush1.bf16.msra.mxu1 %v8644_v1  ;;  %6615 = vtanh.f32 %v5094_v20  ;;  %v9576_v20 = vld [vmem:[#allocation42_spill] sm:$0xff] }
 0xf20   :  { %5195 = vmatprep.subr.bf16.mxu0 %v8647_v12  ;;  %5236 = vmatprep.subr.bf16.mxu1 %v8650_v5 }
 0xf21   :  { %5225 = vmatprep.mubr.bf16.mxu0 %v9294_v63  ;;  %5266 = vmatprep.mubr.bf16.mxu1 %v9294_v63 }
 0xf23   :  { %5196 = vmatpush1.bf16.msra.mxu0 %v8655_v52  ;;  %5237 = vmatpush1.bf16.msra.mxu1 %v8658_v58 }
 0xf24   :  { %5197 = vmatprep.subr.bf16.mxu0 %v8661_v54  ;;  %5238 = vmatprep.subr.bf16.mxu1 %v8664_v14 }
 0xf27   :  { %5198 = vmatpush1.bf16.msra.mxu0 %v8667_v2  ;;  %5239 = vmatpush1.bf16.msra.mxu1 %v8670_v59 }
 0xf28   :  { %v6614_v27 = vpop.eup %6613  ;;  %5199 = vmatprep.subr.bf16.mxu0 %v8673_v28  ;;  %5240 = vmatprep.subr.bf16.mxu1 %v8676_v22 }
 0xf29   :  { %v5098_v38 = vrot.slane %v6614_v27, 1  ;;  %v6616_v53 = vpop.eup %6615  ;;  %v5104_v60 = vrot.slane %v6614_v27, 2 }
 0xf2a   :  { %v5101_v31 = vmul.f32 %v6616_v53, %v6614_v27  ;;  %v9578_v27 = vld [vmem:[#allocation44_spill] sm:$0xff]  ;;  %v9580_v53 = vld [vmem:[#allocation46_spill] sm:$0xff] }
 0xf2b   :  { %v5100_v9 = vmul.f32 %v5098_v38, %v8692_v48  ;;  %5200 = vmatpush1.bf16.msra.mxu0 %v8680_v18  ;;  %5241 = vmatpush1.bf16.msra.mxu1 %v8683_v23  ;;  %v9569_v48 = vld [vmem:[#allocation61_spill] sm:$0xff] }
 0xf2c   :  { %5201 = vmatprep.subr.bf16.mxu0 %v8686_v42  ;;  %5242 = vmatprep.subr.bf16.mxu1 %v8689_v43  ;;  %v9579_v38 = vld [vmem:[#allocation45_spill] sm:$0xff] }
 0xf2d   :  { %v8802_v40 = vadd.f32 %v5101_v31, %v5100_v9  ;;  %v9581_v9 = vld [vmem:[#allocation47_spill] sm:$0xff]  ;;  %v9582_v31 = vld [vmem:[#allocation48_spill] sm:$0xff] }
 0xf2f   :  { %5202 = vmatpush1.bf16.msra.mxu0 %v8694_v56  ;;  %5243 = vmatpush1.bf16.msra.mxu1 %v9567_v15  ;;  %6617 = vtanh.f32 %v8802_v40 }
 0xf30   :  { %5203 = vmatprep.subr.bf16.mxu0 %v9568_v46  ;;  %5244 = vmatprep.subr.bf16.mxu1 %v9569_v48 }
 0xf33   :  { %5204 = vmatpush1.bf16.msra.mxu0 %v9570_v39  ;;  %5245 = vmatpush1.bf16.msra.mxu1 %v9571_v16 }
 0xf34   :  { %5205 = vmatprep.subr.bf16.mxu0 %v9572_v30  ;;  %5246 = vmatprep.subr.bf16.mxu1 %v9573_v3 }
 0xf37   :  { %5206 = vmatpush1.bf16.msra.mxu0 %v9574_v24  ;;  %5247 = vmatpush1.bf16.msra.mxu1 %v9575_v25 }
 0xf38   :  { %5207 = vmatprep.subr.bf16.mxu0 %v8725_v17  ;;  %5248 = vmatprep.subr.bf16.mxu1 %v8728_v0 }
 0xf39   :  { %v6618_v49 = vpop.eup %6617 }
 0xf3a   :  { %v5106_v8 = vmul.f32 %v6618_v49, %v5104_v60  ;;  %v9583_v60 = vld [vmem:[#allocation49_spill] sm:$0xff]  ;;  %v9584_v49 = vld [vmem:[#allocation50_spill] sm:$0xff] }
 0xf3b   :  { %5208 = vmatpush1.bf16.msra.mxu0 %v8731_v32  ;;  %5249 = vmatpush1.bf16.msra.mxu1 %v8734_v51 }
 0xf3c   :  { %5108 = vst [vmem:[#allocation15 + $0xb] sm:$0x1] %v5106_v8  ;;  %v5192_v36 = vpack.c.bf16 %v5106_v8, %v5106_v8  ;;  %5380 = vmatprep.subr.bf16.mxu0 %v8527_v45  ;;  %5421 = vmatprep.subr.bf16.mxu1 %v8530_v11  ;;  %v9585_v8 = vld [vmem:[#allocation40_spill] sm:$0xff] }
 0xf3e   :  { %5226 = vmatmul.mubr.bf16.vlgmr.msra.gmra.mrb[124].mxu0 %v5192_v36  ;;  %5267 = vmatmul.mubr.bf16.vlgmr.msra.gmra.mrb[124].mxu1 %v5192_v36  ;;  %v9586_v36 = vld [vmem:[#allocation39_spill] sm:$0xff] }
 0xf3f   :  { %5381 = vmatpush1.bf16.msra.mxu0 %v8533_v61  ;;  %5422 = vmatpush1.bf16.msra.mxu1 %v8536_v33 }
 0xf40   :  { %5382 = vmatprep.subr.bf16.mxu0 %v8539_v29  ;;  %5423 = vmatprep.subr.bf16.mxu1 %v8542_v26 }
 0xf41   :  { %5412 = vmatprep.mubr.bf16.mxu0 %v9294_v63  ;;  %5453 = vmatprep.mubr.bf16.mxu1 %v9294_v63 }
 0xf43   :  { %5383 = vmatpush1.bf16.msra.mxu0 %v8547_v6  ;;  %5424 = vmatpush1.bf16.msra.mxu1 %v8550_v35 }
 0xf44   :  { %5384 = vmatprep.subr.bf16.mxu0 %v8553_v7  ;;  %5425 = vmatprep.subr.bf16.mxu1 %v8556_v10 }
 0xf47   :  { %5385 = vmatpush1.bf16.msra.mxu0 %v8559_v21  ;;  %5426 = vmatpush1.bf16.msra.mxu1 %v8562_v4 }
 0xf48   :  { %5386 = vmatprep.subr.bf16.mxu0 %v8565_v62  ;;  %5427 = vmatprep.subr.bf16.mxu1 %v8568_v55 }
 0xf4b   :  { %5387 = vmatpush1.bf16.msra.mxu0 %v8571_v57  ;;  %5428 = vmatpush1.bf16.msra.mxu1 %v8574_v37 }
 0xf4c   :  { %5388 = vmatprep.subr.bf16.mxu0 %v8577_v44  ;;  %5429 = vmatprep.subr.bf16.mxu1 %v8580_v13 }
 0xf4f   :  { %5389 = vmatpush1.bf16.msra.mxu0 %v8583_v41  ;;  %5430 = vmatpush1.bf16.msra.mxu1 %v9576_v20  ;;  %v9587_v20 = vld [vmem:[#allocation51_spill] sm:$0xff] }
 0xf50   :  { %5390 = vmatprep.subr.bf16.mxu0 %v9577_v19  ;;  %5431 = vmatprep.subr.bf16.mxu1 %v9578_v27  ;;  %v9588_v19 = vld [vmem:[#allocation52_spill] sm:$0xff]  ;;  %v9589_v27 = vld [vmem:[#allocation53_spill] sm:$0xff] }
 0xf53   :  { %5391 = vmatpush1.bf16.msra.mxu0 %v9579_v38  ;;  %5432 = vmatpush1.bf16.msra.mxu1 %v9580_v53  ;;  %v9590_v38 = vld [vmem:[#allocation54_spill] sm:$0xff] }
 0xf54   :  { %5392 = vmatprep.subr.bf16.mxu0 %v9581_v9  ;;  %5433 = vmatprep.subr.bf16.mxu1 %v9582_v31 }
 0xf57   :  { %5393 = vmatpush1.bf16.msra.mxu0 %v9583_v60  ;;  %5434 = vmatpush1.bf16.msra.mxu1 %v9584_v49 }
 0xf58   :  { %5394 = vmatprep.subr.bf16.mxu0 %v9585_v8  ;;  %5435 = vmatprep.subr.bf16.mxu1 %v9586_v36 }
 0xf5b   :  { %5395 = vmatpush1.bf16.msra.mxu0 %v9587_v20  ;;  %5436 = vmatpush1.bf16.msra.mxu1 %v9588_v19 }
 0xf5c   :  { %5463 = vmatprep.subr.bf16.mxu0 %v9589_v27  ;;  %5504 = vmatprep.subr.bf16.mxu1 %v9590_v38  ;;  %v5275_v27 = vld [vmem:[#allocation2 + $0x5] ss:$8 sm:$0xf] }
 0xff1   :  { %v5144_v53 = vpop.f32.mrb[120].mxu0  ;;  %v5185_v9 = vpop.f32.mrb[120].mxu1 }
 0xff2   :  { %v5146_v41 = vpop.f32.mrb[121].mxu0  ;;  %v5187_v31 = vpop.f32.mrb[121].mxu1 }
 0xff3   :  { %v5280_v13 = vcombine.low %v5144_v53, %v5146_v41  ;;  %v5281_v60 = vcombine.low %v5185_v9, %v5187_v31  ;;  %v5148_v44 = vpop.f32.mrb[122].mxu0  ;;  %v5189_v49 = vpop.f32.mrb[122].mxu1 }
 0xff4   :  { %v5149_v37 = vpop.f32.mrb[123].mxu0  ;;  %v5190_v8 = vpop.f32.mrb[123].mxu1 }
 0xff5   :  { %v5288_v36 = vrot.slane %v5280_v13, %v7325_v34  ;;  %v5295_v20 = vrot.slane %v5281_v60, %v7325_v34 }
 0xff7   :  { %v5296_v57 = vcombine.low %v5288_v36, %v5295_v20  ;;  %v5306_v36 = vld [vmem:[#allocation2 + $0x22] ss:$8 sm:$0xf] }
 0xff9   :  { %v5303_v19 = vrot.slane %v5296_v57, %v7325_v34 }
 0xffb   :  { %v5305_v55 = vadd.f32 %v5303_v19, %v5275_v27 }
 0xffd   :  { %v6162_v38 = vmul.f32 -1.442695, %v5305_v55  ;;  %v5344_v21 = vrot.slane %v5305_v55, 3 }
 0xfff   :  { %6619 = vpow2.f32 %v6162_v38 }
0x1009   :  { %v6620_v62 = vpop.eup %6619 }
0x100a   :  { %v5340_v4 = vadd.f32 1.0, %v6620_v62 }
0x100c   :  { %6621 = vrcp.f32 %v5340_v4 }
0x100d   :  { %6623 = vtanh.f32 %v5344_v21 }
0x1011   :  { %v5227_v44 = vpop.f32.mrb[124].mxu0  ;;  %v5268_v41 = vpop.f32.mrb[124].mxu1 }
0x1012   :  { %v5229_v37 = vpop.f32.mrb[125].mxu0  ;;  %v5270_v53 = vpop.f32.mrb[125].mxu1 }
0x1013   :  { %v5311_v9 = vcombine.low %v5227_v44, %v5229_v37  ;;  %v5312_v13 = vcombine.low %v5268_v41, %v5270_v53  ;;  %v5231_v31 = vpop.f32.mrb[126].mxu0  ;;  %v5272_v60 = vpop.f32.mrb[126].mxu1 }
0x1014   :  { %v5232_v20 = vpop.f32.mrb[127].mxu0  ;;  %v5273_v49 = vpop.f32.mrb[127].mxu1 }
0x1015   :  { %v5319_v57 = vrot.slane %v5311_v9, %v7325_v34  ;;  %v5326_v19 = vrot.slane %v5312_v13, %v7325_v34 }
0x1016   :  { %v6622_v27 = vpop.eup %6621 }
0x1017   :  { %v5348_v38 = vrot.slane %v6622_v27, 1  ;;  %v5327_v62 = vcombine.low %v5319_v57, %v5326_v19  ;;  %v6624_v55 = vpop.eup %6623  ;;  %v5354_v53 = vrot.slane %v6622_v27, 2 }
0x1018   :  { %v5351_v4 = vmul.f32 %v6624_v55, %v6622_v27 }
0x1019   :  { %v5350_v21 = vmul.f32 %v5348_v38, %v8780_v50  ;;  %v5334_v8 = vrot.slane %v5327_v62, %v7325_v34 }
0x101b   :  { %v8862_v44 = vadd.f32 %v5351_v4, %v5350_v21  ;;  %v5336_v41 = vadd.f32 %v5334_v8, %v5306_v36  ;;  %v9597_v8 = vld [vmem:[#allocation67_spill] sm:$0xff]  ;;  %v9602_v36 = vld [vmem:[#allocation44_spill] sm:$0xff] }
0x101d   :  { %v6163_v37 = vmul.f32 -1.442695, %v5336_v41  ;;  %6625 = vtanh.f32 %v8862_v44  ;;  %v5364_v20 = vrot.slane %v5336_v41, 3  ;;  %v9603_v41 = vld [vmem:[#allocation45_spill] sm:$0xff] }
0x101f   :  { %6627 = vpow2.f32 %v6163_v37  ;;  %v9604_v37 = vld [vmem:[#allocation46_spill] sm:$0xff] }
0x1027   :  { %v6626_v9 = vpop.eup %6625 }
0x1028   :  { %v5356_v13 = vmul.f32 %v6626_v9, %v5354_v53  ;;  %v9605_v53 = vld [vmem:[#allocation47_spill] sm:$0xff]  ;;  %v9606_v9 = vld [vmem:[#allocation48_spill] sm:$0xff] }
0x1029   :  { %v6628_v31 = vpop.eup %6627 }
0x102a   :  { %v5360_v60 = vadd.f32 1.0, %v6628_v31  ;;  %5377 = vst [vmem:[#allocation15 + $0x5] sm:$0x1] %v5356_v13  ;;  %v5379_v49 = vpack.c.bf16 %v5356_v13, %v5356_v13  ;;  %v9607_v13 = vld [vmem:[#allocation49_spill] sm:$0xff]  ;;  %v9608_v31 = vld [vmem:[#allocation50_spill] sm:$0xff] }
0x102c   :  { %6629 = vrcp.f32 %v5360_v60  ;;  %5413 = vmatmul.mubr.bf16.vlgmr.msra.gmra.mrb[128].mxu0 %v5379_v49  ;;  %5454 = vmatmul.mubr.bf16.vlgmr.msra.gmra.mrb[128].mxu1 %v5379_v49  ;;  %v9609_v60 = vld [vmem:[#allocation40_spill] sm:$0xff]  ;;  %v9611_v49 = vld [vmem:[#allocation51_spill] sm:$0xff] }
0x102d   :  { %5464 = vmatpush1.bf16.msra.mxu0 %v8641_v47  ;;  %5505 = vmatpush1.bf16.msra.mxu1 %v8644_v1  ;;  %6631 = vtanh.f32 %v5364_v20  ;;  %v9610_v20 = vld [vmem:[#allocation39_spill] sm:$0xff] }
0x102e   :  { %5465 = vmatprep.subr.bf16.mxu0 %v8647_v12  ;;  %5506 = vmatprep.subr.bf16.mxu1 %v8650_v5 }
0x102f   :  { %5495 = vmatprep.mubr.bf16.mxu0 %v9294_v63  ;;  %5536 = vmatprep.mubr.bf16.mxu1 %v9294_v63 }
0x1031   :  { %5466 = vmatpush1.bf16.msra.mxu0 %v8655_v52  ;;  %5507 = vmatpush1.bf16.msra.mxu1 %v8658_v58 }
0x1032   :  { %5467 = vmatprep.subr.bf16.mxu0 %v8661_v54  ;;  %5508 = vmatprep.subr.bf16.mxu1 %v8664_v14 }
0x1035   :  { %5468 = vmatpush1.bf16.msra.mxu0 %v8667_v2  ;;  %5509 = vmatpush1.bf16.msra.mxu1 %v8670_v59 }
0x1036   :  { %v6630_v50 = vpop.eup %6629  ;;  %5469 = vmatprep.subr.bf16.mxu0 %v8673_v28  ;;  %5510 = vmatprep.subr.bf16.mxu1 %v8676_v22 }
0x1037   :  { %v5368_v57 = vrot.slane %v6630_v50, 1  ;;  %v6632_v19 = vpop.eup %6631 }
0x1038   :  { %v5371_v38 = vmul.f32 %v6632_v19, %v6630_v50  ;;  %v9614_v19 = vld [vmem:[#allocation54_spill] sm:$0xff] }
0x1039   :  { %v5370_v27 = vmul.f32 %v5368_v57, %v8802_v40  ;;  %5470 = vmatpush1.bf16.msra.mxu0 %v8680_v18  ;;  %5511 = vmatpush1.bf16.msra.mxu1 %v8683_v23  ;;  %v5374_v40 = vrot.slane %v6630_v50, 2  ;;  %v9612_v50 = vld [vmem:[#allocation52_spill] sm:$0xff]  ;;  %v9613_v57 = vld [vmem:[#allocation53_spill] sm:$0xff] }
0x103a   :  { %5471 = vmatprep.subr.bf16.mxu0 %v8686_v42  ;;  %5512 = vmatprep.subr.bf16.mxu1 %v8689_v43 }
0x103b   :  { %v8884_v62 = vadd.f32 %v5371_v38, %v5370_v27 }
0x103d   :  { %5472 = vmatpush1.bf16.msra.mxu0 %v8694_v56  ;;  %5513 = vmatpush1.bf16.msra.mxu1 %v9567_v15  ;;  %6633 = vtanh.f32 %v8884_v62 }
0x103e   :  { %5473 = vmatprep.subr.bf16.mxu0 %v9568_v46  ;;  %5514 = vmatprep.subr.bf16.mxu1 %v9569_v48 }
0x1041   :  { %5474 = vmatpush1.bf16.msra.mxu0 %v9570_v39  ;;  %5515 = vmatpush1.bf16.msra.mxu1 %v9571_v16 }
0x1042   :  { %5475 = vmatprep.subr.bf16.mxu0 %v9572_v30  ;;  %5516 = vmatprep.subr.bf16.mxu1 %v9573_v3 }
0x1045   :  { %5476 = vmatpush1.bf16.msra.mxu0 %v9574_v24  ;;  %5517 = vmatpush1.bf16.msra.mxu1 %v9575_v25 }
0x1046   :  { %5477 = vmatprep.subr.bf16.mxu0 %v8725_v17  ;;  %5518 = vmatprep.subr.bf16.mxu1 %v8728_v0 }
0x1047   :  { %v6634_v55 = vpop.eup %6633 }
0x1048   :  { %v5376_v21 = vmul.f32 %v6634_v55, %v5374_v40 }
0x1049   :  { %5478 = vmatpush1.bf16.msra.mxu0 %v8731_v32  ;;  %5519 = vmatpush1.bf16.msra.mxu1 %v8734_v51 }
0x104a   :  { %5378 = vst [vmem:[#allocation15 + $0xa] sm:$0x1] %v5376_v21  ;;  %v5462_v4 = vpack.c.bf16 %v5376_v21, %v5376_v21  ;;  %5650 = vmatprep.subr.bf16.mxu0 %v8527_v45  ;;  %5691 = vmatprep.subr.bf16.mxu1 %v8530_v11  ;;  %v9591_v45 = vld [vmem:[#allocation36_spill] sm:$0xff]  ;;  %v9592_v11 = vld [vmem:[#allocation35_spill] sm:$0xff] }
0x104c   :  { %5496 = vmatmul.mubr.bf16.vlgmr.msra.gmra.mrb[132].mxu0 %v5462_v4  ;;  %5537 = vmatmul.mubr.bf16.vlgmr.msra.gmra.mrb[132].mxu1 %v5462_v4 }
0x104d   :  { %5651 = vmatpush1.bf16.msra.mxu0 %v8533_v61  ;;  %5692 = vmatpush1.bf16.msra.mxu1 %v8536_v33  ;;  %v9593_v61 = vld [vmem:[#allocation57_spill] sm:$0xff]  ;;  %v9594_v33 = vld [vmem:[#allocation60_spill] sm:$0xff] }
0x104e   :  { %5652 = vmatprep.subr.bf16.mxu0 %v8539_v29  ;;  %5693 = vmatprep.subr.bf16.mxu1 %v8542_v26  ;;  %v9595_v29 = vld [vmem:[#allocation34_spill] sm:$0xff] }
0x104f   :  { %5682 = vmatprep.mubr.bf16.mxu0 %v9294_v63  ;;  %5723 = vmatprep.mubr.bf16.mxu1 %v9294_v63  ;;  %v9596_v26 = vld [vmem:[#allocation58_spill] sm:$0xff] }
0x1051   :  { %5653 = vmatpush1.bf16.msra.mxu0 %v8547_v6  ;;  %5694 = vmatpush1.bf16.msra.mxu1 %v8550_v35  ;;  %v9598_v6 = vld [vmem:[#allocation68_spill] sm:$0xff]  ;;  %v9599_v35 = vld [vmem:[#allocation41_spill] sm:$0xff] }
0x1052   :  { %5654 = vmatprep.subr.bf16.mxu0 %v8553_v7  ;;  %5695 = vmatprep.subr.bf16.mxu1 %v8556_v10  ;;  %v9600_v7 = vld [vmem:[#allocation42_spill] sm:$0xff]  ;;  %v9601_v10 = vld [vmem:[#allocation43_spill] sm:$0xff] }
0x1055   :  { %5655 = vmatpush1.bf16.msra.mxu0 %v9591_v45  ;;  %5696 = vmatpush1.bf16.msra.mxu1 %v9592_v11 }
0x1056   :  { %5656 = vmatprep.subr.bf16.mxu0 %v9593_v61  ;;  %5697 = vmatprep.subr.bf16.mxu1 %v9594_v33 }
0x1059   :  { %5657 = vmatpush1.bf16.msra.mxu0 %v9595_v29  ;;  %5698 = vmatpush1.bf16.msra.mxu1 %v9596_v26 }
0x105a   :  { %5658 = vmatprep.subr.bf16.mxu0 %v9597_v8  ;;  %5699 = vmatprep.subr.bf16.mxu1 %v9598_v6 }
0x105d   :  { %5659 = vmatpush1.bf16.msra.mxu0 %v9599_v35  ;;  %5700 = vmatpush1.bf16.msra.mxu1 %v9600_v7  ;;  %v5545_v35 = vld [vmem:[#allocation2 + $0x6] ss:$8 sm:$0xf] }
0x105e   :  { %5660 = vmatprep.subr.bf16.mxu0 %v9601_v10  ;;  %5701 = vmatprep.subr.bf16.mxu1 %v9602_v36 }
0x1061   :  { %5661 = vmatpush1.bf16.msra.mxu0 %v9603_v41  ;;  %5702 = vmatpush1.bf16.msra.mxu1 %v9604_v37 }
0x1062   :  { %5662 = vmatprep.subr.bf16.mxu0 %v9605_v53  ;;  %5703 = vmatprep.subr.bf16.mxu1 %v9606_v9 }
0x1065   :  { %5663 = vmatpush1.bf16.msra.mxu0 %v9607_v13  ;;  %5704 = vmatpush1.bf16.msra.mxu1 %v9608_v31 }
0x1066   :  { %5664 = vmatprep.subr.bf16.mxu0 %v9609_v60  ;;  %5705 = vmatprep.subr.bf16.mxu1 %v9610_v20 }
0x1069   :  { %5665 = vmatpush1.bf16.msra.mxu0 %v9611_v49  ;;  %5706 = vmatpush1.bf16.msra.mxu1 %v9612_v50 }
0x106a   :  { %5733 = vmatprep.subr.bf16.mxu0 %v9613_v57  ;;  %5774 = vmatprep.subr.bf16.mxu1 %v9614_v19 }
0x10ff   :  { %v5414_v27 = vpop.f32.mrb[128].mxu0  ;;  %v5455_v38 = vpop.f32.mrb[128].mxu1 }
0x1100   :  { %v5416_v40 = vpop.f32.mrb[129].mxu0  ;;  %v5457_v55 = vpop.f32.mrb[129].mxu1 }
0x1101   :  { %v5550_v21 = vcombine.low %v5414_v27, %v5416_v40  ;;  %v5551_v4 = vcombine.low %v5455_v38, %v5457_v55  ;;  %v5418_v45 = vpop.f32.mrb[130].mxu0  ;;  %v5459_v11 = vpop.f32.mrb[130].mxu1 }
0x1102   :  { %v5419_v61 = vpop.f32.mrb[131].mxu0  ;;  %v5460_v33 = vpop.f32.mrb[131].mxu1 }
0x1103   :  { %v5558_v29 = vrot.slane %v5550_v21, %v7325_v34  ;;  %v5565_v26 = vrot.slane %v5551_v4, %v7325_v34  ;;  %v5576_v33 = vld [vmem:[#allocation2 + $0x21] ss:$8 sm:$0xf] }
0x1105   :  { %v5566_v8 = vcombine.low %v5558_v29, %v5565_v26 }
0x1107   :  { %v5573_v6 = vrot.slane %v5566_v8, %v7325_v34 }
0x1109   :  { %v5575_v7 = vadd.f32 %v5573_v6, %v5545_v35 }
0x110b   :  { %v6164_v10 = vmul.f32 -1.442695, %v5575_v7  ;;  %v5614_v37 = vrot.slane %v5575_v7, 3 }
0x110d   :  { %6635 = vpow2.f32 %v6164_v10 }
0x1117   :  { %v6636_v36 = vpop.eup %6635 }
0x1118   :  { %v5610_v41 = vadd.f32 1.0, %v6636_v36 }
0x111a   :  { %6637 = vrcp.f32 %v5610_v41 }
0x111b   :  { %6639 = vtanh.f32 %v5614_v37 }
0x111f   :  { %v5497_v53 = vpop.f32.mrb[132].mxu0  ;;  %v5538_v9 = vpop.f32.mrb[132].mxu1 }
0x1120   :  { %v5499_v13 = vpop.f32.mrb[133].mxu0  ;;  %v5540_v31 = vpop.f32.mrb[133].mxu1 }
0x1121   :  { %v5581_v60 = vcombine.low %v5497_v53, %v5499_v13  ;;  %v5582_v20 = vcombine.low %v5538_v9, %v5540_v31  ;;  %v5501_v49 = vpop.f32.mrb[134].mxu0  ;;  %v5542_v50 = vpop.f32.mrb[134].mxu1 }
0x1122   :  { %v5502_v57 = vpop.f32.mrb[135].mxu0  ;;  %v5543_v19 = vpop.f32.mrb[135].mxu1 }
0x1123   :  { %v5589_v27 = vrot.slane %v5581_v60, %v7325_v34  ;;  %v5596_v38 = vrot.slane %v5582_v20, %v7325_v34 }
0x1124   :  { %v6638_v40 = vpop.eup %6637 }
0x1125   :  { %v5618_v55 = vrot.slane %v6638_v40, 1  ;;  %v5597_v21 = vcombine.low %v5589_v27, %v5596_v38  ;;  %v6640_v4 = vpop.eup %6639  ;;  %v5624_v6 = vrot.slane %v6638_v40, 2 }
0x1126   :  { %v5621_v11 = vmul.f32 %v6640_v4, %v6638_v40 }
0x1127   :  { %v5620_v45 = vmul.f32 %v5618_v55, %v8862_v44  ;;  %v5604_v61 = vrot.slane %v5597_v21, %v7325_v34 }
0x1129   :  { %v8944_v29 = vadd.f32 %v5621_v11, %v5620_v45  ;;  %v5606_v26 = vadd.f32 %v5604_v61, %v5576_v33  ;;  %v5846_v45 = vld [vmem:[#allocation2 + $0x20] ss:$8 sm:$0xf] }
0x112b   :  { %v6165_v8 = vmul.f32 -1.442695, %v5606_v26  ;;  %6641 = vtanh.f32 %v8944_v29  ;;  %v5634_v41 = vrot.slane %v5606_v26, 3  ;;  %v9615_v26 = vld [vmem:[#allocation59_spill] sm:$0xff] }
0x112d   :  { %6643 = vpow2.f32 %v6165_v8 }
0x1135   :  { %v6642_v35 = vpop.eup %6641 }
0x1136   :  { %v5626_v7 = vmul.f32 %v6642_v35, %v5624_v6  ;;  %v9616_v6 = vld [vmem:[#allocation37_spill] sm:$0xff] }
0x1137   :  { %v6644_v10 = vpop.eup %6643 }
0x1138   :  { %v5630_v36 = vadd.f32 1.0, %v6644_v10  ;;  %5647 = vst [vmem:[#allocation15 + $0x6] sm:$0x1] %v5626_v7  ;;  %v5649_v37 = vpack.c.bf16 %v5626_v7, %v5626_v7 }
0x113a   :  { %6645 = vrcp.f32 %v5630_v36  ;;  %5683 = vmatmul.mubr.bf16.vlgmr.msra.gmra.mrb[136].mxu0 %v5649_v37  ;;  %5724 = vmatmul.mubr.bf16.vlgmr.msra.gmra.mrb[136].mxu1 %v5649_v37 }
0x113b   :  { %5734 = vmatpush1.bf16.msra.mxu0 %v8641_v47  ;;  %5775 = vmatpush1.bf16.msra.mxu1 %v8644_v1  ;;  %6647 = vtanh.f32 %v5634_v41 }
0x113c   :  { %5735 = vmatprep.subr.bf16.mxu0 %v8647_v12  ;;  %5776 = vmatprep.subr.bf16.mxu1 %v8650_v5 }
0x113d   :  { %5765 = vmatprep.mubr.bf16.mxu0 %v9294_v63  ;;  %5806 = vmatprep.mubr.bf16.mxu1 %v9294_v63 }
0x113f   :  { %5736 = vmatpush1.bf16.msra.mxu0 %v8655_v52  ;;  %5777 = vmatpush1.bf16.msra.mxu1 %v8658_v58 }
0x1140   :  { %5737 = vmatprep.subr.bf16.mxu0 %v8661_v54  ;;  %5778 = vmatprep.subr.bf16.mxu1 %v8664_v14 }
0x1143   :  { %5738 = vmatpush1.bf16.msra.mxu0 %v8667_v2  ;;  %5779 = vmatpush1.bf16.msra.mxu1 %v8670_v59 }
0x1144   :  { %v6646_v47 = vpop.eup %6645  ;;  %5739 = vmatprep.subr.bf16.mxu0 %v8673_v28  ;;  %5780 = vmatprep.subr.bf16.mxu1 %v8676_v22 }
0x1145   :  { %v5638_v1 = vrot.slane %v6646_v47, 1  ;;  %v6648_v12 = vpop.eup %6647  ;;  %v5644_v58 = vrot.slane %v6646_v47, 2 }
0x1146   :  { %v5641_v5 = vmul.f32 %v6648_v12, %v6646_v47  ;;  %v9617_v47 = vld [vmem:[#allocation38_spill] sm:$0xff] }
0x1147   :  { %v5640_v63 = vmul.f32 %v5638_v1, %v8884_v62  ;;  %5740 = vmatpush1.bf16.msra.mxu0 %v8680_v18  ;;  %5781 = vmatpush1.bf16.msra.mxu1 %v8683_v23 }
0x1148   :  { %5741 = vmatprep.subr.bf16.mxu0 %v8686_v42  ;;  %5782 = vmatprep.subr.bf16.mxu1 %v8689_v43 }
0x1149   :  { %v8966_v52 = vadd.f32 %v5641_v5, %v5640_v63 }
0x114b   :  { %5742 = vmatpush1.bf16.msra.mxu0 %v8694_v56  ;;  %5783 = vmatpush1.bf16.msra.mxu1 %v9567_v15  ;;  %6649 = vtanh.f32 %v8966_v52 }
0x114c   :  { %5743 = vmatprep.subr.bf16.mxu0 %v9568_v46  ;;  %5784 = vmatprep.subr.bf16.mxu1 %v9569_v48  ;;  %v5815_v48 = vld [vmem:[#allocation2 + $0x7] ss:$8 sm:$0xf] }
0x114f   :  { %5744 = vmatpush1.bf16.msra.mxu0 %v9570_v39  ;;  %5785 = vmatpush1.bf16.msra.mxu1 %v9571_v16 }
0x1150   :  { %5745 = vmatprep.subr.bf16.mxu0 %v9572_v30  ;;  %5786 = vmatprep.subr.bf16.mxu1 %v9573_v3 }
0x1153   :  { %5746 = vmatpush1.bf16.msra.mxu0 %v9574_v24  ;;  %5787 = vmatpush1.bf16.msra.mxu1 %v9575_v25 }
0x1154   :  { %5747 = vmatprep.subr.bf16.mxu0 %v8725_v17  ;;  %5788 = vmatprep.subr.bf16.mxu1 %v8728_v0 }
0x1155   :  { %v6650_v54 = vpop.eup %6649 }
0x1156   :  { %v5646_v14 = vmul.f32 %v6650_v54, %v5644_v58 }
0x1157   :  { %5748 = vmatpush1.bf16.msra.mxu0 %v8731_v32  ;;  %5789 = vmatpush1.bf16.msra.mxu1 %v8734_v51 }
0x1158   :  { %5648 = vst [vmem:[#allocation15 + $0x9] sm:$0x1] %v5646_v14  ;;  %v5732_v2 = vpack.c.bf16 %v5646_v14, %v5646_v14 }
0x115a   :  { %5766 = vmatmul.mubr.bf16.vlgmr.msra.gmra.mrb[140].mxu0 %v5732_v2  ;;  %5807 = vmatmul.mubr.bf16.vlgmr.msra.gmra.mrb[140].mxu1 %v5732_v2 }
0x120d   :  { %v5684_v59 = vpop.f32.mrb[136].mxu0  ;;  %v5725_v28 = vpop.f32.mrb[136].mxu1 }
0x120e   :  { %v5686_v22 = vpop.f32.mrb[137].mxu0  ;;  %v5727_v18 = vpop.f32.mrb[137].mxu1 }
0x120f   :  { %v5820_v23 = vcombine.low %v5684_v59, %v5686_v22  ;;  %v5821_v42 = vcombine.low %v5725_v28, %v5727_v18  ;;  %v5688_v43 = vpop.f32.mrb[138].mxu0  ;;  %v5729_v56 = vpop.f32.mrb[138].mxu1 }
0x1210   :  { %v5689_v17 = vpop.f32.mrb[139].mxu0  ;;  %v5730_v0 = vpop.f32.mrb[139].mxu1 }
0x1211   :  { %v5828_v15 = vrot.slane %v5820_v23, %v7325_v34  ;;  %v5835_v32 = vrot.slane %v5821_v42, %v7325_v34 }
0x1213   :  { %v5836_v46 = vcombine.low %v5828_v15, %v5835_v32 }
0x1215   :  { %v5843_v51 = vrot.slane %v5836_v46, %v7325_v34 }
0x1217   :  { %v5845_v39 = vadd.f32 %v5843_v51, %v5815_v48 }
0x1219   :  { %v6166_v16 = vmul.f32 -1.442695, %v5845_v39  ;;  %v5884_v24 = vrot.slane %v5845_v39, 3 }
0x121b   :  { %6651 = vpow2.f32 %v6166_v16 }
0x1225   :  { %v6652_v30 = vpop.eup %6651 }
0x1226   :  { %v5880_v3 = vadd.f32 1.0, %v6652_v30 }
0x1228   :  { %6653 = vrcp.f32 %v5880_v3 }
0x1229   :  { %6655 = vtanh.f32 %v5884_v24 }
0x122d   :  { %v5767_v25 = vpop.f32.mrb[140].mxu0  ;;  %v5808_v44 = vpop.f32.mrb[140].mxu1 }
0x122e   :  { %v5769_v62 = vpop.f32.mrb[141].mxu0  ;;  %v5810_v53 = vpop.f32.mrb[141].mxu1 }
0x122f   :  { %v5851_v9 = vcombine.low %v5767_v25, %v5769_v62  ;;  %v5852_v13 = vcombine.low %v5808_v44, %v5810_v53  ;;  %v5771_v31 = vpop.f32.mrb[142].mxu0  ;;  %v5812_v60 = vpop.f32.mrb[142].mxu1 }
0x1230   :  { %v5772_v20 = vpop.f32.mrb[143].mxu0  ;;  %v5813_v49 = vpop.f32.mrb[143].mxu1 }
0x1231   :  { %v5859_v50 = vrot.slane %v5851_v9, %v7325_v34  ;;  %v5866_v57 = vrot.slane %v5852_v13, %v7325_v34 }
0x1232   :  { %v6654_v19 = vpop.eup %6653 }
0x1233   :  { %v5867_v27 = vcombine.low %v5859_v50, %v5866_v57  ;;  %v5888_v38 = vrot.slane %v6654_v19, 1  ;;  %v6656_v40 = vpop.eup %6655  ;;  %v5894_v7 = vrot.slane %v6654_v19, 2 }
0x1234   :  { %v5891_v55 = vmul.f32 %v6656_v40, %v6654_v19 }
0x1235   :  { %v5874_v21 = vrot.slane %v5867_v27, %v7325_v34  ;;  %v5890_v4 = vmul.f32 %v5888_v38, %v8944_v29 }
0x1237   :  { %v5876_v11 = vadd.f32 %v5874_v21, %v5846_v45  ;;  %v5892_v61 = vadd.f32 %v5891_v55, %v5890_v4 }
0x1239   :  { %v6167_v33 = vmul.f32 -1.442695, %v5876_v11  ;;  %6657 = vtanh.f32 %v5892_v61  ;;  %v5932_v8 = vrot.slane %v5892_v61, %v9615_v26  ;;  %v5904_v41 = vrot.slane %v5876_v11, 3 }
0x123b   :  { %6659 = vpow2.f32 %v6167_v33  ;;  %v5934_v35 = vsel %vm1283_vm1, %v9616_v6, %v5932_v8 }
0x123c   :  { %5935 = vst [vmem:[#allocation18] sm:$0x3] %v5934_v35 }
0x1243   :  { %v6658_v10 = vpop.eup %6657 }
0x1244   :  { %v5896_v36 = vmul.f32 %v6658_v10, %v5894_v7 }
0x1245   :  { %v6660_v34 = vpop.eup %6659 }
0x1246   :  { %v5900_v29 = vadd.f32 1.0, %v6660_v34  ;;  %5917 = vst [vmem:[#allocation15 + $0x7] sm:$0x1] %v5896_v36  ;;  %v5923_v37 = vrot.slane %v5896_v36, %v9615_v26 }
0x1248   :  { %6661 = vrcp.f32 %v5900_v29  ;;  %v5926_v1 = vsel %vm1283_vm1, %v9617_v47, %v5923_v37 }
0x1249   :  { %5927 = vst [vmem:[#allocation16] sm:$0x3] %v5926_v1  ;;  %6663 = vtanh.f32 %v5904_v41 }
0x124a   :  { %6808 = shalt.err (!%p6805_p0)
}
0x124b   :  { %s6809_s12 = scalar_lea.hbm %s9043_s10, 32 }
0x124c   :  { %p6810_p1 = scmp.ne.s32.totalorder %s9043_s10, %s6809_s12  ;;  %p6813_p2 = scmp.lt.u32.totalorder %s6809_s12, %s9043_s10 }
0x124e   :  { %p6815_p3 = pnand %p6813_p2, %p6810_p1 }
0x1250   :  { %6818 = shalt.err (!%p6815_p3)
}
0x1251   :  { %5955 = dma.vmem_to_hbm [thread:$0]  %s5953_s18, 32, %s9043_s10, [#allocation17]  }
0x1252   :  { %s6819_s1 = scalar_lea.vmem %s5963_s25, 32  ;;  %p6824_p5 = scmp.lt.s32.totalorder %s5963_s25, %s5963_s25 }
0x1253   :  { %p6820_p4 = scmp.ne.s32.totalorder %s5963_s25, %s6819_s1  ;;  %p6825_p6 = scmp.lt.s32.totalorder %s6819_s1, %s6819_s1 }
0x1255   :  { %p6826_p7 = por %p6825_p6, %p6824_p5 }
0x1257   :  { %p6827_p8 = pnand %p6826_p7, %p6820_p4 }
0x1259   :  { %6830 = shalt.err (!%p6827_p8)
}
0x125a   :  { %s6831_s21 = scalar_lea.hbm %s9044_s11, 32 }
0x125b   :  { %p6832_p9 = scmp.ne.s32.totalorder %s9044_s11, %s6831_s21  ;;  %p6835_p10 = scmp.lt.u32.totalorder %s6831_s21, %s9044_s11 }
0x125d   :  { %p6837_p11 = pnand %p6835_p10, %p6832_p9 }
0x125f   :  { %6840 = shalt.err (!%p6837_p11)
}
0x1260   :  { %5965 = dma.vmem_to_hbm [thread:$0]  %s5963_s25, 32, %s9044_s11, [#allocation17]   ;;  %v6662_v12 = vpop.eup %6661 }
0x1261   :  { %v5908_v63 = vrot.slane %v6662_v12, 1  ;;  %v6664_v5 = vpop.eup %6663  ;;  %s6905_s3 = smov [#allocation15]   ;;  %v5914_v2 = vrot.slane %v6662_v12, 2 }
0x1262   :  { %v5911_v54 = vmul.f32 %v6664_v5, %v6662_v12  ;;  %s5942_s7 = sshll.u32 %s6905_s3, 4  ;;  %s5943_s7 = int_to_ptr.vmem [resolvable:$true] %s5942_s7 }
0x1263   :  { %v5910_v58 = vmul.f32 %v5908_v63, %v8966_v52  ;;  %s6841_s8 = scalar_lea.vmem %s5943_s7, 256  ;;  %p6846_p13 = scmp.lt.s32.totalorder %s5943_s7, %s5943_s7 }
0x1264   :  { %p6842_p12 = scmp.ne.s32.totalorder %s5943_s7, %s6841_s8  ;;  %p6847_p0 = scmp.lt.s32.totalorder %s6841_s8, %s6841_s8 }
0x1265   :  { %v5912_v14 = vadd.f32 %v5911_v54, %v5910_v58 }
0x1266   :  { %p6848_p1 = por %p6847_p0, %p6846_p13 }
0x1267   :  { %6665 = vtanh.f32 %v5912_v14 }
0x1268   :  { %p6849_p2 = pnand %p6848_p1, %p6842_p12 }
0x1271   :  { %v6666_v59 = vpop.eup %6665 }
0x1272   :  { %v5916_v28 = vmul.f32 %v6666_v59, %v5914_v2 }
0x1274   :  { %5918 = vst [vmem:[#allocation15 + $0x8] sm:$0x1] %v5916_v28 }
0x1275   :  { %6852 = shalt.err (!%p6849_p2)
}
0x1276   :  { %s6853_s27 = scalar_lea.hbm %s9042_s9, 256 }
0x1277   :  { %p6854_p3 = scmp.ne.s32.totalorder %s9042_s9, %s6853_s27  ;;  %p6857_p4 = scmp.lt.u32.totalorder %s6853_s27, %s9042_s9 }
0x1279   :  { %p6859_p5 = pnand %p6857_p4, %p6854_p3 }
0x127b   :  { %6862 = shalt.err (!%p6859_p5)
}
0x127c   :  { %5945 = dma.vmem_to_hbm [thread:$0]  %s5943_s7, 256, %s9042_s9, [#allocation11]  }
0x127d   :  { %6875 = dma.done.wait [#allocation11], 256  }
0x127e   :  { %6876 = vsyncadd [#allocation11], 4294967040 }
0x127f   :  { %6877 = dma.done.wait [#allocation17], 64  }
0x1280   :  { %6878 = vsyncadd [#allocation17], 4294967232 }
0x1281   :  { %5975 = vsyncpa [#allocation10], 1 }
0x1282   :  { %5976 = vsyncpa [#allocation13], 1 }
0x1283   :  { %5977 = vsyncpa [#allocation11], 1 }
0x1284   :  { %5978 = vsyncpa [#allocation17], 1 }
0x1285   :  { %5979 = vsyncmov [#allocation8] }
0x1288   :  { %s5980_s30 = vpop.sfrf %5979 }
0x1289   :  { %p6168_p6 = scmp.ne.s32.totalorder %s5980_s30, 0 }
0x128b   :  { %5984 = shalt.err (%p6168_p6)  }
0x128c   :  { %5986 = vsyncmov [#allocation8 + $0x1] }
0x128f   :  { %s5987_s12 = vpop.sfrf %5986 }
0x1290   :  { %p6169_p7 = scmp.ne.s32.totalorder %s5987_s12, 0 }
0x1292   :  { %5991 = shalt.err (%p6169_p7)  }
0x1293   :  { %5993 = vsyncmov [#allocation8 + $0x2] }
0x1296   :  { %s5994_s14 = vpop.sfrf %5993 }
0x1297   :  { %p6170_p8 = scmp.ne.s32.totalorder %s5994_s14, 0 }
0x1299   :  { %5998 = shalt.err (%p6170_p8)  }
0x129a   :  { %6000 = vsyncmov [#allocation8 + $0x3] }
0x129d   :  { %s6001_s9 = vpop.sfrf %6000 }
0x129e   :  { %p6171_p9 = scmp.ne.s32.totalorder %s6001_s9, 0 }
0x12a0   :  { %6005 = shalt.err (%p6171_p9)  }

</bundles_post_ra>
